<compile_context>
chip_gen: v7x
topology: tpu7x:2x2x1
jax: 0.10.0
libtpu: 0.0.40
codegen_flags: <defaults>
</compile_context>

<pallas_src>
import functools

import jax
import jax.numpy as jnp
import numpy as np
from jax.experimental import pallas as pl
from jax.experimental.pallas import tpu as pltpu

LANE = 128          # pad matmul output (channel) dims to the TPU lane width (128 on all gens)
NEG_SLOPE = 0.01    # nn.LeakyReLU default
BN_EPS = 1e-5


def _round_up(x, m):
    return (x + m - 1) // m * m


# ---------------------------------------------------------------------------
# Kernel 1: fused Conv2d(k=4, s=2, p=1, bias) + BatchNorm(eval) + LeakyReLU
# x_ref : (1, rows, 4*Cin)  space-to-depth image, spatially flattened, bf16
# w_ref : (4, 4*Cin, 128)   folded weights, one (C4, 128) matrix per 2x2 tap position
# b_ref : (1, 128)          folded conv-bias + BN bias, f32
# o_ref : (1, m_out, 128)   bf16 activation (garbage rows/cols trimmed by the wrapper)
# ---------------------------------------------------------------------------
def _conv_bn_lrelu_kernel(x_ref, w_ref, b_ref, o_ref, *, ws):
    m_out = o_ref.shape[1]
    offs = (0, 1, ws, ws + 1)            # tap (kh', kw') in {0,1}^2 -> static row offsets
    acc = jnp.dot(x_ref[0, 0:m_out, :], w_ref[0],
                  preferred_element_type=jnp.float32)
    for j in range(1, 4):
        off = offs[j]
        acc = acc + jnp.dot(x_ref[0, off:off + m_out, :], w_ref[j],
                            preferred_element_type=jnp.float32)
    y = acc + b_ref[...]                              # folded bias (f32)
    y = jnp.where(y >= 0, y, NEG_SLOPE * y)           # LeakyReLU
    o_ref[0] = y.astype(o_ref.dtype)


def conv4x4_s2_bn_lrelu(x_nhwc, w_pos, bias, cout):
    """x_nhwc: (N, H, W, Cin); returns (N, H//2, W//2, cout) bf16."""
    N, H, W, Cin = x_nhwc.shape
    OH, OW = H // 2, W // 2
    Hs, Ws = OH + 1, OW + 1
    C4 = 4 * Cin

    # pad=1, then space-to-depth(2): x_s2d[n,i,j,(2dy+dx)*Cin+c] = x_pad[n,2i+dy,2j+dx,c]
    xp = jnp.pad(x_nhwc.astype(jnp.bfloat16), ((0, 0), (1, 1), (1, 1), (0, 0)))
    xs = xp.reshape(N, Hs, 2, Ws, 2, Cin).transpose(0, 1, 3, 2, 4, 5)
    x2 = xs.reshape(N, Hs * Ws, C4)

    m_out = _round_up(Hs * Ws, 8)             # output rows computed (extras discarded)
    rows = _round_up(m_out + Ws + 1, 8)       # rows provided (largest static offset is Ws+1)
    x2 = jnp.pad(x2, ((0, 0), (0, rows - Hs * Ws), (0, 0)))

    kernel = functools.partial(_conv_bn_lrelu_kernel, ws=Ws)
    out = pl.pallas_call(
        kernel,
        out_shape=jax.ShapeDtypeStruct((N, m_out, LANE), jnp.bfloat16),
        grid_spec=pltpu.PrefetchScalarGridSpec(
            num_scalar_prefetch=0,
            grid=(N,),                                          # one image per grid step
            in_specs=[
                pl.BlockSpec((1, rows, C4), lambda n: (n, 0, 0)),
                pl.BlockSpec((4, C4, LANE), lambda n: (0, 0, 0)),   # weights stay resident
                pl.BlockSpec((1, LANE), lambda n: (0, 0)),
            ],
            out_specs=pl.BlockSpec((1, m_out, LANE), lambda n: (n, 0, 0)),
        ),
        compiler_params=pltpu.CompilerParams(
            dimension_semantics=("parallel",),
            vmem_limit_bytes=32 * 1024 * 1024),
    )(x2, w_pos, bias)

    # drop the invalid positions (i == OH or j == OW) and the channel padding
    out = out[:, :Hs * Ws, :].reshape(N, Hs, Ws, LANE)[:, :OH, :OW, :cout]
    return out


def fold_conv_bn(w_oihw, b_conv, gamma, beta, mean, var, eps=BN_EPS):
    """Fold eval-mode BN (and the conv bias) into per-tap weight matrices / bias."""
    cout, cin, _, _ = w_oihw.shape                       # kernel is 4x4
    scale = gamma / jnp.sqrt(var + eps)                  # (Cout,)
    bias = beta + scale * (b_conv - mean)                # (Cout,)
    w = jnp.transpose(w_oihw, (2, 3, 1, 0)) * scale      # (4,4,Cin,Cout), BN folded in
    # (kh, kw) = (2kh'+dy, 2kw'+dx)  ->  tap (kh',kw'), s2d channel (dy,dx,c)
    w = w.reshape(2, 2, 2, 2, cin, cout).transpose(0, 2, 1, 3, 4, 5)
    w = w.reshape(4, 4 * cin, cout)
    w = jnp.pad(w, ((0, 0), (0, 0), (0, LANE - cout))).astype(jnp.bfloat16)
    b = jnp.pad(bias, (0, LANE - cout)).reshape(1, LANE).astype(jnp.float32)
    return w, b


# ---------------------------------------------------------------------------
# Kernel 2: fused fc1 / fc2  (single matmul, outputs [mu | logvar] lane-padded to 128)
# ---------------------------------------------------------------------------
def _linear_kernel(x_ref, w_ref, b_ref, o_ref):
    acc = jnp.dot(x_ref[...], w_ref[...], preferred_element_type=jnp.float32)
    o_ref[...] = (acc + b_ref[...]).astype(o_ref.dtype)


def linear(x, w, b):
    return pl.pallas_call(
        _linear_kernel,
        out_shape=jax.ShapeDtypeStruct((x.shape[0], w.shape[1]), jnp.float32),
    )(x, w, b)


# ---------------------------------------------------------------------------
# Full forward
# ---------------------------------------------------------------------------
def inference_model_x_forward(x_nchw, conv_params, fc_w, fc_b, latent_size):
    x = jnp.transpose(x_nchw, (0, 2, 3, 1)).astype(jnp.bfloat16)   # NCHW -> NHWC once
    for (w_pos, bias, cout) in conv_params:
        x = conv4x4_s2_bn_lrelu(x, w_pos, bias, cout)
    n = x.shape[0]
    # flatten in PyTorch NCHW order to match `output.view(-1, C*8*s*s)`
    feat = jnp.transpose(x, (0, 3, 1, 2)).reshape(n, -1).astype(jnp.bfloat16)
    out = linear(feat, fc_w, fc_b)                                  # (N, 128) f32
    mu = out[:, :latent_size]
    logvar = out[:, latent_size:2 * latent_size]
    # TODO(synk): torch.distributions.Independent(Normal(mu, exp(logvar)), 1) has no
    # Pallas equivalent; it is fully determined by (mu, scale) returned below.
    scale = jnp.exp(logvar)
    return mu, logvar, scale


if __name__ == "__main__":
    # Small shapes consistent with the module: input spatial 64 -> 5 stride-2 convs -> 2
    # (the analogue of size_hyperpara), so fc in_features = 8*channels*2*2 = 128.
    N, IN_CH, H, W = 2, 3, 64, 64
    CHANNELS, LATENT = 4, 8

    key = jax.random.PRNGKey(0)
    cins = [IN_CH, CHANNELS, 2 * CHANNELS, 4 * CHANNELS, 8 * CHANNELS]
    couts = [CHANNELS, 2 * CHANNELS, 4 * CHANNELS, 8 * CHANNELS, 8 * CHANNELS]

    raw_convs = []
    for cin, cout in zip(cins, couts):
        key, k1, k2, k3, k4, k5, k6 = jax.random.split(key, 7)
        w = jax.random.normal(k1, (cout, cin, 4, 4), jnp.float32) * 0.1
        bc = jax.random.normal(k2, (cout,), jnp.float32) * 0.1
        gamma = 1.0 + 0.2 * jax.random.normal(k3, (cout,), jnp.float32)
        beta = 0.1 * jax.random.normal(k4, (cout,), jnp.float32)
        mean = 0.1 * jax.random.normal(k5, (cout,), jnp.float32)
        var = 0.5 + 0.5 * jnp.abs(jax.random.normal(k6, (cout,), jnp.float32))
        raw_convs.append((w, bc, gamma, beta, mean, var))

    feat_dim = 8 * CHANNELS * (H // 32) * (W // 32)
    key, kf1, kf2, kb1, kb2, kx = jax.random.split(key, 6)
    fc1_w = jax.random.normal(kf1, (LATENT, feat_dim), jnp.float32) * 0.05
    fc2_w = jax.random.normal(kf2, (LATENT, feat_dim), jnp.float32) * 0.05
    fc1_b = jax.random.normal(kb1, (LATENT,), jnp.float32) * 0.05
    fc2_b = jax.random.normal(kb2, (LATENT,), jnp.float32) * 0.05
    x = jax.random.normal(kx, (N, IN_CH, H, W), jnp.float32)

    # fold / regroup / lane-pad parameters for the kernels
    conv_params = [fold_conv_bn(w, bc, g, b, m, v) + (w.shape[0],)
                   for (w, bc, g, b, m, v) in raw_convs]
    fc_w = jnp.concatenate([fc1_w.T, fc2_w.T], axis=1)              # (feat_dim, 2*latent)
    fc_b = jnp.concatenate([fc1_b, fc2_b], axis=0)
    fc_w = jnp.pad(fc_w, ((0, 0), (0, LANE - 2 * LATENT))).astype(jnp.bfloat16)
    fc_b = jnp.pad(fc_b, (0, LANE - 2 * LATENT)).reshape(1, LANE).astype(jnp.float32)

    fwd = jax.jit(lambda inp: inference_model_x_forward(inp, conv_params, fc_w, fc_b, LATENT))
    mu, logvar, scale = fwd(x)
    jax.block_until_ready((mu, logvar, scale))

    # ----- plain-JAX reference with matched bf16-weight / f32-accumulate precision -----
    h = x.astype(jnp.bfloat16)
    for (w, bc, g, b, m, v) in raw_convs:
        s = g / jnp.sqrt(v + BN_EPS)
        w_f = (w * s[:, None, None, None]).astype(jnp.bfloat16)
        bias = (b + s * (bc - m)).astype(jnp.float32)
        y = jax.lax.conv_general_dilated(
            h, w_f, window_strides=(2, 2), padding=((1, 1), (1, 1)),
            dimension_numbers=("NCHW", "OIHW", "NCHW"),
            preferred_element_type=jnp.float32)
        y = y + bias[None, :, None, None]
        y = jnp.where(y >= 0, y, NEG_SLOPE * y)
        h = y.astype(jnp.bfloat16)
    feat_ref = h.reshape(N, -1)
    out_ref = jnp.dot(feat_ref, fc_w, preferred_element_type=jnp.float32) + fc_b
    mu_ref = out_ref[:, :LATENT]
    logvar_ref = out_ref[:, LATENT:2 * LATENT]

    np.testing.assert_allclose(np.asarray(mu), np.asarray(mu_ref), rtol=2e-2, atol=2e-2)
    np.testing.assert_allclose(np.asarray(logvar), np.asarray(logvar_ref), rtol=2e-2, atol=2e-2)
    print("KERNEL_OK")
</pallas_src>

<mosaic_0001>
module attributes {stable_mosaic.version = 11 : i64} {
  func.func @_conv_bn_lrelu_kernel(%arg0: i32, %arg1: memref<1x1136x12xbf16, #tpu.memory_space<vmem>>, %arg2: memref<4x12x128xbf16, #tpu.memory_space<vmem>>, %arg3: memref<1x128xf32, #tpu.memory_space<vmem>>, %arg4: memref<1x1096x128xbf16, #tpu.memory_space<vmem>>) attributes {dimension_semantics = [#tpu.dimension_semantics<parallel>], iteration_bounds = array<i64: 2>, scalar_prefetch = 0 : i64, scratch_operands = 0 : i64, tpu.core_type = #tpu.core_type<tc>, window_params = [{transform_indices = @transform_0, window_bounds = array<i64: 1, 1136, 12>}, {pipeline_mode = #tpu.pipeline_mode<synchronous>, transform_indices = @transform_1, window_bounds = array<i64: 4, 12, 128>}, {pipeline_mode = #tpu.pipeline_mode<synchronous>, transform_indices = @transform_2, window_bounds = array<i64: 1, 128>}, {transform_indices = @transform_3, window_bounds = array<i64: 1, 1096, 128>}]} {
    %c0 = arith.constant 0 : index
    %c0_0 = arith.constant 0 : index
    %c0_1 = arith.constant 0 : index
    %0 = vector.load %arg1[%c0, %c0_0, %c0_1] : memref<1x1136x12xbf16, #tpu.memory_space<vmem>>, vector<1x1096x12xbf16>
    %1 = vector.shape_cast %0 : vector<1x1096x12xbf16> to vector<1096x12xbf16>
    %c0_2 = arith.constant 0 : index
    %c0_3 = arith.constant 0 : index
    %c0_4 = arith.constant 0 : index
    %2 = vector.load %arg2[%c0_2, %c0_3, %c0_4] : memref<4x12x128xbf16, #tpu.memory_space<vmem>>, vector<1x12x128xbf16>
    %3 = vector.shape_cast %2 : vector<1x12x128xbf16> to vector<12x128xbf16>
    %cst = arith.constant dense<0.000000e+00> : vector<1096x128xf32>
    %4 = tpu.matmul %1, %3, %cst {dimension_numbers = #tpu.dot_dimension_numbers<[1], [0], [0], [1], [0, 0, 1, 1], [], []>} : vector<1096x12xbf16>, vector<12x128xbf16>, vector<1096x128xf32> -> vector<1096x128xf32>
    %c0_5 = arith.constant 0 : index
    %c1 = arith.constant 1 : index
    %c0_6 = arith.constant 0 : index
    %5 = vector.load %arg1[%c0_5, %c1, %c0_6] : memref<1x1136x12xbf16, #tpu.memory_space<vmem>>, vector<1x1096x12xbf16>
    %6 = vector.shape_cast %5 : vector<1x1096x12xbf16> to vector<1096x12xbf16>
    %c1_7 = arith.constant 1 : index
    %c0_8 = arith.constant 0 : index
    %c0_9 = arith.constant 0 : index
    %7 = vector.load %arg2[%c1_7, %c0_8, %c0_9] : memref<4x12x128xbf16, #tpu.memory_space<vmem>>, vector<1x12x128xbf16>
    %8 = vector.shape_cast %7 : vector<1x12x128xbf16> to vector<12x128xbf16>
    %cst_10 = arith.constant dense<0.000000e+00> : vector<1096x128xf32>
    %9 = tpu.matmul %6, %8, %cst_10 {dimension_numbers = #tpu.dot_dimension_numbers<[1], [0], [0], [1], [0, 0, 1, 1], [], []>} : vector<1096x12xbf16>, vector<12x128xbf16>, vector<1096x128xf32> -> vector<1096x128xf32>
    %10 = arith.addf %4, %9 : vector<1096x128xf32>
    %c0_11 = arith.constant 0 : index
    %c33 = arith.constant 33 : index
    %c0_12 = arith.constant 0 : index
    %11 = vector.load %arg1[%c0_11, %c33, %c0_12] : memref<1x1136x12xbf16, #tpu.memory_space<vmem>>, vector<1x1096x12xbf16>
    %12 = vector.shape_cast %11 : vector<1x1096x12xbf16> to vector<1096x12xbf16>
    %c2 = arith.constant 2 : index
    %c0_13 = arith.constant 0 : index
    %c0_14 = arith.constant 0 : index
    %13 = vector.load %arg2[%c2, %c0_13, %c0_14] : memref<4x12x128xbf16, #tpu.memory_space<vmem>>, vector<1x12x128xbf16>
    %14 = vector.shape_cast %13 : vector<1x12x128xbf16> to vector<12x128xbf16>
    %cst_15 = arith.constant dense<0.000000e+00> : vector<1096x128xf32>
    %15 = tpu.matmul %12, %14, %cst_15 {dimension_numbers = #tpu.dot_dimension_numbers<[1], [0], [0], [1], [0, 0, 1, 1], [], []>} : vector<1096x12xbf16>, vector<12x128xbf16>, vector<1096x128xf32> -> vector<1096x128xf32>
    %16 = arith.addf %10, %15 : vector<1096x128xf32>
    %c0_16 = arith.constant 0 : index
    %c34 = arith.constant 34 : index
    %c0_17 = arith.constant 0 : index
    %17 = vector.load %arg1[%c0_16, %c34, %c0_17] : memref<1x1136x12xbf16, #tpu.memory_space<vmem>>, vector<1x1096x12xbf16>
    %18 = vector.shape_cast %17 : vector<1x1096x12xbf16> to vector<1096x12xbf16>
    %c3 = arith.constant 3 : index
    %c0_18 = arith.constant 0 : index
    %c0_19 = arith.constant 0 : index
    %19 = vector.load %arg2[%c3, %c0_18, %c0_19] : memref<4x12x128xbf16, #tpu.memory_space<vmem>>, vector<1x12x128xbf16>
    %20 = vector.shape_cast %19 : vector<1x12x128xbf16> to vector<12x128xbf16>
    %cst_20 = arith.constant dense<0.000000e+00> : vector<1096x128xf32>
    %21 = tpu.matmul %18, %20, %cst_20 {dimension_numbers = #tpu.dot_dimension_numbers<[1], [0], [0], [1], [0, 0, 1, 1], [], []>} : vector<1096x12xbf16>, vector<12x128xbf16>, vector<1096x128xf32> -> vector<1096x128xf32>
    %22 = arith.addf %16, %21 : vector<1096x128xf32>
    %c0_21 = arith.constant 0 : index
    %c0_22 = arith.constant 0 : index
    %23 = vector.load %arg3[%c0_21, %c0_22] : memref<1x128xf32, #tpu.memory_space<vmem>>, vector<1x128xf32>
    %24 = vector.broadcast %23 : vector<1x128xf32> to vector<1096x128xf32>
    %25 = arith.addf %22, %24 : vector<1096x128xf32>
    %cst_23 = arith.constant 0.000000e+00 : f32
    %26 = vector.broadcast %cst_23 : f32 to vector<1096x128xf32>
    %27 = arith.cmpf oge, %25, %26 : vector<1096x128xf32>
    %cst_24 = arith.constant 0.00999999977 : f32
    %28 = vector.broadcast %cst_24 : f32 to vector<1096x128xf32>
    %29 = arith.mulf %28, %25 : vector<1096x128xf32>
    %30 = arith.select %27, %25, %29 : vector<1096x128xi1>, vector<1096x128xf32>
    %31 = arith.truncf %30 : vector<1096x128xf32> to vector<1096x128xbf16>
    %c0_25 = arith.constant 0 : index
    %c0_26 = arith.constant 0 : index
    %c0_27 = arith.constant 0 : index
    %32 = vector.load %arg4[%c0_25, %c0_26, %c0_27] : memref<1x1096x128xbf16, #tpu.memory_space<vmem>>, vector<1x1096x128xbf16>
    %33 = vector.shape_cast %32 : vector<1x1096x128xbf16> to vector<1096x128xbf16>
    %34 = vector.shape_cast %31 : vector<1096x128xbf16> to vector<1x1096x128xbf16>
    tpu.vector_store %arg4[%c0_25, %c0_26, %c0_27], %34 {strides = array<i32>} : memref<1x1096x128xbf16, #tpu.memory_space<vmem>>, vector<1x1096x128xbf16>,
    return
  }
  func.func @transform_0(%arg0: i32) -> (i32, i32, i32) {
    %c0_i32 = arith.constant 0 : i32
    %c0_i32_0 = arith.constant 0 : i32
    %c0_i32_1 = arith.constant 0 : i32
    return %arg0, %c0_i32, %c0_i32_0 : i32, i32, i32
  }
  func.func @transform_1(%arg0: i32) -> (i32, i32, i32) {
    %c0_i32 = arith.constant 0 : i32
    %c0_i32_0 = arith.constant 0 : i32
    %c0_i32_1 = arith.constant 0 : i32
    %c0_i32_2 = arith.constant 0 : i32
    return %c0_i32, %c0_i32_0, %c0_i32_1 : i32, i32, i32
  }
  func.func @transform_2(%arg0: i32) -> (i32, i32) {
    %c0_i32 = arith.constant 0 : i32
    %c0_i32_0 = arith.constant 0 : i32
    %c0_i32_1 = arith.constant 0 : i32
    return %c0_i32, %c0_i32_0 : i32, i32
  }
  func.func @transform_3(%arg0: i32) -> (i32, i32, i32) {
    %c0_i32 = arith.constant 0 : i32
    %c0_i32_0 = arith.constant 0 : i32
    %c0_i32_1 = arith.constant 0 : i32
    return %arg0, %c0_i32, %c0_i32_0 : i32, i32, i32
  }
}

module attributes {stable_mosaic.version = 11 : i64} {
  func.func @_conv_bn_lrelu_kernel(%arg0: i32, %arg1: memref<1x320x16xbf16, #tpu.memory_space<vmem>>, %arg2: memref<4x16x128xbf16, #tpu.memory_space<vmem>>, %arg3: memref<1x128xf32, #tpu.memory_space<vmem>>, %arg4: memref<1x296x128xbf16, #tpu.memory_space<vmem>>) attributes {dimension_semantics = [#tpu.dimension_semantics<parallel>], iteration_bounds = array<i64: 2>, scalar_prefetch = 0 : i64, scratch_operands = 0 : i64, tpu.core_type = #tpu.core_type<tc>, window_params = [{transform_indices = @transform_0, window_bounds = array<i64: 1, 320, 16>}, {pipeline_mode = #tpu.pipeline_mode<synchronous>, transform_indices = @transform_1, window_bounds = array<i64: 4, 16, 128>}, {pipeline_mode = #tpu.pipeline_mode<synchronous>, transform_indices = @transform_2, window_bounds = array<i64: 1, 128>}, {transform_indices = @transform_3, window_bounds = array<i64: 1, 296, 128>}]} {
    %c0 = arith.constant 0 : index
    %c0_0 = arith.constant 0 : index
    %c0_1 = arith.constant 0 : index
    %0 = vector.load %arg1[%c0, %c0_0, %c0_1] : memref<1x320x16xbf16, #tpu.memory_space<vmem>>, vector<1x296x16xbf16>
    %1 = vector.shape_cast %0 : vector<1x296x16xbf16> to vector<296x16xbf16>
    %c0_2 = arith.constant 0 : index
    %c0_3 = arith.constant 0 : index
    %c0_4 = arith.constant 0 : index
    %2 = vector.load %arg2[%c0_2, %c0_3, %c0_4] : memref<4x16x128xbf16, #tpu.memory_space<vmem>>, vector<1x16x128xbf16>
    %3 = vector.shape_cast %2 : vector<1x16x128xbf16> to vector<16x128xbf16>
    %cst = arith.constant dense<0.000000e+00> : vector<296x128xf32>
    %4 = tpu.matmul %1, %3, %cst {dimension_numbers = #tpu.dot_dimension_numbers<[1], [0], [0], [1], [0, 0, 1, 1], [], []>} : vector<296x16xbf16>, vector<16x128xbf16>, vector<296x128xf32> -> vector<296x128xf32>
    %c0_5 = arith.constant 0 : index
    %c1 = arith.constant 1 : index
    %c0_6 = arith.constant 0 : index
    %5 = vector.load %arg1[%c0_5, %c1, %c0_6] : memref<1x320x16xbf16, #tpu.memory_space<vmem>>, vector<1x296x16xbf16>
    %6 = vector.shape_cast %5 : vector<1x296x16xbf16> to vector<296x16xbf16>
    %c1_7 = arith.constant 1 : index
    %c0_8 = arith.constant 0 : index
    %c0_9 = arith.constant 0 : index
    %7 = vector.load %arg2[%c1_7, %c0_8, %c0_9] : memref<4x16x128xbf16, #tpu.memory_space<vmem>>, vector<1x16x128xbf16>
    %8 = vector.shape_cast %7 : vector<1x16x128xbf16> to vector<16x128xbf16>
    %cst_10 = arith.constant dense<0.000000e+00> : vector<296x128xf32>
    %9 = tpu.matmul %6, %8, %cst_10 {dimension_numbers = #tpu.dot_dimension_numbers<[1], [0], [0], [1], [0, 0, 1, 1], [], []>} : vector<296x16xbf16>, vector<16x128xbf16>, vector<296x128xf32> -> vector<296x128xf32>
    %10 = arith.addf %4, %9 : vector<296x128xf32>
    %c0_11 = arith.constant 0 : index
    %c17 = arith.constant 17 : index
    %c0_12 = arith.constant 0 : index
    %11 = vector.load %arg1[%c0_11, %c17, %c0_12] : memref<1x320x16xbf16, #tpu.memory_space<vmem>>, vector<1x296x16xbf16>
    %12 = vector.shape_cast %11 : vector<1x296x16xbf16> to vector<296x16xbf16>
    %c2 = arith.constant 2 : index
    %c0_13 = arith.constant 0 : index
    %c0_14 = arith.constant 0 : index
    %13 = vector.load %arg2[%c2, %c0_13, %c0_14] : memref<4x16x128xbf16, #tpu.memory_space<vmem>>, vector<1x16x128xbf16>
    %14 = vector.shape_cast %13 : vector<1x16x128xbf16> to vector<16x128xbf16>
    %cst_15 = arith.constant dense<0.000000e+00> : vector<296x128xf32>
    %15 = tpu.matmul %12, %14, %cst_15 {dimension_numbers = #tpu.dot_dimension_numbers<[1], [0], [0], [1], [0, 0, 1, 1], [], []>} : vector<296x16xbf16>, vector<16x128xbf16>, vector<296x128xf32> -> vector<296x128xf32>
    %16 = arith.addf %10, %15 : vector<296x128xf32>
    %c0_16 = arith.constant 0 : index
    %c18 = arith.constant 18 : index
    %c0_17 = arith.constant 0 : index
    %17 = vector.load %arg1[%c0_16, %c18, %c0_17] : memref<1x320x16xbf16, #tpu.memory_space<vmem>>, vector<1x296x16xbf16>
    %18 = vector.shape_cast %17 : vector<1x296x16xbf16> to vector<296x16xbf16>
    %c3 = arith.constant 3 : index
    %c0_18 = arith.constant 0 : index
    %c0_19 = arith.constant 0 : index
    %19 = vector.load %arg2[%c3, %c0_18, %c0_19] : memref<4x16x128xbf16, #tpu.memory_space<vmem>>, vector<1x16x128xbf16>
    %20 = vector.shape_cast %19 : vector<1x16x128xbf16> to vector<16x128xbf16>
    %cst_20 = arith.constant dense<0.000000e+00> : vector<296x128xf32>
    %21 = tpu.matmul %18, %20, %cst_20 {dimension_numbers = #tpu.dot_dimension_numbers<[1], [0], [0], [1], [0, 0, 1, 1], [], []>} : vector<296x16xbf16>, vector<16x128xbf16>, vector<296x128xf32> -> vector<296x128xf32>
    %22 = arith.addf %16, %21 : vector<296x128xf32>
    %c0_21 = arith.constant 0 : index
    %c0_22 = arith.constant 0 : index
    %23 = vector.load %arg3[%c0_21, %c0_22] : memref<1x128xf32, #tpu.memory_space<vmem>>, vector<1x128xf32>
    %24 = vector.broadcast %23 : vector<1x128xf32> to vector<296x128xf32>
    %25 = arith.addf %22, %24 : vector<296x128xf32>
    %cst_23 = arith.constant 0.000000e+00 : f32
    %26 = vector.broadcast %cst_23 : f32 to vector<296x128xf32>
    %27 = arith.cmpf oge, %25, %26 : vector<296x128xf32>
    %cst_24 = arith.constant 0.00999999977 : f32
    %28 = vector.broadcast %cst_24 : f32 to vector<296x128xf32>
    %29 = arith.mulf %28, %25 : vector<296x128xf32>
    %30 = arith.select %27, %25, %29 : vector<296x128xi1>, vector<296x128xf32>
    %31 = arith.truncf %30 : vector<296x128xf32> to vector<296x128xbf16>
    %c0_25 = arith.constant 0 : index
    %c0_26 = arith.constant 0 : index
    %c0_27 = arith.constant 0 : index
    %32 = vector.load %arg4[%c0_25, %c0_26, %c0_27] : memref<1x296x128xbf16, #tpu.memory_space<vmem>>, vector<1x296x128xbf16>
    %33 = vector.shape_cast %32 : vector<1x296x128xbf16> to vector<296x128xbf16>
    %34 = vector.shape_cast %31 : vector<296x128xbf16> to vector<1x296x128xbf16>
    tpu.vector_store %arg4[%c0_25, %c0_26, %c0_27], %34 {strides = array<i32>} : memref<1x296x128xbf16, #tpu.memory_space<vmem>>, vector<1x296x128xbf16>,
    return
  }
  func.func @transform_0(%arg0: i32) -> (i32, i32, i32) {
    %c0_i32 = arith.constant 0 : i32
    %c0_i32_0 = arith.constant 0 : i32
    %c0_i32_1 = arith.constant 0 : i32
    return %arg0, %c0_i32, %c0_i32_0 : i32, i32, i32
  }
  func.func @transform_1(%arg0: i32) -> (i32, i32, i32) {
    %c0_i32 = arith.constant 0 : i32
    %c0_i32_0 = arith.constant 0 : i32
    %c0_i32_1 = arith.constant 0 : i32
    %c0_i32_2 = arith.constant 0 : i32
    return %c0_i32, %c0_i32_0, %c0_i32_1 : i32, i32, i32
  }
  func.func @transform_2(%arg0: i32) -> (i32, i32) {
    %c0_i32 = arith.constant 0 : i32
    %c0_i32_0 = arith.constant 0 : i32
    %c0_i32_1 = arith.constant 0 : i32
    return %c0_i32, %c0_i32_0 : i32, i32
  }
  func.func @transform_3(%arg0: i32) -> (i32, i32, i32) {
    %c0_i32 = arith.constant 0 : i32
    %c0_i32_0 = arith.constant 0 : i32
    %c0_i32_1 = arith.constant 0 : i32
    return %arg0, %c0_i32, %c0_i32_0 : i32, i32, i32
  }
}

module attributes {stable_mosaic.version = 11 : i64} {
  func.func @_conv_bn_lrelu_kernel(%arg0: i32, %arg1: memref<1x104x32xbf16, #tpu.memory_space<vmem>>, %arg2: memref<4x32x128xbf16, #tpu.memory_space<vmem>>, %arg3: memref<1x128xf32, #tpu.memory_space<vmem>>, %arg4: memref<1x88x128xbf16, #tpu.memory_space<vmem>>) attributes {dimension_semantics = [#tpu.dimension_semantics<parallel>], iteration_bounds = array<i64: 2>, scalar_prefetch = 0 : i64, scratch_operands = 0 : i64, tpu.core_type = #tpu.core_type<tc>, window_params = [{transform_indices = @transform_0, window_bounds = array<i64: 1, 104, 32>}, {pipeline_mode = #tpu.pipeline_mode<synchronous>, transform_indices = @transform_1, window_bounds = array<i64: 4, 32, 128>}, {pipeline_mode = #tpu.pipeline_mode<synchronous>, transform_indices = @transform_2, window_bounds = array<i64: 1, 128>}, {transform_indices = @transform_3, window_bounds = array<i64: 1, 88, 128>}]} {
    %c0 = arith.constant 0 : index
    %c0_0 = arith.constant 0 : index
    %c0_1 = arith.constant 0 : index
    %0 = vector.load %arg1[%c0, %c0_0, %c0_1] : memref<1x104x32xbf16, #tpu.memory_space<vmem>>, vector<1x88x32xbf16>
    %1 = vector.shape_cast %0 : vector<1x88x32xbf16> to vector<88x32xbf16>
    %c0_2 = arith.constant 0 : index
    %c0_3 = arith.constant 0 : index
    %c0_4 = arith.constant 0 : index
    %2 = vector.load %arg2[%c0_2, %c0_3, %c0_4] : memref<4x32x128xbf16, #tpu.memory_space<vmem>>, vector<1x32x128xbf16>
    %3 = vector.shape_cast %2 : vector<1x32x128xbf16> to vector<32x128xbf16>
    %cst = arith.constant dense<0.000000e+00> : vector<88x128xf32>
    %4 = tpu.matmul %1, %3, %cst {dimension_numbers = #tpu.dot_dimension_numbers<[1], [0], [0], [1], [0, 0, 1, 1], [], []>} : vector<88x32xbf16>, vector<32x128xbf16>, vector<88x128xf32> -> vector<88x128xf32>
    %c0_5 = arith.constant 0 : index
    %c1 = arith.constant 1 : index
    %c0_6 = arith.constant 0 : index
    %5 = vector.load %arg1[%c0_5, %c1, %c0_6] : memref<1x104x32xbf16, #tpu.memory_space<vmem>>, vector<1x88x32xbf16>
    %6 = vector.shape_cast %5 : vector<1x88x32xbf16> to vector<88x32xbf16>
    %c1_7 = arith.constant 1 : index
    %c0_8 = arith.constant 0 : index
    %c0_9 = arith.constant 0 : index
    %7 = vector.load %arg2[%c1_7, %c0_8, %c0_9] : memref<4x32x128xbf16, #tpu.memory_space<vmem>>, vector<1x32x128xbf16>
    %8 = vector.shape_cast %7 : vector<1x32x128xbf16> to vector<32x128xbf16>
    %cst_10 = arith.constant dense<0.000000e+00> : vector<88x128xf32>
    %9 = tpu.matmul %6, %8, %cst_10 {dimension_numbers = #tpu.dot_dimension_numbers<[1], [0], [0], [1], [0, 0, 1, 1], [], []>} : vector<88x32xbf16>, vector<32x128xbf16>, vector<88x128xf32> -> vector<88x128xf32>
    %10 = arith.addf %4, %9 : vector<88x128xf32>
    %c0_11 = arith.constant 0 : index
    %c9 = arith.constant 9 : index
    %c0_12 = arith.constant 0 : index
    %11 = vector.load %arg1[%c0_11, %c9, %c0_12] : memref<1x104x32xbf16, #tpu.memory_space<vmem>>, vector<1x88x32xbf16>
    %12 = vector.shape_cast %11 : vector<1x88x32xbf16> to vector<88x32xbf16>
    %c2 = arith.constant 2 : index
    %c0_13 = arith.constant 0 : index
    %c0_14 = arith.constant 0 : index
    %13 = vector.load %arg2[%c2, %c0_13, %c0_14] : memref<4x32x128xbf16, #tpu.memory_space<vmem>>, vector<1x32x128xbf16>
    %14 = vector.shape_cast %13 : vector<1x32x128xbf16> to vector<32x128xbf16>
    %cst_15 = arith.constant dense<0.000000e+00> : vector<88x128xf32>
    %15 = tpu.matmul %12, %14, %cst_15 {dimension_numbers = #tpu.dot_dimension_numbers<[1], [0], [0], [1], [0, 0, 1, 1], [], []>} : vector<88x32xbf16>, vector<32x128xbf16>, vector<88x128xf32> -> vector<88x128xf32>
    %16 = arith.addf %10, %15 : vector<88x128xf32>
    %c0_16 = arith.constant 0 : index
    %c10 = arith.constant 10 : index
    %c0_17 = arith.constant 0 : index
    %17 = vector.load %arg1[%c0_16, %c10, %c0_17] : memref<1x104x32xbf16, #tpu.memory_space<vmem>>, vector<1x88x32xbf16>
    %18 = vector.shape_cast %17 : vector<1x88x32xbf16> to vector<88x32xbf16>
    %c3 = arith.constant 3 : index
    %c0_18 = arith.constant 0 : index
    %c0_19 = arith.constant 0 : index
    %19 = vector.load %arg2[%c3, %c0_18, %c0_19] : memref<4x32x128xbf16, #tpu.memory_space<vmem>>, vector<1x32x128xbf16>
    %20 = vector.shape_cast %19 : vector<1x32x128xbf16> to vector<32x128xbf16>
    %cst_20 = arith.constant dense<0.000000e+00> : vector<88x128xf32>
    %21 = tpu.matmul %18, %20, %cst_20 {dimension_numbers = #tpu.dot_dimension_numbers<[1], [0], [0], [1], [0, 0, 1, 1], [], []>} : vector<88x32xbf16>, vector<32x128xbf16>, vector<88x128xf32> -> vector<88x128xf32>
    %22 = arith.addf %16, %21 : vector<88x128xf32>
    %c0_21 = arith.constant 0 : index
    %c0_22 = arith.constant 0 : index
    %23 = vector.load %arg3[%c0_21, %c0_22] : memref<1x128xf32, #tpu.memory_space<vmem>>, vector<1x128xf32>
    %24 = vector.broadcast %23 : vector<1x128xf32> to vector<88x128xf32>
    %25 = arith.addf %22, %24 : vector<88x128xf32>
    %cst_23 = arith.constant 0.000000e+00 : f32
    %26 = vector.broadcast %cst_23 : f32 to vector<88x128xf32>
    %27 = arith.cmpf oge, %25, %26 : vector<88x128xf32>
    %cst_24 = arith.constant 0.00999999977 : f32
    %28 = vector.broadcast %cst_24 : f32 to vector<88x128xf32>
    %29 = arith.mulf %28, %25 : vector<88x128xf32>
    %30 = arith.select %27, %25, %29 : vector<88x128xi1>, vector<88x128xf32>
    %31 = arith.truncf %30 : vector<88x128xf32> to vector<88x128xbf16>
    %c0_25 = arith.constant 0 : index
    %c0_26 = arith.constant 0 : index
    %c0_27 = arith.constant 0 : index
    %32 = vector.load %arg4[%c0_25, %c0_26, %c0_27] : memref<1x88x128xbf16, #tpu.memory_space<vmem>>, vector<1x88x128xbf16>
    %33 = vector.shape_cast %32 : vector<1x88x128xbf16> to vector<88x128xbf16>
    %34 = vector.shape_cast %31 : vector<88x128xbf16> to vector<1x88x128xbf16>
    tpu.vector_store %arg4[%c0_25, %c0_26, %c0_27], %34 {strides = array<i32>} : memref<1x88x128xbf16, #tpu.memory_space<vmem>>, vector<1x88x128xbf16>,
    return
  }
  func.func @transform_0(%arg0: i32) -> (i32, i32, i32) {
    %c0_i32 = arith.constant 0 : i32
    %c0_i32_0 = arith.constant 0 : i32
    %c0_i32_1 = arith.constant 0 : i32
    return %arg0, %c0_i32, %c0_i32_0 : i32, i32, i32
  }
  func.func @transform_1(%arg0: i32) -> (i32, i32, i32) {
    %c0_i32 = arith.constant 0 : i32
    %c0_i32_0 = arith.constant 0 : i32
    %c0_i32_1 = arith.constant 0 : i32
    %c0_i32_2 = arith.constant 0 : i32
    return %c0_i32, %c0_i32_0, %c0_i32_1 : i32, i32, i32
  }
  func.func @transform_2(%arg0: i32) -> (i32, i32) {
    %c0_i32 = arith.constant 0 : i32
    %c0_i32_0 = arith.constant 0 : i32
    %c0_i32_1 = arith.constant 0 : i32
    return %c0_i32, %c0_i32_0 : i32, i32
  }
  func.func @transform_3(%arg0: i32) -> (i32, i32, i32) {
    %c0_i32 = arith.constant 0 : i32
    %c0_i32_0 = arith.constant 0 : i32
    %c0_i32_1 = arith.constant 0 : i32
    return %arg0, %c0_i32, %c0_i32_0 : i32, i32, i32
  }
}

module attributes {stable_mosaic.version = 11 : i64} {
  func.func @_conv_bn_lrelu_kernel(%arg0: i32, %arg1: memref<1x40x64xbf16, #tpu.memory_space<vmem>>, %arg2: memref<4x64x128xbf16, #tpu.memory_space<vmem>>, %arg3: memref<1x128xf32, #tpu.memory_space<vmem>>, %arg4: memref<1x32x128xbf16, #tpu.memory_space<vmem>>) attributes {dimension_semantics = [#tpu.dimension_semantics<parallel>], iteration_bounds = array<i64: 2>, scalar_prefetch = 0 : i64, scratch_operands = 0 : i64, tpu.core_type = #tpu.core_type<tc>, window_params = [{transform_indices = @transform_0, window_bounds = array<i64: 1, 40, 64>}, {pipeline_mode = #tpu.pipeline_mode<synchronous>, transform_indices = @transform_1, window_bounds = array<i64: 4, 64, 128>}, {pipeline_mode = #tpu.pipeline_mode<synchronous>, transform_indices = @transform_2, window_bounds = array<i64: 1, 128>}, {transform_indices = @transform_3, window_bounds = array<i64: 1, 32, 128>}]} {
    %c0 = arith.constant 0 : index
    %c0_0 = arith.constant 0 : index
    %c0_1 = arith.constant 0 : index
    %0 = vector.load %arg1[%c0, %c0_0, %c0_1] : memref<1x40x64xbf16, #tpu.memory_space<vmem>>, vector<1x32x64xbf16>
    %1 = vector.shape_cast %0 : vector<1x32x64xbf16> to vector<32x64xbf16>
    %c0_2 = arith.constant 0 : index
    %c0_3 = arith.constant 0 : index
    %c0_4 = arith.constant 0 : index
    %2 = vector.load %arg2[%c0_2, %c0_3, %c0_4] : memref<4x64x128xbf16, #tpu.memory_space<vmem>>, vector<1x64x128xbf16>
    %3 = vector.shape_cast %2 : vector<1x64x128xbf16> to vector<64x128xbf16>
    %cst = arith.constant dense<0.000000e+00> : vector<32x128xf32>
    %4 = tpu.matmul %1, %3, %cst {dimension_numbers = #tpu.dot_dimension_numbers<[1], [0], [0], [1], [0, 0, 1, 1], [], []>} : vector<32x64xbf16>, vector<64x128xbf16>, vector<32x128xf32> -> vector<32x128xf32>
    %c0_5 = arith.constant 0 : index
    %c1 = arith.constant 1 : index
    %c0_6 = arith.constant 0 : index
    %5 = vector.load %arg1[%c0_5, %c1, %c0_6] : memref<1x40x64xbf16, #tpu.memory_space<vmem>>, vector<1x32x64xbf16>
    %6 = vector.shape_cast %5 : vector<1x32x64xbf16> to vector<32x64xbf16>
    %c1_7 = arith.constant 1 : index
    %c0_8 = arith.constant 0 : index
    %c0_9 = arith.constant 0 : index
    %7 = vector.load %arg2[%c1_7, %c0_8, %c0_9] : memref<4x64x128xbf16, #tpu.memory_space<vmem>>, vector<1x64x128xbf16>
    %8 = vector.shape_cast %7 : vector<1x64x128xbf16> to vector<64x128xbf16>
    %cst_10 = arith.constant dense<0.000000e+00> : vector<32x128xf32>
    %9 = tpu.matmul %6, %8, %cst_10 {dimension_numbers = #tpu.dot_dimension_numbers<[1], [0], [0], [1], [0, 0, 1, 1], [], []>} : vector<32x64xbf16>, vector<64x128xbf16>, vector<32x128xf32> -> vector<32x128xf32>
    %10 = arith.addf %4, %9 : vector<32x128xf32>
    %c0_11 = arith.constant 0 : index
    %c5 = arith.constant 5 : index
    %c0_12 = arith.constant 0 : index
    %11 = vector.load %arg1[%c0_11, %c5, %c0_12] : memref<1x40x64xbf16, #tpu.memory_space<vmem>>, vector<1x32x64xbf16>
    %12 = vector.shape_cast %11 : vector<1x32x64xbf16> to vector<32x64xbf16>
    %c2 = arith.constant 2 : index
    %c0_13 = arith.constant 0 : index
    %c0_14 = arith.constant 0 : index
    %13 = vector.load %arg2[%c2, %c0_13, %c0_14] : memref<4x64x128xbf16, #tpu.memory_space<vmem>>, vector<1x64x128xbf16>
    %14 = vector.shape_cast %13 : vector<1x64x128xbf16> to vector<64x128xbf16>
    %cst_15 = arith.constant dense<0.000000e+00> : vector<32x128xf32>
    %15 = tpu.matmul %12, %14, %cst_15 {dimension_numbers = #tpu.dot_dimension_numbers<[1], [0], [0], [1], [0, 0, 1, 1], [], []>} : vector<32x64xbf16>, vector<64x128xbf16>, vector<32x128xf32> -> vector<32x128xf32>
    %16 = arith.addf %10, %15 : vector<32x128xf32>
    %c0_16 = arith.constant 0 : index
    %c6 = arith.constant 6 : index
    %c0_17 = arith.constant 0 : index
    %17 = vector.load %arg1[%c0_16, %c6, %c0_17] : memref<1x40x64xbf16, #tpu.memory_space<vmem>>, vector<1x32x64xbf16>
    %18 = vector.shape_cast %17 : vector<1x32x64xbf16> to vector<32x64xbf16>
    %c3 = arith.constant 3 : index
    %c0_18 = arith.constant 0 : index
    %c0_19 = arith.constant 0 : index
    %19 = vector.load %arg2[%c3, %c0_18, %c0_19] : memref<4x64x128xbf16, #tpu.memory_space<vmem>>, vector<1x64x128xbf16>
    %20 = vector.shape_cast %19 : vector<1x64x128xbf16> to vector<64x128xbf16>
    %cst_20 = arith.constant dense<0.000000e+00> : vector<32x128xf32>
    %21 = tpu.matmul %18, %20, %cst_20 {dimension_numbers = #tpu.dot_dimension_numbers<[1], [0], [0], [1], [0, 0, 1, 1], [], []>} : vector<32x64xbf16>, vector<64x128xbf16>, vector<32x128xf32> -> vector<32x128xf32>
    %22 = arith.addf %16, %21 : vector<32x128xf32>
    %c0_21 = arith.constant 0 : index
    %c0_22 = arith.constant 0 : index
    %23 = vector.load %arg3[%c0_21, %c0_22] : memref<1x128xf32, #tpu.memory_space<vmem>>, vector<1x128xf32>
    %24 = vector.broadcast %23 : vector<1x128xf32> to vector<32x128xf32>
    %25 = arith.addf %22, %24 : vector<32x128xf32>
    %cst_23 = arith.constant 0.000000e+00 : f32
    %26 = vector.broadcast %cst_23 : f32 to vector<32x128xf32>
    %27 = arith.cmpf oge, %25, %26 : vector<32x128xf32>
    %cst_24 = arith.constant 0.00999999977 : f32
    %28 = vector.broadcast %cst_24 : f32 to vector<32x128xf32>
    %29 = arith.mulf %28, %25 : vector<32x128xf32>
    %30 = arith.select %27, %25, %29 : vector<32x128xi1>, vector<32x128xf32>
    %31 = arith.truncf %30 : vector<32x128xf32> to vector<32x128xbf16>
    %c0_25 = arith.constant 0 : index
    %c0_26 = arith.constant 0 : index
    %c0_27 = arith.constant 0 : index
    %32 = vector.load %arg4[%c0_25, %c0_26, %c0_27] : memref<1x32x128xbf16, #tpu.memory_space<vmem>>, vector<1x32x128xbf16>
    %33 = vector.shape_cast %32 : vector<1x32x128xbf16> to vector<32x128xbf16>
    %34 = vector.shape_cast %31 : vector<32x128xbf16> to vector<1x32x128xbf16>
    tpu.vector_store %arg4[%c0_25, %c0_26, %c0_27], %34 {strides = array<i32>} : memref<1x32x128xbf16, #tpu.memory_space<vmem>>, vector<1x32x128xbf16>,
    return
  }
  func.func @transform_0(%arg0: i32) -> (i32, i32, i32) {
    %c0_i32 = arith.constant 0 : i32
    %c0_i32_0 = arith.constant 0 : i32
    %c0_i32_1 = arith.constant 0 : i32
    return %arg0, %c0_i32, %c0_i32_0 : i32, i32, i32
  }
  func.func @transform_1(%arg0: i32) -> (i32, i32, i32) {
    %c0_i32 = arith.constant 0 : i32
    %c0_i32_0 = arith.constant 0 : i32
    %c0_i32_1 = arith.constant 0 : i32
    %c0_i32_2 = arith.constant 0 : i32
    return %c0_i32, %c0_i32_0, %c0_i32_1 : i32, i32, i32
  }
  func.func @transform_2(%arg0: i32) -> (i32, i32) {
    %c0_i32 = arith.constant 0 : i32
    %c0_i32_0 = arith.constant 0 : i32
    %c0_i32_1 = arith.constant 0 : i32
    return %c0_i32, %c0_i32_0 : i32, i32
  }
  func.func @transform_3(%arg0: i32) -> (i32, i32, i32) {
    %c0_i32 = arith.constant 0 : i32
    %c0_i32_0 = arith.constant 0 : i32
    %c0_i32_1 = arith.constant 0 : i32
    return %arg0, %c0_i32, %c0_i32_0 : i32, i32, i32
  }
}

module attributes {stable_mosaic.version = 11 : i64} {
  func.func @_linear_kernel(%arg0: memref<2x128xbf16, #tpu.memory_space<vmem>>, %arg1: memref<128x128xbf16, #tpu.memory_space<vmem>>, %arg2: memref<1x128xf32, #tpu.memory_space<vmem>>, %arg3: memref<2x128xf32, #tpu.memory_space<vmem>>) attributes {dimension_semantics = [], scalar_prefetch = 0 : i64, scratch_operands = 0 : i64, tpu.core_type = #tpu.core_type<tc>} {
    %c0 = arith.constant 0 : index
    %c0_0 = arith.constant 0 : index
    %0 = vector.load %arg0[%c0, %c0_0] : memref<2x128xbf16, #tpu.memory_space<vmem>>, vector<2x128xbf16>
    %c0_1 = arith.constant 0 : index
    %c0_2 = arith.constant 0 : index
    %1 = vector.load %arg1[%c0_1, %c0_2] : memref<128x128xbf16, #tpu.memory_space<vmem>>, vector<128x128xbf16>
    %cst = arith.constant dense<0.000000e+00> : vector<2x128xf32>
    %2 = tpu.matmul %0, %1, %cst {dimension_numbers = #tpu.dot_dimension_numbers<[1], [0], [0], [1], [0, 0, 1, 1], [], []>} : vector<2x128xbf16>, vector<128x128xbf16>, vector<2x128xf32> -> vector<2x128xf32>
    %c0_3 = arith.constant 0 : index
    %c0_4 = arith.constant 0 : index
    %3 = vector.load %arg2[%c0_3, %c0_4] : memref<1x128xf32, #tpu.memory_space<vmem>>, vector<1x128xf32>
    %4 = vector.broadcast %3 : vector<1x128xf32> to vector<2x128xf32>
    %5 = arith.addf %2, %4 : vector<2x128xf32>
    %c0_5 = arith.constant 0 : index
    %c0_6 = arith.constant 0 : index
    %6 = vector.load %arg3[%c0_5, %c0_6] : memref<2x128xf32, #tpu.memory_space<vmem>>, vector<2x128xf32>
    tpu.vector_store %arg3[%c0_5, %c0_6], %5 {strides = array<i32>} : memref<2x128xf32, #tpu.memory_space<vmem>>, vector<2x128xf32>,
    return
  }
}

module attributes {stable_mosaic.version = 11 : i64} {
  func.func @_conv_bn_lrelu_kernel(%arg0: i32, %arg1: memref<1x24x128xbf16, #tpu.memory_space<vmem>>, %arg2: memref<4x128x128xbf16, #tpu.memory_space<vmem>>, %arg3: memref<1x128xf32, #tpu.memory_space<vmem>>, %arg4: memref<1x16x128xbf16, #tpu.memory_space<vmem>>) attributes {dimension_semantics = [#tpu.dimension_semantics<parallel>], iteration_bounds = array<i64: 2>, scalar_prefetch = 0 : i64, scratch_operands = 0 : i64, tpu.core_type = #tpu.core_type<tc>, window_params = [{transform_indices = @transform_0, window_bounds = array<i64: 1, 24, 128>}, {pipeline_mode = #tpu.pipeline_mode<synchronous>, transform_indices = @transform_1, window_bounds = array<i64: 4, 128, 128>}, {pipeline_mode = #tpu.pipeline_mode<synchronous>, transform_indices = @transform_2, window_bounds = array<i64: 1, 128>}, {transform_indices = @transform_3, window_bounds = array<i64: 1, 16, 128>}]} {
    %c0 = arith.constant 0 : index
    %c0_0 = arith.constant 0 : index
    %c0_1 = arith.constant 0 : index
    %0 = vector.load %arg1[%c0, %c0_0, %c0_1] : memref<1x24x128xbf16, #tpu.memory_space<vmem>>, vector<1x16x128xbf16>
    %1 = vector.shape_cast %0 : vector<1x16x128xbf16> to vector<16x128xbf16>
    %c0_2 = arith.constant 0 : index
    %c0_3 = arith.constant 0 : index
    %c0_4 = arith.constant 0 : index
    %2 = vector.load %arg2[%c0_2, %c0_3, %c0_4] : memref<4x128x128xbf16, #tpu.memory_space<vmem>>, vector<1x128x128xbf16>
    %3 = vector.shape_cast %2 : vector<1x128x128xbf16> to vector<128x128xbf16>
    %cst = arith.constant dense<0.000000e+00> : vector<16x128xf32>
    %4 = tpu.matmul %1, %3, %cst {dimension_numbers = #tpu.dot_dimension_numbers<[1], [0], [0], [1], [0, 0, 1, 1], [], []>} : vector<16x128xbf16>, vector<128x128xbf16>, vector<16x128xf32> -> vector<16x128xf32>
    %c0_5 = arith.constant 0 : index
    %c1 = arith.constant 1 : index
    %c0_6 = arith.constant 0 : index
    %5 = vector.load %arg1[%c0_5, %c1, %c0_6] : memref<1x24x128xbf16, #tpu.memory_space<vmem>>, vector<1x16x128xbf16>
    %6 = vector.shape_cast %5 : vector<1x16x128xbf16> to vector<16x128xbf16>
    %c1_7 = arith.constant 1 : index
    %c0_8 = arith.constant 0 : index
    %c0_9 = arith.constant 0 : index
    %7 = vector.load %arg2[%c1_7, %c0_8, %c0_9] : memref<4x128x128xbf16, #tpu.memory_space<vmem>>, vector<1x128x128xbf16>
    %8 = vector.shape_cast %7 : vector<1x128x128xbf16> to vector<128x128xbf16>
    %cst_10 = arith.constant dense<0.000000e+00> : vector<16x128xf32>
    %9 = tpu.matmul %6, %8, %cst_10 {dimension_numbers = #tpu.dot_dimension_numbers<[1], [0], [0], [1], [0, 0, 1, 1], [], []>} : vector<16x128xbf16>, vector<128x128xbf16>, vector<16x128xf32> -> vector<16x128xf32>
    %10 = arith.addf %4, %9 : vector<16x128xf32>
    %c0_11 = arith.constant 0 : index
    %c3 = arith.constant 3 : index
    %c0_12 = arith.constant 0 : index
    %11 = vector.load %arg1[%c0_11, %c3, %c0_12] : memref<1x24x128xbf16, #tpu.memory_space<vmem>>, vector<1x16x128xbf16>
    %12 = vector.shape_cast %11 : vector<1x16x128xbf16> to vector<16x128xbf16>
    %c2 = arith.constant 2 : index
    %c0_13 = arith.constant 0 : index
    %c0_14 = arith.constant 0 : index
    %13 = vector.load %arg2[%c2, %c0_13, %c0_14] : memref<4x128x128xbf16, #tpu.memory_space<vmem>>, vector<1x128x128xbf16>
    %14 = vector.shape_cast %13 : vector<1x128x128xbf16> to vector<128x128xbf16>
    %cst_15 = arith.constant dense<0.000000e+00> : vector<16x128xf32>
    %15 = tpu.matmul %12, %14, %cst_15 {dimension_numbers = #tpu.dot_dimension_numbers<[1], [0], [0], [1], [0, 0, 1, 1], [], []>} : vector<16x128xbf16>, vector<128x128xbf16>, vector<16x128xf32> -> vector<16x128xf32>
    %16 = arith.addf %10, %15 : vector<16x128xf32>
    %c0_16 = arith.constant 0 : index
    %c4 = arith.constant 4 : index
    %c0_17 = arith.constant 0 : index
    %17 = vector.load %arg1[%c0_16, %c4, %c0_17] : memref<1x24x128xbf16, #tpu.memory_space<vmem>>, vector<1x16x128xbf16>
    %18 = vector.shape_cast %17 : vector<1x16x128xbf16> to vector<16x128xbf16>
    %c3_18 = arith.constant 3 : index
    %c0_19 = arith.constant 0 : index
    %c0_20 = arith.constant 0 : index
    %19 = vector.load %arg2[%c3_18, %c0_19, %c0_20] : memref<4x128x128xbf16, #tpu.memory_space<vmem>>, vector<1x128x128xbf16>
    %20 = vector.shape_cast %19 : vector<1x128x128xbf16> to vector<128x128xbf16>
    %cst_21 = arith.constant dense<0.000000e+00> : vector<16x128xf32>
    %21 = tpu.matmul %18, %20, %cst_21 {dimension_numbers = #tpu.dot_dimension_numbers<[1], [0], [0], [1], [0, 0, 1, 1], [], []>} : vector<16x128xbf16>, vector<128x128xbf16>, vector<16x128xf32> -> vector<16x128xf32>
    %22 = arith.addf %16, %21 : vector<16x128xf32>
    %c0_22 = arith.constant 0 : index
    %c0_23 = arith.constant 0 : index
    %23 = vector.load %arg3[%c0_22, %c0_23] : memref<1x128xf32, #tpu.memory_space<vmem>>, vector<1x128xf32>
    %24 = vector.broadcast %23 : vector<1x128xf32> to vector<16x128xf32>
    %25 = arith.addf %22, %24 : vector<16x128xf32>
    %cst_24 = arith.constant 0.000000e+00 : f32
    %26 = vector.broadcast %cst_24 : f32 to vector<16x128xf32>
    %27 = arith.cmpf oge, %25, %26 : vector<16x128xf32>
    %cst_25 = arith.constant 0.00999999977 : f32
    %28 = vector.broadcast %cst_25 : f32 to vector<16x128xf32>
    %29 = arith.mulf %28, %25 : vector<16x128xf32>
    %30 = arith.select %27, %25, %29 : vector<16x128xi1>, vector<16x128xf32>
    %31 = arith.truncf %30 : vector<16x128xf32> to vector<16x128xbf16>
    %c0_26 = arith.constant 0 : index
    %c0_27 = arith.constant 0 : index
    %c0_28 = arith.constant 0 : index
    %32 = vector.load %arg4[%c0_26, %c0_27, %c0_28] : memref<1x16x128xbf16, #tpu.memory_space<vmem>>, vector<1x16x128xbf16>
    %33 = vector.shape_cast %32 : vector<1x16x128xbf16> to vector<16x128xbf16>
    %34 = vector.shape_cast %31 : vector<16x128xbf16> to vector<1x16x128xbf16>
    tpu.vector_store %arg4[%c0_26, %c0_27, %c0_28], %34 {strides = array<i32>} : memref<1x16x128xbf16, #tpu.memory_space<vmem>>, vector<1x16x128xbf16>,
    return
  }
  func.func @transform_0(%arg0: i32) -> (i32, i32, i32) {
    %c0_i32 = arith.constant 0 : i32
    %c0_i32_0 = arith.constant 0 : i32
    %c0_i32_1 = arith.constant 0 : i32
    return %arg0, %c0_i32, %c0_i32_0 : i32, i32, i32
  }
  func.func @transform_1(%arg0: i32) -> (i32, i32, i32) {
    %c0_i32 = arith.constant 0 : i32
    %c0_i32_0 = arith.constant 0 : i32
    %c0_i32_1 = arith.constant 0 : i32
    %c0_i32_2 = arith.constant 0 : i32
    return %c0_i32, %c0_i32_0, %c0_i32_1 : i32, i32, i32
  }
  func.func @transform_2(%arg0: i32) -> (i32, i32) {
    %c0_i32 = arith.constant 0 : i32
    %c0_i32_0 = arith.constant 0 : i32
    %c0_i32_1 = arith.constant 0 : i32
    return %c0_i32, %c0_i32_0 : i32, i32
  }
  func.func @transform_3(%arg0: i32) -> (i32, i32, i32) {
    %c0_i32 = arith.constant 0 : i32
    %c0_i32_0 = arith.constant 0 : i32
    %c0_i32_1 = arith.constant 0 : i32
    return %arg0, %c0_i32, %c0_i32_0 : i32, i32, i32
  }
}

</mosaic_0001>

<bundles_post_ra>
// kernel: _lambda_.6
= control target key start
LH: loop header
LB: loop body
LE: loop exit
PB: predicated region body
PF: predicated region fallthrough
CT: control target
= control target key end

     0   :  { %s9793_s12 = smov 0   ;;  %s11848_s0 = inlined_call_operand.vmem [shape: bf16[2,1136,12], index: 0, kind: input, shape index: {}]   ;;  %s11849_s1 = inlined_call_operand.vmem [shape: bf16[4,12,128], index: 1, kind: input, shape index: {}]   ;;  %s11850_s2 = inlined_call_operand.vmem [shape: f32[1,128], index: 2, kind: input, shape index: {}]   ;;  %s11851_s3 = inlined_call_operand.vmem [shape: bf16[2,1096,128], index: 3, kind: output, shape index: {}]  }
   0x1 LB: > { %s7095_s13 = sadd.s32 4294967295, %s9769_s12   ;;  %p7099_p0 = scmp.ge.s32.totalorder %s9769_s12, 1  ;;  %s9769_s12 = sphi %s9793_s12, %s13_s12  }
   0x2   : > { %p137_p1 = scmp.lt.s32.totalorder %s9769_s12, 3 }
   0x4   : > { %p138_p2 = pnand %p7099_p0, %p137_p1 }
   0x6   : > { %141 = sbr.rel (%p138_p2) target bundleno = 1348 (0x544), region = 32 }
   0xd   : > { %vm1425_vm0 = vcmask 1045504   ;;  %v11852_v0 = vmov 0.0   ;;  %v9616_v1 = vld [vmem:[%s11849_s1 + $0x8] sm:$0x3f]   ;;  %v9617_v2 = vld [vmem:[%s11849_s1] sm:$0x3f]  }
   0xe   : > { %8492 = vmatprep.subr.bf16.mxu0 %v11852_v0  ;;  %8770 = vmatprep.subr.bf16.mxu1 %v11852_v0  ;;  %p161_p3 = scmp.lt.s32.totalorder %s7095_s13, 1  ;;  %v1427_v3 = vsel %vm1425_vm0, %v9616_v1, 0  ;;  %vm9772_vm1 = vmmov 0   ;;  %v2159_v4 = vsel %vm1425_vm0, %v9617_v2, 0  ;;  %v9621_v5 = vld [vmem:[%s11849_s1 + $0x18] sm:$0x3f]  }
   0xf   : > { %8772 = vmatprep.mubr.msk.bf16.mxu1 %vm9772_vm1, %v11852_v0  ;;  %8494 = vmatprep.mubr.msk.bf16.mxu0 %vm9772_vm1, %v11852_v0  ;;  %vm1217_vm2 = vcmask 97280   ;;  %v5076_v7 = vsel %vm1425_vm0, %v9621_v5, 0  ;;  %v9620_v12 = vld [vmem:[%s11849_s1 + $0x10] sm:$0x3f]   ;;  %vm660_vm3 = vsmask.f32 7424 }
  0x10   : > { %8493 = vmatpush3.bf16.msra.mxu0 %v1427_v3  ;;  %s12054_s13 = smov (!%p161_p3, %s7095_s13), 1  ;;  %8771 = vmatpush3.bf16.msra.mxu1 %v2159_v4  ;;  %v3995_v19 = vsel %vm1425_vm0, %v9620_v12, 0  ;;  %vm4725_vm4 = vcmask 1046528  }
  0x11   : > { %9048 = vmatprep.subr.bf16.mxu0 %v11852_v0  ;;  %s9604_s20 = smul.u32 568, %s12054_s13  ;;  %9326 = vmatprep.subr.bf16.mxu1 %v11852_v0 }
  0x12   : > { %s9605_s28 = smul.u32 548, %s12054_s13 }
  0x13   : > { %s9826_s23 = scalar_lea.vmem %s11848_s0, %s9604_s20 }
  0x14   : > { %v9618_v6 = vld [vmem:[%s9826_s23] sm:$0xff]   ;;  %v9619_v8 = vld [vmem:[%s9826_s23 + $0x8] sm:$0xff]   ;;  %v9622_v13 = vld [vmem:[%s9826_s23 + $0x10] sm:$0xff]   ;;  %s10944_s4 = scalar_lea.vmem %s11851_s3, %s9605_s28 }
  0x15   : > { %8773 = vmatmul.mubr.msk.bf16.vlgmr.msra.gmra.mrb[0].mxu1 %vm1217_vm2, %v9618_v6  ;;  %v662_v9 = vshrl.u32 %v9618_v6, 16  ;;  %v664_v10 = vshll.u32 %v9618_v6, 16  ;;  %v669_v11 = vshll.u32 %v9619_v8, 16  ;;  %v673_v17 = vshrl.u32 %v9619_v8, 16  ;;  %v9623_v23 = vld [vmem:[%s9826_s23 + $0x18] sm:$0xff]   ;;  %v9624_v29 = vld [vmem:[%s9826_s23 + $0x20] sm:$0xff]  }
  0x16   : > { %9327 = vmatpush3.bf16.msra.mxu1 %v5076_v7  ;;  %8776 = vmatprep.mubr.msk.bf16.mxu1 %vm9772_vm1, %v11852_v0  ;;  %v677_v18 = vshll.u32 %v9622_v13, 16  ;;  %v681_v25 = vshrl.u32 %v9622_v13, 16  ;;  %v685_v26 = vshll.u32 %v9623_v23, 16  ;;  %v689_v31 = vshrl.u32 %v9623_v23, 16  ;;  %v9625_v35 = vld [vmem:[%s9826_s23 + $0x28] sm:$0xff]   ;;  %v9626_v41 = vld [vmem:[%s9826_s23 + $0x30] sm:$0xff]  }
  0x17   : > { %v666_v14 = vrot.slane %v664_v10, 1  ;;  %v671_v15 = vrot.slane %v669_v11, 1  ;;  %v693_v32 = vshll.u32 %v9624_v29, 16  ;;  %v697_v37 = vshrl.u32 %v9624_v29, 16  ;;  %v9627_v47 = vld [vmem:[%s9826_s23 + $0x38] sm:$0xff]   ;;  %v9628_v53 = vld [vmem:[%s9826_s23 + $0x40] sm:$0xff]  }
  0x18   : > { %v679_v22 = vrot.slane %v677_v18, 1  ;;  %v687_v28 = vrot.slane %v685_v26, 1  ;;  %v701_v38 = vshll.u32 %v9625_v35, 16  ;;  %v705_v43 = vshrl.u32 %v9625_v35, 16  ;;  %v9629_v59 = vld [vmem:[%s9826_s23 + $0x48] sm:$0xff]   ;;  %v9630_v2 = vld [vmem:[%s9826_s23 + $0x50] sm:$0xff]  }
  0x19   : > { %v667_v16 = vor.u32 %v666_v14, %v662_v9  ;;  %v675_v21 = vor.u32 %v673_v17, %v671_v15  ;;  %v695_v34 = vrot.slane %v693_v32, 1  ;;  %v709_v44 = vshll.u32 %v9626_v41, 16  ;;  %v9632_v14 = vld [vmem:[%s9826_s23 + $0x60] sm:$0xff]   ;;  %v9634_v26 = vld [vmem:[%s9826_s23 + $0x70] sm:$0xff]   ;;  %v9635_v32 = vld [vmem:[%s9826_s23 + $0x78] sm:$0xff]  }
  0x1a   : > { %v683_v27 = vor.u32 %v681_v25, %v679_v22  ;;  %v691_v33 = vor.u32 %v689_v31, %v687_v28  ;;  %v703_v40 = vrot.slane %v701_v38, 1  ;;  %v713_v49 = vshrl.u32 %v9626_v41, 16  ;;  %v9636_v38 = vld [vmem:[%s9826_s23 + $0x80] sm:$0xff]  }
  0x1b   : > { %v672_v20 = vsel %vm660_vm3, %v667_v16, %v671_v15  ;;  %v680_v24 = vsel %vm660_vm3, %v675_v21, %v679_v22  ;;  %v699_v39 = vor.u32 %v697_v37, %v695_v34  ;;  %v711_v46 = vrot.slane %v709_v44, 1  ;;  %v9637_v44 = vld [vmem:[%s9826_s23 + $0x88] sm:$0xff]  }
  0x1c   : > { %8495 = vmatmul.mubr.msk.bf16.vlgmr.msra.gmra.mrb[0].mxu0 %vm1217_vm2, %v672_v20  ;;  %v688_v30 = vsel %vm660_vm3, %v683_v27, %v687_v28  ;;  %v696_v36 = vsel %vm660_vm3, %v691_v33, %v695_v34  ;;  %v707_v45 = vor.u32 %v705_v43, %v703_v40  ;;  %v717_v50 = vshll.u32 %v9627_v47, 16  ;;  %v9633_v20 = vld [vmem:[%s9826_s23 + $0x68] sm:$0xff]  }
  0x1d   : > { %9049 = vmatpush3.bf16.msra.mxu0 %v3995_v19  ;;  %8498 = vmatprep.mubr.msk.bf16.mxu0 %vm9772_vm1, %v11852_v0  ;;  %v704_v42 = vsel %vm660_vm3, %v699_v39, %v703_v40  ;;  %v715_v51 = vor.u32 %v713_v49, %v711_v46  ;;  %v721_v55 = vshrl.u32 %v9627_v47, 16  ;;  %v725_v56 = vshll.u32 %v9628_v53, 16 }
  0x1e   : > { %8777 = vmatmul.mubr.msk.bf16.gmra.mrb[4].mxu1 %vm1217_vm2, %v9619_v8  ;;  %v712_v48 = vsel %vm660_vm3, %v707_v45, %v711_v46  ;;  %v719_v52 = vrot.slane %v717_v50, 1  ;;  %v729_v61 = vshrl.u32 %v9628_v53, 16  ;;  %v733_v62 = vshll.u32 %v9629_v59, 16  ;;  %v9631_v8 = vld [vmem:[%s9826_s23 + $0x58] sm:$0xff]   ;;  %v9638_v50 = vld [vmem:[%s9826_s23 + $0x90] sm:$0xff]  }
  0x1f   : > { %8780 = vmatprep.mubr.msk.bf16.mxu1 %vm9772_vm1, %v11852_v0  ;;  %v727_v58 = vrot.slane %v725_v56, 1  ;;  %v737_v4 = vshrl.u32 %v9629_v59, 16  ;;  %v741_v5 = vshll.u32 %v9630_v2, 16  ;;  %v745_v10 = vshrl.u32 %v9630_v2, 16  ;;  %v9639_v56 = vld [vmem:[%s9826_s23 + $0x98] sm:$0xff]  }
  0x20   : > { %v720_v54 = vsel %vm660_vm3, %v715_v51, %v719_v52  ;;  %v723_v57 = vor.u32 %v721_v55, %v719_v52  ;;  %v735_v1 = vrot.slane %v733_v62, 1  ;;  %v749_v11 = vshll.u32 %v9631_v8, 16  ;;  %v9640_v62 = vld [vmem:[%s9826_s23 + $0xa0] sm:$0xff]  }
  0x21   : > { %v731_v63 = vor.u32 %v729_v61, %v727_v58  ;;  %v743_v7 = vrot.slane %v741_v5, 1  ;;  %v753_v16 = vshrl.u32 %v9631_v8, 16  ;;  %v757_v17 = vshll.u32 %v9632_v14, 16  ;;  %v9641_v5 = vld [vmem:[%s9826_s23 + $0xa8] sm:$0xff]  }
  0x22   : > { %v728_v60 = vsel %vm660_vm3, %v723_v57, %v727_v58  ;;  %v739_v6 = vor.u32 %v737_v4, %v735_v1  ;;  %v761_v22 = vshrl.u32 %v9632_v14, 16  ;;  %v769_v28 = vshrl.u32 %v9633_v20, 16 }
  0x23   : > { %v736_v3 = vsel %vm660_vm3, %v731_v63, %v735_v1  ;;  %v747_v12 = vor.u32 %v745_v10, %v743_v7  ;;  %v759_v19 = vrot.slane %v757_v17, 1  ;;  %v777_v34 = vshrl.u32 %v9634_v26, 16  ;;  %v9643_v17 = vld [vmem:[%s9826_s23 + $0xb8] sm:$0xff]  }
  0x24   : > { %8499 = vmatmul.mubr.msk.bf16.gmra.mrb[4].mxu0 %vm1217_vm2, %v680_v24  ;;  %v744_v9 = vsel %vm660_vm3, %v739_v6, %v743_v7  ;;  %v785_v40 = vshrl.u32 %v9635_v32, 16  ;;  %v793_v46 = vshrl.u32 %v9636_v38, 16  ;;  %v801_v52 = vshrl.u32 %v9637_v44, 16 }
  0x25   : > { %8502 = vmatprep.mubr.msk.bf16.mxu0 %vm9772_vm1, %v11852_v0  ;;  %v763_v24 = vor.u32 %v761_v22, %v759_v19  ;;  %v809_v58 = vshrl.u32 %v9638_v50, 16  ;;  %v817_v1 = vshrl.u32 %v9639_v56, 16  ;;  %v825_v7 = vshrl.u32 %v9640_v62, 16 }
  0x26   : > { %8781 = vmatmul.mubr.msk.bf16.gmra.mrb[8].mxu1 %vm1217_vm2, %v9622_v13  ;;  %v751_v13 = vrot.slane %v749_v11, 1  ;;  %v9642_v11 = vld [vmem:[%s9826_s23 + $0xb0] sm:$0xff]  }
  0x27   : > { %8784 = vmatprep.mubr.msk.bf16.mxu1 %vm9772_vm1, %v11852_v0 }
  0x28   : > { %v752_v15 = vsel %vm660_vm3, %v747_v12, %v751_v13  ;;  %v755_v18 = vor.u32 %v753_v16, %v751_v13  ;;  %v833_v13 = vshrl.u32 %v9641_v5, 16 }
  0x2a   : > { %v760_v21 = vsel %vm660_vm3, %v755_v18, %v759_v19  ;;  %v841_v19 = vshrl.u32 %v9642_v11, 16 }
  0x2c   : > { %8503 = vmatmul.mubr.msk.bf16.gmra.mrb[8].mxu0 %vm1217_vm2, %v688_v30 }
  0x2d   : > { %8506 = vmatprep.mubr.msk.bf16.mxu0 %vm9772_vm1, %v11852_v0 }
  0x2e   : > { %8785 = vmatmul.mubr.msk.bf16.gmra.mrb[12].mxu1 %vm1217_vm2, %v9623_v23  ;;  %v765_v23 = vshll.u32 %v9633_v20, 16 }
  0x2f   : > { %8788 = vmatprep.mubr.msk.bf16.mxu1 %vm9772_vm1, %v11852_v0 }
  0x30   : > { %v767_v25 = vrot.slane %v765_v23, 1  ;;  %v9644_v23 = vld [vmem:[%s9826_s23 + $0xc0] sm:$0xff]  }
  0x32   : > { %v768_v27 = vsel %vm660_vm3, %v763_v24, %v767_v25  ;;  %v771_v30 = vor.u32 %v769_v28, %v767_v25  ;;  %v849_v25 = vshrl.u32 %v9643_v17, 16 }
  0x34   : > { %8507 = vmatmul.mubr.msk.bf16.gmra.mrb[12].mxu0 %vm1217_vm2, %v696_v36 }
  0x35   : > { %8510 = vmatprep.mubr.msk.bf16.mxu0 %vm9772_vm1, %v11852_v0 }
  0x36   : > { %8789 = vmatmul.mubr.msk.bf16.gmra.mrb[16].mxu1 %vm1217_vm2, %v9624_v29  ;;  %v773_v29 = vshll.u32 %v9634_v26, 16 }
  0x37   : > { %8792 = vmatprep.mubr.msk.bf16.mxu1 %vm9772_vm1, %v11852_v0 }
  0x38   : > { %v775_v31 = vrot.slane %v773_v29, 1  ;;  %v9645_v29 = vld [vmem:[%s9826_s23 + $0xc8] sm:$0xff]  }
  0x3a   : > { %v776_v33 = vsel %vm660_vm3, %v771_v30, %v775_v31  ;;  %v779_v36 = vor.u32 %v777_v34, %v775_v31  ;;  %v857_v31 = vshrl.u32 %v9644_v23, 16 }
  0x3c   : > { %8511 = vmatmul.mubr.msk.bf16.gmra.mrb[16].mxu0 %vm1217_vm2, %v704_v42 }
  0x3d   : > { %8514 = vmatprep.mubr.msk.bf16.mxu0 %vm9772_vm1, %v11852_v0 }
  0x3e   : > { %8793 = vmatmul.mubr.msk.bf16.gmra.mrb[20].mxu1 %vm1217_vm2, %v9625_v35  ;;  %v781_v35 = vshll.u32 %v9635_v32, 16 }
  0x3f   : > { %8796 = vmatprep.mubr.msk.bf16.mxu1 %vm9772_vm1, %v11852_v0 }
  0x40   : > { %v783_v37 = vrot.slane %v781_v35, 1  ;;  %v9646_v35 = vld [vmem:[%s9826_s23 + $0xd0] sm:$0xff]  }
  0x42   : > { %v784_v39 = vsel %vm660_vm3, %v779_v36, %v783_v37  ;;  %v787_v42 = vor.u32 %v785_v40, %v783_v37  ;;  %v865_v37 = vshrl.u32 %v9645_v29, 16 }
  0x44   : > { %8515 = vmatmul.mubr.msk.bf16.gmra.mrb[20].mxu0 %vm1217_vm2, %v712_v48 }
  0x45   : > { %8518 = vmatprep.mubr.msk.bf16.mxu0 %vm9772_vm1, %v11852_v0 }
  0x46   : > { %8797 = vmatmul.mubr.msk.bf16.gmra.mrb[24].mxu1 %vm1217_vm2, %v9626_v41  ;;  %v789_v41 = vshll.u32 %v9636_v38, 16 }
  0x47   : > { %8800 = vmatprep.mubr.msk.bf16.mxu1 %vm9772_vm1, %v11852_v0 }
  0x48   : > { %v791_v43 = vrot.slane %v789_v41, 1  ;;  %v9647_v41 = vld [vmem:[%s9826_s23 + $0xd8] sm:$0xff]  }
  0x4a   : > { %v792_v45 = vsel %vm660_vm3, %v787_v42, %v791_v43  ;;  %v795_v48 = vor.u32 %v793_v46, %v791_v43  ;;  %v873_v43 = vshrl.u32 %v9646_v35, 16 }
  0x4c   : > { %8519 = vmatmul.mubr.msk.bf16.gmra.mrb[24].mxu0 %vm1217_vm2, %v720_v54 }
  0x4d   : > { %8522 = vmatprep.mubr.msk.bf16.mxu0 %vm9772_vm1, %v11852_v0 }
  0x4e   : > { %8801 = vmatmul.mubr.msk.bf16.gmra.mrb[28].mxu1 %vm1217_vm2, %v9627_v47  ;;  %v797_v47 = vshll.u32 %v9637_v44, 16 }
  0x4f   : > { %8804 = vmatprep.mubr.msk.bf16.mxu1 %vm9772_vm1, %v11852_v0 }
  0x50   : > { %v799_v49 = vrot.slane %v797_v47, 1  ;;  %v9648_v47 = vld [vmem:[%s9826_s23 + $0xe0] sm:$0xff]  }
  0x52   : > { %v800_v51 = vsel %vm660_vm3, %v795_v48, %v799_v49  ;;  %v803_v54 = vor.u32 %v801_v52, %v799_v49  ;;  %v885_v52 = vshll.u32 %v9648_v47, 16 }
  0x54   : > { %8523 = vmatmul.mubr.msk.bf16.gmra.mrb[28].mxu0 %vm1217_vm2, %v728_v60 }
  0x55   : > { %8526 = vmatprep.mubr.msk.bf16.mxu0 %vm9772_vm1, %v11852_v0 }
  0x56   : > { %8805 = vmatmul.mubr.msk.bf16.gmra.mrb[32].mxu1 %vm1217_vm2, %v9628_v53  ;;  %v805_v53 = vshll.u32 %v9638_v50, 16 }
  0x57   : > { %8808 = vmatprep.mubr.msk.bf16.mxu1 %vm9772_vm1, %v11852_v0 }
  0x58   : > { %v807_v55 = vrot.slane %v805_v53, 1 }
  0x5a   : > { %v808_v57 = vsel %vm660_vm3, %v803_v54, %v807_v55  ;;  %v811_v60 = vor.u32 %v809_v58, %v807_v55 }
  0x5c   : > { %8527 = vmatmul.mubr.msk.bf16.gmra.mrb[32].mxu0 %vm1217_vm2, %v736_v3 }
  0x5d   : > { %8530 = vmatprep.mubr.msk.bf16.mxu0 %vm9772_vm1, %v11852_v0 }
  0x5e   : > { %8809 = vmatmul.mubr.msk.bf16.gmra.mrb[36].mxu1 %vm1217_vm2, %v9629_v59  ;;  %v813_v59 = vshll.u32 %v9639_v56, 16 }
  0x5f   : > { %8812 = vmatprep.mubr.msk.bf16.mxu1 %vm9772_vm1, %v11852_v0 }
  0x60   : > { %v815_v61 = vrot.slane %v813_v59, 1 }
  0x62   : > { %v816_v63 = vsel %vm660_vm3, %v811_v60, %v815_v61  ;;  %v819_v3 = vor.u32 %v817_v1, %v815_v61  ;;  %v889_v1 = vshrl.u32 %v9648_v47, 16 }
  0x64   : > { %8531 = vmatmul.mubr.msk.bf16.gmra.mrb[36].mxu0 %vm1217_vm2, %v744_v9 }
  0x65   : > { %8534 = vmatprep.mubr.msk.bf16.mxu0 %vm9772_vm1, %v11852_v0 }
  0x66   : > { %8813 = vmatmul.mubr.msk.bf16.gmra.mrb[40].mxu1 %vm1217_vm2, %v9630_v2  ;;  %v821_v2 = vshll.u32 %v9640_v62, 16 }
  0x67   : > { %8816 = vmatprep.mubr.msk.bf16.mxu1 %vm9772_vm1, %v11852_v0 }
  0x68   : > { %v823_v4 = vrot.slane %v821_v2, 1 }
  0x6a   : > { %v824_v6 = vsel %vm660_vm3, %v819_v3, %v823_v4  ;;  %v827_v9 = vor.u32 %v825_v7, %v823_v4 }
  0x6c   : > { %8535 = vmatmul.mubr.msk.bf16.gmra.mrb[40].mxu0 %vm1217_vm2, %v752_v15 }
  0x6d   : > { %8538 = vmatprep.mubr.msk.bf16.mxu0 %vm9772_vm1, %v11852_v0 }
  0x6e   : > { %8817 = vmatmul.mubr.msk.bf16.gmra.mrb[44].mxu1 %vm1217_vm2, %v9631_v8  ;;  %v829_v8 = vshll.u32 %v9641_v5, 16 }
  0x6f   : > { %8820 = vmatprep.mubr.msk.bf16.mxu1 %vm9772_vm1, %v11852_v0 }
  0x70   : > { %v831_v10 = vrot.slane %v829_v8, 1 }
  0x72   : > { %v832_v12 = vsel %vm660_vm3, %v827_v9, %v831_v10  ;;  %v835_v15 = vor.u32 %v833_v13, %v831_v10  ;;  %v9650_v10 = vld [vmem:[%s9826_s23 + $0xf0] sm:$0xff]  }
  0x74   : > { %8539 = vmatmul.mubr.msk.bf16.gmra.mrb[44].mxu0 %vm1217_vm2, %v760_v21 }
  0x75   : > { %8542 = vmatprep.mubr.msk.bf16.mxu0 %vm9772_vm1, %v11852_v0 }
  0x76   : > { %8821 = vmatmul.mubr.msk.bf16.gmra.mrb[48].mxu1 %vm1217_vm2, %v9632_v14  ;;  %v837_v14 = vshll.u32 %v9642_v11, 16 }
  0x77   : > { %8824 = vmatprep.mubr.msk.bf16.mxu1 %vm9772_vm1, %v11852_v0 }
  0x78   : > { %v839_v16 = vrot.slane %v837_v14, 1 }
  0x7a   : > { %v840_v18 = vsel %vm660_vm3, %v835_v15, %v839_v16  ;;  %v843_v21 = vor.u32 %v841_v19, %v839_v16 }
  0x7c   : > { %8543 = vmatmul.mubr.msk.bf16.gmra.mrb[48].mxu0 %vm1217_vm2, %v768_v27 }
  0x7d   : > { %8546 = vmatprep.mubr.msk.bf16.mxu0 %vm9772_vm1, %v11852_v0 }
  0x7e   : > { %8825 = vmatmul.mubr.msk.bf16.gmra.mrb[52].mxu1 %vm1217_vm2, %v9633_v20  ;;  %v845_v20 = vshll.u32 %v9643_v17, 16 }
  0x7f   : > { %8828 = vmatprep.mubr.msk.bf16.mxu1 %vm9772_vm1, %v11852_v0 }
  0x80   : > { %v847_v22 = vrot.slane %v845_v20, 1 }
  0x82   : > { %v848_v24 = vsel %vm660_vm3, %v843_v21, %v847_v22  ;;  %v851_v27 = vor.u32 %v849_v25, %v847_v22 }
  0x84   : > { %8547 = vmatmul.mubr.msk.bf16.gmra.mrb[52].mxu0 %vm1217_vm2, %v776_v33 }
  0x85   : > { %8550 = vmatprep.mubr.msk.bf16.mxu0 %vm9772_vm1, %v11852_v0 }
  0x86   : > { %8829 = vmatmul.mubr.msk.bf16.gmra.mrb[56].mxu1 %vm1217_vm2, %v9634_v26  ;;  %v853_v26 = vshll.u32 %v9644_v23, 16 }
  0x87   : > { %8832 = vmatprep.mubr.msk.bf16.mxu1 %vm9772_vm1, %v11852_v0 }
  0x88   : > { %v855_v28 = vrot.slane %v853_v26, 1  ;;  %v9651_v26 = vld [vmem:[%s9826_s23 + $0xf8] sm:$0xff]  }
  0x8a   : > { %v856_v30 = vsel %vm660_vm3, %v851_v27, %v855_v28  ;;  %v859_v33 = vor.u32 %v857_v31, %v855_v28 }
  0x8c   : > { %8551 = vmatmul.mubr.msk.bf16.gmra.mrb[56].mxu0 %vm1217_vm2, %v784_v39 }
  0x8d   : > { %8554 = vmatprep.mubr.msk.bf16.mxu0 %vm9772_vm1, %v11852_v0 }
  0x8e   : > { %8833 = vmatmul.mubr.msk.bf16.gmra.mrb[60].mxu1 %vm1217_vm2, %v9635_v32  ;;  %v861_v32 = vshll.u32 %v9645_v29, 16 }
  0x8f   : > { %8836 = vmatprep.mubr.msk.bf16.mxu1 %vm9772_vm1, %v11852_v0 }
  0x90   : > { %v863_v34 = vrot.slane %v861_v32, 1 }
  0x92   : > { %v864_v36 = vsel %vm660_vm3, %v859_v33, %v863_v34  ;;  %v867_v39 = vor.u32 %v865_v37, %v863_v34  ;;  %v905_v33 = vshrl.u32 %v9650_v10, 16  ;;  %v909_v34 = vshll.u32 %v9651_v26, 16 }
  0x94   : > { %8555 = vmatmul.mubr.msk.bf16.gmra.mrb[60].mxu0 %vm1217_vm2, %v792_v45 }
  0x95   : > { %8558 = vmatprep.mubr.msk.bf16.mxu0 %vm9772_vm1, %v11852_v0 }
  0x96   : > { %8837 = vmatmul.mubr.msk.bf16.gmra.mrb[64].mxu1 %vm1217_vm2, %v9636_v38  ;;  %v869_v38 = vshll.u32 %v9646_v35, 16 }
  0x97   : > { %8840 = vmatprep.mubr.msk.bf16.mxu1 %vm9772_vm1, %v11852_v0 }
  0x98   : > { %v871_v40 = vrot.slane %v869_v38, 1 }
  0x9a   : > { %v872_v42 = vsel %vm660_vm3, %v867_v39, %v871_v40  ;;  %v875_v45 = vor.u32 %v873_v43, %v871_v40 }
  0x9c   : > { %8559 = vmatmul.mubr.msk.bf16.gmra.mrb[64].mxu0 %vm1217_vm2, %v800_v51  ;;  %v881_v51 = vshrl.u32 %v9647_v41, 16 }
  0x9d   : > { %8562 = vmatprep.mubr.msk.bf16.mxu0 %vm9772_vm1, %v11852_v0 }
  0x9e   : > { %8841 = vmatmul.mubr.msk.bf16.gmra.mrb[68].mxu1 %vm1217_vm2, %v9637_v44  ;;  %v877_v44 = vshll.u32 %v9647_v41, 16 }
  0x9f   : > { %8844 = vmatprep.mubr.msk.bf16.mxu1 %vm9772_vm1, %v11852_v0 }
  0xa0   : > { %v879_v46 = vrot.slane %v877_v44, 1 }
  0xa2   : > { %v880_v49 = vsel %vm660_vm3, %v875_v45, %v879_v46  ;;  %v883_v55 = vor.u32 %v881_v51, %v879_v46 }
  0xa4   : > { %8563 = vmatmul.mubr.msk.bf16.gmra.mrb[68].mxu0 %vm1217_vm2, %v808_v57  ;;  %v9649_v57 = vld [vmem:[%s9826_s23 + $0xe8] sm:$0xff]  }
  0xa5   : > { %8566 = vmatprep.mubr.msk.bf16.mxu0 %vm9772_vm1, %v11852_v0  ;;  %v893_v2 = vshll.u32 %v9649_v57, 16 }
  0xa6   : > { %8845 = vmatmul.mubr.msk.bf16.gmra.mrb[72].mxu1 %vm1217_vm2, %v9638_v50 }
  0xa7   : > { %8848 = vmatprep.mubr.msk.bf16.mxu1 %vm9772_vm1, %v11852_v0  ;;  %v895_v9 = vrot.slane %v893_v2, 1 }
  0xac   : > { %8567 = vmatmul.mubr.msk.bf16.gmra.mrb[72].mxu0 %vm1217_vm2, %v816_v63 }
  0xad   : > { %8570 = vmatprep.mubr.msk.bf16.mxu0 %vm9772_vm1, %v11852_v0 }
  0xae   : > { %8849 = vmatmul.mubr.msk.bf16.gmra.mrb[76].mxu1 %vm1217_vm2, %v9639_v56  ;;  %v887_v56 = vrot.slane %v885_v52, 1 }
  0xaf   : > { %8852 = vmatprep.mubr.msk.bf16.mxu1 %vm9772_vm1, %v11852_v0 }
  0xb0   : > { %v891_v8 = vor.u32 %v889_v1, %v887_v56 }
  0xb2   : > { %v896_v15 = vsel %vm660_vm3, %v891_v8, %v895_v9 }
  0xb4   : > { %8571 = vmatmul.mubr.msk.bf16.gmra.mrb[76].mxu0 %vm1217_vm2, %v824_v6 }
  0xb5   : > { %8574 = vmatprep.mubr.msk.bf16.mxu0 %vm9772_vm1, %v11852_v0 }
  0xb6   : > { %8853 = vmatmul.mubr.msk.bf16.gmra.mrb[80].mxu1 %vm1217_vm2, %v9640_v62  ;;  %v888_v62 = vsel %vm660_vm3, %v883_v55, %v887_v56 }
  0xb7   : > { %8856 = vmatprep.mubr.msk.bf16.mxu1 %vm9772_vm1, %v11852_v0 }
  0xbc   : > { %8575 = vmatmul.mubr.msk.bf16.gmra.mrb[80].mxu0 %vm1217_vm2, %v832_v12 }
  0xbd   : > { %8578 = vmatprep.mubr.msk.bf16.mxu0 %vm9772_vm1, %v11852_v0 }
  0xbe   : > { %8857 = vmatmul.mubr.msk.bf16.gmra.mrb[84].mxu1 %vm1217_vm2, %v9641_v5 }
  0xbf   : > { %8860 = vmatprep.mubr.msk.bf16.mxu1 %vm9772_vm1, %v11852_v0 }
  0xc4   : > { %8579 = vmatmul.mubr.msk.bf16.gmra.mrb[84].mxu0 %vm1217_vm2, %v840_v18  ;;  %v901_v18 = vshll.u32 %v9650_v10, 16 }
  0xc5   : > { %8582 = vmatprep.mubr.msk.bf16.mxu0 %vm9772_vm1, %v11852_v0 }
  0xc6   : > { %8861 = vmatmul.mubr.msk.bf16.gmra.mrb[88].mxu1 %vm1217_vm2, %v9642_v11  ;;  %v903_v25 = vrot.slane %v901_v18, 1 }
  0xc7   : > { %8864 = vmatprep.mubr.msk.bf16.mxu1 %vm9772_vm1, %v11852_v0 }
  0xc8   : > { %v907_v40 = vor.u32 %v905_v33, %v903_v25 }
  0xcc   : > { %8583 = vmatmul.mubr.msk.bf16.gmra.mrb[88].mxu0 %vm1217_vm2, %v848_v24 }
  0xcd   : > { %8586 = vmatprep.mubr.msk.bf16.mxu0 %vm9772_vm1, %v11852_v0 }
  0xce   : > { %8865 = vmatmul.mubr.msk.bf16.gmra.mrb[92].mxu1 %vm1217_vm2, %v9643_v17  ;;  %v897_v17 = vshrl.u32 %v9649_v57, 16 }
  0xcf   : > { %8868 = vmatprep.mubr.msk.bf16.mxu1 %vm9772_vm1, %v11852_v0 }
  0xd0   : > { %v899_v24 = vor.u32 %v897_v17, %v895_v9 }
  0xd2   : > { %v904_v31 = vsel %vm660_vm3, %v899_v24, %v903_v25 }
  0xd4   : > { %8587 = vmatmul.mubr.msk.bf16.gmra.mrb[92].mxu0 %vm1217_vm2, %v856_v30 }
  0xd5   : > { %8590 = vmatprep.mubr.msk.bf16.mxu0 %vm9772_vm1, %v11852_v0 }
  0xd6   : > { %8869 = vmatmul.mubr.msk.bf16.gmra.mrb[96].mxu1 %vm1217_vm2, %v9644_v23 }
  0xd7   : > { %8872 = vmatprep.mubr.msk.bf16.mxu1 %vm9772_vm1, %v11852_v0 }
  0xdc   : > { %8591 = vmatmul.mubr.msk.bf16.gmra.mrb[96].mxu0 %vm1217_vm2, %v864_v36 }
  0xdd   : > { %8594 = vmatprep.mubr.msk.bf16.mxu0 %vm9772_vm1, %v11852_v0 }
  0xde   : > { %8873 = vmatmul.mubr.msk.bf16.gmra.mrb[100].mxu1 %vm1217_vm2, %v9645_v29 }
  0xdf   : > { %8876 = vmatprep.mubr.msk.bf16.mxu1 %vm9772_vm1, %v11852_v0 }
  0xe4   : > { %8595 = vmatmul.mubr.msk.bf16.gmra.mrb[100].mxu0 %vm1217_vm2, %v872_v42  ;;  %v9652_v42 = vld [vmem:[%s9826_s23 + $0x100] sm:$0xff]  }
  0xe5   : > { %8598 = vmatprep.mubr.msk.bf16.mxu0 %vm9772_vm1, %v11852_v0 }
  0xe6   : > { %8877 = vmatmul.mubr.msk.bf16.gmra.mrb[104].mxu1 %vm1217_vm2, %v9646_v35 }
  0xe7   : > { %8880 = vmatprep.mubr.msk.bf16.mxu1 %vm9772_vm1, %v11852_v0 }
  0xe8   : > { %v2195_v48 = vpop.f32.mrb[0].mxu1 }
  0xe9   : > { %v8774_v50 = vpop.f32.mrb[1].mxu1 }
  0xea   : > { %v2198_v53 = vpop.f32.mrb[2].mxu1  ;;  %v917_v50 = vshll.u32 %v9652_v42, 16 }
  0xeb   : > { %v8775_v54 = vpop.f32.mrb[3].mxu1 }
  0xec   : > { %8599 = vmatmul.mubr.msk.bf16.gmra.mrb[104].mxu0 %vm1217_vm2, %v880_v49  ;;  %v913_v49 = vshrl.u32 %v9651_v26, 16 }
  0xed   : > { %8602 = vmatprep.mubr.msk.bf16.mxu0 %vm9772_vm1, %v11852_v0 }
  0xee   : > { %8881 = vmatmul.mubr.msk.bf16.gmra.mrb[108].mxu1 %vm1217_vm2, %v9647_v41  ;;  %v911_v41 = vrot.slane %v909_v34, 1 }
  0xef   : > { %v1463_v58 = vpop.f32.mrb[0].mxu0  ;;  %8884 = vmatprep.mubr.msk.bf16.mxu1 %vm9772_vm1, %v11852_v0 }
  0xf0   : > { %v10055_v59 = vadd.f32 %v2195_v48, %v1463_v58  ;;  %v8496_v60 = vpop.f32.mrb[1].mxu0  ;;  %v915_v56 = vor.u32 %v913_v49, %v911_v41  ;;  %v9653_v58 = vld [vmem:[%s9826_s23 + $0x108] sm:$0xff]  }
  0xf1   : > { %v1466_v61 = vpop.f32.mrb[2].mxu0  ;;  %v2203_v63 = vpop.f32.mrb[4].mxu1 }
  0xf2   : > { %v10058_v3 = vadd.f32 %v2198_v53, %v1466_v61  ;;  %v8497_v4 = vpop.f32.mrb[3].mxu0  ;;  %v8778_v5 = vpop.f32.mrb[5].mxu1 }
  0xf3   : > { %v2206_v6 = vpop.f32.mrb[6].mxu1  ;;  %v921_v4 = vshrl.u32 %v9652_v42, 16  ;;  %v925_v5 = vshll.u32 %v9653_v58, 16 }
  0xf4   : > { %8603 = vmatmul.mubr.msk.bf16.gmra.mrb[108].mxu0 %vm1217_vm2, %v888_v62  ;;  %v8779_v7 = vpop.f32.mrb[7].mxu1 }
  0xf5   : > { %8606 = vmatprep.mubr.msk.bf16.mxu0 %vm9772_vm1, %v11852_v0 }
  0xf6   : > { %8885 = vmatmul.mubr.msk.bf16.gmra.mrb[112].mxu1 %vm1217_vm2, %v9648_v47  ;;  %v912_v47 = vsel %vm660_vm3, %v907_v40, %v911_v41 }
  0xf7   : > { %v1471_v11 = vpop.f32.mrb[4].mxu0  ;;  %8888 = vmatprep.mubr.msk.bf16.mxu1 %vm9772_vm1, %v11852_v0 }
  0xf8   : > { %v10067_v12 = vadd.f32 %v2203_v63, %v1471_v11  ;;  %v8500_v13 = vpop.f32.mrb[5].mxu0 }
  0xf9   : > { %v1474_v14 = vpop.f32.mrb[6].mxu0  ;;  %v2211_v16 = vpop.f32.mrb[8].mxu1  ;;  %v927_v13 = vrot.slane %v925_v5, 1 }
  0xfa   : > { %v10070_v19 = vadd.f32 %v2206_v6, %v1474_v14  ;;  %v8501_v20 = vpop.f32.mrb[7].mxu0  ;;  %v8782_v21 = vpop.f32.mrb[9].mxu1  ;;  %v9654_v14 = vld [vmem:[%s9826_s23 + $0x110] sm:$0xff]  }
  0xfb   : > { %v2214_v22 = vpop.f32.mrb[10].mxu1  ;;  %v937_v40 = vshrl.u32 %v9654_v14, 16 }
  0xfc   : > { %8607 = vmatmul.mubr.msk.bf16.gmra.mrb[112].mxu0 %vm1217_vm2, %v896_v15  ;;  %v8783_v23 = vpop.f32.mrb[11].mxu1 }
  0xfd   : > { %8610 = vmatprep.mubr.msk.bf16.mxu0 %vm9772_vm1, %v11852_v0  ;;  %v933_v23 = vshll.u32 %v9654_v14, 16 }
  0xfe   : > { %8889 = vmatmul.mubr.msk.bf16.gmra.mrb[116].mxu1 %vm1217_vm2, %v9649_v57  ;;  %v919_v57 = vrot.slane %v917_v50, 1  ;;  %v9656_v50 = vld [vmem:[%s9826_s23 + $0x120] sm:$0xff]  }
  0xff   : > { %v1479_v27 = vpop.f32.mrb[8].mxu0  ;;  %8892 = vmatprep.mubr.msk.bf16.mxu1 %vm9772_vm1, %v11852_v0 }
 0x100   : > { %v10079_v28 = vadd.f32 %v2211_v16, %v1479_v27  ;;  %v8504_v29 = vpop.f32.mrb[9].mxu0  ;;  %v920_v1 = vsel %vm660_vm3, %v915_v56, %v919_v57  ;;  %v923_v11 = vor.u32 %v921_v4, %v919_v57 }
 0x101   : > { %v1482_v30 = vpop.f32.mrb[10].mxu0  ;;  %v2219_v32 = vpop.f32.mrb[12].mxu1 }
 0x102   : > { %v10082_v35 = vadd.f32 %v2214_v22, %v1482_v30  ;;  %v8505_v36 = vpop.f32.mrb[11].mxu0  ;;  %v8786_v37 = vpop.f32.mrb[13].mxu1  ;;  %v928_v20 = vsel %vm660_vm3, %v923_v11, %v927_v13  ;;  %v929_v22 = vshrl.u32 %v9653_v58, 16 }
 0x103   : > { %v2222_v38 = vpop.f32.mrb[14].mxu1 }
 0x104   : > { %8611 = vmatmul.mubr.msk.bf16.gmra.mrb[116].mxu0 %vm1217_vm2, %v904_v31  ;;  %v8787_v39 = vpop.f32.mrb[15].mxu1  ;;  %v931_v30 = vor.u32 %v929_v22, %v927_v13  ;;  %v935_v31 = vrot.slane %v933_v23, 1 }
 0x105   : > { %8614 = vmatprep.mubr.msk.bf16.mxu0 %vm9772_vm1, %v11852_v0 }
 0x106   : > { %8893 = vmatmul.mubr.msk.bf16.gmra.mrb[120].mxu1 %vm1217_vm2, %v9650_v10 }
 0x107   : > { %v1487_v43 = vpop.f32.mrb[12].mxu0  ;;  %8896 = vmatprep.mubr.msk.bf16.mxu1 %vm9772_vm1, %v11852_v0 }
 0x108   : > { %v10091_v44 = vadd.f32 %v2219_v32, %v1487_v43  ;;  %v8508_v45 = vpop.f32.mrb[13].mxu0  ;;  %v9655_v32 = vld [vmem:[%s9826_s23 + $0x118] sm:$0xff]  }
 0x109   : > { %v1490_v46 = vpop.f32.mrb[14].mxu0  ;;  %v2227_v48 = vpop.f32.mrb[16].mxu1  ;;  %v941_v41 = vshll.u32 %v9655_v32, 16 }
 0x10a   : > { %v10094_v51 = vadd.f32 %v2222_v38, %v1490_v46  ;;  %v8509_v52 = vpop.f32.mrb[15].mxu0  ;;  %v8790_v53 = vpop.f32.mrb[17].mxu1  ;;  %v936_v38 = vsel %vm660_vm3, %v931_v30, %v935_v31 }
 0x10b   : > { %v2230_v54 = vpop.f32.mrb[18].mxu1  ;;  %v943_v49 = vrot.slane %v941_v41, 1 }
 0x10c   : > { %8615 = vmatmul.mubr.msk.bf16.gmra.mrb[120].mxu0 %vm1217_vm2, %v912_v47  ;;  %v8791_v55 = vpop.f32.mrb[19].mxu1 }
 0x10d   : > { %8618 = vmatprep.mubr.msk.bf16.mxu0 %vm9772_vm1, %v11852_v0 }
 0x10e   : > { %8897 = vmatmul.mubr.msk.bf16.gmra.mrb[124].mxu1 %vm1217_vm2, %v9651_v26 }
 0x10f   : > { %v1495_v60 = vpop.f32.mrb[16].mxu0  ;;  %8900 = vmatprep.mubr.msk.bf16.mxu1 %vm9772_vm1, %v11852_v0 }
 0x110   : > { %v10103_v61 = vadd.f32 %v2227_v48, %v1495_v60  ;;  %v8512_v62 = vpop.f32.mrb[17].mxu0  ;;  %v939_v48 = vor.u32 %v937_v40, %v935_v31  ;;  %v949_v60 = vshll.u32 %v9656_v50, 16 }
 0x111   : > { %v1498_v63 = vpop.f32.mrb[18].mxu0  ;;  %v2235_v2 = vpop.f32.mrb[20].mxu1 }
 0x112   : > { %v10106_v6 = vadd.f32 %v2230_v54, %v1498_v63  ;;  %v8513_v7 = vpop.f32.mrb[19].mxu0  ;;  %v8794_v8 = vpop.f32.mrb[21].mxu1  ;;  %v944_v56 = vsel %vm660_vm3, %v939_v48, %v943_v49 }
 0x113   : > { %v2238_v9 = vpop.f32.mrb[22].mxu1  ;;  %v951_v7 = vrot.slane %v949_v60, 1  ;;  %v9657_v8 = vld [vmem:[%s9826_s23 + $0x128] sm:$0xff]  }
 0x114   : > { %8619 = vmatmul.mubr.msk.bf16.gmra.mrb[124].mxu0 %vm1217_vm2, %v920_v1  ;;  %v8795_v10 = vpop.f32.mrb[23].mxu1 }
 0x115   : > { %8622 = vmatprep.mubr.msk.bf16.mxu0 %vm9772_vm1, %v11852_v0 }
 0x116   : > { %8901 = vmatmul.mubr.msk.bf16.gmra.mrb[128].mxu1 %vm1217_vm2, %v9652_v42 }
 0x117   : > { %v1503_v15 = vpop.f32.mrb[20].mxu0  ;;  %8904 = vmatprep.mubr.msk.bf16.mxu1 %vm9772_vm1, %v11852_v0 }
 0x118   : > { %v8516_v16 = vpop.f32.mrb[21].mxu0  ;;  %v10115_v17 = vadd.f32 %v2235_v2, %v1503_v15 }
 0x119   : > { %v1506_v18 = vpop.f32.mrb[22].mxu0  ;;  %v2243_v21 = vpop.f32.mrb[24].mxu1  ;;  %v953_v16 = vshrl.u32 %v9656_v50, 16 }
 0x11a   : > { %v8517_v24 = vpop.f32.mrb[23].mxu0  ;;  %v8798_v25 = vpop.f32.mrb[25].mxu1  ;;  %v10118_v26 = vadd.f32 %v2238_v9, %v1506_v18  ;;  %v957_v18 = vshll.u32 %v9657_v8, 16 }
 0x11b   : > { %v2246_v27 = vpop.f32.mrb[26].mxu1  ;;  %v955_v25 = vor.u32 %v953_v16, %v951_v7 }
 0x11c   : > { %8623 = vmatmul.mubr.msk.bf16.gmra.mrb[128].mxu0 %vm1217_vm2, %v928_v20  ;;  %v8799_v29 = vpop.f32.mrb[27].mxu1 }
 0x11d   : > { %8626 = vmatprep.mubr.msk.bf16.mxu0 %vm9772_vm1, %v11852_v0  ;;  %v9658_v29 = vld [vmem:[%s9826_s23 + $0x130] sm:$0xff]  }
 0x11e   : > { %8905 = vmatmul.mubr.msk.bf16.gmra.mrb[132].mxu1 %vm1217_vm2, %v9653_v58  ;;  %v945_v58 = vshrl.u32 %v9655_v32, 16 }
 0x11f   : > { %v1511_v33 = vpop.f32.mrb[24].mxu0  ;;  %8908 = vmatprep.mubr.msk.bf16.mxu1 %vm9772_vm1, %v11852_v0 }
 0x120   : > { %v8520_v34 = vpop.f32.mrb[25].mxu0  ;;  %v10127_v36 = vadd.f32 %v2243_v21, %v1511_v33  ;;  %v947_v5 = vor.u32 %v945_v58, %v943_v49  ;;  %v9659_v49 = vld [vmem:[%s9826_s23 + $0x138] sm:$0xff]   ;;  %v969_v58 = vshrl.u32 %v9658_v29, 16 }
 0x121   : > { %v1514_v37 = vpop.f32.mrb[26].mxu0  ;;  %v2251_v39 = vpop.f32.mrb[28].mxu1  ;;  %v973_v60 = vshll.u32 %v9659_v49, 16 }
 0x122   : > { %v8521_v42 = vpop.f32.mrb[27].mxu0  ;;  %v8802_v43 = vpop.f32.mrb[29].mxu1  ;;  %v10130_v45 = vadd.f32 %v2246_v27, %v1514_v37  ;;  %v959_v27 = vrot.slane %v957_v18, 1 }
 0x123   : > { %v2254_v46 = vpop.f32.mrb[30].mxu1 }
 0x124   : > { %8627 = vmatmul.mubr.msk.bf16.gmra.mrb[132].mxu0 %vm1217_vm2, %v936_v38  ;;  %v8803_v47 = vpop.f32.mrb[31].mxu1  ;;  %v960_v34 = vsel %vm660_vm3, %v955_v25, %v959_v27  ;;  %v961_v38 = vshrl.u32 %v9657_v8, 16 }
 0x125   : > { %8630 = vmatprep.mubr.msk.bf16.mxu0 %vm9772_vm1, %v11852_v0 }
 0x126   : > { %8909 = vmatmul.mubr.msk.bf16.gmra.mrb[136].mxu1 %vm1217_vm2, %v9654_v14  ;;  %v952_v14 = vsel %vm660_vm3, %v947_v5, %v951_v7  ;;  %v963_v47 = vor.u32 %v961_v38, %v959_v27 }
 0x127   : > { %v1519_v52 = vpop.f32.mrb[28].mxu0  ;;  %8912 = vmatprep.mubr.msk.bf16.mxu1 %vm9772_vm1, %v11852_v0 }
 0x128   : > { %v8524_v53 = vpop.f32.mrb[29].mxu0  ;;  %v10139_v54 = vadd.f32 %v2251_v39, %v1519_v52  ;;  %v965_v39 = vshll.u32 %v9658_v29, 16 }
 0x129   : > { %v1522_v55 = vpop.f32.mrb[30].mxu0  ;;  %v2259_v57 = vpop.f32.mrb[32].mxu1 }
 0x12a   : > { %v8525_v62 = vpop.f32.mrb[31].mxu0  ;;  %v8806_v63 = vpop.f32.mrb[33].mxu1  ;;  %v10142_v1 = vadd.f32 %v2254_v46, %v1522_v55  ;;  %v967_v48 = vrot.slane %v965_v39, 1 }
 0x12b   : > { %v2262_v2 = vpop.f32.mrb[34].mxu1 }
 0x12c   : > { %8631 = vmatmul.mubr.msk.bf16.gmra.mrb[136].mxu0 %vm1217_vm2, %v944_v56  ;;  %v8807_v4 = vpop.f32.mrb[35].mxu1  ;;  %v968_v56 = vsel %vm660_vm3, %v963_v47, %v967_v48  ;;  %v971_v7 = vor.u32 %v969_v58, %v967_v48 }
 0x12d   : > { %8634 = vmatprep.mubr.msk.bf16.mxu0 %vm9772_vm1, %v11852_v0 }
 0x12e   : > { %8913 = vmatmul.mubr.msk.bf16.gmra.mrb[140].mxu1 %vm1217_vm2, %v9655_v32 }
 0x12f   : > { %v1527_v9 = vpop.f32.mrb[32].mxu0  ;;  %8916 = vmatprep.mubr.msk.bf16.mxu1 %vm9772_vm1, %v11852_v0 }
 0x130   : > { %v8528_v10 = vpop.f32.mrb[33].mxu0  ;;  %v10151_v11 = vadd.f32 %v2259_v57, %v1527_v9  ;;  %v9660_v9 = vld [vmem:[%s9826_s23 + $0x140] sm:$0xff]  }
 0x131   : > { %v1530_v13 = vpop.f32.mrb[34].mxu0  ;;  %v2267_v15 = vpop.f32.mrb[36].mxu1 }
 0x132   : > { %v8529_v20 = vpop.f32.mrb[35].mxu0  ;;  %v8810_v21 = vpop.f32.mrb[37].mxu1  ;;  %v10154_v22 = vadd.f32 %v2262_v2, %v1530_v13 }
 0x133   : > { %v2270_v23 = vpop.f32.mrb[38].mxu1  ;;  %v977_v20 = vshrl.u32 %v9659_v49, 16  ;;  %v981_v21 = vshll.u32 %v9660_v9, 16 }
 0x134   : > { %8635 = vmatmul.mubr.msk.bf16.gmra.mrb[140].mxu0 %vm1217_vm2, %v952_v14  ;;  %v8811_v24 = vpop.f32.mrb[39].mxu1 }
 0x135   : > { %8638 = vmatprep.mubr.msk.bf16.mxu0 %vm9772_vm1, %v11852_v0 }
 0x136   : > { %8917 = vmatmul.mubr.msk.bf16.gmra.mrb[144].mxu1 %vm1217_vm2, %v9656_v50 }
 0x137   : > { %v1535_v30 = vpop.f32.mrb[36].mxu0  ;;  %8920 = vmatprep.mubr.msk.bf16.mxu1 %vm9772_vm1, %v11852_v0 }
 0x138   : > { %v8532_v31 = vpop.f32.mrb[37].mxu0  ;;  %v10163_v32 = vadd.f32 %v2267_v15, %v1535_v30 }
 0x139   : > { %v1538_v33 = vpop.f32.mrb[38].mxu0  ;;  %v2275_v37 = vpop.f32.mrb[40].mxu1  ;;  %v983_v31 = vrot.slane %v981_v21, 1  ;;  %v9663_v21 = vld [vmem:[%s9826_s23 + $0x158] sm:$0xff]  }
 0x13a   : > { %v8533_v40 = vpop.f32.mrb[39].mxu0  ;;  %v8814_v41 = vpop.f32.mrb[41].mxu1  ;;  %v10166_v42 = vadd.f32 %v2270_v23, %v1538_v33  ;;  %v9661_v33 = vld [vmem:[%s9826_s23 + $0x148] sm:$0xff]  }
 0x13b   : > { %v2278_v43 = vpop.f32.mrb[42].mxu1 }
 0x13c   : > { %8639 = vmatmul.mubr.msk.bf16.gmra.mrb[144].mxu0 %vm1217_vm2, %v960_v34  ;;  %v8815_v46 = vpop.f32.mrb[43].mxu1 }
 0x13d   : > { %8642 = vmatprep.mubr.msk.bf16.mxu0 %vm9772_vm1, %v11852_v0  ;;  %v989_v46 = vshll.u32 %v9661_v33, 16 }
 0x13e   : > { %8921 = vmatmul.mubr.msk.bf16.gmra.mrb[148].mxu1 %vm1217_vm2, %v9657_v8  ;;  %v975_v8 = vrot.slane %v973_v60, 1 }
 0x13f   : > { %v1543_v50 = vpop.f32.mrb[40].mxu0  ;;  %8924 = vmatprep.mubr.msk.bf16.mxu1 %vm9772_vm1, %v11852_v0 }
 0x140   : > { %v8536_v52 = vpop.f32.mrb[41].mxu0  ;;  %v10175_v53 = vadd.f32 %v2275_v37, %v1543_v50  ;;  %v976_v16 = vsel %vm660_vm3, %v971_v7, %v975_v8  ;;  %v979_v30 = vor.u32 %v977_v20, %v975_v8  ;;  %v993_v7 = vshrl.u32 %v9661_v33, 16 }
 0x141   : > { %v1546_v55 = vpop.f32.mrb[42].mxu0  ;;  %v2283_v57 = vpop.f32.mrb[44].mxu1 }
 0x142   : > { %v8537_v62 = vpop.f32.mrb[43].mxu0  ;;  %v8818_v63 = vpop.f32.mrb[45].mxu1  ;;  %v10178_v2 = vadd.f32 %v2278_v43, %v1546_v55  ;;  %v984_v40 = vsel %vm660_vm3, %v979_v30, %v983_v31  ;;  %v985_v43 = vshrl.u32 %v9660_v9, 16 }
 0x143   : > { %v2286_v4 = vpop.f32.mrb[46].mxu1 }
 0x144   : > { %8643 = vmatmul.mubr.msk.bf16.gmra.mrb[148].mxu0 %vm1217_vm2, %v968_v56  ;;  %v8819_v5 = vpop.f32.mrb[47].mxu1  ;;  %v987_v55 = vor.u32 %v985_v43, %v983_v31  ;;  %v991_v56 = vrot.slane %v989_v46, 1 }
 0x145   : > { %8646 = vmatprep.mubr.msk.bf16.mxu0 %vm9772_vm1, %v11852_v0 }
 0x146   : > { %8925 = vmatmul.mubr.msk.bf16.gmra.mrb[152].mxu1 %vm1217_vm2, %v9658_v29 }
 0x147   : > { %v1551_v10 = vpop.f32.mrb[44].mxu0  ;;  %8928 = vmatprep.mubr.msk.bf16.mxu1 %vm9772_vm1, %v11852_v0 }
 0x148   : > { %v8540_v13 = vpop.f32.mrb[45].mxu0  ;;  %v10187_v14 = vadd.f32 %v2283_v57, %v1551_v10  ;;  %v9662_v57 = vld [vmem:[%s9826_s23 + $0x150] sm:$0xff]  }
 0x149   : > { %v1554_v15 = vpop.f32.mrb[46].mxu0  ;;  %v2291_v18 = vpop.f32.mrb[48].mxu1  ;;  %v997_v8 = vshll.u32 %v9662_v57, 16 }
 0x14a   : > { %v8541_v23 = vpop.f32.mrb[47].mxu0  ;;  %v8822_v24 = vpop.f32.mrb[49].mxu1  ;;  %v10190_v25 = vadd.f32 %v2286_v4, %v1554_v15  ;;  %v992_v4 = vsel %vm660_vm3, %v987_v55, %v991_v56 }
 0x14b   : > { %v2294_v27 = vpop.f32.mrb[50].mxu1  ;;  %v999_v20 = vrot.slane %v997_v8, 1 }
 0x14c   : > { %8647 = vmatmul.mubr.msk.bf16.gmra.mrb[152].mxu0 %vm1217_vm2, %v976_v16  ;;  %v8823_v29 = vpop.f32.mrb[51].mxu1 }
 0x14d   : > { %8650 = vmatprep.mubr.msk.bf16.mxu0 %vm9772_vm1, %v11852_v0 }
 0x14e   : > { %8929 = vmatmul.mubr.msk.bf16.gmra.mrb[156].mxu1 %vm1217_vm2, %v9659_v49 }
 0x14f   : > { %v1559_v34 = vpop.f32.mrb[48].mxu0  ;;  %8932 = vmatprep.mubr.msk.bf16.mxu1 %vm9772_vm1, %v11852_v0 }
 0x150   : > { %v8544_v37 = vpop.f32.mrb[49].mxu0  ;;  %v10199_v38 = vadd.f32 %v2291_v18, %v1559_v34  ;;  %v995_v18 = vor.u32 %v993_v7, %v991_v56  ;;  %v1001_v34 = vshrl.u32 %v9662_v57, 16 }
 0x151   : > { %v1562_v39 = vpop.f32.mrb[50].mxu0  ;;  %v2299_v41 = vpop.f32.mrb[52].mxu1  ;;  %v1005_v37 = vshll.u32 %v9663_v21, 16 }
 0x152   : > { %v8545_v47 = vpop.f32.mrb[51].mxu0  ;;  %v8826_v48 = vpop.f32.mrb[53].mxu1  ;;  %v10202_v50 = vadd.f32 %v2294_v27, %v1562_v39  ;;  %v1000_v30 = vsel %vm660_vm3, %v995_v18, %v999_v20  ;;  %v1003_v46 = vor.u32 %v1001_v34, %v999_v20 }
 0x153   : > { %v2302_v52 = vpop.f32.mrb[54].mxu1  ;;  %v1007_v47 = vrot.slane %v1005_v37, 1  ;;  %v9664_v48 = vld [vmem:[%s9826_s23 + $0x160] sm:$0xff]  }
 0x154   : > { %8651 = vmatmul.mubr.msk.bf16.gmra.mrb[156].mxu0 %vm1217_vm2, %v984_v40  ;;  %v8827_v49 = vpop.f32.mrb[55].mxu1 }
 0x155   : > { %8654 = vmatprep.mubr.msk.bf16.mxu0 %vm9772_vm1, %v11852_v0 }
 0x156   : > { %8933 = vmatmul.mubr.msk.bf16.gmra.mrb[160].mxu1 %vm1217_vm2, %v9660_v9 }
 0x157   : > { %v1567_v58 = vpop.f32.mrb[52].mxu0  ;;  %8936 = vmatprep.mubr.msk.bf16.mxu1 %vm9772_vm1, %v11852_v0 }
 0x158   : > { %v8548_v60 = vpop.f32.mrb[53].mxu0  ;;  %v10211_v62 = vadd.f32 %v2299_v41, %v1567_v58  ;;  %v1008_v58 = vsel %vm660_vm3, %v1003_v46, %v1007_v47 }
 0x159   : > { %v1570_v63 = vpop.f32.mrb[54].mxu0  ;;  %v2307_v5 = vpop.f32.mrb[56].mxu1 }
 0x15a   : > { %v8549_v10 = vpop.f32.mrb[55].mxu0  ;;  %v8830_v13 = vpop.f32.mrb[57].mxu1  ;;  %v10214_v15 = vadd.f32 %v2302_v52, %v1570_v63  ;;  %v1009_v63 = vshrl.u32 %v9663_v21, 16 }
 0x15b   : > { %v2310_v16 = vpop.f32.mrb[58].mxu1 }
 0x15c   : > { %8655 = vmatmul.mubr.msk.bf16.gmra.mrb[160].mxu0 %vm1217_vm2, %v992_v4  ;;  %v8831_v9 = vpop.f32.mrb[59].mxu1  ;;  %v1013_v4 = vshll.u32 %v9664_v48, 16  ;;  %v1011_v13 = vor.u32 %v1009_v63, %v1007_v47  ;;  %v9666_v47 = vld [vmem:[%s9826_s23 + $0x170] sm:$0xff]  }
 0x15d   : > { %8658 = vmatprep.mubr.msk.bf16.mxu0 %vm9772_vm1, %v11852_v0  ;;  %v9665_v9 = vld [vmem:[%s9826_s23 + $0x168] sm:$0xff]  }
 0x15e   : > { %8937 = vmatmul.mubr.msk.bf16.gmra.mrb[164].mxu1 %vm1217_vm2, %v9661_v33  ;;  %v1021_v34 = vshll.u32 %v9665_v9, 16 }
 0x15f   : > { %v1575_v23 = vpop.f32.mrb[56].mxu0  ;;  %8940 = vmatprep.mubr.msk.bf16.mxu1 %vm9772_vm1, %v11852_v0 }
 0x160   : > { %v8552_v24 = vpop.f32.mrb[57].mxu0  ;;  %v10223_v27 = vadd.f32 %v2307_v5, %v1575_v23  ;;  %v1023_v46 = vrot.slane %v1021_v34, 1 }
 0x161   : > { %v1578_v29 = vpop.f32.mrb[58].mxu0  ;;  %v2315_v31 = vpop.f32.mrb[60].mxu1 }
 0x162   : > { %v8553_v39 = vpop.f32.mrb[59].mxu0  ;;  %v8834_v40 = vpop.f32.mrb[61].mxu1  ;;  %v10226_v41 = vadd.f32 %v2310_v16, %v1578_v29  ;;  %v1015_v16 = vrot.slane %v1013_v4, 1  ;;  %v1025_v4 = vshrl.u32 %v9665_v9, 16 }
 0x163   : > { %v2318_v43 = vpop.f32.mrb[62].mxu1 }
 0x164   : > { %8659 = vmatmul.mubr.msk.bf16.gmra.mrb[164].mxu0 %vm1217_vm2, %v1000_v30  ;;  %v8835_v33 = vpop.f32.mrb[63].mxu1  ;;  %v1016_v29 = vsel %vm660_vm3, %v1011_v13, %v1015_v16 }
 0x165   : > { %8662 = vmatprep.mubr.msk.bf16.mxu0 %vm9772_vm1, %v11852_v0 }
 0x166   : > { %8941 = vmatmul.mubr.msk.bf16.gmra.mrb[168].mxu1 %vm1217_vm2, %v9662_v57 }
 0x167   : > { %v1583_v52 = vpop.f32.mrb[60].mxu0  ;;  %8944 = vmatprep.mubr.msk.bf16.mxu1 %vm9772_vm1, %v11852_v0 }
 0x168   : > { %v8556_v49 = vpop.f32.mrb[61].mxu0  ;;  %v10235_v55 = vadd.f32 %v2315_v31, %v1583_v52  ;;  %v1017_v31 = vshrl.u32 %v9664_v48, 16 }
 0x169   : > { %v1586_v56 = vpop.f32.mrb[62].mxu0  ;;  %v2323_v60 = vpop.f32.mrb[64].mxu1 }
 0x16a   : > { %v8557_v5 = vpop.f32.mrb[63].mxu0  ;;  %v8838_v7 = vpop.f32.mrb[65].mxu1  ;;  %v10238_v8 = vadd.f32 %v2318_v43, %v1586_v56  ;;  %v1019_v33 = vor.u32 %v1017_v31, %v1015_v16  ;;  %v1027_v16 = vor.u32 %v1025_v4, %v1023_v46 }
 0x16b   : > { %v2326_v10 = vpop.f32.mrb[66].mxu1  ;;  %v1029_v5 = vshll.u32 %v9666_v47, 16 }
 0x16c   : > { %8663 = vmatmul.mubr.msk.bf16.gmra.mrb[168].mxu0 %vm1217_vm2, %v1008_v58  ;;  %v8839_v57 = vpop.f32.mrb[67].mxu1 }
 0x16d   : > { %8666 = vmatprep.mubr.msk.bf16.mxu0 %vm9772_vm1, %v11852_v0 }
 0x16e   : > { %8945 = vmatmul.mubr.msk.bf16.gmra.mrb[172].mxu1 %vm1217_vm2, %v9663_v21 }
 0x16f   : > { %v1591_v18 = vpop.f32.mrb[64].mxu0  ;;  %8948 = vmatprep.mubr.msk.bf16.mxu1 %vm9772_vm1, %v11852_v0 }
 0x170   : > { %v8560_v20 = vpop.f32.mrb[65].mxu0  ;;  %v10247_v23 = vadd.f32 %v2323_v60, %v1591_v18  ;;  %v1024_v60 = vsel %vm660_vm3, %v1019_v33, %v1023_v46  ;;  %v1031_v18 = vrot.slane %v1029_v5, 1 }
 0x171   : > { %v1594_v24 = vpop.f32.mrb[66].mxu0  ;;  %v2331_v30 = vpop.f32.mrb[68].mxu1  ;;  %v9667_v20 = vld [vmem:[%s9826_s23 + $0x178] sm:$0xff]  }
 0x172   : > { %v8561_v37 = vpop.f32.mrb[67].mxu0  ;;  %v8842_v39 = vpop.f32.mrb[69].mxu1  ;;  %v10250_v40 = vadd.f32 %v2326_v10, %v1594_v24  ;;  %v1032_v34 = vsel %vm660_vm3, %v1027_v16, %v1031_v18 }
 0x173   : > { %v2334_v43 = vpop.f32.mrb[70].mxu1  ;;  %v1033_v39 = vshrl.u32 %v9666_v47, 16 }
 0x174   : > { %8667 = vmatmul.mubr.msk.bf16.gmra.mrb[172].mxu0 %vm1217_vm2, %v1016_v29  ;;  %v8843_v21 = vpop.f32.mrb[71].mxu1 }
 0x175   : > { %8670 = vmatprep.mubr.msk.bf16.mxu0 %vm9772_vm1, %v11852_v0 }
 0x176   : > { %8949 = vmatmul.mubr.msk.bf16.gmra.mrb[176].mxu1 %vm1217_vm2, %v9664_v48 }
 0x177   : > { %v1599_v52 = vpop.f32.mrb[68].mxu0  ;;  %8952 = vmatprep.mubr.msk.bf16.mxu1 %vm9772_vm1, %v11852_v0 }
 0x178   : > { %v8564_v49 = vpop.f32.mrb[69].mxu0  ;;  %v10259_v56 = vadd.f32 %v2331_v30, %v1599_v52 }
 0x179   : > { %v1602_v58 = vpop.f32.mrb[70].mxu0  ;;  %v2339_v63 = vpop.f32.mrb[72].mxu1  ;;  %v1035_v49 = vor.u32 %v1033_v39, %v1031_v18  ;;  %v9669_v39 = vld [vmem:[%s9826_s23 + $0x188] sm:$0xff]  }
 0x17a   : > { %v8565_v7 = vpop.f32.mrb[71].mxu0  ;;  %v8846_v10 = vpop.f32.mrb[73].mxu1  ;;  %v10262_v57 = vadd.f32 %v2334_v43, %v1602_v58  ;;  %v1037_v43 = vshll.u32 %v9667_v20, 16 }
 0x17b   : > { %v2342_v13 = vpop.f32.mrb[74].mxu1 }
 0x17c   : > { %8671 = vmatmul.mubr.msk.bf16.gmra.mrb[176].mxu0 %vm1217_vm2, %v1024_v60  ;;  %v8847_v48 = vpop.f32.mrb[75].mxu1  ;;  %v1039_v58 = vrot.slane %v1037_v43, 1  ;;  %v9668_v60 = vld [vmem:[%s9826_s23 + $0x180] sm:$0xff]  }
 0x17d   : > { %8674 = vmatprep.mubr.msk.bf16.mxu0 %vm9772_vm1, %v11852_v0  ;;  %v1041_v48 = vshrl.u32 %v9667_v20, 16  ;;  %v1045_v16 = vshll.u32 %v9668_v60, 16 }
 0x17e   : > { %8953 = vmatmul.mubr.msk.bf16.gmra.mrb[180].mxu1 %vm1217_vm2, %v9665_v9  ;;  %v1040_v10 = vsel %vm660_vm3, %v1035_v49, %v1039_v58 }
 0x17f   : > { %v1607_v24 = vpop.f32.mrb[72].mxu0  ;;  %8956 = vmatprep.mubr.msk.bf16.mxu1 %vm9772_vm1, %v11852_v0 }
 0x180   : > { %v8568_v29 = vpop.f32.mrb[73].mxu0  ;;  %v10271_v30 = vadd.f32 %v2339_v63, %v1607_v24 }
 0x181   : > { %v1610_v31 = vpop.f32.mrb[74].mxu0  ;;  %v2347_v37 = vpop.f32.mrb[76].mxu1 }
 0x182   : > { %v8569_v21 = vpop.f32.mrb[75].mxu0  ;;  %v8850_v33 = vpop.f32.mrb[77].mxu1  ;;  %v10274_v46 = vadd.f32 %v2342_v13, %v1610_v31 }
 0x183   : > { %v2350_v52 = vpop.f32.mrb[78].mxu1 }
 0x184   : > { %8675 = vmatmul.mubr.msk.bf16.gmra.mrb[180].mxu0 %vm1217_vm2, %v1032_v34  ;;  %v8851_v9 = vpop.f32.mrb[79].mxu1  ;;  %v1043_v34 = vor.u32 %v1041_v48, %v1039_v58 }
 0x185   : > { %8678 = vmatprep.mubr.msk.bf16.mxu0 %vm9772_vm1, %v11852_v0 }
 0x186   : > { %8957 = vmatmul.mubr.msk.bf16.gmra.mrb[184].mxu1 %vm1217_vm2, %v9666_v47 }
 0x187   : > { %v1615_v63 = vpop.f32.mrb[76].mxu0  ;;  %8960 = vmatprep.mubr.msk.bf16.mxu1 %vm9772_vm1, %v11852_v0 }
 0x188   : > { %v8572_v4 = vpop.f32.mrb[77].mxu0  ;;  %v10283_v5 = vadd.f32 %v2347_v37, %v1615_v63  ;;  %v1047_v37 = vrot.slane %v1045_v16, 1  ;;  %v1049_v63 = vshrl.u32 %v9668_v60, 16 }
 0x189   : > { %v1618_v7 = vpop.f32.mrb[78].mxu0  ;;  %v2355_v13 = vpop.f32.mrb[80].mxu1  ;;  %v1053_v4 = vshll.u32 %v9669_v39, 16 }
 0x18a   : > { %11854 = vst [vmem:[#allocation2_spill] sm:$0xff] %v10283_v5  ;;  %v8573_v24 = vpop.f32.mrb[79].mxu0  ;;  %v8854_v18 = vpop.f32.mrb[81].mxu1  ;;  %v10286_v29 = vadd.f32 %v2350_v52, %v1618_v7  ;;  %v1048_v9 = vsel %vm660_vm3, %v1043_v34, %v1047_v37  ;;  %v1051_v16 = vor.u32 %v1049_v63, %v1047_v37 }
 0x18b   : > { %v2358_v31 = vpop.f32.mrb[82].mxu1  ;;  %v9670_v24 = vld [vmem:[%s9826_s23 + $0x190] sm:$0xff]  }
 0x18c   : > { %11855 = vst [vmem:[#allocation3_spill] sm:$0xff] %v10286_v29  ;;  %8679 = vmatmul.mubr.msk.bf16.gmra.mrb[184].mxu0 %vm1217_vm2, %v1040_v10  ;;  %v8855_v47 = vpop.f32.mrb[83].mxu1 }
 0x18d   : > { %8682 = vmatprep.mubr.msk.bf16.mxu0 %vm9772_vm1, %v11852_v0 }
 0x18e   : > { %8961 = vmatmul.mubr.msk.bf16.gmra.mrb[188].mxu1 %vm1217_vm2, %v9667_v20 }
 0x18f   : > { %v1623_v43 = vpop.f32.mrb[80].mxu0  ;;  %8964 = vmatprep.mubr.msk.bf16.mxu1 %vm9772_vm1, %v11852_v0 }
 0x190   : > { %v8576_v21 = vpop.f32.mrb[81].mxu0  ;;  %v10295_v33 = vadd.f32 %v2355_v13, %v1623_v43  ;;  %v1055_v13 = vrot.slane %v1053_v4, 1 }
 0x191   : > { %v1626_v52 = vpop.f32.mrb[82].mxu0  ;;  %v2363_v49 = vpop.f32.mrb[84].mxu1 }
 0x192   : > { %11856 = vst [vmem:[#allocation4_spill] sm:$0xff] %v10295_v33  ;;  %v8577_v7 = vpop.f32.mrb[83].mxu0  ;;  %v8858_v58 = vpop.f32.mrb[85].mxu1  ;;  %v10298_v10 = vadd.f32 %v2358_v31, %v1626_v52  ;;  %v1056_v43 = vsel %vm660_vm3, %v1051_v16, %v1055_v13  ;;  %v1057_v52 = vshrl.u32 %v9669_v39, 16 }
 0x193   : > { %v2366_v48 = vpop.f32.mrb[86].mxu1 }
 0x194   : > { %11857 = vst [vmem:[#allocation5_spill] sm:$0xff] %v10298_v10  ;;  %8683 = vmatmul.mubr.msk.bf16.gmra.mrb[188].mxu0 %vm1217_vm2, %v1048_v9  ;;  %v8859_v20 = vpop.f32.mrb[87].mxu1  ;;  %v1061_v9 = vshll.u32 %v9670_v24, 16  ;;  %v1059_v58 = vor.u32 %v1057_v52, %v1055_v13  ;;  %v9691_v10 = vld [vmem:[%s9826_s23 + $0x18] sm:$0xff]  }
 0x195   : > { %8686 = vmatprep.mubr.msk.bf16.mxu0 %vm9772_vm1, %v11852_v0  ;;  %v9671_v20 = vld [vmem:[%s9826_s23 + $0x198] sm:$0xff]  }
 0x196   : > { %8965 = vmatmul.mubr.msk.bf16.gmra.mrb[192].mxu1 %vm1217_vm2, %v9668_v60 }
 0x197   : > { %v1631_v18 = vpop.f32.mrb[84].mxu0  ;;  %8968 = vmatprep.mubr.msk.bf16.mxu1 %vm9772_vm1, %v11852_v0 }
 0x198   : > { %v8580_v47 = vpop.f32.mrb[85].mxu0  ;;  %v10307_v31 = vadd.f32 %v2363_v49, %v1631_v18  ;;  %v1063_v49 = vrot.slane %v1061_v9, 1 }
 0x199   : > { %v1634_v34 = vpop.f32.mrb[86].mxu0  ;;  %v2371_v21 = vpop.f32.mrb[88].mxu1 }
 0x19a   : > { %11858 = vst [vmem:[#allocation6_spill] sm:$0xff] %v10307_v31  ;;  %v8581_v7 = vpop.f32.mrb[87].mxu0  ;;  %v8862_v37 = vpop.f32.mrb[89].mxu1  ;;  %v10310_v63 = vadd.f32 %v2366_v48, %v1634_v34  ;;  %v1064_v34 = vsel %vm660_vm3, %v1059_v58, %v1063_v49 }
 0x19b   : > { %v2374_v4 = vpop.f32.mrb[90].mxu1  ;;  %v1065_v7 = vshrl.u32 %v9670_v24, 16  ;;  %v1069_v37 = vshll.u32 %v9671_v20, 16 }
 0x19c   : > { %11859 = vst [vmem:[#allocation7_spill] sm:$0xff] %v10310_v63  ;;  %8687 = vmatmul.mubr.msk.bf16.gmra.mrb[192].mxu0 %vm1217_vm2, %v1056_v43  ;;  %v8863_v60 = vpop.f32.mrb[91].mxu1 }
 0x19d   : > { %8690 = vmatprep.mubr.msk.bf16.mxu0 %vm9772_vm1, %v11852_v0 }
 0x19e   : > { %8969 = vmatmul.mubr.msk.bf16.gmra.mrb[196].mxu1 %vm1217_vm2, %v9669_v39 }
 0x19f   : > { %v1639_v16 = vpop.f32.mrb[88].mxu0  ;;  %8972 = vmatprep.mubr.msk.bf16.mxu1 %vm9772_vm1, %v11852_v0 }
 0x1a0   : > { %v8584_v18 = vpop.f32.mrb[89].mxu0  ;;  %v10319_v48 = vadd.f32 %v2371_v21, %v1639_v16  ;;  %v1071_v21 = vrot.slane %v1069_v37, 1  ;;  %v9672_v16 = vld [vmem:[%s9826_s23 + $0x1a0] sm:$0xff]  }
 0x1a1   : > { %v1642_v47 = vpop.f32.mrb[90].mxu0  ;;  %v2379_v43 = vpop.f32.mrb[92].mxu1  ;;  %v1067_v18 = vor.u32 %v1065_v7, %v1063_v49 }
 0x1a2   : > { %11860 = vst [vmem:[#allocation8_spill] sm:$0xff] %v10319_v48  ;;  %v8585_v60 = vpop.f32.mrb[91].mxu0  ;;  %v8866_v13 = vpop.f32.mrb[93].mxu1  ;;  %v10322_v52 = vadd.f32 %v2374_v4, %v1642_v47 }
 0x1a3   : > { %v2382_v9 = vpop.f32.mrb[94].mxu1 }
 0x1a4   : > { %11861 = vst [vmem:[#allocation9_spill] sm:$0xff] %v10322_v52  ;;  %8691 = vmatmul.mubr.msk.bf16.gmra.mrb[196].mxu0 %vm1217_vm2, %v1064_v34  ;;  %v8867_v39 = vpop.f32.mrb[95].mxu1  ;;  %v1072_v34 = vsel %vm660_vm3, %v1067_v18, %v1071_v21  ;;  %v1077_v52 = vshll.u32 %v9672_v16, 16 }
 0x1a5   : > { %8694 = vmatprep.mubr.msk.bf16.mxu0 %vm9772_vm1, %v11852_v0  ;;  %v1073_v39 = vshrl.u32 %v9671_v20, 16 }
 0x1a6   : > { %8973 = vmatmul.mubr.msk.bf16.gmra.mrb[200].mxu1 %vm1217_vm2, %v9670_v24 }
 0x1a7   : > { %v1647_v58 = vpop.f32.mrb[92].mxu0  ;;  %8976 = vmatprep.mubr.msk.bf16.mxu1 %vm9772_vm1, %v11852_v0 }
 0x1a8   : > { %v8588_v60 = vpop.f32.mrb[93].mxu0  ;;  %v10331_v4 = vadd.f32 %v2379_v43, %v1647_v58  ;;  %v1079_v43 = vrot.slane %v1077_v52, 1  ;;  %v9673_v58 = vld [vmem:[%s9826_s23 + $0x1a8] sm:$0xff]  }
 0x1a9   : > { %v1650_v47 = vpop.f32.mrb[94].mxu0  ;;  %v2387_v13 = vpop.f32.mrb[96].mxu1  ;;  %v1075_v60 = vor.u32 %v1073_v39, %v1071_v21 }
 0x1aa   : > { %11862 = vst [vmem:[#allocation10_spill] sm:$0xff] %v10331_v4  ;;  %v8589_v48 = vpop.f32.mrb[95].mxu0  ;;  %v8870_v49 = vpop.f32.mrb[97].mxu1  ;;  %v10334_v7 = vadd.f32 %v2382_v9, %v1650_v47 }
 0x1ab   : > { %v2390_v37 = vpop.f32.mrb[98].mxu1 }
 0x1ac   : > { %11863 = vst [vmem:[#allocation11_spill] sm:$0xff] %v10334_v7  ;;  %8695 = vmatmul.mubr.msk.bf16.gmra.mrb[200].mxu0 %vm1217_vm2, %v1072_v34  ;;  %v8871_v24 = vpop.f32.mrb[99].mxu1  ;;  %v1080_v34 = vsel %vm660_vm3, %v1075_v60, %v1079_v43  ;;  %v1085_v7 = vshll.u32 %v9673_v58, 16 }
 0x1ad   : > { %8698 = vmatprep.mubr.msk.bf16.mxu0 %vm9772_vm1, %v11852_v0  ;;  %v1081_v24 = vshrl.u32 %v9672_v16, 16 }
 0x1ae   : > { %8977 = vmatmul.mubr.msk.bf16.gmra.mrb[204].mxu1 %vm1217_vm2, %v9671_v20 }
 0x1af   : > { %v1655_v18 = vpop.f32.mrb[96].mxu0  ;;  %8980 = vmatprep.mubr.msk.bf16.mxu1 %vm9772_vm1, %v11852_v0 }
 0x1b0   : > { %v8592_v48 = vpop.f32.mrb[97].mxu0  ;;  %v10343_v9 = vadd.f32 %v2387_v13, %v1655_v18  ;;  %v1087_v13 = vrot.slane %v1085_v7, 1  ;;  %v9674_v18 = vld [vmem:[%s9826_s23 + $0x1b0] sm:$0xff]  }
 0x1b1   : > { %v1658_v47 = vpop.f32.mrb[98].mxu0  ;;  %v2395_v49 = vpop.f32.mrb[100].mxu1  ;;  %v1083_v48 = vor.u32 %v1081_v24, %v1079_v43 }
 0x1b2   : > { %11864 = vst [vmem:[#allocation12_spill] sm:$0xff] %v10343_v9  ;;  %v8593_v4 = vpop.f32.mrb[99].mxu0  ;;  %v8874_v21 = vpop.f32.mrb[101].mxu1  ;;  %v10346_v52 = vadd.f32 %v2390_v37, %v1658_v47 }
 0x1b3   : > { %v2398_v39 = vpop.f32.mrb[102].mxu1 }
 0x1b4   : > { %11865 = vst [vmem:[#allocation13_spill] sm:$0xff] %v10346_v52  ;;  %8699 = vmatmul.mubr.msk.bf16.gmra.mrb[204].mxu0 %vm1217_vm2, %v1080_v34  ;;  %v8875_v20 = vpop.f32.mrb[103].mxu1  ;;  %v1088_v34 = vsel %vm660_vm3, %v1083_v48, %v1087_v13  ;;  %v1093_v52 = vshll.u32 %v9674_v18, 16 }
 0x1b5   : > { %8702 = vmatprep.mubr.msk.bf16.mxu0 %vm9772_vm1, %v11852_v0  ;;  %v1089_v20 = vshrl.u32 %v9673_v58, 16 }
 0x1b6   : > { %8981 = vmatmul.mubr.msk.bf16.gmra.mrb[208].mxu1 %vm1217_vm2, %v9672_v16 }
 0x1b7   : > { %v1663_v60 = vpop.f32.mrb[100].mxu0  ;;  %8984 = vmatprep.mubr.msk.bf16.mxu1 %vm9772_vm1, %v11852_v0 }
 0x1b8   : > { %v8596_v4 = vpop.f32.mrb[101].mxu0  ;;  %v10355_v37 = vadd.f32 %v2395_v49, %v1663_v60  ;;  %v1095_v49 = vrot.slane %v1093_v52, 1  ;;  %v9675_v60 = vld [vmem:[%s9826_s23 + $0x1b8] sm:$0xff]  }
 0x1b9   : > { %v1666_v47 = vpop.f32.mrb[102].mxu0  ;;  %v2403_v21 = vpop.f32.mrb[104].mxu1  ;;  %v1091_v4 = vor.u32 %v1089_v20, %v1087_v13 }
 0x1ba   : > { %11866 = vst [vmem:[#allocation14_spill] sm:$0xff] %v10355_v37  ;;  %v8597_v9 = vpop.f32.mrb[103].mxu0  ;;  %v8878_v43 = vpop.f32.mrb[105].mxu1  ;;  %v10358_v7 = vadd.f32 %v2398_v39, %v1666_v47 }
 0x1bb   : > { %v2406_v24 = vpop.f32.mrb[106].mxu1 }
 0x1bc   : > { %11867 = vst [vmem:[#allocation15_spill] sm:$0xff] %v10358_v7  ;;  %8703 = vmatmul.mubr.msk.bf16.gmra.mrb[208].mxu0 %vm1217_vm2, %v1088_v34  ;;  %v8879_v16 = vpop.f32.mrb[107].mxu1  ;;  %v1096_v34 = vsel %vm660_vm3, %v1091_v4, %v1095_v49  ;;  %v1101_v7 = vshll.u32 %v9675_v60, 16 }
 0x1bd   : > { %8706 = vmatprep.mubr.msk.bf16.mxu0 %vm9772_vm1, %v11852_v0  ;;  %v1097_v16 = vshrl.u32 %v9674_v18, 16 }
 0x1be   : > { %8985 = vmatmul.mubr.msk.bf16.gmra.mrb[212].mxu1 %vm1217_vm2, %v9673_v58 }
 0x1bf   : > { %v1671_v48 = vpop.f32.mrb[104].mxu0  ;;  %8988 = vmatprep.mubr.msk.bf16.mxu1 %vm9772_vm1, %v11852_v0 }
 0x1c0   : > { %v8600_v9 = vpop.f32.mrb[105].mxu0  ;;  %v10367_v39 = vadd.f32 %v2403_v21, %v1671_v48  ;;  %v1103_v21 = vrot.slane %v1101_v7, 1  ;;  %v9676_v48 = vld [vmem:[%s9826_s23 + $0x1c0] sm:$0xff]  }
 0x1c1   : > { %v1674_v47 = vpop.f32.mrb[106].mxu0  ;;  %v2411_v43 = vpop.f32.mrb[108].mxu1  ;;  %v1099_v9 = vor.u32 %v1097_v16, %v1095_v49 }
 0x1c2   : > { %11868 = vst [vmem:[#allocation16_spill] sm:$0xff] %v10367_v39  ;;  %v8601_v37 = vpop.f32.mrb[107].mxu0  ;;  %v8882_v13 = vpop.f32.mrb[109].mxu1  ;;  %v10370_v52 = vadd.f32 %v2406_v24, %v1674_v47 }
 0x1c3   : > { %v2414_v20 = vpop.f32.mrb[110].mxu1 }
 0x1c4   : > { %11869 = vst [vmem:[#allocation17_spill] sm:$0xff] %v10370_v52  ;;  %8707 = vmatmul.mubr.msk.bf16.gmra.mrb[212].mxu0 %vm1217_vm2, %v1096_v34  ;;  %v8883_v58 = vpop.f32.mrb[111].mxu1  ;;  %v1104_v34 = vsel %vm660_vm3, %v1099_v9, %v1103_v21  ;;  %v1109_v52 = vshll.u32 %v9676_v48, 16 }
 0x1c5   : > { %8710 = vmatprep.mubr.msk.bf16.mxu0 %vm9772_vm1, %v11852_v0  ;;  %v1105_v58 = vshrl.u32 %v9675_v60, 16 }
 0x1c6   : > { %8989 = vmatmul.mubr.msk.bf16.gmra.mrb[216].mxu1 %vm1217_vm2, %v9674_v18 }
 0x1c7   : > { %v1679_v4 = vpop.f32.mrb[108].mxu0  ;;  %8992 = vmatprep.mubr.msk.bf16.mxu1 %vm9772_vm1, %v11852_v0 }
 0x1c8   : > { %v8604_v37 = vpop.f32.mrb[109].mxu0  ;;  %v10379_v24 = vadd.f32 %v2411_v43, %v1679_v4  ;;  %v1111_v43 = vrot.slane %v1109_v52, 1  ;;  %v9677_v4 = vld [vmem:[%s9826_s23 + $0x1c8] sm:$0xff]  }
 0x1c9   : > { %v1682_v47 = vpop.f32.mrb[110].mxu0  ;;  %v2419_v13 = vpop.f32.mrb[112].mxu1  ;;  %v1107_v37 = vor.u32 %v1105_v58, %v1103_v21 }
 0x1ca   : > { %11870 = vst [vmem:[#allocation18_spill] sm:$0xff] %v10379_v24  ;;  %v8605_v39 = vpop.f32.mrb[111].mxu0  ;;  %v8886_v49 = vpop.f32.mrb[113].mxu1  ;;  %v10382_v7 = vadd.f32 %v2414_v20, %v1682_v47 }
 0x1cb   : > { %v2422_v16 = vpop.f32.mrb[114].mxu1 }
 0x1cc   : > { %11871 = vst [vmem:[#allocation19_spill] sm:$0xff] %v10382_v7  ;;  %8711 = vmatmul.mubr.msk.bf16.gmra.mrb[216].mxu0 %vm1217_vm2, %v1104_v34  ;;  %v8887_v18 = vpop.f32.mrb[115].mxu1  ;;  %v1112_v34 = vsel %vm660_vm3, %v1107_v37, %v1111_v43  ;;  %v1117_v7 = vshll.u32 %v9677_v4, 16 }
 0x1cd   : > { %8714 = vmatprep.mubr.msk.bf16.mxu0 %vm9772_vm1, %v11852_v0  ;;  %v1113_v18 = vshrl.u32 %v9676_v48, 16 }
 0x1ce   : > { %8993 = vmatmul.mubr.msk.bf16.gmra.mrb[220].mxu1 %vm1217_vm2, %v9675_v60 }
 0x1cf   : > { %v1687_v9 = vpop.f32.mrb[112].mxu0  ;;  %8996 = vmatprep.mubr.msk.bf16.mxu1 %vm9772_vm1, %v11852_v0 }
 0x1d0   : > { %v8608_v39 = vpop.f32.mrb[113].mxu0  ;;  %v10391_v20 = vadd.f32 %v2419_v13, %v1687_v9  ;;  %v1119_v13 = vrot.slane %v1117_v7, 1  ;;  %v9678_v9 = vld [vmem:[%s9826_s23 + $0x1d0] sm:$0xff]  }
 0x1d1   : > { %v1690_v47 = vpop.f32.mrb[114].mxu0  ;;  %v2427_v49 = vpop.f32.mrb[116].mxu1  ;;  %v1115_v39 = vor.u32 %v1113_v18, %v1111_v43 }
 0x1d2   : > { %11872 = vst [vmem:[#allocation20_spill] sm:$0xff] %v10391_v20  ;;  %v8609_v24 = vpop.f32.mrb[115].mxu0  ;;  %v8890_v21 = vpop.f32.mrb[117].mxu1  ;;  %v10394_v52 = vadd.f32 %v2422_v16, %v1690_v47 }
 0x1d3   : > { %v2430_v58 = vpop.f32.mrb[118].mxu1 }
 0x1d4   : > { %11873 = vst [vmem:[#allocation21_spill] sm:$0xff] %v10394_v52  ;;  %8715 = vmatmul.mubr.msk.bf16.gmra.mrb[220].mxu0 %vm1217_vm2, %v1112_v34  ;;  %v8891_v60 = vpop.f32.mrb[119].mxu1  ;;  %v1120_v34 = vsel %vm660_vm3, %v1115_v39, %v1119_v13  ;;  %v1125_v52 = vshll.u32 %v9678_v9, 16 }
 0x1d5   : > { %8718 = vmatprep.mubr.msk.bf16.mxu0 %vm9772_vm1, %v11852_v0  ;;  %v1121_v60 = vshrl.u32 %v9677_v4, 16 }
 0x1d6   : > { %8997 = vmatmul.mubr.msk.bf16.gmra.mrb[224].mxu1 %vm1217_vm2, %v9676_v48 }
 0x1d7   : > { %v1695_v37 = vpop.f32.mrb[116].mxu0  ;;  %9000 = vmatprep.mubr.msk.bf16.mxu1 %vm9772_vm1, %v11852_v0 }
 0x1d8   : > { %v8612_v24 = vpop.f32.mrb[117].mxu0  ;;  %v10403_v16 = vadd.f32 %v2427_v49, %v1695_v37  ;;  %v1127_v49 = vrot.slane %v1125_v52, 1  ;;  %v9679_v37 = vld [vmem:[%s9826_s23 + $0x1d8] sm:$0xff]  }
 0x1d9   : > { %v1698_v47 = vpop.f32.mrb[118].mxu0  ;;  %v2435_v21 = vpop.f32.mrb[120].mxu1  ;;  %v1123_v24 = vor.u32 %v1121_v60, %v1119_v13 }
 0x1da   : > { %11874 = vst [vmem:[#allocation22_spill] sm:$0xff] %v10403_v16  ;;  %v8613_v20 = vpop.f32.mrb[119].mxu0  ;;  %v8894_v43 = vpop.f32.mrb[121].mxu1  ;;  %v10406_v7 = vadd.f32 %v2430_v58, %v1698_v47 }
 0x1db   : > { %v2438_v18 = vpop.f32.mrb[122].mxu1 }
 0x1dc   : > { %11875 = vst [vmem:[#allocation23_spill] sm:$0xff] %v10406_v7  ;;  %8719 = vmatmul.mubr.msk.bf16.gmra.mrb[224].mxu0 %vm1217_vm2, %v1120_v34  ;;  %v8895_v48 = vpop.f32.mrb[123].mxu1  ;;  %v1128_v34 = vsel %vm660_vm3, %v1123_v24, %v1127_v49  ;;  %v1133_v7 = vshll.u32 %v9679_v37, 16 }
 0x1dd   : > { %8722 = vmatprep.mubr.msk.bf16.mxu0 %vm9772_vm1, %v11852_v0  ;;  %v1129_v48 = vshrl.u32 %v9678_v9, 16 }
 0x1de   : > { %9001 = vmatmul.mubr.msk.bf16.gmra.mrb[228].mxu1 %vm1217_vm2, %v9677_v4 }
 0x1df   : > { %v1703_v39 = vpop.f32.mrb[120].mxu0  ;;  %9004 = vmatprep.mubr.msk.bf16.mxu1 %vm9772_vm1, %v11852_v0 }
 0x1e0   : > { %v8616_v20 = vpop.f32.mrb[121].mxu0  ;;  %v10415_v58 = vadd.f32 %v2435_v21, %v1703_v39  ;;  %v1135_v21 = vrot.slane %v1133_v7, 1  ;;  %v9680_v39 = vld [vmem:[%s9826_s23 + $0x1e0] sm:$0xff]  }
 0x1e1   : > { %v1706_v47 = vpop.f32.mrb[122].mxu0  ;;  %v2443_v43 = vpop.f32.mrb[124].mxu1  ;;  %v1131_v20 = vor.u32 %v1129_v48, %v1127_v49 }
 0x1e2   : > { %11876 = vst [vmem:[#allocation24_spill] sm:$0xff] %v10415_v58  ;;  %v8617_v16 = vpop.f32.mrb[123].mxu0  ;;  %v8898_v13 = vpop.f32.mrb[125].mxu1  ;;  %v10418_v52 = vadd.f32 %v2438_v18, %v1706_v47 }
 0x1e3   : > { %v2446_v60 = vpop.f32.mrb[126].mxu1 }
 0x1e4   : > { %11877 = vst [vmem:[#allocation25_spill] sm:$0xff] %v10418_v52  ;;  %8723 = vmatmul.mubr.msk.bf16.gmra.mrb[228].mxu0 %vm1217_vm2, %v1128_v34  ;;  %v8899_v4 = vpop.f32.mrb[127].mxu1  ;;  %v1136_v34 = vsel %vm660_vm3, %v1131_v20, %v1135_v21  ;;  %v1141_v52 = vshll.u32 %v9680_v39, 16 }
 0x1e5   : > { %8726 = vmatprep.mubr.msk.bf16.mxu0 %vm9772_vm1, %v11852_v0  ;;  %v1137_v4 = vshrl.u32 %v9679_v37, 16 }
 0x1e6   : > { %9005 = vmatmul.mubr.msk.bf16.gmra.mrb[232].mxu1 %vm1217_vm2, %v9678_v9 }
 0x1e7   : > { %v1711_v24 = vpop.f32.mrb[124].mxu0  ;;  %9008 = vmatprep.mubr.msk.bf16.mxu1 %vm9772_vm1, %v11852_v0 }
 0x1e8   : > { %v8620_v16 = vpop.f32.mrb[125].mxu0  ;;  %v10427_v18 = vadd.f32 %v2443_v43, %v1711_v24  ;;  %v1143_v43 = vrot.slane %v1141_v52, 1  ;;  %v9681_v24 = vld [vmem:[%s9826_s23 + $0x1e8] sm:$0xff]  }
 0x1e9   : > { %v1714_v47 = vpop.f32.mrb[126].mxu0  ;;  %v2451_v13 = vpop.f32.mrb[128].mxu1  ;;  %v1139_v16 = vor.u32 %v1137_v4, %v1135_v21 }
 0x1ea   : > { %11878 = vst [vmem:[#allocation26_spill] sm:$0xff] %v10427_v18  ;;  %v8621_v58 = vpop.f32.mrb[127].mxu0  ;;  %v8902_v49 = vpop.f32.mrb[129].mxu1  ;;  %v10430_v7 = vadd.f32 %v2446_v60, %v1714_v47 }
 0x1eb   : > { %v2454_v48 = vpop.f32.mrb[130].mxu1 }
 0x1ec   : > { %11879 = vst [vmem:[#allocation27_spill] sm:$0xff] %v10430_v7  ;;  %8727 = vmatmul.mubr.msk.bf16.gmra.mrb[232].mxu0 %vm1217_vm2, %v1136_v34  ;;  %v8903_v9 = vpop.f32.mrb[131].mxu1  ;;  %v1144_v34 = vsel %vm660_vm3, %v1139_v16, %v1143_v43  ;;  %v1149_v7 = vshll.u32 %v9681_v24, 16 }
 0x1ed   : > { %8730 = vmatprep.mubr.msk.bf16.mxu0 %vm9772_vm1, %v11852_v0  ;;  %v1145_v9 = vshrl.u32 %v9680_v39, 16 }
 0x1ee   : > { %9009 = vmatmul.mubr.msk.bf16.gmra.mrb[236].mxu1 %vm1217_vm2, %v9679_v37 }
 0x1ef   : > { %v1719_v20 = vpop.f32.mrb[128].mxu0  ;;  %9012 = vmatprep.mubr.msk.bf16.mxu1 %vm9772_vm1, %v11852_v0 }
 0x1f0   : > { %v8624_v58 = vpop.f32.mrb[129].mxu0  ;;  %v10439_v60 = vadd.f32 %v2451_v13, %v1719_v20  ;;  %v1151_v13 = vrot.slane %v1149_v7, 1  ;;  %v9682_v20 = vld [vmem:[%s9826_s23 + $0x1f0] sm:$0xff]  }
 0x1f1   : > { %v1722_v47 = vpop.f32.mrb[130].mxu0  ;;  %v2459_v49 = vpop.f32.mrb[132].mxu1  ;;  %v1147_v58 = vor.u32 %v1145_v9, %v1143_v43 }
 0x1f2   : > { %11880 = vst [vmem:[#allocation28_spill] sm:$0xff] %v10439_v60  ;;  %v8625_v18 = vpop.f32.mrb[131].mxu0  ;;  %v8906_v21 = vpop.f32.mrb[133].mxu1  ;;  %v10442_v52 = vadd.f32 %v2454_v48, %v1722_v47 }
 0x1f3   : > { %v2462_v4 = vpop.f32.mrb[134].mxu1 }
 0x1f4   : > { %11881 = vst [vmem:[#allocation29_spill] sm:$0xff] %v10442_v52  ;;  %8731 = vmatmul.mubr.msk.bf16.gmra.mrb[236].mxu0 %vm1217_vm2, %v1144_v34  ;;  %v8907_v37 = vpop.f32.mrb[135].mxu1  ;;  %v1152_v34 = vsel %vm660_vm3, %v1147_v58, %v1151_v13  ;;  %v1157_v52 = vshll.u32 %v9682_v20, 16 }
 0x1f5   : > { %8734 = vmatprep.mubr.msk.bf16.mxu0 %vm9772_vm1, %v11852_v0  ;;  %v1153_v37 = vshrl.u32 %v9681_v24, 16 }
 0x1f6   : > { %9013 = vmatmul.mubr.msk.bf16.gmra.mrb[240].mxu1 %vm1217_vm2, %v9680_v39 }
 0x1f7   : > { %v1727_v16 = vpop.f32.mrb[132].mxu0  ;;  %9016 = vmatprep.mubr.msk.bf16.mxu1 %vm9772_vm1, %v11852_v0 }
 0x1f8   : > { %v8628_v18 = vpop.f32.mrb[133].mxu0  ;;  %v10451_v48 = vadd.f32 %v2459_v49, %v1727_v16  ;;  %v1159_v49 = vrot.slane %v1157_v52, 1  ;;  %v9683_v16 = vld [vmem:[%s9826_s23 + $0x1f8] sm:$0xff]  }
 0x1f9   : > { %v1730_v47 = vpop.f32.mrb[134].mxu0  ;;  %v2467_v21 = vpop.f32.mrb[136].mxu1  ;;  %v1155_v18 = vor.u32 %v1153_v37, %v1151_v13 }
 0x1fa   : > { %11882 = vst [vmem:[#allocation30_spill] sm:$0xff] %v10451_v48  ;;  %v8629_v60 = vpop.f32.mrb[135].mxu0  ;;  %v8910_v43 = vpop.f32.mrb[137].mxu1  ;;  %v10454_v7 = vadd.f32 %v2462_v4, %v1730_v47 }
 0x1fb   : > { %v2470_v9 = vpop.f32.mrb[138].mxu1 }
 0x1fc   : > { %11883 = vst [vmem:[#allocation31_spill] sm:$0xff] %v10454_v7  ;;  %8735 = vmatmul.mubr.msk.bf16.gmra.mrb[240].mxu0 %vm1217_vm2, %v1152_v34  ;;  %v8911_v39 = vpop.f32.mrb[139].mxu1  ;;  %v1160_v34 = vsel %vm660_vm3, %v1155_v18, %v1159_v49  ;;  %v1165_v7 = vshll.u32 %v9683_v16, 16 }
 0x1fd   : > { %8738 = vmatprep.mubr.msk.bf16.mxu0 %vm9772_vm1, %v11852_v0  ;;  %v1161_v39 = vshrl.u32 %v9682_v20, 16 }
 0x1fe   : > { %9017 = vmatmul.mubr.msk.bf16.gmra.mrb[244].mxu1 %vm1217_vm2, %v9681_v24 }
 0x1ff   : > { %v1735_v58 = vpop.f32.mrb[136].mxu0  ;;  %9020 = vmatprep.mubr.msk.bf16.mxu1 %vm9772_vm1, %v11852_v0 }
 0x200   : > { %v8632_v60 = vpop.f32.mrb[137].mxu0  ;;  %v10463_v4 = vadd.f32 %v2467_v21, %v1735_v58  ;;  %v1167_v21 = vrot.slane %v1165_v7, 1  ;;  %v9684_v58 = vld [vmem:[%s9826_s23 + $0x200] sm:$0xff]  }
 0x201   : > { %v1738_v47 = vpop.f32.mrb[138].mxu0  ;;  %v2475_v43 = vpop.f32.mrb[140].mxu1  ;;  %v1163_v60 = vor.u32 %v1161_v39, %v1159_v49 }
 0x202   : > { %11884 = vst [vmem:[#allocation32_spill] sm:$0xff] %v10463_v4  ;;  %v8633_v48 = vpop.f32.mrb[139].mxu0  ;;  %v8914_v13 = vpop.f32.mrb[141].mxu1  ;;  %v10466_v52 = vadd.f32 %v2470_v9, %v1738_v47 }
 0x203   : > { %v2478_v37 = vpop.f32.mrb[142].mxu1 }
 0x204   : > { %11885 = vst [vmem:[#allocation33_spill] sm:$0xff] %v10466_v52  ;;  %8739 = vmatmul.mubr.msk.bf16.gmra.mrb[244].mxu0 %vm1217_vm2, %v1160_v34  ;;  %v8915_v24 = vpop.f32.mrb[143].mxu1  ;;  %v1168_v34 = vsel %vm660_vm3, %v1163_v60, %v1167_v21  ;;  %v1173_v52 = vshll.u32 %v9684_v58, 16 }
 0x205   : > { %8742 = vmatprep.mubr.msk.bf16.mxu0 %vm9772_vm1, %v11852_v0  ;;  %v1169_v24 = vshrl.u32 %v9683_v16, 16 }
 0x206   : > { %9021 = vmatmul.mubr.msk.bf16.gmra.mrb[248].mxu1 %vm1217_vm2, %v9682_v20 }
 0x207   : > { %v1743_v18 = vpop.f32.mrb[140].mxu0  ;;  %9024 = vmatprep.mubr.msk.bf16.mxu1 %vm9772_vm1, %v11852_v0 }
 0x208   : > { %v8636_v48 = vpop.f32.mrb[141].mxu0  ;;  %v10475_v9 = vadd.f32 %v2475_v43, %v1743_v18  ;;  %v1171_v43 = vor.u32 %v1169_v24, %v1167_v21  ;;  %v1175_v18 = vrot.slane %v1173_v52, 1 }
 0x209   : > { %v1746_v47 = vpop.f32.mrb[142].mxu0  ;;  %v2483_v13 = vpop.f32.mrb[144].mxu1  ;;  %v9685_v48 = vld [vmem:[%s9826_s23 + $0x208] sm:$0xff]  }
 0x20a   : > { %11886 = vst [vmem:[#allocation34_spill] sm:$0xff] %v10475_v9  ;;  %v8637_v4 = vpop.f32.mrb[143].mxu0  ;;  %v8918_v49 = vpop.f32.mrb[145].mxu1  ;;  %v10478_v7 = vadd.f32 %v2478_v37, %v1746_v47 }
 0x20b   : > { %v2486_v39 = vpop.f32.mrb[146].mxu1  ;;  %v1177_v49 = vshrl.u32 %v9684_v58, 16 }
 0x20c   : > { %11887 = vst [vmem:[#allocation35_spill] sm:$0xff] %v10478_v7  ;;  %8743 = vmatmul.mubr.msk.bf16.gmra.mrb[248].mxu0 %vm1217_vm2, %v1168_v34  ;;  %v8919_v20 = vpop.f32.mrb[147].mxu1  ;;  %v1176_v34 = vsel %vm660_vm3, %v1171_v43, %v1175_v18 }
 0x20d   : > { %8746 = vmatprep.mubr.msk.bf16.mxu0 %vm9772_vm1, %v11852_v0  ;;  %v1181_v20 = vshll.u32 %v9685_v48, 16  ;;  %v1179_v24 = vor.u32 %v1177_v49, %v1175_v18  ;;  %v1185_v18 = vshrl.u32 %v9685_v48, 16 }
 0x20e   : > { %9025 = vmatmul.mubr.msk.bf16.gmra.mrb[252].mxu1 %vm1217_vm2, %v9683_v16 }
 0x20f   : > { %v1751_v60 = vpop.f32.mrb[144].mxu0  ;;  %9028 = vmatprep.mubr.msk.bf16.mxu1 %vm9772_vm1, %v11852_v0  ;;  %v1183_v0 = vrot.slane %v1181_v20, 1 }
 0x210   : > { %v8640_v4 = vpop.f32.mrb[145].mxu0  ;;  %v10487_v37 = vadd.f32 %v2483_v13, %v1751_v60  ;;  %v9686_v13 = vld [vmem:[%s9826_s23 + $0x210] sm:$0xff]  }
 0x211   : > { %v1754_v47 = vpop.f32.mrb[146].mxu0  ;;  %v2491_v7 = vpop.f32.mrb[148].mxu1  ;;  %v11890_v4 = vmov 0.0  }
 0x212   : > { %11888 = vst [vmem:[#allocation36_spill] sm:$0xff] %v10487_v37  ;;  %v8641_v9 = vpop.f32.mrb[147].mxu0  ;;  %v8922_v63 = vpop.f32.mrb[149].mxu1  ;;  %v10490_v21 = vadd.f32 %v2486_v39, %v1754_v47  ;;  %v1184_v39 = vsel %vm660_vm3, %v1179_v24, %v1183_v0  ;;  %v9687_v24 = vld [vmem:[%s9826_s23 + $0x218] sm:$0xff]  }
 0x213   : > { %v2494_v52 = vpop.f32.mrb[150].mxu1 }
 0x214   : > { %11889 = vst [vmem:[#allocation37_spill] sm:$0xff] %v10490_v21  ;;  %8747 = vmatmul.mubr.msk.bf16.gmra.mrb[252].mxu0 %vm1217_vm2, %v1176_v34  ;;  %v8923_v16 = vpop.f32.mrb[151].mxu1  ;;  %v1189_v34 = vshll.u32 %v9686_v13, 16 }
 0x215   : > { %8750 = vmatprep.mubr.msk.bf16.mxu0 %vm9772_vm1, %v11890_v4 }
 0x216   : > { %9029 = vmatmul.mubr.msk.bf16.gmra.mrb[0].mxu1 %vm1217_vm2, %v9684_v58 }
 0x217   : > { %v1759_v43 = vpop.f32.mrb[148].mxu0  ;;  %9032 = vmatprep.mubr.msk.bf16.mxu1 %vm9772_vm1, %v11890_v4 }
 0x218   : > { %v8644_v9 = vpop.f32.mrb[149].mxu0  ;;  %v10499_v63 = vadd.f32 %v2491_v7, %v1759_v43  ;;  %v1187_v7 = vor.u32 %v1185_v18, %v1183_v0  ;;  %v1191_v43 = vrot.slane %v1189_v34, 1  ;;  %v308_v18 = vld [vmem:[%s9826_s23 + $0x220] sm:$0xf]  ;;  %v311_v34 = vld [vmem:[%s9826_s23 + $0x224] sm:$0x1] }
 0x219   : > { %v1762_v60 = vpop.f32.mrb[150].mxu0  ;;  %v2499_v47 = vpop.f32.mrb[152].mxu1 }
 0x21a   : > { %11891 = vst [vmem:[#allocation38_spill] sm:$0xff] %v10499_v63  ;;  %v8645_v49 = vpop.f32.mrb[151].mxu0  ;;  %v8926_v20 = vpop.f32.mrb[153].mxu1  ;;  %v10502_v16 = vadd.f32 %v2494_v52, %v1762_v60 }
 0x21b   : > { %v2502_v21 = vpop.f32.mrb[154].mxu1 }
 0x21c   : > { %11892 = vst [vmem:[#allocation39_spill] sm:$0xff] %v10502_v16  ;;  %8751 = vmatmul.mubr.msk.bf16.gmra.mrb[0].mxu0 %vm1217_vm2, %v1184_v39  ;;  %v8927_v58 = vpop.f32.mrb[155].mxu1  ;;  %v1192_v39 = vsel %vm660_vm3, %v1187_v7, %v1191_v43  ;;  %v1197_v16 = vshll.u32 %v9687_v24, 16 }
 0x21d   : > { %8754 = vmatprep.mubr.msk.bf16.mxu0 %vm9772_vm1, %v11890_v4  ;;  %v1193_v58 = vshrl.u32 %v9686_v13, 16 }
 0x21e   : > { %9033 = vmatmul.mubr.msk.bf16.gmra.mrb[4].mxu1 %vm1217_vm2, %v9685_v48 }
 0x21f   : > { %v1767_v9 = vpop.f32.mrb[152].mxu0  ;;  %9036 = vmatprep.mubr.msk.bf16.mxu1 %vm9772_vm1, %v11890_v4 }
 0x220   : > { %v8648_v52 = vpop.f32.mrb[153].mxu0  ;;  %v10511_v60 = vadd.f32 %v2499_v47, %v1767_v9  ;;  %v1195_v47 = vor.u32 %v1193_v58, %v1191_v43  ;;  %v1199_v9 = vrot.slane %v1197_v16, 1 }
 0x221   : > { %v1770_v49 = vpop.f32.mrb[154].mxu0  ;;  %v2507_v20 = vpop.f32.mrb[156].mxu1  ;;  %v7172_v52 = vcombine.low %v308_v18, %v311_v34 }
 0x222   : > { %11893 = vst [vmem:[#allocation40_spill] sm:$0xff] %v10511_v60  ;;  %v8649_v63 = vpop.f32.mrb[155].mxu0  ;;  %v8930_v0 = vpop.f32.mrb[157].mxu1  ;;  %v10516_v37 = vadd.f32 %v2502_v21, %v1770_v49 }
 0x223   : > { %v2510_v48 = vpop.f32.mrb[158].mxu1  ;;  %v1209_v29 = vshrl.u32 %v7172_v52, 16 }
 0x224   : > { %11894 = vst [vmem:[#allocation41_spill] sm:$0xff] %v10516_v37  ;;  %8755 = vmatmul.mubr.msk.bf16.gmra.mrb[4].mxu0 %vm1217_vm2, %v1192_v39  ;;  %v8931_v31 = vpop.f32.mrb[159].mxu1  ;;  %v1201_v39 = vshrl.u32 %v9687_v24, 16  ;;  %v1205_v37 = vshll.u32 %v7172_v52, 16 }
 0x225   : > { %8758 = vmatprep.mubr.msk.bf16.mxu0 %vm9772_vm1, %v11890_v4  ;;  %v1200_v31 = vsel %vm660_vm3, %v1195_v47, %v1199_v9  ;;  %v2745_v47 = vld [vmem:[%s9826_s23 + $0x10] sm:$0xf] }
 0x226   : > { %9037 = vmatmul.mubr.msk.bf16.gmra.mrb[8].mxu1 %vm1217_vm2, %v9686_v13 }
 0x227   : > { %v1775_v7 = vpop.f32.mrb[156].mxu0  ;;  %9040 = vmatprep.mubr.msk.bf16.mxu1 %vm9772_vm1, %v11890_v4 }
 0x228   : > { %v8652_v63 = vpop.f32.mrb[157].mxu0  ;;  %v10524_v0 = vadd.f32 %v2507_v20, %v1775_v7  ;;  %v1203_v20 = vor.u32 %v1201_v39, %v1199_v9  ;;  %v1207_v7 = vrot.slane %v1205_v37, 1  ;;  %v7243_v37 = vcombine.low %v308_v18, %v308_v18 }
 0x229   : > { %v1778_v21 = vpop.f32.mrb[158].mxu0  ;;  %v2515_v49 = vpop.f32.mrb[160].mxu1  ;;  %v2746_v63 = vld [vmem:[%s9826_s23 + $0x14] sm:$0xf] }
 0x22a   : > { %11895 = vst [vmem:[#allocation42_spill] sm:$0xff] %v10524_v0  ;;  %v8653_v16 = vpop.f32.mrb[159].mxu0  ;;  %v8934_v43 = vpop.f32.mrb[161].mxu1  ;;  %v10527_v58 = vadd.f32 %v2510_v48, %v1778_v21  ;;  %v4718_v21 = vld [vmem:[%s9826_s23 + $0x10] sm:$0xe] }
 0x22b   : > { %v2518_v13 = vpop.f32.mrb[162].mxu1  ;;  %v1208_v43 = vsel %vm660_vm3, %v1203_v20, %v1207_v7  ;;  %v7457_v33 = vcombine.low %v4718_v21, %v2746_v63  ;;  %v1211_v20 = vor.u32 %v1209_v29, %v1207_v7 }
 0x22c   : > { %11896 = vst [vmem:[#allocation43_spill] sm:$0xff] %v10527_v58  ;;  %8759 = vmatmul.mubr.msk.bf16.gmra.mrb[8].mxu0 %vm1217_vm2, %v1200_v31  ;;  %v8935_v34 = vpop.f32.mrb[163].mxu1  ;;  %v7316_v58 = vcombine.low %v2745_v47, %v2746_v63 }
 0x22d   : > { %8762 = vmatprep.mubr.msk.bf16.mxu0 %vm9772_vm1, %v11890_v4  ;;  %v4726_v18 = vrot.slane %v7457_v33, 1  ;;  %v9693_v33 = vld [vmem:[%s9826_s23 + $0x20] sm:$0xff]  }
 0x22e   : > { %9041 = vmatmul.mubr.msk.bf16.gmra.mrb[12].mxu1 %vm1217_vm2, %v9687_v24 }
 0x22f   : > { %v1783_v0 = vpop.f32.mrb[160].mxu0  ;;  %9044 = vmatprep.mubr.msk.bf16.mxu1 %vm9772_vm1, %v11890_v4 }
 0x230   : > { %v8656_v48 = vpop.f32.mrb[161].mxu0  ;;  %v10538_v16 = vadd.f32 %v2515_v49, %v1783_v0  ;;  %v3234_v0 = vshll.u32 %v7316_v58, 16 }
 0x231   : > { %v1786_v31 = vpop.f32.mrb[162].mxu0  ;;  %v2523_v34 = vpop.f32.mrb[164].mxu1 }
 0x232   : > { %11897 = vst [vmem:[#allocation44_spill] sm:$0xff] %v10538_v16  ;;  %v8657_v9 = vpop.f32.mrb[163].mxu0  ;;  %v8938_v39 = vpop.f32.mrb[165].mxu1  ;;  %v10541_v24 = vadd.f32 %v2518_v13, %v1786_v31  ;;  %v4727_v13 = vrot.slane %v9691_v10, 1  ;;  %v3232_v31 = vshrl.u32 %v7316_v58, 16 }
 0x233   : > { %v2526_v60 = vpop.f32.mrb[166].mxu1  ;;  %v3239_v9 = vshll.u32 %v9691_v10, 16 }
 0x234   : > { %11898 = vst [vmem:[#allocation45_spill] sm:$0xff] %v10541_v24  ;;  %8763 = vmatmul.mubr.msk.bf16.gmra.mrb[12].mxu0 %vm1217_vm2, %v1208_v43  ;;  %v8939_v48 = vpop.f32.mrb[167].mxu1  ;;  %v3236_v43 = vrot.slane %v3234_v0, 1  ;;  %v4728_v16 = vsel %vm4725_vm4, %v4726_v18, %v4727_v13 }
 0x235   : > { %8766 = vmatprep.mubr.msk.bf16.mxu0 %vm9772_vm1, %v11890_v4 }
 0x236   : > { %9045 = vmatmul.mubr.msk.bf16.gmra.mrb[16].mxu1 %vm1217_vm2, %v7243_v37  ;;  %v3237_v7 = vor.u32 %v3236_v43, %v3232_v31 }
 0x237   : > { %v1791_v49 = vpop.f32.mrb[164].mxu0  ;;  %9328 = vmatprep.mubr.msk.bf16.mxu1 %vm9772_vm1, %v11890_v4 }
 0x238   : > { %v8660_v47 = vpop.f32.mrb[165].mxu0  ;;  %v10550_v52 = vadd.f32 %v2523_v34, %v1791_v49  ;;  %v3241_v34 = vrot.slane %v3239_v9, 1 }
 0x239   : > { %v1794_v63 = vpop.f32.mrb[166].mxu0  ;;  %v2531_v21 = vpop.f32.mrb[168].mxu1 }
 0x23a   : > { %11899 = vst [vmem:[#allocation46_spill] sm:$0xff] %v10550_v52  ;;  %v8661_v39 = vpop.f32.mrb[167].mxu0  ;;  %v8942_v48 = vpop.f32.mrb[169].mxu1  ;;  %v10552_v37 = vadd.f32 %v2526_v60, %v1794_v63  ;;  %v4729_v60 = vrot.slane %v9693_v33, 1  ;;  %v3243_v63 = vshrl.u32 %v9691_v10, 16 }
 0x23b   : > { %v2534_v24 = vpop.f32.mrb[170].mxu1  ;;  %v3247_v39 = vshll.u32 %v9693_v33, 16 }
 0x23c   : > { %11900 = vst [vmem:[#allocation47_spill] sm:$0xff] %v10552_v37  ;;  %8767 = vmatmul.mubr.msk.bf16.gmra.mrb[16].mxu0 %vm1217_vm2, %v1211_v20  ;;  %v8943_v29 = vpop.f32.mrb[171].mxu1  ;;  %v3242_v20 = vsel %vm660_vm3, %v3237_v7, %v3241_v34  ;;  %v4730_v9 = vsel %vm4725_vm4, %v4727_v13, %v4729_v60 }
 0x23d   : > { %9050 = vmatprep.mubr.msk.bf16.mxu0 %vm9772_vm1, %v11890_v4  ;;  %v9694_v29 = vld [vmem:[%s9826_s23 + $0x28] sm:$0xff]  }
 0x23e   : > { %9329 = vmatmul.mubr.msk.bf16.vlgmr.msra.gmra.mrb[20].mxu1 %vm1217_vm2, %v4728_v16 }
 0x23f   : > { %v1799_v58 = vpop.f32.mrb[168].mxu0  ;;  %9332 = vmatprep.mubr.msk.bf16.mxu1 %vm9772_vm1, %v11890_v4 }
 0x240   : > { %v8664_v0 = vpop.f32.mrb[169].mxu0  ;;  %v10562_v49 = vadd.f32 %v2531_v21, %v1799_v58  ;;  %v3245_v21 = vor.u32 %v3243_v63, %v3241_v34  ;;  %v3249_v58 = vrot.slane %v3247_v39, 1 }
 0x241   : > { %v1802_v18 = vpop.f32.mrb[170].mxu0  ;;  %v2539_v47 = vpop.f32.mrb[172].mxu1 }
 0x242   : > { %11901 = vst [vmem:[#allocation48_spill] sm:$0xff] %v10562_v49  ;;  %v8665_v48 = vpop.f32.mrb[171].mxu0  ;;  %v8946_v31 = vpop.f32.mrb[173].mxu1  ;;  %v10565_v43 = vadd.f32 %v2534_v24, %v1802_v18  ;;  %v4731_v24 = vrot.slane %v9694_v29, 1  ;;  %v3250_v18 = vsel %vm660_vm3, %v3245_v21, %v3249_v58 }
 0x243   : > { %v2542_v16 = vpop.f32.mrb[174].mxu1  ;;  %v3255_v48 = vshll.u32 %v9694_v29, 16 }
 0x244   : > { %11902 = vst [vmem:[#allocation49_spill] sm:$0xff] %v10565_v43  ;;  %9051 = vmatmul.mubr.msk.bf16.vlgmr.msra.gmra.mrb[20].mxu0 %vm1217_vm2, %v3242_v20  ;;  %v8947_v37 = vpop.f32.mrb[175].mxu1  ;;  %v3251_v20 = vshrl.u32 %v9693_v33, 16  ;;  %v9695_v43 = vld [vmem:[%s9826_s23 + $0x30] sm:$0xff]  }
 0x245   : > { %9054 = vmatprep.mubr.msk.bf16.mxu0 %vm9772_vm1, %v11890_v4 }
 0x246   : > { %9333 = vmatmul.mubr.msk.bf16.gmra.mrb[24].mxu1 %vm1217_vm2, %v4730_v9  ;;  %v4732_v9 = vsel %vm4725_vm4, %v4729_v60, %v4731_v24 }
 0x247   : > { %v1807_v10 = vpop.f32.mrb[172].mxu0  ;;  %9336 = vmatprep.mubr.msk.bf16.mxu1 %vm9772_vm1, %v11890_v4 }
 0x248   : > { %v8668_v7 = vpop.f32.mrb[173].mxu0  ;;  %v10575_v0 = vadd.f32 %v2539_v47, %v1807_v10  ;;  %v3253_v47 = vor.u32 %v3251_v20, %v3249_v58  ;;  %v3257_v10 = vrot.slane %v3255_v48, 1 }
 0x249   : > { %v1810_v13 = vpop.f32.mrb[174].mxu0  ;;  %v2547_v37 = vpop.f32.mrb[176].mxu1 }
 0x24a   : > { %11903 = vst [vmem:[#allocation50_spill] sm:$0xff] %v10575_v0  ;;  %v8669_v31 = vpop.f32.mrb[175].mxu0  ;;  %v8950_v34 = vpop.f32.mrb[177].mxu1  ;;  %v10578_v63 = vadd.f32 %v2542_v16, %v1810_v13  ;;  %v4733_v16 = vrot.slane %v9695_v43, 1  ;;  %v3258_v13 = vsel %vm660_vm3, %v3253_v47, %v3257_v10 }
 0x24b   : > { %v2550_v39 = vpop.f32.mrb[178].mxu1  ;;  %v3263_v31 = vshll.u32 %v9695_v43, 16 }
 0x24c   : > { %11904 = vst [vmem:[#allocation51_spill] sm:$0xff] %v10578_v63  ;;  %9055 = vmatmul.mubr.msk.bf16.gmra.mrb[24].mxu0 %vm1217_vm2, %v3250_v18  ;;  %v8951_v49 = vpop.f32.mrb[179].mxu1  ;;  %v3259_v18 = vshrl.u32 %v9694_v29, 16  ;;  %v9696_v63 = vld [vmem:[%s9826_s23 + $0x38] sm:$0xff]  }
 0x24d   : > { %9058 = vmatprep.mubr.msk.bf16.mxu0 %vm9772_vm1, %v11890_v4 }
 0x24e   : > { %9337 = vmatmul.mubr.msk.bf16.gmra.mrb[28].mxu1 %vm1217_vm2, %v4732_v9  ;;  %v4734_v9 = vsel %vm4725_vm4, %v4731_v24, %v4733_v16 }
 0x24f   : > { %v1815_v33 = vpop.f32.mrb[176].mxu0  ;;  %9340 = vmatprep.mubr.msk.bf16.mxu1 %vm9772_vm1, %v11890_v4 }
 0x250   : > { %v8672_v21 = vpop.f32.mrb[177].mxu0  ;;  %v10588_v7 = vadd.f32 %v2547_v37, %v1815_v33  ;;  %v3261_v37 = vor.u32 %v3259_v18, %v3257_v10  ;;  %v3265_v33 = vrot.slane %v3263_v31, 1 }
 0x251   : > { %v1818_v60 = vpop.f32.mrb[178].mxu0  ;;  %v2555_v49 = vpop.f32.mrb[180].mxu1 }
 0x252   : > { %11905 = vst [vmem:[#allocation52_spill] sm:$0xff] %v10588_v7  ;;  %v8673_v34 = vpop.f32.mrb[179].mxu0  ;;  %v8954_v58 = vpop.f32.mrb[181].mxu1  ;;  %v10591_v20 = vadd.f32 %v2550_v39, %v1818_v60  ;;  %v4735_v39 = vrot.slane %v9696_v63, 1  ;;  %v3266_v60 = vsel %vm660_vm3, %v3261_v37, %v3265_v33 }
 0x253   : > { %v2558_v48 = vpop.f32.mrb[182].mxu1  ;;  %v3271_v34 = vshll.u32 %v9696_v63, 16 }
 0x254   : > { %11906 = vst [vmem:[#allocation53_spill] sm:$0xff] %v10591_v20  ;;  %9059 = vmatmul.mubr.msk.bf16.gmra.mrb[28].mxu0 %vm1217_vm2, %v3258_v13  ;;  %v8955_v0 = vpop.f32.mrb[183].mxu1  ;;  %v3267_v13 = vshrl.u32 %v9695_v43, 16  ;;  %v9697_v20 = vld [vmem:[%s9826_s23 + $0x40] sm:$0xff]  }
 0x255   : > { %9062 = vmatprep.mubr.msk.bf16.mxu0 %vm9772_vm1, %v11890_v4 }
 0x256   : > { %9341 = vmatmul.mubr.msk.bf16.gmra.mrb[32].mxu1 %vm1217_vm2, %v4734_v9  ;;  %v4736_v9 = vsel %vm4725_vm4, %v4733_v16, %v4735_v39 }
 0x257   : > { %v1823_v29 = vpop.f32.mrb[180].mxu0  ;;  %9344 = vmatprep.mubr.msk.bf16.mxu1 %vm9772_vm1, %v11890_v4 }
 0x258   : > { %v8676_v47 = vpop.f32.mrb[181].mxu0  ;;  %v10601_v21 = vadd.f32 %v2555_v49, %v1823_v29  ;;  %v3269_v49 = vor.u32 %v3267_v13, %v3265_v33  ;;  %v3273_v29 = vrot.slane %v3271_v34, 1 }
 0x259   : > { %v1826_v24 = vpop.f32.mrb[182].mxu0  ;;  %v2563_v0 = vpop.f32.mrb[184].mxu1 }
 0x25a   : > { %11907 = vst [vmem:[#allocation54_spill] sm:$0xff] %v10601_v21  ;;  %v8677_v58 = vpop.f32.mrb[183].mxu0  ;;  %v8958_v10 = vpop.f32.mrb[185].mxu1  ;;  %v10604_v18 = vadd.f32 %v2558_v48, %v1826_v24  ;;  %v4737_v48 = vrot.slane %v9697_v20, 1  ;;  %v3274_v24 = vsel %vm660_vm3, %v3269_v49, %v3273_v29 }
 0x25b   : > { %v2566_v31 = vpop.f32.mrb[186].mxu1  ;;  %v3279_v58 = vshll.u32 %v9697_v20, 16 }
 0x25c   : > { %11908 = vst [vmem:[#allocation55_spill] sm:$0xff] %v10604_v18  ;;  %9063 = vmatmul.mubr.msk.bf16.gmra.mrb[32].mxu0 %vm1217_vm2, %v3266_v60  ;;  %v8959_v7 = vpop.f32.mrb[187].mxu1  ;;  %v3275_v60 = vshrl.u32 %v9696_v63, 16  ;;  %v9698_v18 = vld [vmem:[%s9826_s23 + $0x48] sm:$0xff]  }
 0x25d   : > { %9066 = vmatprep.mubr.msk.bf16.mxu0 %vm9772_vm1, %v11890_v4 }
 0x25e   : > { %9345 = vmatmul.mubr.msk.bf16.gmra.mrb[36].mxu1 %vm1217_vm2, %v4736_v9  ;;  %v4738_v9 = vsel %vm4725_vm4, %v4735_v39, %v4737_v48 }
 0x25f   : > { %v1831_v43 = vpop.f32.mrb[184].mxu0  ;;  %9348 = vmatprep.mubr.msk.bf16.mxu1 %vm9772_vm1, %v11890_v4 }
 0x260   : > { %v8680_v37 = vpop.f32.mrb[185].mxu0  ;;  %v10614_v47 = vadd.f32 %v2563_v0, %v1831_v43  ;;  %v3277_v0 = vor.u32 %v3275_v60, %v3273_v29  ;;  %v3281_v43 = vrot.slane %v3279_v58, 1 }
 0x261   : > { %v1834_v16 = vpop.f32.mrb[186].mxu0  ;;  %v2571_v7 = vpop.f32.mrb[188].mxu1 }
 0x262   : > { %11909 = vst [vmem:[#allocation56_spill] sm:$0xff] %v10614_v47  ;;  %v8681_v10 = vpop.f32.mrb[187].mxu0  ;;  %v8962_v33 = vpop.f32.mrb[189].mxu1  ;;  %v10617_v13 = vadd.f32 %v2566_v31, %v1834_v16  ;;  %v4739_v31 = vrot.slane %v9698_v18, 1  ;;  %v3282_v16 = vsel %vm660_vm3, %v3277_v0, %v3281_v43 }
 0x263   : > { %v2574_v34 = vpop.f32.mrb[190].mxu1  ;;  %v3287_v10 = vshll.u32 %v9698_v18, 16 }
 0x264   : > { %11910 = vst [vmem:[#allocation57_spill] sm:$0xff] %v10617_v13  ;;  %9067 = vmatmul.mubr.msk.bf16.gmra.mrb[36].mxu0 %vm1217_vm2, %v3274_v24  ;;  %v8963_v21 = vpop.f32.mrb[191].mxu1  ;;  %v3283_v24 = vshrl.u32 %v9697_v20, 16  ;;  %v9699_v13 = vld [vmem:[%s9826_s23 + $0x50] sm:$0xff]  }
 0x265   : > { %9070 = vmatprep.mubr.msk.bf16.mxu0 %vm9772_vm1, %v11890_v4 }
 0x266   : > { %9349 = vmatmul.mubr.msk.bf16.gmra.mrb[40].mxu1 %vm1217_vm2, %v4738_v9  ;;  %v4740_v9 = vsel %vm4725_vm4, %v4737_v48, %v4739_v31 }
 0x267   : > { %v1839_v63 = vpop.f32.mrb[188].mxu0  ;;  %9352 = vmatprep.mubr.msk.bf16.mxu1 %vm9772_vm1, %v11890_v4 }
 0x268   : > { %v8684_v49 = vpop.f32.mrb[189].mxu0  ;;  %v10627_v37 = vadd.f32 %v2571_v7, %v1839_v63  ;;  %v3285_v7 = vor.u32 %v3283_v24, %v3281_v43  ;;  %v3289_v63 = vrot.slane %v3287_v10, 1 }
 0x269   : > { %v1842_v39 = vpop.f32.mrb[190].mxu0  ;;  %v2579_v21 = vpop.f32.mrb[192].mxu1 }
 0x26a   : > { %11911 = vst [vmem:[#allocation58_spill] sm:$0xff] %v10627_v37  ;;  %v8685_v33 = vpop.f32.mrb[191].mxu0  ;;  %v8966_v29 = vpop.f32.mrb[193].mxu1  ;;  %v10630_v60 = vadd.f32 %v2574_v34, %v1842_v39  ;;  %v4741_v34 = vrot.slane %v9699_v13, 1  ;;  %v3290_v39 = vsel %vm660_vm3, %v3285_v7, %v3289_v63 }
 0x26b   : > { %v2582_v58 = vpop.f32.mrb[194].mxu1  ;;  %v3295_v33 = vshll.u32 %v9699_v13, 16 }
 0x26c   : > { %11912 = vst [vmem:[#allocation59_spill] sm:$0xff] %v10630_v60  ;;  %9071 = vmatmul.mubr.msk.bf16.gmra.mrb[40].mxu0 %vm1217_vm2, %v3282_v16  ;;  %v8967_v47 = vpop.f32.mrb[195].mxu1  ;;  %v3291_v16 = vshrl.u32 %v9698_v18, 16  ;;  %v9700_v60 = vld [vmem:[%s9826_s23 + $0x58] sm:$0xff]  }
 0x26d   : > { %9074 = vmatprep.mubr.msk.bf16.mxu0 %vm9772_vm1, %v11890_v4 }
 0x26e   : > { %9353 = vmatmul.mubr.msk.bf16.gmra.mrb[44].mxu1 %vm1217_vm2, %v4740_v9  ;;  %v4742_v9 = vsel %vm4725_vm4, %v4739_v31, %v4741_v34 }
 0x26f   : > { %v1847_v20 = vpop.f32.mrb[192].mxu0  ;;  %9356 = vmatprep.mubr.msk.bf16.mxu1 %vm9772_vm1, %v11890_v4 }
 0x270   : > { %v8688_v0 = vpop.f32.mrb[193].mxu0  ;;  %v10640_v49 = vadd.f32 %v2579_v21, %v1847_v20  ;;  %v3293_v21 = vor.u32 %v3291_v16, %v3289_v63  ;;  %v3297_v20 = vrot.slane %v3295_v33, 1 }
 0x271   : > { %v1850_v48 = vpop.f32.mrb[194].mxu0  ;;  %v2587_v47 = vpop.f32.mrb[196].mxu1 }
 0x272   : > { %11913 = vst [vmem:[#allocation60_spill] sm:$0xff] %v10640_v49  ;;  %v8689_v29 = vpop.f32.mrb[195].mxu0  ;;  %v8970_v43 = vpop.f32.mrb[197].mxu1  ;;  %v10643_v24 = vadd.f32 %v2582_v58, %v1850_v48  ;;  %v4743_v58 = vrot.slane %v9700_v60, 1  ;;  %v3298_v48 = vsel %vm660_vm3, %v3293_v21, %v3297_v20 }
 0x273   : > { %v2590_v10 = vpop.f32.mrb[198].mxu1  ;;  %v3303_v29 = vshll.u32 %v9700_v60, 16 }
 0x274   : > { %11914 = vst [vmem:[#allocation61_spill] sm:$0xff] %v10643_v24  ;;  %9075 = vmatmul.mubr.msk.bf16.gmra.mrb[44].mxu0 %vm1217_vm2, %v3290_v39  ;;  %v8971_v37 = vpop.f32.mrb[199].mxu1  ;;  %v3299_v39 = vshrl.u32 %v9699_v13, 16  ;;  %v9701_v24 = vld [vmem:[%s9826_s23 + $0x60] sm:$0xff]  }
 0x275   : > { %9078 = vmatprep.mubr.msk.bf16.mxu0 %vm9772_vm1, %v11890_v4 }
 0x276   : > { %9357 = vmatmul.mubr.msk.bf16.gmra.mrb[48].mxu1 %vm1217_vm2, %v4742_v9  ;;  %v4744_v9 = vsel %vm4725_vm4, %v4741_v34, %v4743_v58 }
 0x277   : > { %v1855_v18 = vpop.f32.mrb[196].mxu0  ;;  %9360 = vmatprep.mubr.msk.bf16.mxu1 %vm9772_vm1, %v11890_v4 }
 0x278   : > { %v8692_v7 = vpop.f32.mrb[197].mxu0  ;;  %v10653_v0 = vadd.f32 %v2587_v47, %v1855_v18  ;;  %v3301_v47 = vor.u32 %v3299_v39, %v3297_v20  ;;  %v3305_v18 = vrot.slane %v3303_v29, 1 }
 0x279   : > { %v1858_v31 = vpop.f32.mrb[198].mxu0  ;;  %v2595_v37 = vpop.f32.mrb[200].mxu1 }
 0x27a   : > { %11915 = vst [vmem:[#allocation62_spill] sm:$0xff] %v10653_v0  ;;  %v8693_v43 = vpop.f32.mrb[199].mxu0  ;;  %v8974_v63 = vpop.f32.mrb[201].mxu1  ;;  %v10656_v16 = vadd.f32 %v2590_v10, %v1858_v31  ;;  %v4745_v10 = vrot.slane %v9701_v24, 1  ;;  %v3306_v31 = vsel %vm660_vm3, %v3301_v47, %v3305_v18 }
 0x27b   : > { %v2598_v33 = vpop.f32.mrb[202].mxu1  ;;  %v3311_v43 = vshll.u32 %v9701_v24, 16 }
 0x27c   : > { %11916 = vst [vmem:[#allocation63_spill] sm:$0xff] %v10656_v16  ;;  %9079 = vmatmul.mubr.msk.bf16.gmra.mrb[48].mxu0 %vm1217_vm2, %v3298_v48  ;;  %v8975_v49 = vpop.f32.mrb[203].mxu1  ;;  %v3307_v48 = vshrl.u32 %v9700_v60, 16  ;;  %v9702_v16 = vld [vmem:[%s9826_s23 + $0x68] sm:$0xff]  }
 0x27d   : > { %9082 = vmatprep.mubr.msk.bf16.mxu0 %vm9772_vm1, %v11890_v4 }
 0x27e   : > { %9361 = vmatmul.mubr.msk.bf16.gmra.mrb[52].mxu1 %vm1217_vm2, %v4744_v9  ;;  %v4746_v9 = vsel %vm4725_vm4, %v4743_v58, %v4745_v10 }
 0x27f   : > { %v1863_v13 = vpop.f32.mrb[200].mxu0  ;;  %9364 = vmatprep.mubr.msk.bf16.mxu1 %vm9772_vm1, %v11890_v4 }
 0x280   : > { %v8696_v21 = vpop.f32.mrb[201].mxu0  ;;  %v10666_v7 = vadd.f32 %v2595_v37, %v1863_v13  ;;  %v3309_v37 = vor.u32 %v3307_v48, %v3305_v18  ;;  %v3313_v13 = vrot.slane %v3311_v43, 1 }
 0x281   : > { %v1866_v34 = vpop.f32.mrb[202].mxu0  ;;  %v2603_v49 = vpop.f32.mrb[204].mxu1 }
 0x282   : > { %11917 = vst [vmem:[#allocation64_spill] sm:$0xff] %v10666_v7  ;;  %v8697_v63 = vpop.f32.mrb[203].mxu0  ;;  %v8978_v20 = vpop.f32.mrb[205].mxu1  ;;  %v10669_v39 = vadd.f32 %v2598_v33, %v1866_v34  ;;  %v4747_v33 = vrot.slane %v9702_v16, 1  ;;  %v3314_v34 = vsel %vm660_vm3, %v3309_v37, %v3313_v13 }
 0x283   : > { %v2606_v29 = vpop.f32.mrb[206].mxu1  ;;  %v3319_v63 = vshll.u32 %v9702_v16, 16 }
 0x284   : > { %11918 = vst [vmem:[#allocation65_spill] sm:$0xff] %v10669_v39  ;;  %9083 = vmatmul.mubr.msk.bf16.gmra.mrb[52].mxu0 %vm1217_vm2, %v3306_v31  ;;  %v8979_v0 = vpop.f32.mrb[207].mxu1  ;;  %v3315_v31 = vshrl.u32 %v9701_v24, 16  ;;  %v9703_v39 = vld [vmem:[%s9826_s23 + $0x70] sm:$0xff]  }
 0x285   : > { %9086 = vmatprep.mubr.msk.bf16.mxu0 %vm9772_vm1, %v11890_v4 }
 0x286   : > { %9365 = vmatmul.mubr.msk.bf16.gmra.mrb[56].mxu1 %vm1217_vm2, %v4746_v9  ;;  %v4748_v9 = vsel %vm4725_vm4, %v4745_v10, %v4747_v33 }
 0x287   : > { %v1871_v60 = vpop.f32.mrb[204].mxu0  ;;  %9368 = vmatprep.mubr.msk.bf16.mxu1 %vm9772_vm1, %v11890_v4 }
 0x288   : > { %v8700_v47 = vpop.f32.mrb[205].mxu0  ;;  %v10679_v21 = vadd.f32 %v2603_v49, %v1871_v60  ;;  %v3317_v49 = vor.u32 %v3315_v31, %v3313_v13  ;;  %v3321_v60 = vrot.slane %v3319_v63, 1 }
 0x289   : > { %v1874_v58 = vpop.f32.mrb[206].mxu0  ;;  %v2611_v0 = vpop.f32.mrb[208].mxu1 }
 0x28a   : > { %11919 = vst [vmem:[#allocation66_spill] sm:$0xff] %v10679_v21  ;;  %v8701_v20 = vpop.f32.mrb[207].mxu0  ;;  %v8982_v18 = vpop.f32.mrb[209].mxu1  ;;  %v10682_v48 = vadd.f32 %v2606_v29, %v1874_v58  ;;  %v4749_v29 = vrot.slane %v9703_v39, 1  ;;  %v3322_v58 = vsel %vm660_vm3, %v3317_v49, %v3321_v60 }
 0x28b   : > { %v2614_v43 = vpop.f32.mrb[210].mxu1  ;;  %v3327_v20 = vshll.u32 %v9703_v39, 16 }
 0x28c   : > { %11920 = vst [vmem:[#allocation67_spill] sm:$0xff] %v10682_v48  ;;  %9087 = vmatmul.mubr.msk.bf16.gmra.mrb[56].mxu0 %vm1217_vm2, %v3314_v34  ;;  %v8983_v7 = vpop.f32.mrb[211].mxu1  ;;  %v3323_v34 = vshrl.u32 %v9702_v16, 16  ;;  %v9704_v48 = vld [vmem:[%s9826_s23 + $0x78] sm:$0xff]  }
 0x28d   : > { %9090 = vmatprep.mubr.msk.bf16.mxu0 %vm9772_vm1, %v11890_v4 }
 0x28e   : > { %9369 = vmatmul.mubr.msk.bf16.gmra.mrb[60].mxu1 %vm1217_vm2, %v4748_v9  ;;  %v4750_v9 = vsel %vm4725_vm4, %v4747_v33, %v4749_v29 }
 0x28f   : > { %v1879_v24 = vpop.f32.mrb[208].mxu0  ;;  %9372 = vmatprep.mubr.msk.bf16.mxu1 %vm9772_vm1, %v11890_v4 }
 0x290   : > { %v8704_v37 = vpop.f32.mrb[209].mxu0  ;;  %v10692_v47 = vadd.f32 %v2611_v0, %v1879_v24  ;;  %v3325_v0 = vor.u32 %v3323_v34, %v3321_v60  ;;  %v3329_v24 = vrot.slane %v3327_v20, 1 }
 0x291   : > { %v1882_v10 = vpop.f32.mrb[210].mxu0  ;;  %v2619_v7 = vpop.f32.mrb[212].mxu1 }
 0x292   : > { %11921 = vst [vmem:[#allocation68_spill] sm:$0xff] %v10692_v47  ;;  %v8705_v18 = vpop.f32.mrb[211].mxu0  ;;  %v8986_v13 = vpop.f32.mrb[213].mxu1  ;;  %v10695_v31 = vadd.f32 %v2614_v43, %v1882_v10  ;;  %v4751_v43 = vrot.slane %v9704_v48, 1  ;;  %v3330_v10 = vsel %vm660_vm3, %v3325_v0, %v3329_v24 }
 0x293   : > { %v2622_v63 = vpop.f32.mrb[214].mxu1  ;;  %v3335_v18 = vshll.u32 %v9704_v48, 16 }
 0x294   : > { %11922 = vst [vmem:[#allocation69_spill] sm:$0xff] %v10695_v31  ;;  %9091 = vmatmul.mubr.msk.bf16.gmra.mrb[60].mxu0 %vm1217_vm2, %v3322_v58  ;;  %v8987_v21 = vpop.f32.mrb[215].mxu1  ;;  %v3331_v58 = vshrl.u32 %v9703_v39, 16  ;;  %v9705_v31 = vld [vmem:[%s9826_s23 + $0x80] sm:$0xff]  }
 0x295   : > { %9094 = vmatprep.mubr.msk.bf16.mxu0 %vm9772_vm1, %v11890_v4 }
 0x296   : > { %9373 = vmatmul.mubr.msk.bf16.gmra.mrb[64].mxu1 %vm1217_vm2, %v4750_v9  ;;  %v4752_v9 = vsel %vm4725_vm4, %v4749_v29, %v4751_v43 }
 0x297   : > { %v1887_v16 = vpop.f32.mrb[212].mxu0  ;;  %9376 = vmatprep.mubr.msk.bf16.mxu1 %vm9772_vm1, %v11890_v4 }
 0x298   : > { %v8708_v49 = vpop.f32.mrb[213].mxu0  ;;  %v10705_v37 = vadd.f32 %v2619_v7, %v1887_v16  ;;  %v3333_v7 = vor.u32 %v3331_v58, %v3329_v24  ;;  %v3337_v16 = vrot.slane %v3335_v18, 1 }
 0x299   : > { %v1890_v33 = vpop.f32.mrb[214].mxu0  ;;  %v2627_v21 = vpop.f32.mrb[216].mxu1 }
 0x29a   : > { %11923 = vst [vmem:[#allocation70_spill] sm:$0xff] %v10705_v37  ;;  %v8709_v13 = vpop.f32.mrb[215].mxu0  ;;  %v8990_v60 = vpop.f32.mrb[217].mxu1  ;;  %v10708_v34 = vadd.f32 %v2622_v63, %v1890_v33  ;;  %v4753_v63 = vrot.slane %v9705_v31, 1  ;;  %v3338_v33 = vsel %vm660_vm3, %v3333_v7, %v3337_v16 }
 0x29b   : > { %v2630_v20 = vpop.f32.mrb[218].mxu1  ;;  %v3343_v13 = vshll.u32 %v9705_v31, 16 }
 0x29c   : > { %11924 = vst [vmem:[#allocation71_spill] sm:$0xff] %v10708_v34  ;;  %9095 = vmatmul.mubr.msk.bf16.gmra.mrb[64].mxu0 %vm1217_vm2, %v3330_v10  ;;  %v8991_v47 = vpop.f32.mrb[219].mxu1  ;;  %v3339_v10 = vshrl.u32 %v9704_v48, 16  ;;  %v9706_v34 = vld [vmem:[%s9826_s23 + $0x88] sm:$0xff]  }
 0x29d   : > { %9098 = vmatprep.mubr.msk.bf16.mxu0 %vm9772_vm1, %v11890_v4 }
 0x29e   : > { %9377 = vmatmul.mubr.msk.bf16.gmra.mrb[68].mxu1 %vm1217_vm2, %v4752_v9  ;;  %v4754_v9 = vsel %vm4725_vm4, %v4751_v43, %v4753_v63 }
 0x29f   : > { %v1895_v39 = vpop.f32.mrb[216].mxu0  ;;  %9380 = vmatprep.mubr.msk.bf16.mxu1 %vm9772_vm1, %v11890_v4 }
 0x2a0   : > { %v8712_v0 = vpop.f32.mrb[217].mxu0  ;;  %v10718_v49 = vadd.f32 %v2627_v21, %v1895_v39  ;;  %v3341_v21 = vor.u32 %v3339_v10, %v3337_v16  ;;  %v3345_v39 = vrot.slane %v3343_v13, 1 }
 0x2a1   : > { %v1898_v29 = vpop.f32.mrb[218].mxu0  ;;  %v2635_v47 = vpop.f32.mrb[220].mxu1 }
 0x2a2   : > { %11925 = vst [vmem:[#allocation72_spill] sm:$0xff] %v10718_v49  ;;  %v8713_v60 = vpop.f32.mrb[219].mxu0  ;;  %v8994_v24 = vpop.f32.mrb[221].mxu1  ;;  %v10721_v58 = vadd.f32 %v2630_v20, %v1898_v29  ;;  %v4755_v20 = vrot.slane %v9706_v34, 1  ;;  %v3346_v29 = vsel %vm660_vm3, %v3341_v21, %v3345_v39 }
 0x2a3   : > { %v2638_v18 = vpop.f32.mrb[222].mxu1  ;;  %v3351_v60 = vshll.u32 %v9706_v34, 16 }
 0x2a4   : > { %11926 = vst [vmem:[#allocation73_spill] sm:$0xff] %v10721_v58  ;;  %9099 = vmatmul.mubr.msk.bf16.gmra.mrb[68].mxu0 %vm1217_vm2, %v3338_v33  ;;  %v8995_v37 = vpop.f32.mrb[223].mxu1  ;;  %v3347_v33 = vshrl.u32 %v9705_v31, 16  ;;  %v9707_v58 = vld [vmem:[%s9826_s23 + $0x90] sm:$0xff]  }
 0x2a5   : > { %9102 = vmatprep.mubr.msk.bf16.mxu0 %vm9772_vm1, %v11890_v4 }
 0x2a6   : > { %9381 = vmatmul.mubr.msk.bf16.gmra.mrb[72].mxu1 %vm1217_vm2, %v4754_v9  ;;  %v4756_v9 = vsel %vm4725_vm4, %v4753_v63, %v4755_v20 }
 0x2a7   : > { %v1903_v48 = vpop.f32.mrb[220].mxu0  ;;  %9384 = vmatprep.mubr.msk.bf16.mxu1 %vm9772_vm1, %v11890_v4 }
 0x2a8   : > { %v8716_v7 = vpop.f32.mrb[221].mxu0  ;;  %v10731_v0 = vadd.f32 %v2635_v47, %v1903_v48  ;;  %v3349_v47 = vor.u32 %v3347_v33, %v3345_v39  ;;  %v3353_v48 = vrot.slane %v3351_v60, 1 }
 0x2a9   : > { %v1906_v43 = vpop.f32.mrb[222].mxu0  ;;  %v2643_v37 = vpop.f32.mrb[224].mxu1 }
 0x2aa   : > { %11927 = vst [vmem:[#allocation74_spill] sm:$0xff] %v10731_v0  ;;  %v8717_v24 = vpop.f32.mrb[223].mxu0  ;;  %v8998_v16 = vpop.f32.mrb[225].mxu1  ;;  %v10734_v10 = vadd.f32 %v2638_v18, %v1906_v43  ;;  %v4757_v18 = vrot.slane %v9707_v58, 1  ;;  %v3354_v43 = vsel %vm660_vm3, %v3349_v47, %v3353_v48 }
 0x2ab   : > { %v2646_v13 = vpop.f32.mrb[226].mxu1  ;;  %v3359_v24 = vshll.u32 %v9707_v58, 16 }
 0x2ac   : > { %11928 = vst [vmem:[#allocation75_spill] sm:$0xff] %v10734_v10  ;;  %9103 = vmatmul.mubr.msk.bf16.gmra.mrb[72].mxu0 %vm1217_vm2, %v3346_v29  ;;  %v8999_v49 = vpop.f32.mrb[227].mxu1  ;;  %v3355_v29 = vshrl.u32 %v9706_v34, 16  ;;  %v9708_v10 = vld [vmem:[%s9826_s23 + $0x98] sm:$0xff]  }
 0x2ad   : > { %9106 = vmatprep.mubr.msk.bf16.mxu0 %vm9772_vm1, %v11890_v4 }
 0x2ae   : > { %9385 = vmatmul.mubr.msk.bf16.gmra.mrb[76].mxu1 %vm1217_vm2, %v4756_v9  ;;  %v4758_v9 = vsel %vm4725_vm4, %v4755_v20, %v4757_v18 }
 0x2af   : > { %v1911_v31 = vpop.f32.mrb[224].mxu0  ;;  %9388 = vmatprep.mubr.msk.bf16.mxu1 %vm9772_vm1, %v11890_v4 }
 0x2b0   : > { %v8720_v21 = vpop.f32.mrb[225].mxu0  ;;  %v10744_v7 = vadd.f32 %v2643_v37, %v1911_v31  ;;  %v3357_v37 = vor.u32 %v3355_v29, %v3353_v48  ;;  %v3361_v31 = vrot.slane %v3359_v24, 1 }
 0x2b1   : > { %v1914_v63 = vpop.f32.mrb[226].mxu0  ;;  %v2651_v49 = vpop.f32.mrb[228].mxu1 }
 0x2b2   : > { %11929 = vst [vmem:[#allocation76_spill] sm:$0xff] %v10744_v7  ;;  %v8721_v16 = vpop.f32.mrb[227].mxu0  ;;  %v9002_v39 = vpop.f32.mrb[229].mxu1  ;;  %v10747_v33 = vadd.f32 %v2646_v13, %v1914_v63  ;;  %v4759_v13 = vrot.slane %v9708_v10, 1  ;;  %v3362_v63 = vsel %vm660_vm3, %v3357_v37, %v3361_v31 }
 0x2b3   : > { %v2654_v60 = vpop.f32.mrb[230].mxu1  ;;  %v3367_v16 = vshll.u32 %v9708_v10, 16 }
 0x2b4   : > { %11930 = vst [vmem:[#allocation77_spill] sm:$0xff] %v10747_v33  ;;  %9107 = vmatmul.mubr.msk.bf16.gmra.mrb[76].mxu0 %vm1217_vm2, %v3354_v43  ;;  %v9003_v0 = vpop.f32.mrb[231].mxu1  ;;  %v3363_v43 = vshrl.u32 %v9707_v58, 16  ;;  %v9709_v33 = vld [vmem:[%s9826_s23 + $0xa0] sm:$0xff]  }
 0x2b5   : > { %9110 = vmatprep.mubr.msk.bf16.mxu0 %vm9772_vm1, %v11890_v4 }
 0x2b6   : > { %9389 = vmatmul.mubr.msk.bf16.gmra.mrb[80].mxu1 %vm1217_vm2, %v4758_v9  ;;  %v4760_v9 = vsel %vm4725_vm4, %v4757_v18, %v4759_v13 }
 0x2b7   : > { %v1919_v34 = vpop.f32.mrb[228].mxu0  ;;  %9392 = vmatprep.mubr.msk.bf16.mxu1 %vm9772_vm1, %v11890_v4 }
 0x2b8   : > { %v8724_v47 = vpop.f32.mrb[229].mxu0  ;;  %v10757_v21 = vadd.f32 %v2651_v49, %v1919_v34  ;;  %v3365_v49 = vor.u32 %v3363_v43, %v3361_v31  ;;  %v3369_v34 = vrot.slane %v3367_v16, 1 }
 0x2b9   : > { %v1922_v20 = vpop.f32.mrb[230].mxu0  ;;  %v2659_v0 = vpop.f32.mrb[232].mxu1 }
 0x2ba   : > { %11931 = vst [vmem:[#allocation78_spill] sm:$0xff] %v10757_v21  ;;  %v8725_v39 = vpop.f32.mrb[231].mxu0  ;;  %v9006_v48 = vpop.f32.mrb[233].mxu1  ;;  %v10760_v29 = vadd.f32 %v2654_v60, %v1922_v20  ;;  %v4761_v60 = vrot.slane %v9709_v33, 1  ;;  %v3370_v20 = vsel %vm660_vm3, %v3365_v49, %v3369_v34 }
 0x2bb   : > { %v2662_v24 = vpop.f32.mrb[234].mxu1  ;;  %v3375_v39 = vshll.u32 %v9709_v33, 16 }
 0x2bc   : > { %11932 = vst [vmem:[#allocation79_spill] sm:$0xff] %v10760_v29  ;;  %9111 = vmatmul.mubr.msk.bf16.gmra.mrb[80].mxu0 %vm1217_vm2, %v3362_v63  ;;  %v9007_v7 = vpop.f32.mrb[235].mxu1  ;;  %v3371_v63 = vshrl.u32 %v9708_v10, 16  ;;  %v9710_v29 = vld [vmem:[%s9826_s23 + $0xa8] sm:$0xff]  }
 0x2bd   : > { %9114 = vmatprep.mubr.msk.bf16.mxu0 %vm9772_vm1, %v11890_v4 }
 0x2be   : > { %9393 = vmatmul.mubr.msk.bf16.gmra.mrb[84].mxu1 %vm1217_vm2, %v4760_v9  ;;  %v4762_v9 = vsel %vm4725_vm4, %v4759_v13, %v4761_v60 }
 0x2bf   : > { %v1927_v58 = vpop.f32.mrb[232].mxu0  ;;  %9396 = vmatprep.mubr.msk.bf16.mxu1 %vm9772_vm1, %v11890_v4 }
 0x2c0   : > { %v8728_v37 = vpop.f32.mrb[233].mxu0  ;;  %v10770_v47 = vadd.f32 %v2659_v0, %v1927_v58  ;;  %v3373_v0 = vor.u32 %v3371_v63, %v3369_v34  ;;  %v3377_v58 = vrot.slane %v3375_v39, 1 }
 0x2c1   : > { %v1930_v18 = vpop.f32.mrb[234].mxu0  ;;  %v2667_v7 = vpop.f32.mrb[236].mxu1 }
 0x2c2   : > { %11933 = vst [vmem:[#allocation80_spill] sm:$0xff] %v10770_v47  ;;  %v8729_v48 = vpop.f32.mrb[235].mxu0  ;;  %v9010_v31 = vpop.f32.mrb[237].mxu1  ;;  %v10773_v43 = vadd.f32 %v2662_v24, %v1930_v18  ;;  %v4763_v24 = vrot.slane %v9710_v29, 1  ;;  %v3378_v18 = vsel %vm660_vm3, %v3373_v0, %v3377_v58 }
 0x2c3   : > { %v2670_v16 = vpop.f32.mrb[238].mxu1  ;;  %v3383_v48 = vshll.u32 %v9710_v29, 16 }
 0x2c4   : > { %11934 = vst [vmem:[#allocation81_spill] sm:$0xff] %v10773_v43  ;;  %9115 = vmatmul.mubr.msk.bf16.gmra.mrb[84].mxu0 %vm1217_vm2, %v3370_v20  ;;  %v9011_v21 = vpop.f32.mrb[239].mxu1  ;;  %v3379_v20 = vshrl.u32 %v9709_v33, 16  ;;  %v9711_v43 = vld [vmem:[%s9826_s23 + $0xb0] sm:$0xff]  }
 0x2c5   : > { %9118 = vmatprep.mubr.msk.bf16.mxu0 %vm9772_vm1, %v11890_v4 }
 0x2c6   : > { %9397 = vmatmul.mubr.msk.bf16.gmra.mrb[88].mxu1 %vm1217_vm2, %v4762_v9  ;;  %v4764_v9 = vsel %vm4725_vm4, %v4761_v60, %v4763_v24 }
 0x2c7   : > { %v1935_v10 = vpop.f32.mrb[236].mxu0  ;;  %9400 = vmatprep.mubr.msk.bf16.mxu1 %vm9772_vm1, %v11890_v4 }
 0x2c8   : > { %v8732_v49 = vpop.f32.mrb[237].mxu0  ;;  %v10783_v37 = vadd.f32 %v2667_v7, %v1935_v10  ;;  %v3381_v7 = vor.u32 %v3379_v20, %v3377_v58  ;;  %v3385_v10 = vrot.slane %v3383_v48, 1 }
 0x2c9   : > { %v1938_v13 = vpop.f32.mrb[238].mxu0  ;;  %v2675_v21 = vpop.f32.mrb[240].mxu1 }
 0x2ca   : > { %11935 = vst [vmem:[#allocation82_spill] sm:$0xff] %v10783_v37  ;;  %v8733_v31 = vpop.f32.mrb[239].mxu0  ;;  %v9014_v34 = vpop.f32.mrb[241].mxu1  ;;  %v10786_v63 = vadd.f32 %v2670_v16, %v1938_v13  ;;  %v4765_v16 = vrot.slane %v9711_v43, 1  ;;  %v3386_v13 = vsel %vm660_vm3, %v3381_v7, %v3385_v10 }
 0x2cb   : > { %v2678_v39 = vpop.f32.mrb[242].mxu1  ;;  %v3391_v31 = vshll.u32 %v9711_v43, 16 }
 0x2cc   : > { %11936 = vst [vmem:[#allocation83_spill] sm:$0xff] %v10786_v63  ;;  %9119 = vmatmul.mubr.msk.bf16.gmra.mrb[88].mxu0 %vm1217_vm2, %v3378_v18  ;;  %v9015_v47 = vpop.f32.mrb[243].mxu1  ;;  %v3387_v18 = vshrl.u32 %v9710_v29, 16  ;;  %v9712_v63 = vld [vmem:[%s9826_s23 + $0xb8] sm:$0xff]  }
 0x2cd   : > { %9122 = vmatprep.mubr.msk.bf16.mxu0 %vm9772_vm1, %v11890_v4 }
 0x2ce   : > { %9401 = vmatmul.mubr.msk.bf16.gmra.mrb[92].mxu1 %vm1217_vm2, %v4764_v9  ;;  %v4766_v9 = vsel %vm4725_vm4, %v4763_v24, %v4765_v16 }
 0x2cf   : > { %v1943_v33 = vpop.f32.mrb[240].mxu0  ;;  %9404 = vmatprep.mubr.msk.bf16.mxu1 %vm9772_vm1, %v11890_v4 }
 0x2d0   : > { %v8736_v0 = vpop.f32.mrb[241].mxu0  ;;  %v10796_v49 = vadd.f32 %v2675_v21, %v1943_v33  ;;  %v3389_v21 = vor.u32 %v3387_v18, %v3385_v10  ;;  %v3393_v33 = vrot.slane %v3391_v31, 1 }
 0x2d1   : > { %v1946_v60 = vpop.f32.mrb[242].mxu0  ;;  %v2683_v47 = vpop.f32.mrb[244].mxu1 }
 0x2d2   : > { %11937 = vst [vmem:[#allocation84_spill] sm:$0xff] %v10796_v49  ;;  %v8737_v34 = vpop.f32.mrb[243].mxu0  ;;  %v9018_v58 = vpop.f32.mrb[245].mxu1  ;;  %v10799_v20 = vadd.f32 %v2678_v39, %v1946_v60  ;;  %v4767_v39 = vrot.slane %v9712_v63, 1  ;;  %v3394_v60 = vsel %vm660_vm3, %v3389_v21, %v3393_v33 }
 0x2d3   : > { %v2686_v48 = vpop.f32.mrb[246].mxu1  ;;  %v3399_v34 = vshll.u32 %v9712_v63, 16 }
 0x2d4   : > { %11938 = vst [vmem:[#allocation85_spill] sm:$0xff] %v10799_v20  ;;  %9123 = vmatmul.mubr.msk.bf16.gmra.mrb[92].mxu0 %vm1217_vm2, %v3386_v13  ;;  %v9019_v37 = vpop.f32.mrb[247].mxu1  ;;  %v3395_v13 = vshrl.u32 %v9711_v43, 16  ;;  %v9713_v20 = vld [vmem:[%s9826_s23 + $0xc0] sm:$0xff]  }
 0x2d5   : > { %9126 = vmatprep.mubr.msk.bf16.mxu0 %vm9772_vm1, %v11890_v4 }
 0x2d6   : > { %9405 = vmatmul.mubr.msk.bf16.gmra.mrb[96].mxu1 %vm1217_vm2, %v4766_v9  ;;  %v4768_v9 = vsel %vm4725_vm4, %v4765_v16, %v4767_v39 }
 0x2d7   : > { %v1951_v29 = vpop.f32.mrb[244].mxu0  ;;  %9408 = vmatprep.mubr.msk.bf16.mxu1 %vm9772_vm1, %v11890_v4 }
 0x2d8   : > { %v8740_v7 = vpop.f32.mrb[245].mxu0  ;;  %v10809_v0 = vadd.f32 %v2683_v47, %v1951_v29  ;;  %v3397_v47 = vor.u32 %v3395_v13, %v3393_v33  ;;  %v3401_v29 = vrot.slane %v3399_v34, 1 }
 0x2d9   : > { %v1954_v24 = vpop.f32.mrb[246].mxu0  ;;  %v2691_v37 = vpop.f32.mrb[248].mxu1 }
 0x2da   : > { %11939 = vst [vmem:[#allocation86_spill] sm:$0xff] %v10809_v0  ;;  %v8741_v58 = vpop.f32.mrb[247].mxu0  ;;  %v9022_v10 = vpop.f32.mrb[249].mxu1  ;;  %v10812_v18 = vadd.f32 %v2686_v48, %v1954_v24  ;;  %v4769_v48 = vrot.slane %v9713_v20, 1  ;;  %v3402_v24 = vsel %vm660_vm3, %v3397_v47, %v3401_v29 }
 0x2db   : > { %v2694_v31 = vpop.f32.mrb[250].mxu1  ;;  %v3407_v58 = vshll.u32 %v9713_v20, 16 }
 0x2dc   : > { %11940 = vst [vmem:[#allocation87_spill] sm:$0xff] %v10812_v18  ;;  %9127 = vmatmul.mubr.msk.bf16.gmra.mrb[96].mxu0 %vm1217_vm2, %v3394_v60  ;;  %v9023_v49 = vpop.f32.mrb[251].mxu1  ;;  %v3403_v60 = vshrl.u32 %v9712_v63, 16  ;;  %v9714_v18 = vld [vmem:[%s9826_s23 + $0xc8] sm:$0xff]  }
 0x2dd   : > { %9130 = vmatprep.mubr.msk.bf16.mxu0 %vm9772_vm1, %v11890_v4 }
 0x2de   : > { %9409 = vmatmul.mubr.msk.bf16.gmra.mrb[100].mxu1 %vm1217_vm2, %v4768_v9  ;;  %v4770_v9 = vsel %vm4725_vm4, %v4767_v39, %v4769_v48 }
 0x2df   : > { %v1959_v43 = vpop.f32.mrb[248].mxu0  ;;  %9412 = vmatprep.mubr.msk.bf16.mxu1 %vm9772_vm1, %v11890_v4 }
 0x2e0   : > { %v8744_v21 = vpop.f32.mrb[249].mxu0  ;;  %v10822_v7 = vadd.f32 %v2691_v37, %v1959_v43  ;;  %v3405_v37 = vor.u32 %v3403_v60, %v3401_v29  ;;  %v3409_v43 = vrot.slane %v3407_v58, 1 }
 0x2e1   : > { %v1962_v16 = vpop.f32.mrb[250].mxu0  ;;  %v2699_v49 = vpop.f32.mrb[252].mxu1 }
 0x2e2   : > { %11941 = vst [vmem:[#allocation88_spill] sm:$0xff] %v10822_v7  ;;  %v8745_v10 = vpop.f32.mrb[251].mxu0  ;;  %v9026_v33 = vpop.f32.mrb[253].mxu1  ;;  %v10825_v13 = vadd.f32 %v2694_v31, %v1962_v16  ;;  %v4771_v31 = vrot.slane %v9714_v18, 1  ;;  %v3410_v16 = vsel %vm660_vm3, %v3405_v37, %v3409_v43 }
 0x2e3   : > { %v2702_v34 = vpop.f32.mrb[254].mxu1  ;;  %v3415_v10 = vshll.u32 %v9714_v18, 16 }
 0x2e4   : > { %11942 = vst [vmem:[#allocation89_spill] sm:$0xff] %v10825_v13  ;;  %9131 = vmatmul.mubr.msk.bf16.gmra.mrb[100].mxu0 %vm1217_vm2, %v3402_v24  ;;  %v9027_v0 = vpop.f32.mrb[255].mxu1  ;;  %v3411_v24 = vshrl.u32 %v9713_v20, 16  ;;  %v9715_v13 = vld [vmem:[%s9826_s23 + $0xd0] sm:$0xff]  }
 0x2e5   : > { %9134 = vmatprep.mubr.msk.bf16.mxu0 %vm9772_vm1, %v11890_v4 }
 0x2e6   : > { %9413 = vmatmul.mubr.msk.bf16.gmra.mrb[104].mxu1 %vm1217_vm2, %v4770_v9  ;;  %v4772_v9 = vsel %vm4725_vm4, %v4769_v48, %v4771_v31 }
 0x2e7   : > { %v1967_v63 = vpop.f32.mrb[252].mxu0  ;;  %9416 = vmatprep.mubr.msk.bf16.mxu1 %vm9772_vm1, %v11890_v4 }
 0x2e8   : > { %v8748_v47 = vpop.f32.mrb[253].mxu0  ;;  %v10835_v21 = vadd.f32 %v2699_v49, %v1967_v63  ;;  %v3413_v49 = vor.u32 %v3411_v24, %v3409_v43  ;;  %v3417_v63 = vrot.slane %v3415_v10, 1 }
 0x2e9   : > { %v1970_v39 = vpop.f32.mrb[254].mxu0  ;;  %v2707_v0 = vpop.f32.mrb[0].mxu1 }
 0x2ea   : > { %11943 = vst [vmem:[#allocation90_spill] sm:$0xff] %v10835_v21  ;;  %v8749_v33 = vpop.f32.mrb[255].mxu0  ;;  %v9030_v29 = vpop.f32.mrb[1].mxu1  ;;  %v10838_v60 = vadd.f32 %v2702_v34, %v1970_v39  ;;  %v4773_v34 = vrot.slane %v9715_v13, 1  ;;  %v3418_v39 = vsel %vm660_vm3, %v3413_v49, %v3417_v63 }
 0x2eb   : > { %v2710_v58 = vpop.f32.mrb[2].mxu1  ;;  %v3423_v33 = vshll.u32 %v9715_v13, 16 }
 0x2ec   : > { %11944 = vst [vmem:[#allocation91_spill] sm:$0xff] %v10838_v60  ;;  %9135 = vmatmul.mubr.msk.bf16.gmra.mrb[104].mxu0 %vm1217_vm2, %v3410_v16  ;;  %v9031_v7 = vpop.f32.mrb[3].mxu1  ;;  %v3419_v16 = vshrl.u32 %v9714_v18, 16  ;;  %v9716_v60 = vld [vmem:[%s9826_s23 + $0xd8] sm:$0xff]  }
 0x2ed   : > { %9138 = vmatprep.mubr.msk.bf16.mxu0 %vm9772_vm1, %v11890_v4 }
 0x2ee   : > { %9417 = vmatmul.mubr.msk.bf16.gmra.mrb[108].mxu1 %vm1217_vm2, %v4772_v9  ;;  %v4774_v9 = vsel %vm4725_vm4, %v4771_v31, %v4773_v34 }
 0x2ef   : > { %v1975_v20 = vpop.f32.mrb[0].mxu0  ;;  %9420 = vmatprep.mubr.msk.bf16.mxu1 %vm9772_vm1, %v11890_v4 }
 0x2f0   : > { %v8752_v37 = vpop.f32.mrb[1].mxu0  ;;  %v10848_v47 = vadd.f32 %v2707_v0, %v1975_v20  ;;  %v3421_v0 = vor.u32 %v3419_v16, %v3417_v63  ;;  %v3425_v20 = vrot.slane %v3423_v33, 1 }
 0x2f1   : > { %v1978_v48 = vpop.f32.mrb[2].mxu0  ;;  %v2715_v7 = vpop.f32.mrb[4].mxu1 }
 0x2f2   : > { %11945 = vst [vmem:[#allocation92_spill] sm:$0xff] %v10848_v47  ;;  %v8753_v29 = vpop.f32.mrb[3].mxu0  ;;  %v9034_v43 = vpop.f32.mrb[5].mxu1  ;;  %v10851_v24 = vadd.f32 %v2710_v58, %v1978_v48  ;;  %v4775_v58 = vrot.slane %v9716_v60, 1  ;;  %v3426_v48 = vsel %vm660_vm3, %v3421_v0, %v3425_v20 }
 0x2f3   : > { %v2718_v10 = vpop.f32.mrb[6].mxu1  ;;  %v3431_v29 = vshll.u32 %v9716_v60, 16 }
 0x2f4   : > { %11946 = vst [vmem:[#allocation93_spill] sm:$0xff] %v10851_v24  ;;  %9139 = vmatmul.mubr.msk.bf16.gmra.mrb[108].mxu0 %vm1217_vm2, %v3418_v39  ;;  %v9035_v21 = vpop.f32.mrb[7].mxu1  ;;  %v3427_v39 = vshrl.u32 %v9715_v13, 16  ;;  %v9717_v24 = vld [vmem:[%s9826_s23 + $0xe0] sm:$0xff]  }
 0x2f5   : > { %9142 = vmatprep.mubr.msk.bf16.mxu0 %vm9772_vm1, %v11890_v4 }
 0x2f6   : > { %9421 = vmatmul.mubr.msk.bf16.gmra.mrb[112].mxu1 %vm1217_vm2, %v4774_v9  ;;  %v4776_v9 = vsel %vm4725_vm4, %v4773_v34, %v4775_v58 }
 0x2f7   : > { %v1983_v18 = vpop.f32.mrb[4].mxu0  ;;  %9424 = vmatprep.mubr.msk.bf16.mxu1 %vm9772_vm1, %v11890_v4 }
 0x2f8   : > { %v8756_v49 = vpop.f32.mrb[5].mxu0  ;;  %v10861_v37 = vadd.f32 %v2715_v7, %v1983_v18  ;;  %v3429_v7 = vor.u32 %v3427_v39, %v3425_v20  ;;  %v3433_v18 = vrot.slane %v3431_v29, 1 }
 0x2f9   : > { %v1986_v31 = vpop.f32.mrb[6].mxu0  ;;  %v2723_v21 = vpop.f32.mrb[8].mxu1 }
 0x2fa   : > { %11947 = vst [vmem:[#allocation94_spill] sm:$0xff] %v10861_v37  ;;  %v8757_v43 = vpop.f32.mrb[7].mxu0  ;;  %v9038_v63 = vpop.f32.mrb[9].mxu1  ;;  %v10864_v16 = vadd.f32 %v2718_v10, %v1986_v31  ;;  %v4777_v10 = vrot.slane %v9717_v24, 1  ;;  %v3434_v31 = vsel %vm660_vm3, %v3429_v7, %v3433_v18 }
 0x2fb   : > { %v2726_v33 = vpop.f32.mrb[10].mxu1  ;;  %v3439_v43 = vshll.u32 %v9717_v24, 16 }
 0x2fc   : > { %11948 = vst [vmem:[#allocation95_spill] sm:$0xff] %v10864_v16  ;;  %9143 = vmatmul.mubr.msk.bf16.gmra.mrb[112].mxu0 %vm1217_vm2, %v3426_v48  ;;  %v9039_v47 = vpop.f32.mrb[11].mxu1  ;;  %v3435_v48 = vshrl.u32 %v9716_v60, 16  ;;  %v9718_v16 = vld [vmem:[%s9826_s23 + $0xe8] sm:$0xff]  }
 0x2fd   : > { %9146 = vmatprep.mubr.msk.bf16.mxu0 %vm9772_vm1, %v11890_v4 }
 0x2fe   : > { %9425 = vmatmul.mubr.msk.bf16.gmra.mrb[116].mxu1 %vm1217_vm2, %v4776_v9  ;;  %v4778_v9 = vsel %vm4725_vm4, %v4775_v58, %v4777_v10 }
 0x2ff   : > { %v1991_v13 = vpop.f32.mrb[8].mxu0  ;;  %9428 = vmatprep.mubr.msk.bf16.mxu1 %vm9772_vm1, %v11890_v4 }
 0x300   : > { %v8760_v0 = vpop.f32.mrb[9].mxu0  ;;  %v10874_v49 = vadd.f32 %v2723_v21, %v1991_v13  ;;  %v3437_v21 = vor.u32 %v3435_v48, %v3433_v18  ;;  %v3441_v13 = vrot.slane %v3439_v43, 1 }
 0x301   : > { %v1994_v34 = vpop.f32.mrb[10].mxu0  ;;  %v2731_v47 = vpop.f32.mrb[12].mxu1 }
 0x302   : > { %11949 = vst [vmem:[#allocation96_spill] sm:$0xff] %v10874_v49  ;;  %v8761_v63 = vpop.f32.mrb[11].mxu0  ;;  %v9042_v20 = vpop.f32.mrb[13].mxu1  ;;  %v10877_v39 = vadd.f32 %v2726_v33, %v1994_v34  ;;  %v4779_v33 = vrot.slane %v9718_v16, 1  ;;  %v3442_v34 = vsel %vm660_vm3, %v3437_v21, %v3441_v13 }
 0x303   : > { %v2734_v29 = vpop.f32.mrb[14].mxu1  ;;  %v3447_v63 = vshll.u32 %v9718_v16, 16 }
 0x304   : > { %11950 = vst [vmem:[#allocation97_spill] sm:$0xff] %v10877_v39  ;;  %9147 = vmatmul.mubr.msk.bf16.gmra.mrb[116].mxu0 %vm1217_vm2, %v3434_v31  ;;  %v9043_v37 = vpop.f32.mrb[15].mxu1  ;;  %v3443_v31 = vshrl.u32 %v9717_v24, 16  ;;  %v9719_v39 = vld [vmem:[%s9826_s23 + $0xf0] sm:$0xff]  }
 0x305   : > { %9150 = vmatprep.mubr.msk.bf16.mxu0 %vm9772_vm1, %v11890_v4 }
 0x306   : > { %9429 = vmatmul.mubr.msk.bf16.gmra.mrb[120].mxu1 %vm1217_vm2, %v4778_v9  ;;  %v4780_v9 = vsel %vm4725_vm4, %v4777_v10, %v4779_v33 }
 0x307   : > { %v1999_v60 = vpop.f32.mrb[12].mxu0  ;;  %9432 = vmatprep.mubr.msk.bf16.mxu1 %vm9772_vm1, %v11890_v4 }
 0x308   : > { %v8764_v7 = vpop.f32.mrb[13].mxu0  ;;  %v10887_v0 = vadd.f32 %v2731_v47, %v1999_v60  ;;  %v3445_v47 = vor.u32 %v3443_v31, %v3441_v13  ;;  %v3449_v60 = vrot.slane %v3447_v63, 1 }
 0x309   : > { %v2002_v58 = vpop.f32.mrb[14].mxu0  ;;  %v2739_v37 = vpop.f32.mrb[16].mxu1 }
 0x30a   : > { %11951 = vst [vmem:[#allocation98_spill] sm:$0xff] %v10887_v0  ;;  %v8765_v20 = vpop.f32.mrb[15].mxu0  ;;  %v9046_v18 = vpop.f32.mrb[17].mxu1  ;;  %v10890_v48 = vadd.f32 %v2734_v29, %v2002_v58  ;;  %v4781_v29 = vrot.slane %v9719_v39, 1  ;;  %v3450_v58 = vsel %vm660_vm3, %v3445_v47, %v3449_v60 }
 0x30b   : > { %v2742_v43 = vpop.f32.mrb[18].mxu1  ;;  %v3455_v20 = vshll.u32 %v9719_v39, 16 }
 0x30c   : > { %11952 = vst [vmem:[#allocation99_spill] sm:$0xff] %v10890_v48  ;;  %9151 = vmatmul.mubr.msk.bf16.gmra.mrb[120].mxu0 %vm1217_vm2, %v3442_v34  ;;  %v9047_v49 = vpop.f32.mrb[19].mxu1  ;;  %v3451_v34 = vshrl.u32 %v9718_v16, 16  ;;  %v4782_v63 = vsel %vm4725_vm4, %v4779_v33, %v4781_v29  ;;  %v10905_v43 = vld [vmem:[%s9826_s23 + $0xf8] sm:$0xff]  }
 0x30d   : > { %9154 = vmatprep.mubr.msk.bf16.mxu0 %vm9772_vm1, %v11890_v4  ;;  %v4783_v16 = vrot.slane %v10905_v43, 1 }
 0x30e   : > { %9433 = vmatmul.mubr.msk.bf16.gmra.mrb[124].mxu1 %vm1217_vm2, %v4780_v9 }
 0x30f   : > { %v2007_v24 = vpop.f32.mrb[16].mxu0  ;;  %9436 = vmatprep.mubr.msk.bf16.mxu1 %vm9772_vm1, %v11890_v4 }
 0x310   : > { %v8768_v21 = vpop.f32.mrb[17].mxu0  ;;  %v10900_v7 = vadd.f32 %v2739_v37, %v2007_v24  ;;  %v3453_v37 = vor.u32 %v3451_v34, %v3449_v60  ;;  %v3457_v24 = vrot.slane %v3455_v20, 1  ;;  %v3459_v20 = vshrl.u32 %v9719_v39, 16 }
 0x311   : > { %v2010_v10 = vpop.f32.mrb[18].mxu0  ;;  %v5112_v49 = vpop.f32.mrb[20].mxu1 }
 0x312   : > { %11953 = vst [vmem:[#allocation100_spill] sm:$0xff] %v10900_v7  ;;  %v8769_v18 = vpop.f32.mrb[19].mxu0  ;;  %v9330_v13 = vpop.f32.mrb[21].mxu1  ;;  %v10918_v10 = vld [vmem:[%s11850_s2] ss:$0 sm:$0xff]  ;;  %v3458_v60 = vsel %vm660_vm3, %v3453_v37, %v3457_v24  ;;  %v3461_v39 = vor.u32 %v3459_v20, %v3457_v24 }
 0x313   : > { %v5115_v31 = vpop.f32.mrb[22].mxu1  ;;  %v3463_v18 = vshll.u32 %v10905_v43, 16 }
 0x314   : > { %9155 = vmatmul.mubr.msk.bf16.gmra.mrb[124].mxu0 %vm1217_vm2, %v3450_v58  ;;  %v9331_v9 = vpop.f32.mrb[23].mxu1 }
 0x315   : > { %9158 = vmatprep.mubr.msk.bf16.mxu0 %vm9772_vm1, %v11890_v4 }
 0x316   : > { %9437 = vmatmul.mubr.msk.bf16.gmra.mrb[128].mxu1 %vm1217_vm2, %v4782_v63 }
 0x317   : > { %v4031_v47 = vpop.f32.mrb[20].mxu0  ;;  %9440 = vmatprep.mubr.msk.bf16.mxu1 %vm9772_vm1, %v11890_v4 }
 0x318   : > { %v4581_v33 = vadd.f32 %v4031_v47, %v10055_v59  ;;  %v9052_v21 = vpop.f32.mrb[21].mxu0  ;;  %v4784_v47 = vsel %vm4725_vm4, %v4781_v29, %v4783_v16 }
 0x319   : > { %v4034_v58 = vpop.f32.mrb[22].mxu0  ;;  %v5120_v34 = vpop.f32.mrb[24].mxu1  ;;  %v10925_v21 = vld [vmem:[%s9826_s23 + $0x100] sm:$0xff]  }
 0x31a   : > { %v5662_v13 = vadd.f32 %v5112_v49, %v4581_v33  ;;  %v4582_v63 = vadd.f32 %v4034_v58, %v10058_v3  ;;  %v9053_v9 = vpop.f32.mrb[23].mxu0  ;;  %v9334_v7 = vpop.f32.mrb[25].mxu1  ;;  %v3465_v49 = vrot.slane %v3463_v18, 1 }
 0x31b   : > { %v5123_v59 = vpop.f32.mrb[26].mxu1  ;;  %v4785_v7 = vrot.slane %v10925_v21, 1 }
 0x31c   : > { %v5806_v48 = vadd.f32 %v10918_v10, %v5662_v13  ;;  %v5663_v0 = vadd.f32 %v5115_v31, %v4582_v63  ;;  %9159 = vmatmul.mubr.msk.bf16.gmra.mrb[128].mxu0 %vm1217_vm2, %v3458_v60  ;;  %v9335_v37 = vpop.f32.mrb[27].mxu1  ;;  %v3466_v20 = vsel %vm660_vm3, %v3461_v39, %v3465_v49  ;;  %v3471_v13 = vshll.u32 %v10925_v21, 16 }
 0x31d   : > { %9162 = vmatprep.mubr.msk.bf16.mxu0 %vm9772_vm1, %v11890_v4  ;;  %v4786_v52 = vsel %vm4725_vm4, %v4783_v16, %v4785_v7 }
 0x31e   : > { %v6080_v33 = vmul.f32 0.01, %v5806_v48  ;;  %v5807_v3 = vadd.f32 %v10918_v10, %v5663_v0  ;;  %9441 = vmatmul.mubr.msk.bf16.gmra.mrb[132].mxu1 %vm1217_vm2, %v4784_v47  ;;  %vm5943_vm5 = vcmp.ge.f32.partialorder %v5806_v48, 0.0  ;;  %v3467_v0 = vshrl.u32 %v10905_v43, 16  ;;  %v10949_v43 = vld [vmem:[%s9826_s23 + $0x108] sm:$0xff]  }
 0x31f   : > { %v4039_v29 = vpop.f32.mrb[24].mxu0  ;;  %9444 = vmatprep.mubr.msk.bf16.mxu1 %vm9772_vm1, %v11890_v4 }
 0x320   : > { %vm5944_vm6 = vcmp.ge.f32.partialorder %v5807_v3, 0.0  ;;  %v6081_v31 = vmul.f32 0.01, %v5807_v3  ;;  %v4583_v58 = vadd.f32 %v4039_v29, %v10067_v12  ;;  %v9056_v60 = vpop.f32.mrb[25].mxu0  ;;  %v6217_v63 = vsel %vm5943_vm5, %v5806_v48, %v6080_v33 }
 0x321   : > { %v4042_v24 = vpop.f32.mrb[26].mxu0  ;;  %v5128_v18 = vpop.f32.mrb[28].mxu1 }
 0x322   : > { %v6218_v9 = vsel %vm5944_vm6, %v5807_v3, %v6081_v31  ;;  %v5664_v47 = vadd.f32 %v5120_v34, %v4583_v58  ;;  %v4584_v12 = vadd.f32 %v4042_v24, %v10070_v19  ;;  %v9057_v37 = vpop.f32.mrb[27].mxu0  ;;  %v9338_v29 = vpop.f32.mrb[29].mxu1  ;;  %v3469_v34 = vor.u32 %v3467_v0, %v3465_v49 }
 0x323   : > { %v7808_v60 = vpack.c.bf16 %v6218_v9, %v6217_v63  ;;  %v5131_v39 = vpop.f32.mrb[30].mxu1  ;;  %v3473_v19 = vrot.slane %v3471_v13, 1  ;;  %v3475_v13 = vshrl.u32 %v10925_v21, 16 }
 0x324   : > { %v5808_v48 = vadd.f32 %v10918_v10, %v5664_v47  ;;  %v5665_v33 = vadd.f32 %v5123_v59, %v4584_v12  ;;  %9163 = vmatmul.mubr.msk.bf16.gmra.mrb[132].mxu0 %vm1217_vm2, %v3466_v20  ;;  %v9339_v5 = vpop.f32.mrb[31].mxu1  ;;  %v4787_v59 = vrot.slane %v10949_v43, 1 }
 0x325   : > { %7809 = vst [vmem:[%s10944_s4] sm:$0xff] %v7808_v60   ;;  %9166 = vmatprep.mubr.msk.bf16.mxu0 %vm9772_vm1, %v11890_v4  ;;  %v3474_v20 = vsel %vm660_vm3, %v3469_v34, %v3473_v19 }
 0x326   : > { %v6082_v3 = vmul.f32 0.01, %v5808_v48  ;;  %v5809_v31 = vadd.f32 %v10918_v10, %v5665_v33  ;;  %9445 = vmatmul.mubr.msk.bf16.gmra.mrb[136].mxu1 %vm1217_vm2, %v4786_v52  ;;  %vm5945_vm7 = vcmp.ge.f32.partialorder %v5808_v48, 0.0  ;;  %v3479_v52 = vshll.u32 %v10949_v43, 16 }
 0x327   : > { %v4047_v16 = vpop.f32.mrb[28].mxu0  ;;  %9448 = vmatprep.mubr.msk.bf16.mxu1 %vm9772_vm1, %v11890_v4  ;;  %v4788_v33 = vsel %vm4725_vm4, %v4785_v7, %v4787_v59 }
 0x328   : > { %vm5946_vm8 = vcmp.ge.f32.partialorder %v5809_v31, 0.0  ;;  %v6083_v5 = vmul.f32 0.01, %v5809_v31  ;;  %v4585_v58 = vadd.f32 %v4047_v16, %v10079_v28  ;;  %v9060_v24 = vpop.f32.mrb[29].mxu0  ;;  %v6219_v63 = vsel %vm5945_vm7, %v5808_v48, %v6082_v3  ;;  %v10968_v16 = vld [vmem:[%s9826_s23 + $0x110] sm:$0xff]  }
 0x329   : > { %v4050_v49 = vpop.f32.mrb[30].mxu0  ;;  %v5136_v0 = vpop.f32.mrb[32].mxu1 }
 0x32a   : > { %v6220_v9 = vsel %vm5946_vm8, %v5809_v31, %v6083_v5  ;;  %v5666_v47 = vadd.f32 %v5128_v18, %v4585_v58  ;;  %v4586_v12 = vadd.f32 %v4050_v49, %v10082_v35  ;;  %v9061_v37 = vpop.f32.mrb[31].mxu0  ;;  %v9342_v29 = vpop.f32.mrb[33].mxu1  ;;  %v3477_v18 = vor.u32 %v3475_v13, %v3473_v19 }
 0x32b   : > { %v7813_v60 = vpack.c.bf16 %v6220_v9, %v6219_v63  ;;  %v5139_v28 = vpop.f32.mrb[34].mxu1  ;;  %v3481_v35 = vrot.slane %v3479_v52, 1  ;;  %v3483_v13 = vshrl.u32 %v10949_v43, 16  ;;  %v3487_v52 = vshll.u32 %v10968_v16, 16 }
 0x32c   : > { %v5810_v34 = vadd.f32 %v10918_v10, %v5666_v47  ;;  %v5667_v24 = vadd.f32 %v5131_v39, %v4586_v12  ;;  %9167 = vmatmul.mubr.msk.bf16.gmra.mrb[136].mxu0 %vm1217_vm2, %v3474_v20  ;;  %v9343_v21 = vpop.f32.mrb[35].mxu1  ;;  %v4789_v39 = vrot.slane %v10968_v16, 1 }
 0x32d   : > { %8145 = vst [vmem:[%s10944_s4 + $0x8] sm:$0xff] %v7813_v60   ;;  %9170 = vmatprep.mubr.msk.bf16.mxu0 %vm9772_vm1, %v11890_v4  ;;  %v3482_v49 = vsel %vm660_vm3, %v3477_v18, %v3481_v35 }
 0x32e   : > { %v6084_v48 = vmul.f32 0.01, %v5810_v34  ;;  %v5811_v3 = vadd.f32 %v10918_v10, %v5667_v24  ;;  %9449 = vmatmul.mubr.msk.bf16.gmra.mrb[140].mxu1 %vm1217_vm2, %v4788_v33  ;;  %vm5947_vm9 = vcmp.ge.f32.partialorder %v5810_v34, 0.0  ;;  %v4790_v33 = vsel %vm4725_vm4, %v4787_v59, %v4789_v39  ;;  %v10987_v24 = vld [vmem:[%s9826_s23 + $0x118] sm:$0xff]  }
 0x32f   : > { %v4055_v7 = vpop.f32.mrb[32].mxu0  ;;  %9452 = vmatprep.mubr.msk.bf16.mxu1 %vm9772_vm1, %v11890_v4 }
 0x330   : > { %vm5948_vm10 = vcmp.ge.f32.partialorder %v5811_v3, 0.0  ;;  %v6085_v31 = vmul.f32 0.01, %v5811_v3  ;;  %v4587_v5 = vadd.f32 %v4055_v7, %v10091_v44  ;;  %v9064_v58 = vpop.f32.mrb[33].mxu0  ;;  %v6221_v63 = vsel %vm5947_vm9, %v5810_v34, %v6084_v48 }
 0x331   : > { %v4058_v19 = vpop.f32.mrb[34].mxu0  ;;  %v5144_v20 = vpop.f32.mrb[36].mxu1 }
 0x332   : > { %v6222_v9 = vsel %vm5948_vm10, %v5811_v3, %v6085_v31  ;;  %v5668_v47 = vadd.f32 %v5136_v0, %v4587_v5  ;;  %v4588_v12 = vadd.f32 %v4058_v19, %v10094_v51  ;;  %v9065_v37 = vpop.f32.mrb[35].mxu0  ;;  %v9346_v29 = vpop.f32.mrb[37].mxu1  ;;  %v3485_v0 = vor.u32 %v3483_v13, %v3481_v35 }
 0x333   : > { %v7818_v60 = vpack.c.bf16 %v6222_v9, %v6221_v63  ;;  %v5147_v44 = vpop.f32.mrb[38].mxu1  ;;  %v3489_v51 = vrot.slane %v3487_v52, 1  ;;  %v3491_v19 = vshrl.u32 %v10968_v16, 16 }
 0x334   : > { %v5812_v21 = vadd.f32 %v10918_v10, %v5668_v47  ;;  %v5669_v18 = vadd.f32 %v5139_v28, %v4588_v12  ;;  %9171 = vmatmul.mubr.msk.bf16.gmra.mrb[140].mxu0 %vm1217_vm2, %v3482_v49  ;;  %v9347_v43 = vpop.f32.mrb[39].mxu1  ;;  %v4791_v28 = vrot.slane %v10987_v24, 1  ;;  %v3495_v49 = vshll.u32 %v10987_v24, 16 }
 0x335   : > { %8146 = vst [vmem:[%s10944_s4 + $0x10] sm:$0xff] %v7818_v60   ;;  %9174 = vmatprep.mubr.msk.bf16.mxu0 %vm9772_vm1, %v11890_v4  ;;  %v3490_v5 = vsel %vm660_vm3, %v3485_v0, %v3489_v51  ;;  %v11006_v60 = vld [vmem:[%s9826_s23 + $0x120] sm:$0xff]  }
 0x336   : > { %v6086_v34 = vmul.f32 0.01, %v5812_v21  ;;  %v5813_v48 = vadd.f32 %v10918_v10, %v5669_v18  ;;  %9453 = vmatmul.mubr.msk.bf16.gmra.mrb[144].mxu1 %vm1217_vm2, %v4790_v33  ;;  %vm5949_vm11 = vcmp.ge.f32.partialorder %v5812_v21, 0.0  ;;  %v4792_v29 = vsel %vm4725_vm4, %v4789_v39, %v4791_v28 }
 0x337   : > { %v4063_v59 = vpop.f32.mrb[36].mxu0  ;;  %9456 = vmatprep.mubr.msk.bf16.mxu1 %vm9772_vm1, %v11890_v4 }
 0x338   : > { %vm5950_vm12 = vcmp.ge.f32.partialorder %v5813_v48, 0.0  ;;  %v6087_v3 = vmul.f32 0.01, %v5813_v48  ;;  %v4589_v7 = vadd.f32 %v4063_v59, %v10103_v61  ;;  %v9068_v31 = vpop.f32.mrb[37].mxu0  ;;  %v6223_v13 = vsel %vm5949_vm11, %v5812_v21, %v6086_v34 }
 0x339   : > { %v4066_v35 = vpop.f32.mrb[38].mxu0  ;;  %v5152_v58 = vpop.f32.mrb[40].mxu1  ;;  %v3503_v31 = vshll.u32 %v11006_v60, 16 }
 0x33a   : > { %v6224_v52 = vsel %vm5950_vm12, %v5813_v48, %v6087_v3  ;;  %v5670_v63 = vadd.f32 %v5144_v20, %v4589_v7  ;;  %v4590_v9 = vadd.f32 %v4066_v35, %v10106_v6  ;;  %v9069_v47 = vpop.f32.mrb[39].mxu0  ;;  %v9350_v12 = vpop.f32.mrb[41].mxu1  ;;  %v3493_v20 = vor.u32 %v3491_v19, %v3489_v51 }
 0x33b   : > { %v7823_v37 = vpack.c.bf16 %v6224_v52, %v6223_v13  ;;  %v5155_v61 = vpop.f32.mrb[42].mxu1  ;;  %v3497_v6 = vrot.slane %v3495_v49, 1  ;;  %v3499_v7 = vshrl.u32 %v10987_v24, 16  ;;  %v11025_v47 = vld [vmem:[%s9826_s23 + $0x128] sm:$0xff]  }
 0x33c   : > { %v5814_v33 = vadd.f32 %v10918_v10, %v5670_v63  ;;  %v5671_v18 = vadd.f32 %v5147_v44, %v4590_v9  ;;  %9175 = vmatmul.mubr.msk.bf16.gmra.mrb[144].mxu0 %vm1217_vm2, %v3490_v5  ;;  %v9351_v16 = vpop.f32.mrb[43].mxu1  ;;  %v4793_v44 = vrot.slane %v11006_v60, 1 }
 0x33d   : > { %8147 = vst [vmem:[%s10944_s4 + $0x18] sm:$0xff] %v7823_v37   ;;  %9178 = vmatprep.mubr.msk.bf16.mxu0 %vm9772_vm1, %v11890_v4  ;;  %v3498_v59 = vsel %vm660_vm3, %v3493_v20, %v3497_v6 }
 0x33e   : > { %v6088_v21 = vmul.f32 0.01, %v5814_v33  ;;  %v5815_v43 = vadd.f32 %v10918_v10, %v5671_v18  ;;  %9457 = vmatmul.mubr.msk.bf16.gmra.mrb[148].mxu1 %vm1217_vm2, %v4792_v29  ;;  %vm5951_vm13 = vcmp.ge.f32.partialorder %v5814_v33, 0.0  ;;  %v4794_v9 = vsel %vm4725_vm4, %v4791_v28, %v4793_v44 }
 0x33f   : > { %v4071_v39 = vpop.f32.mrb[40].mxu0  ;;  %9460 = vmatprep.mubr.msk.bf16.mxu1 %vm9772_vm1, %v11890_v4 }
 0x340   : > { %vm5952_vm14 = vcmp.ge.f32.partialorder %v5815_v43, 0.0  ;;  %v6089_v0 = vmul.f32 0.01, %v5815_v43  ;;  %v4591_v34 = vadd.f32 %v4071_v39, %v10115_v17  ;;  %v9072_v48 = vpop.f32.mrb[41].mxu0  ;;  %v6225_v35 = vsel %vm5951_vm13, %v5814_v33, %v6088_v21 }
 0x341   : > { %v4074_v51 = vpop.f32.mrb[42].mxu0  ;;  %v5160_v3 = vpop.f32.mrb[44].mxu1  ;;  %v3507_v39 = vshrl.u32 %v11006_v60, 16 }
 0x342   : > { %v6226_v5 = vsel %vm5952_vm14, %v5815_v43, %v6089_v0  ;;  %v5672_v19 = vadd.f32 %v5152_v58, %v4591_v34  ;;  %v4592_v49 = vadd.f32 %v4074_v51, %v10118_v26  ;;  %v9073_v13 = vpop.f32.mrb[43].mxu0  ;;  %v9354_v52 = vpop.f32.mrb[45].mxu1  ;;  %v3501_v58 = vor.u32 %v3499_v7, %v3497_v6 }
 0x343   : > { %v7828_v63 = vpack.c.bf16 %v6226_v5, %v6225_v35  ;;  %v5163_v17 = vpop.f32.mrb[46].mxu1  ;;  %v3505_v26 = vrot.slane %v3503_v31, 1  ;;  %v3511_v0 = vshll.u32 %v11025_v47, 16 }
 0x344   : > { %v5816_v12 = vadd.f32 %v10918_v10, %v5672_v19  ;;  %v5673_v37 = vadd.f32 %v5155_v61, %v4592_v49  ;;  %9179 = vmatmul.mubr.msk.bf16.gmra.mrb[148].mxu0 %vm1217_vm2, %v3498_v59  ;;  %v9355_v24 = vpop.f32.mrb[47].mxu1  ;;  %v4795_v61 = vrot.slane %v11025_v47, 1  ;;  %v11044_v19 = vld [vmem:[%s9826_s23 + $0x130] sm:$0xff]  }
 0x345   : > { %8148 = vst [vmem:[%s10944_s4 + $0x20] sm:$0xff] %v7828_v63   ;;  %9182 = vmatprep.mubr.msk.bf16.mxu0 %vm9772_vm1, %v11890_v4  ;;  %v3506_v21 = vsel %vm660_vm3, %v3501_v58, %v3505_v26 }
 0x346   : > { %v6090_v29 = vmul.f32 0.01, %v5816_v12  ;;  %v5817_v33 = vadd.f32 %v10918_v10, %v5673_v37  ;;  %9461 = vmatmul.mubr.msk.bf16.gmra.mrb[152].mxu1 %vm1217_vm2, %v4794_v9  ;;  %vm5953_vm15 = vcmp.ge.f32.partialorder %v5816_v12, 0.0  ;;  %v4796_v5 = vsel %vm4725_vm4, %v4793_v44, %v4795_v61 }
 0x347   : > { %v4079_v28 = vpop.f32.mrb[44].mxu0  ;;  %9464 = vmatprep.mubr.msk.bf16.mxu1 %vm9772_vm1, %v11890_v4 }
 0x348   : > { %vm5954_vm0 = vcmp.ge.f32.partialorder %v5817_v33, 0.0  ;;  %v6091_v18 = vmul.f32 0.01, %v5817_v33  ;;  %v4593_v16 = vadd.f32 %v4079_v28, %v10127_v36  ;;  %v9076_v20 = vpop.f32.mrb[45].mxu0  ;;  %v6227_v34 = vsel %vm5953_vm15, %v5816_v12, %v6090_v29 }
 0x349   : > { %v4082_v6 = vpop.f32.mrb[46].mxu0  ;;  %v5168_v43 = vpop.f32.mrb[48].mxu1  ;;  %v3515_v29 = vshrl.u32 %v11025_v47, 16 }
 0x34a   : > { %v6228_v48 = vsel %vm5954_vm0, %v5817_v33, %v6091_v18  ;;  %v5674_v51 = vadd.f32 %v5160_v3, %v4593_v16  ;;  %v4594_v59 = vadd.f32 %v4082_v6, %v10130_v45  ;;  %v9077_v7 = vpop.f32.mrb[47].mxu0  ;;  %v9358_v31 = vpop.f32.mrb[49].mxu1  ;;  %v3509_v3 = vor.u32 %v3507_v39, %v3505_v26 }
 0x34b   : > { %v7833_v35 = vpack.c.bf16 %v6228_v48, %v6227_v34  ;;  %v5171_v36 = vpop.f32.mrb[50].mxu1  ;;  %v3513_v45 = vrot.slane %v3511_v0, 1  ;;  %v3519_v33 = vshll.u32 %v11044_v19, 16  ;;  %v11063_v34 = vld [vmem:[%s9826_s23 + $0x138] sm:$0xff]  }
 0x34c   : > { %v5818_v49 = vadd.f32 %v10918_v10, %v5674_v51  ;;  %v5675_v13 = vadd.f32 %v5163_v17, %v4594_v59  ;;  %9183 = vmatmul.mubr.msk.bf16.gmra.mrb[152].mxu0 %vm1217_vm2, %v3506_v21  ;;  %v9359_v60 = vpop.f32.mrb[51].mxu1  ;;  %v4797_v17 = vrot.slane %v11044_v19, 1  ;;  %v4799_v31 = vrot.slane %v11063_v34, 1 }
 0x34d   : > { %8149 = vst [vmem:[%s10944_s4 + $0x28] sm:$0xff] %v7833_v35   ;;  %9186 = vmatprep.mubr.msk.bf16.mxu0 %vm9772_vm1, %v11890_v4  ;;  %v3514_v58 = vsel %vm660_vm3, %v3509_v3, %v3513_v45  ;;  %v3523_v3 = vshrl.u32 %v11044_v19, 16 }
 0x34e   : > { %v6092_v52 = vmul.f32 0.01, %v5818_v49  ;;  %v5819_v63 = vadd.f32 %v10918_v10, %v5675_v13  ;;  %9465 = vmatmul.mubr.msk.bf16.gmra.mrb[156].mxu1 %vm1217_vm2, %v4796_v5  ;;  %vm5955_vm5 = vcmp.ge.f32.partialorder %v5818_v49, 0.0  ;;  %v4798_v0 = vsel %vm4725_vm4, %v4795_v61, %v4797_v17 }
 0x34f   : > { %v4087_v44 = vpop.f32.mrb[48].mxu0  ;;  %9468 = vmatprep.mubr.msk.bf16.mxu1 %vm9772_vm1, %v11890_v4 }
 0x350   : > { %vm5956_vm6 = vcmp.ge.f32.partialorder %v5819_v63, 0.0  ;;  %v6093_v9 = vmul.f32 0.01, %v5819_v63  ;;  %v4595_v12 = vadd.f32 %v4087_v44, %v10139_v54  ;;  %v9080_v37 = vpop.f32.mrb[49].mxu0  ;;  %v6229_v28 = vsel %vm5955_vm5, %v5818_v49, %v6092_v52 }
 0x351   : > { %v4090_v24 = vpop.f32.mrb[50].mxu0  ;;  %v5176_v26 = vpop.f32.mrb[52].mxu1 }
 0x352   : > { %v6230_v18 = vsel %vm5956_vm6, %v5819_v63, %v6093_v9  ;;  %v5676_v16 = vadd.f32 %v5168_v43, %v4595_v12  ;;  %v4596_v20 = vadd.f32 %v4090_v24, %v10142_v1  ;;  %v9081_v6 = vpop.f32.mrb[51].mxu0  ;;  %v9362_v21 = vpop.f32.mrb[53].mxu1  ;;  %v3517_v43 = vor.u32 %v3515_v29, %v3513_v45  ;;  %v11082_v29 = vld [vmem:[%s9826_s23 + $0x140] sm:$0xff]  }
 0x353   : > { %v7838_v39 = vpack.c.bf16 %v6230_v18, %v6229_v28  ;;  %v5179_v54 = vpop.f32.mrb[54].mxu1  ;;  %v3521_v1 = vrot.slane %v3519_v33, 1  ;;  %v3527_v45 = vshll.u32 %v11063_v34, 16 }
 0x354   : > { %v5820_v48 = vadd.f32 %v10918_v10, %v5676_v16  ;;  %v5677_v51 = vadd.f32 %v5171_v36, %v4596_v20  ;;  %9187 = vmatmul.mubr.msk.bf16.gmra.mrb[156].mxu0 %vm1217_vm2, %v3514_v58  ;;  %v9363_v47 = vpop.f32.mrb[55].mxu1  ;;  %v4800_v58 = vsel %vm4725_vm4, %v4797_v17, %v4799_v31  ;;  %v4801_v20 = vrot.slane %v11082_v29, 1 }
 0x355   : > { %8150 = vst [vmem:[%s10944_s4 + $0x30] sm:$0xff] %v7838_v39   ;;  %9190 = vmatprep.mubr.msk.bf16.mxu0 %vm9772_vm1, %v11890_v4  ;;  %v3522_v13 = vsel %vm660_vm3, %v3517_v43, %v3521_v1  ;;  %v3535_v47 = vshll.u32 %v11082_v29, 16 }
 0x356   : > { %v6094_v59 = vmul.f32 0.01, %v5820_v48  ;;  %v5821_v7 = vadd.f32 %v10918_v10, %v5677_v51  ;;  %9469 = vmatmul.mubr.msk.bf16.gmra.mrb[160].mxu1 %vm1217_vm2, %v4798_v0  ;;  %vm5957_vm7 = vcmp.ge.f32.partialorder %v5820_v48, 0.0  ;;  %v3531_v51 = vshrl.u32 %v11063_v34, 16 }
 0x357   : > { %v4095_v61 = vpop.f32.mrb[52].mxu0  ;;  %9472 = vmatprep.mubr.msk.bf16.mxu1 %vm9772_vm1, %v11890_v4 }
 0x358   : > { %vm5958_vm8 = vcmp.ge.f32.partialorder %v5821_v7, 0.0  ;;  %v6095_v35 = vmul.f32 0.01, %v5821_v7  ;;  %v4597_v36 = vadd.f32 %v4095_v61, %v10151_v11  ;;  %v9084_v5 = vpop.f32.mrb[53].mxu0  ;;  %v6231_v52 = vsel %vm5957_vm7, %v5820_v48, %v6094_v59 }
 0x359   : > { %v4098_v49 = vpop.f32.mrb[54].mxu0  ;;  %v5184_v60 = vpop.f32.mrb[56].mxu1  ;;  %v4802_v5 = vsel %vm4725_vm4, %v4799_v31, %v4801_v20 }
 0x35a   : > { %v6232_v63 = vsel %vm5958_vm8, %v5821_v7, %v6095_v35  ;;  %v5678_v44 = vadd.f32 %v5176_v26, %v4597_v36  ;;  %v4598_v9 = vadd.f32 %v4098_v49, %v10154_v22  ;;  %v9085_v12 = vpop.f32.mrb[55].mxu0  ;;  %v9366_v37 = vpop.f32.mrb[57].mxu1  ;;  %v3525_v26 = vor.u32 %v3523_v3, %v3521_v1  ;;  %v11101_v49 = vld [vmem:[%s9826_s23 + $0x148] sm:$0xff]  }
 0x35b   : > { %v7843_v24 = vpack.c.bf16 %v6232_v63, %v6231_v52  ;;  %v5187_v11 = vpop.f32.mrb[58].mxu1  ;;  %v3529_v22 = vrot.slane %v3527_v45, 1  ;;  %v4803_v63 = vrot.slane %v11101_v49, 1 }
 0x35c   : > { %v5822_v33 = vadd.f32 %v10918_v10, %v5678_v44  ;;  %v5679_v28 = vadd.f32 %v5179_v54, %v4598_v9  ;;  %9191 = vmatmul.mubr.msk.bf16.gmra.mrb[160].mxu0 %vm1217_vm2, %v3522_v13  ;;  %v9367_v19 = vpop.f32.mrb[59].mxu1 }
 0x35d   : > { %8151 = vst [vmem:[%s10944_s4 + $0x38] sm:$0xff] %v7843_v24   ;;  %9194 = vmatprep.mubr.msk.bf16.mxu0 %vm9772_vm1, %v11890_v4  ;;  %v3530_v0 = vsel %vm660_vm3, %v3525_v26, %v3529_v22 }
 0x35e   : > { %v6096_v18 = vmul.f32 0.01, %v5822_v33  ;;  %v5823_v16 = vadd.f32 %v10918_v10, %v5679_v28  ;;  %9473 = vmatmul.mubr.msk.bf16.gmra.mrb[164].mxu1 %vm1217_vm2, %v4800_v58  ;;  %vm5959_vm9 = vcmp.ge.f32.partialorder %v5822_v33, 0.0  ;;  %v3539_v58 = vshrl.u32 %v11082_v29, 16 }
 0x35f   : > { %v4103_v17 = vpop.f32.mrb[56].mxu0  ;;  %9476 = vmatprep.mubr.msk.bf16.mxu1 %vm9772_vm1, %v11890_v4 }
 0x360   : > { %vm5960_vm10 = vcmp.ge.f32.partialorder %v5823_v16, 0.0  ;;  %v6097_v6 = vmul.f32 0.01, %v5823_v16  ;;  %v4599_v21 = vadd.f32 %v4103_v17, %v10163_v32  ;;  %v9088_v39 = vpop.f32.mrb[57].mxu0  ;;  %v6233_v43 = vsel %vm5959_vm9, %v5822_v33, %v6096_v18 }
 0x361   : > { %v4106_v54 = vpop.f32.mrb[58].mxu0  ;;  %v5192_v48 = vpop.f32.mrb[60].mxu1  ;;  %v3543_v33 = vshll.u32 %v11101_v49, 16 }
 0x362   : > { %v6234_v1 = vsel %vm5960_vm10, %v5823_v16, %v6097_v6  ;;  %v5680_v59 = vadd.f32 %v5184_v60, %v4599_v21  ;;  %v4600_v7 = vadd.f32 %v4106_v54, %v10166_v42  ;;  %v9089_v61 = vpop.f32.mrb[59].mxu0  ;;  %v9370_v35 = vpop.f32.mrb[61].mxu1  ;;  %v3533_v60 = vor.u32 %v3531_v51, %v3529_v22  ;;  %v11120_v21 = vld [vmem:[%s9826_s23 + $0x150] sm:$0xff]  }
 0x363   : > { %v7848_v36 = vpack.c.bf16 %v6234_v1, %v6233_v43  ;;  %v5195_v32 = vpop.f32.mrb[62].mxu1  ;;  %v3537_v42 = vrot.slane %v3535_v47, 1  ;;  %v4804_v6 = vsel %vm4725_vm4, %v4801_v20, %v4803_v63  ;;  %v4805_v47 = vrot.slane %v11120_v21, 1 }
 0x364   : > { %v5824_v13 = vadd.f32 %v10918_v10, %v5680_v59  ;;  %v5681_v3 = vadd.f32 %v5187_v11, %v4600_v7  ;;  %9195 = vmatmul.mubr.msk.bf16.gmra.mrb[164].mxu0 %vm1217_vm2, %v3530_v0  ;;  %v9371_v34 = vpop.f32.mrb[63].mxu1 }
 0x365   : > { %8152 = vst [vmem:[%s10944_s4 + $0x40] sm:$0xff] %v7848_v36   ;;  %9198 = vmatprep.mubr.msk.bf16.mxu0 %vm9772_vm1, %v11890_v4  ;;  %v3538_v24 = vsel %vm660_vm3, %v3533_v60, %v3537_v42  ;;  %v3541_v0 = vor.u32 %v3539_v58, %v3537_v42  ;;  %v3547_v36 = vshrl.u32 %v11101_v49, 16 }
 0x366   : > { %v6098_v45 = vmul.f32 0.01, %v5824_v13  ;;  %v5825_v52 = vadd.f32 %v10918_v10, %v5681_v3  ;;  %9477 = vmatmul.mubr.msk.bf16.gmra.mrb[168].mxu1 %vm1217_vm2, %v4802_v5  ;;  %vm5961_vm11 = vcmp.ge.f32.partialorder %v5824_v13, 0.0 }
 0x367   : > { %v4111_v31 = vpop.f32.mrb[60].mxu0  ;;  %9480 = vmatprep.mubr.msk.bf16.mxu1 %vm9772_vm1, %v11890_v4 }
 0x368   : > { %vm5962_vm12 = vcmp.ge.f32.partialorder %v5825_v52, 0.0  ;;  %v6099_v44 = vmul.f32 0.01, %v5825_v52  ;;  %v4601_v9 = vadd.f32 %v4111_v31, %v10175_v53  ;;  %v9092_v12 = vpop.f32.mrb[61].mxu0  ;;  %v6235_v28 = vsel %vm5961_vm11, %v5824_v13, %v6098_v45  ;;  %v11139_v31 = vld [vmem:[%s9826_s23 + $0x158] sm:$0xff]  }
 0x369   : > { %v4114_v37 = vpop.f32.mrb[62].mxu0  ;;  %v5200_v11 = vpop.f32.mrb[64].mxu1 }
 0x36a   : > { %v6236_v19 = vsel %vm5962_vm12, %v5825_v52, %v6099_v44  ;;  %v5682_v26 = vadd.f32 %v5192_v48, %v4601_v9  ;;  %v4602_v22 = vadd.f32 %v4114_v37, %v10178_v2  ;;  %v9093_v18 = vpop.f32.mrb[63].mxu0  ;;  %v9374_v16 = vpop.f32.mrb[65].mxu1  ;;  %v3545_v2 = vrot.slane %v3543_v33, 1 }
 0x36b   : > { %v7853_v17 = vpack.c.bf16 %v6236_v19, %v6235_v28  ;;  %v5203_v53 = vpop.f32.mrb[66].mxu1  ;;  %v4806_v52 = vsel %vm4725_vm4, %v4803_v63, %v4805_v47  ;;  %v3555_v18 = vshrl.u32 %v11120_v21, 16  ;;  %v3559_v16 = vshll.u32 %v11139_v31, 16 }
 0x36c   : > { %v5826_v39 = vadd.f32 %v10918_v10, %v5682_v26  ;;  %v5683_v54 = vadd.f32 %v5195_v32, %v4602_v22  ;;  %9199 = vmatmul.mubr.msk.bf16.gmra.mrb[168].mxu0 %vm1217_vm2, %v3538_v24  ;;  %v9375_v29 = vpop.f32.mrb[67].mxu1  ;;  %v3546_v61 = vsel %vm660_vm3, %v3541_v0, %v3545_v2  ;;  %v3551_v32 = vshll.u32 %v11120_v21, 16 }
 0x36d   : > { %8153 = vst [vmem:[%s10944_s4 + $0x48] sm:$0xff] %v7853_v17   ;;  %9202 = vmatprep.mubr.msk.bf16.mxu0 %vm9772_vm1, %v11890_v4  ;;  %v3549_v12 = vor.u32 %v3547_v36, %v3545_v2 }
 0x36e   : > { %v6100_v48 = vmul.f32 0.01, %v5826_v39  ;;  %v5827_v51 = vadd.f32 %v10918_v10, %v5683_v54  ;;  %9481 = vmatmul.mubr.msk.bf16.gmra.mrb[172].mxu1 %vm1217_vm2, %v4804_v6  ;;  %vm5963_vm13 = vcmp.ge.f32.partialorder %v5826_v39, 0.0 }
 0x36f   : > { %v4119_v20 = vpop.f32.mrb[64].mxu0  ;;  %9484 = vmatprep.mubr.msk.bf16.mxu1 %vm9772_vm1, %v11890_v4 }
 0x370   : > { %vm5964_vm14 = vcmp.ge.f32.partialorder %v5827_v51, 0.0  ;;  %v6101_v43 = vmul.f32 0.01, %v5827_v51  ;;  %v4603_v1 = vadd.f32 %v4119_v20, %v10187_v14  ;;  %v9096_v59 = vpop.f32.mrb[65].mxu0  ;;  %v6237_v5 = vsel %vm5963_vm13, %v5826_v39, %v6100_v48  ;;  %v11158_v48 = vld [vmem:[%s9826_s23 + $0x160] sm:$0xff]  }
 0x371   : > { %v4122_v7 = vpop.f32.mrb[66].mxu0  ;;  %v5208_v35 = vpop.f32.mrb[68].mxu1 }
 0x372   : > { %v6238_v13 = vsel %vm5964_vm14, %v5827_v51, %v6101_v43  ;;  %v5684_v3 = vadd.f32 %v5200_v11, %v4603_v1  ;;  %v4604_v34 = vadd.f32 %v4122_v7, %v10190_v25  ;;  %v9097_v60 = vpop.f32.mrb[67].mxu0  ;;  %v9378_v42 = vpop.f32.mrb[69].mxu1  ;;  %v3553_v25 = vrot.slane %v3551_v32, 1 }
 0x373   : > { %v7858_v45 = vpack.c.bf16 %v6238_v13, %v6237_v5  ;;  %v5211_v14 = vpop.f32.mrb[70].mxu1  ;;  %v4807_v11 = vrot.slane %v11139_v31, 1  ;;  %v4809_v7 = vrot.slane %v11158_v48, 1 }
 0x374   : > { %v5828_v44 = vadd.f32 %v10918_v10, %v5684_v3  ;;  %v5685_v9 = vadd.f32 %v5203_v53, %v4604_v34  ;;  %9203 = vmatmul.mubr.msk.bf16.gmra.mrb[172].mxu0 %vm1217_vm2, %v3546_v61  ;;  %v9379_v49 = vpop.f32.mrb[71].mxu1  ;;  %v3554_v26 = vsel %vm660_vm3, %v3549_v12, %v3553_v25  ;;  %v3557_v43 = vor.u32 %v3555_v18, %v3553_v25  ;;  %v11177_v12 = vld [vmem:[%s9826_s23 + $0x168] sm:$0xff]  }
 0x375   : > { %8154 = vst [vmem:[%s10944_s4 + $0x50] sm:$0xff] %v7858_v45   ;;  %9206 = vmatprep.mubr.msk.bf16.mxu0 %vm9772_vm1, %v11890_v4  ;;  %v4808_v2 = vsel %vm4725_vm4, %v4805_v47, %v4807_v11  ;;  %v3563_v3 = vshrl.u32 %v11139_v31, 16  ;;  %v3567_v34 = vshll.u32 %v11158_v48, 16  ;;  %v4810_v49 = vsel %vm4725_vm4, %v4807_v11, %v4809_v7 }
 0x376   : > { %v6102_v37 = vmul.f32 0.01, %v5828_v44  ;;  %v5829_v24 = vadd.f32 %v10918_v10, %v5685_v9  ;;  %9485 = vmatmul.mubr.msk.bf16.gmra.mrb[176].mxu1 %vm1217_vm2, %v4806_v52  ;;  %vm5965_vm15 = vcmp.ge.f32.partialorder %v5828_v44, 0.0 }
 0x377   : > { %v4127_v63 = vpop.f32.mrb[68].mxu0  ;;  %9488 = vmatprep.mubr.msk.bf16.mxu1 %vm9772_vm1, %v11890_v4 }
 0x378   : > { %vm5966_vm0 = vcmp.ge.f32.partialorder %v5829_v24, 0.0  ;;  %v6103_v58 = vmul.f32 0.01, %v5829_v24  ;;  %v4605_v33 = vadd.f32 %v4127_v63, %v10199_v38  ;;  %v9100_v28 = vpop.f32.mrb[69].mxu0  ;;  %v6239_v17 = vsel %vm5965_vm15, %v5828_v44, %v6102_v37 }
 0x379   : > { %v4130_v19 = vpop.f32.mrb[70].mxu0  ;;  %v5216_v22 = vpop.f32.mrb[72].mxu1 }
 0x37a   : > { %v6240_v53 = vsel %vm5966_vm0, %v5829_v24, %v6103_v58  ;;  %v5686_v6 = vadd.f32 %v5208_v35, %v4605_v33  ;;  %v4606_v39 = vadd.f32 %v4130_v19, %v10202_v50  ;;  %v9101_v54 = vpop.f32.mrb[71].mxu0  ;;  %v9382_v29 = vpop.f32.mrb[73].mxu1  ;;  %v3561_v50 = vrot.slane %v3559_v16, 1 }
 0x37b   : > { %v7863_v0 = vpack.c.bf16 %v6240_v53, %v6239_v17  ;;  %v5219_v38 = vpop.f32.mrb[74].mxu1  ;;  %v4811_v33 = vrot.slane %v11177_v12, 1  ;;  %v3571_v17 = vshrl.u32 %v11158_v48, 16  ;;  %v3575_v53 = vshll.u32 %v11177_v12, 16 }
 0x37c   : > { %v5830_v51 = vadd.f32 %v10918_v10, %v5686_v6  ;;  %v5687_v20 = vadd.f32 %v5211_v14, %v4606_v39  ;;  %9207 = vmatmul.mubr.msk.bf16.gmra.mrb[176].mxu0 %vm1217_vm2, %v3554_v26  ;;  %v9383_v21 = vpop.f32.mrb[75].mxu1  ;;  %v3562_v5 = vsel %vm660_vm3, %v3557_v43, %v3561_v50  ;;  %v3565_v24 = vor.u32 %v3563_v3, %v3561_v50 }
 0x37d   : > { %8155 = vst [vmem:[%s10944_s4 + $0x58] sm:$0xff] %v7863_v0   ;;  %9210 = vmatprep.mubr.msk.bf16.mxu0 %vm9772_vm1, %v11890_v4 }
 0x37e   : > { %v6104_v1 = vmul.f32 0.01, %v5830_v51  ;;  %v5831_v59 = vadd.f32 %v10918_v10, %v5687_v20  ;;  %9489 = vmatmul.mubr.msk.bf16.gmra.mrb[180].mxu1 %vm1217_vm2, %v4808_v2  ;;  %vm5967_vm5 = vcmp.ge.f32.partialorder %v5830_v51, 0.0  ;;  %v11196_v20 = vld [vmem:[%s9826_s23 + $0x170] sm:$0xff]  }
 0x37f   : > { %v4135_v47 = vpop.f32.mrb[72].mxu0  ;;  %9492 = vmatprep.mubr.msk.bf16.mxu1 %vm9772_vm1, %v11890_v4  ;;  %v3583_v3 = vshll.u32 %v11196_v20, 16 }
 0x380   : > { %vm5968_vm6 = vcmp.ge.f32.partialorder %v5831_v59, 0.0  ;;  %v6105_v61 = vmul.f32 0.01, %v5831_v59  ;;  %v4607_v35 = vadd.f32 %v4135_v47, %v10211_v62  ;;  %v9104_v36 = vpop.f32.mrb[73].mxu0  ;;  %v6241_v60 = vsel %vm5967_vm5, %v5830_v51, %v6104_v1 }
 0x381   : > { %v4138_v32 = vpop.f32.mrb[74].mxu0  ;;  %v5224_v13 = vpop.f32.mrb[76].mxu1  ;;  %v4812_v51 = vsel %vm4725_vm4, %v4809_v7, %v4811_v33  ;;  %v4813_v7 = vrot.slane %v11196_v20, 1 }
 0x382   : > { %v6242_v42 = vsel %vm5968_vm6, %v5831_v59, %v6105_v61  ;;  %v5688_v45 = vadd.f32 %v5216_v22, %v4607_v35  ;;  %v4608_v14 = vadd.f32 %v4138_v32, %v10214_v15  ;;  %v9105_v52 = vpop.f32.mrb[75].mxu0  ;;  %v9386_v44 = vpop.f32.mrb[77].mxu1  ;;  %v3569_v15 = vrot.slane %v3567_v34, 1 }
 0x383   : > { %v7868_v9 = vpack.c.bf16 %v6242_v42, %v6241_v60  ;;  %v5227_v62 = vpop.f32.mrb[78].mxu1 }
 0x384   : > { %v5832_v25 = vadd.f32 %v10918_v10, %v5688_v45  ;;  %v5689_v37 = vadd.f32 %v5219_v38, %v4608_v14  ;;  %9211 = vmatmul.mubr.msk.bf16.gmra.mrb[180].mxu0 %vm1217_vm2, %v3562_v5  ;;  %v9387_v31 = vpop.f32.mrb[79].mxu1  ;;  %v3570_v18 = vsel %vm660_vm3, %v3565_v24, %v3569_v15  ;;  %v3573_v50 = vor.u32 %v3571_v17, %v3569_v15 }
 0x385   : > { %8156 = vst [vmem:[%s10944_s4 + $0x60] sm:$0xff] %v7868_v9   ;;  %9214 = vmatprep.mubr.msk.bf16.mxu0 %vm9772_vm1, %v11890_v4  ;;  %v4814_v9 = vsel %vm4725_vm4, %v4811_v33, %v4813_v7  ;;  %v3585_v31 = vrot.slane %v3583_v3, 1 }
 0x386   : > { %v6106_v63 = vmul.f32 0.01, %v5832_v25  ;;  %v5833_v58 = vadd.f32 %v10918_v10, %v5689_v37  ;;  %9493 = vmatmul.mubr.msk.bf16.gmra.mrb[184].mxu1 %vm1217_vm2, %v4810_v49  ;;  %vm5969_vm7 = vcmp.ge.f32.partialorder %v5832_v25, 0.0  ;;  %v11220_v49 = vld [vmem:[%s11850_s2] ss:$0 sm:$0xff] }
 0x387   : > { %v4143_v11 = vpop.f32.mrb[76].mxu0  ;;  %9496 = vmatprep.mubr.msk.bf16.mxu1 %vm9772_vm1, %v11890_v4 }
 0x388   : > { %vm5970_vm8 = vcmp.ge.f32.partialorder %v5833_v58, 0.0  ;;  %v6107_v28 = vmul.f32 0.01, %v5833_v58  ;;  %v4609_v19 = vadd.f32 %v4143_v11, %v10223_v27  ;;  %v9108_v26 = vpop.f32.mrb[77].mxu0  ;;  %v6243_v6 = vsel %vm5969_vm7, %v5832_v25, %v6106_v63 }
 0x389   : > { %v4146_v22 = vpop.f32.mrb[78].mxu0  ;;  %v5232_v16 = vpop.f32.mrb[80].mxu1 }
 0x38a   : > { %v6244_v39 = vsel %vm5970_vm8, %v5833_v58, %v6107_v28  ;;  %v5690_v54 = vadd.f32 %v5224_v13, %v4609_v19  ;;  %v4610_v29 = vadd.f32 %v4146_v22, %v10226_v41  ;;  %v9109_v0 = vpop.f32.mrb[79].mxu0  ;;  %v9390_v38 = vpop.f32.mrb[81].mxu1  ;;  %v3577_v41 = vrot.slane %v3575_v53, 1 }
 0x38b   : > { %v7873_v2 = vpack.c.bf16 %v6244_v39, %v6243_v6  ;;  %v5235_v27 = vpop.f32.mrb[82].mxu1 }
 0x38c   : > { %v5834_v21 = vadd.f32 %v10918_v10, %v5690_v54  ;;  %v5691_v43 = vadd.f32 %v5227_v62, %v4610_v29  ;;  %9215 = vmatmul.mubr.msk.bf16.gmra.mrb[184].mxu0 %vm1217_vm2, %v3570_v18  ;;  %v9391_v48 = vpop.f32.mrb[83].mxu1  ;;  %v3578_v5 = vsel %vm660_vm3, %v3573_v50, %v3577_v41  ;;  %v11215_v62 = vld [vmem:[%s9826_s23 + $0x178] sm:$0xff]   ;;  %v3587_v18 = vshrl.u32 %v11196_v20, 16 }
 0x38d   : > { %8157 = vst [vmem:[%s10944_s4 + $0x68] sm:$0xff] %v7873_v2   ;;  %9218 = vmatprep.mubr.msk.bf16.mxu0 %vm9772_vm1, %v11890_v4  ;;  %v4815_v58 = vrot.slane %v11215_v62, 1  ;;  %v11239_v2 = vld [vmem:[%s9826_s23 + $0x180] sm:$0xff]  }
 0x38e   : > { %v6108_v1 = vmul.f32 0.01, %v5834_v21  ;;  %v5835_v59 = vadd.f32 %v10918_v10, %v5691_v43  ;;  %9497 = vmatmul.mubr.msk.bf16.gmra.mrb[188].mxu1 %vm1217_vm2, %v4812_v51  ;;  %vm5971_vm9 = vcmp.ge.f32.partialorder %v5834_v21, 0.0  ;;  %v3579_v10 = vshrl.u32 %v11177_v12, 16 }
 0x38f   : > { %v4151_v47 = vpop.f32.mrb[80].mxu0  ;;  %9500 = vmatprep.mubr.msk.bf16.mxu1 %vm9772_vm1, %v11890_v4  ;;  %v4816_v38 = vsel %vm4725_vm4, %v4813_v7, %v4815_v58 }
 0x390   : > { %vm5972_vm10 = vcmp.ge.f32.partialorder %v5835_v59, 0.0  ;;  %v6109_v61 = vmul.f32 0.01, %v5835_v59  ;;  %v4611_v35 = vadd.f32 %v4151_v47, %v10235_v55  ;;  %v9112_v36 = vpop.f32.mrb[81].mxu0  ;;  %v6245_v34 = vsel %vm5971_vm9, %v5834_v21, %v6108_v1 }
 0x391   : > { %v4154_v32 = vpop.f32.mrb[82].mxu0  ;;  %v5240_v13 = vpop.f32.mrb[84].mxu1  ;;  %v3589_v21 = vor.u32 %v3587_v18, %v3585_v31  ;;  %v3595_v36 = vshrl.u32 %v11215_v62, 16 }
 0x392   : > { %v6246_v60 = vsel %vm5972_vm10, %v5835_v59, %v6109_v61  ;;  %v5692_v42 = vadd.f32 %v5232_v16, %v4611_v35  ;;  %v4612_v45 = vadd.f32 %v4154_v32, %v10238_v8  ;;  %v9113_v14 = vpop.f32.mrb[83].mxu0  ;;  %v9394_v52 = vpop.f32.mrb[85].mxu1  ;;  %v3581_v8 = vor.u32 %v3579_v10, %v3577_v41 }
 0x393   : > { %v7878_v44 = vpack.c.bf16 %v6246_v60, %v6245_v34  ;;  %v5243_v55 = vpop.f32.mrb[86].mxu1  ;;  %v3591_v16 = vshll.u32 %v11215_v62, 16  ;;  %v4817_v41 = vrot.slane %v11239_v2, 1  ;;  %v3599_v32 = vshll.u32 %v11239_v2, 16  ;;  %v11258_v14 = vld [vmem:[%s9826_s23 + $0x188] sm:$0xff]  }
 0x394   : > { %v5836_v12 = vadd.f32 %v11220_v49, %v5692_v42  ;;  %v5693_v25 = vadd.f32 %v5235_v27, %v4612_v45  ;;  %9219 = vmatmul.mubr.msk.bf16.gmra.mrb[188].mxu0 %vm1217_vm2, %v3578_v5  ;;  %v9395_v37 = vpop.f32.mrb[87].mxu1  ;;  %v3586_v26 = vsel %vm660_vm3, %v3581_v8, %v3585_v31 }
 0x395   : > { %8158 = vst [vmem:[%s10944_s4 + $0x70] sm:$0xff] %v7878_v44   ;;  %9222 = vmatprep.mubr.msk.bf16.mxu0 %vm9772_vm1, %v11890_v4  ;;  %v4818_v45 = vsel %vm4725_vm4, %v4815_v58, %v4817_v41  ;;  %v4819_v37 = vrot.slane %v11258_v14, 1 }
 0x396   : > { %v6110_v24 = vmul.f32 0.01, %v5836_v12  ;;  %v5837_v15 = vadd.f32 %v11220_v49, %v5693_v25  ;;  %9501 = vmatmul.mubr.msk.bf16.gmra.mrb[192].mxu1 %vm1217_vm2, %v4814_v9  ;;  %vm5973_vm11 = vcmp.ge.f32.partialorder %v5836_v12, 0.0 }
 0x397   : > { %v4159_v63 = vpop.f32.mrb[84].mxu0  ;;  %9504 = vmatprep.mubr.msk.bf16.mxu1 %vm9772_vm1, %v11890_v4 }
 0x398   : > { %vm5974_vm12 = vcmp.ge.f32.partialorder %v5837_v15, 0.0  ;;  %v6111_v11 = vmul.f32 0.01, %v5837_v15  ;;  %v4613_v33 = vadd.f32 %v4159_v63, %v10247_v23  ;;  %v9116_v28 = vpop.f32.mrb[85].mxu0  ;;  %v6247_v17 = vsel %vm5973_vm11, %v5836_v12, %v6110_v24 }
 0x399   : > { %v4162_v19 = vpop.f32.mrb[86].mxu0  ;;  %v5248_v22 = vpop.f32.mrb[88].mxu1 }
 0x39a   : > { %v6248_v53 = vsel %vm5974_vm12, %v5837_v15, %v6111_v11  ;;  %v5694_v6 = vadd.f32 %v5240_v13, %v4613_v33  ;;  %v4614_v39 = vadd.f32 %v4162_v19, %v10250_v40  ;;  %v9117_v54 = vpop.f32.mrb[87].mxu0  ;;  %v9398_v29 = vpop.f32.mrb[89].mxu1  ;;  %v3593_v40 = vrot.slane %v3591_v16, 1 }
 0x39b   : > { %v7883_v0 = vpack.c.bf16 %v6248_v53, %v6247_v17  ;;  %v5251_v23 = vpop.f32.mrb[90].mxu1  ;;  %v3603_v11 = vshrl.u32 %v11239_v2, 16  ;;  %v3607_v33 = vshll.u32 %v11258_v14, 16  ;;  %v4820_v53 = vsel %vm4725_vm4, %v4817_v41, %v4819_v37 }
 0x39c   : > { %v5838_v27 = vadd.f32 %v11220_v49, %v5694_v6  ;;  %v5695_v51 = vadd.f32 %v5243_v55, %v4614_v39  ;;  %9223 = vmatmul.mubr.msk.bf16.gmra.mrb[192].mxu0 %vm1217_vm2, %v3586_v26  ;;  %v9399_v20 = vpop.f32.mrb[91].mxu1  ;;  %v3594_v61 = vsel %vm660_vm3, %v3589_v21, %v3593_v40  ;;  %v3597_v9 = vor.u32 %v3595_v36, %v3593_v40  ;;  %v11277_v6 = vld [vmem:[%s9826_s23 + $0x190] sm:$0xff]  }
 0x39d   : > { %8159 = vst [vmem:[%s10944_s4 + $0x78] sm:$0xff] %v7883_v0   ;;  %9226 = vmatprep.mubr.msk.bf16.mxu0 %vm9772_vm1, %v11890_v4  ;;  %v11954_v20 = vld [vmem:[#allocation2_spill] sm:$0xff]  ;;  %v3611_v41 = vshrl.u32 %v11258_v14, 16 }
 0x39e   : > { %v6112_v43 = vmul.f32 0.01, %v5838_v27  ;;  %v5839_v48 = vadd.f32 %v11220_v49, %v5695_v51  ;;  %9505 = vmatmul.mubr.msk.bf16.gmra.mrb[196].mxu1 %vm1217_vm2, %v4816_v38  ;;  %vm5975_vm13 = vcmp.ge.f32.partialorder %v5838_v27, 0.0 }
 0x39f   : > { %v4167_v50 = vpop.f32.mrb[88].mxu0  ;;  %9508 = vmatprep.mubr.msk.bf16.mxu1 %vm9772_vm1, %v11890_v4 }
 0x3a0   : > { %vm5976_vm14 = vcmp.ge.f32.partialorder %v5839_v48, 0.0  ;;  %v6113_v1 = vmul.f32 0.01, %v5839_v48  ;;  %v4615_v59 = vadd.f32 %v4167_v50, %v10259_v56  ;;  %v9120_v47 = vpop.f32.mrb[89].mxu0  ;;  %v6249_v5 = vsel %vm5975_vm13, %v5838_v27, %v6112_v43 }
 0x3a1   : > { %v4170_v7 = vpop.f32.mrb[90].mxu0  ;;  %v5256_v35 = vpop.f32.mrb[92].mxu1  ;;  %v4821_v27 = vrot.slane %v11277_v6, 1 }
 0x3a2   : > { %v6250_v13 = vsel %vm5976_vm14, %v5839_v48, %v6113_v1  ;;  %v5696_v10 = vadd.f32 %v5248_v22, %v4615_v59  ;;  %v4616_v3 = vadd.f32 %v4170_v7, %v10262_v57  ;;  %v9121_v34 = vpop.f32.mrb[91].mxu0  ;;  %v9402_v60 = vpop.f32.mrb[93].mxu1  ;;  %v3601_v57 = vrot.slane %v3599_v32, 1 }
 0x3a3   : > { %v7888_v42 = vpack.c.bf16 %v6250_v13, %v6249_v5  ;;  %v5259_v56 = vpop.f32.mrb[94].mxu1  ;;  %v3615_v1 = vshll.u32 %v11277_v6, 16 }
 0x3a4   : > { %v5840_v52 = vadd.f32 %v11220_v49, %v5696_v10  ;;  %v5697_v44 = vadd.f32 %v5251_v23, %v4616_v3  ;;  %9227 = vmatmul.mubr.msk.bf16.gmra.mrb[196].mxu0 %vm1217_vm2, %v3594_v61  ;;  %v9403_v55 = vpop.f32.mrb[95].mxu1  ;;  %v3602_v63 = vsel %vm660_vm3, %v3597_v9, %v3601_v57  ;;  %v3605_v0 = vor.u32 %v3603_v11, %v3601_v57  ;;  %v11955_v61 = vld [vmem:[#allocation3_spill] sm:$0xff]  ;;  %v11296_v3 = vld [vmem:[%s9826_s23 + $0x198] sm:$0xff]   ;;  %v11956_v57 = vld [vmem:[#allocation4_spill] sm:$0xff] }
 0x3a5   : > { %8160 = vst [vmem:[%s10944_s4 + $0x80] sm:$0xff] %v7888_v42   ;;  %9230 = vmatprep.mubr.msk.bf16.mxu0 %vm9772_vm1, %v11890_v4  ;;  %v4822_v10 = vsel %vm4725_vm4, %v4819_v37, %v4821_v27  ;;  %v4823_v55 = vrot.slane %v11296_v3, 1  ;;  %v11957_v11 = vld [vmem:[#allocation5_spill] sm:$0xff] }
 0x3a6   : > { %v6114_v62 = vmul.f32 0.01, %v5840_v52  ;;  %v5841_v12 = vadd.f32 %v11220_v49, %v5697_v44  ;;  %9509 = vmatmul.mubr.msk.bf16.gmra.mrb[200].mxu1 %vm1217_vm2, %v4818_v45  ;;  %vm5977_vm15 = vcmp.ge.f32.partialorder %v5840_v52, 0.0  ;;  %v3617_v45 = vrot.slane %v3615_v1, 1  ;;  %v11959_v1 = vld [vmem:[#allocation7_spill] sm:$0xff] }
 0x3a7   : > { %v4175_v25 = vpop.f32.mrb[92].mxu0  ;;  %9512 = vmatprep.mubr.msk.bf16.mxu1 %vm9772_vm1, %v11890_v4 }
 0x3a8   : > { %vm5978_vm0 = vcmp.ge.f32.partialorder %v5841_v12, 0.0  ;;  %v6115_v8 = vmul.f32 0.01, %v5841_v12  ;;  %v4617_v31 = vadd.f32 %v4175_v25, %v10271_v30  ;;  %v9124_v24 = vpop.f32.mrb[93].mxu0  ;;  %v6251_v28 = vsel %vm5977_vm15, %v5840_v52, %v6114_v62 }
 0x3a9   : > { %v4178_v15 = vpop.f32.mrb[94].mxu0  ;;  %v5264_v58 = vpop.f32.mrb[96].mxu1  ;;  %v3623_v24 = vshll.u32 %v11296_v3, 16 }
 0x3aa   : > { %v6252_v19 = vsel %vm5978_vm0, %v5841_v12, %v6115_v8  ;;  %v5698_v26 = vadd.f32 %v5256_v35, %v4617_v31  ;;  %v4618_v22 = vadd.f32 %v4178_v15, %v10274_v46  ;;  %v9125_v18 = vpop.f32.mrb[95].mxu0  ;;  %v9406_v16 = vpop.f32.mrb[97].mxu1  ;;  %v3609_v46 = vrot.slane %v3607_v33, 1 }
 0x3ab   : > { %v7893_v17 = vpack.c.bf16 %v6252_v19, %v6251_v28  ;;  %v5267_v30 = vpop.f32.mrb[98].mxu1  ;;  %v3619_v31 = vshrl.u32 %v11277_v6, 16  ;;  %v4824_v18 = vsel %vm4725_vm4, %v4821_v27, %v4823_v55  ;;  %v11315_v16 = vld [vmem:[%s9826_s23 + $0x1a0] sm:$0xff]  }
 0x3ac   : > { %v5842_v39 = vadd.f32 %v11220_v49, %v5698_v26  ;;  %v5699_v54 = vadd.f32 %v5259_v56, %v4618_v22  ;;  %9231 = vmatmul.mubr.msk.bf16.gmra.mrb[200].mxu0 %vm1217_vm2, %v3602_v63  ;;  %v9407_v29 = vpop.f32.mrb[99].mxu1  ;;  %v3610_v48 = vsel %vm660_vm3, %v3605_v0, %v3609_v46  ;;  %v3613_v56 = vor.u32 %v3611_v41, %v3609_v46 }
 0x3ad   : > { %8161 = vst [vmem:[%s10944_s4 + $0x88] sm:$0xff] %v7893_v17   ;;  %9234 = vmatprep.mubr.msk.bf16.mxu0 %vm9772_vm1, %v11890_v4  ;;  %v3621_v6 = vor.u32 %v3619_v31, %v3617_v45  ;;  %v4825_v46 = vrot.slane %v11315_v16, 1 }
 0x3ae   : > { %v6116_v23 = vmul.f32 0.01, %v5842_v39  ;;  %v5843_v38 = vadd.f32 %v11220_v49, %v5699_v54  ;;  %9513 = vmatmul.mubr.msk.bf16.gmra.mrb[204].mxu1 %vm1217_vm2, %v4820_v53  ;;  %vm5979_vm5 = vcmp.ge.f32.partialorder %v5842_v39, 0.0  ;;  %v3618_v37 = vsel %vm660_vm3, %v3613_v56, %v3617_v45 }
 0x3af   : > { %v4183_v2 = vpop.f32.mrb[96].mxu0  ;;  %9516 = vmatprep.mubr.msk.bf16.mxu1 %vm9772_vm1, %v11890_v4 }
 0x3b0   : > { %vm5980_vm6 = vcmp.ge.f32.partialorder %v5843_v38, 0.0  ;;  %v6117_v51 = vmul.f32 0.01, %v5843_v38  ;;  %v4619_v21 = vadd.f32 %v4183_v2, %v11954_v20  ;;  %v9128_v40 = vpop.f32.mrb[97].mxu0  ;;  %v6253_v59 = vsel %vm5979_vm5, %v5842_v39, %v6116_v23 }
 0x3b1   : > { %v4186_v43 = vpop.f32.mrb[98].mxu0  ;;  %v5272_v50 = vpop.f32.mrb[100].mxu1  ;;  %v3625_v39 = vrot.slane %v3623_v24, 1  ;;  %v3627_v40 = vshrl.u32 %v11296_v3, 16  ;;  %v11961_v24 = vld [vmem:[#allocation9_spill] sm:$0xff] }
 0x3b2   : > { %v6254_v47 = vsel %vm5980_vm6, %v5843_v38, %v6117_v51  ;;  %v5700_v7 = vadd.f32 %v5264_v58, %v4619_v21  ;;  %v4620_v35 = vadd.f32 %v4186_v43, %v11955_v61  ;;  %v9129_v36 = vpop.f32.mrb[99].mxu0  ;;  %v9410_v32 = vpop.f32.mrb[101].mxu1  ;;  %v11958_v38 = vld [vmem:[#allocation6_spill] sm:$0xff]  ;;  %v3631_v43 = vshll.u32 %v11315_v16, 16 }
 0x3b3   : > { %v7898_v5 = vpack.c.bf16 %v6254_v47, %v6253_v59  ;;  %v5275_v13 = vpop.f32.mrb[102].mxu1  ;;  %v3626_v20 = vsel %vm660_vm3, %v3621_v6, %v3625_v39  ;;  %v4826_v36 = vsel %vm4725_vm4, %v4823_v55, %v4825_v46  ;;  %v11334_v32 = vld [vmem:[%s9826_s23 + $0x1a8] sm:$0xff]   ;;  %v3629_v3 = vor.u32 %v3627_v40, %v3625_v39 }
 0x3b4   : > { %v5844_v34 = vadd.f32 %v11220_v49, %v5700_v7  ;;  %v5701_v60 = vadd.f32 %v5267_v30, %v4620_v35  ;;  %9235 = vmatmul.mubr.msk.bf16.gmra.mrb[204].mxu0 %vm1217_vm2, %v3610_v48  ;;  %v9411_v42 = vpop.f32.mrb[103].mxu1  ;;  %v4827_v45 = vrot.slane %v11334_v32, 1 }
 0x3b5   : > { %8162 = vst [vmem:[%s10944_s4 + $0x90] sm:$0xff] %v7898_v5   ;;  %9238 = vmatprep.mubr.msk.bf16.mxu0 %vm9772_vm1, %v11890_v4 }
 0x3b6   : > { %v6118_v14 = vmul.f32 0.01, %v5844_v34  ;;  %v5845_v52 = vadd.f32 %v11220_v49, %v5701_v60  ;;  %9517 = vmatmul.mubr.msk.bf16.gmra.mrb[208].mxu1 %vm1217_vm2, %v4822_v10  ;;  %vm5981_vm7 = vcmp.ge.f32.partialorder %v5844_v34, 0.0 }
 0x3b7   : > { %v4191_v44 = vpop.f32.mrb[100].mxu0  ;;  %9520 = vmatprep.mubr.msk.bf16.mxu1 %vm9772_vm1, %v11890_v4 }
 0x3b8   : > { %vm5982_vm8 = vcmp.ge.f32.partialorder %v5845_v52, 0.0  ;;  %v6119_v9 = vmul.f32 0.01, %v5845_v52  ;;  %v4621_v62 = vadd.f32 %v4191_v44, %v11956_v57  ;;  %v9132_v12 = vpop.f32.mrb[101].mxu0  ;;  %v6255_v15 = vsel %vm5981_vm7, %v5844_v34, %v6118_v14 }
 0x3b9   : > { %v4194_v25 = vpop.f32.mrb[102].mxu0  ;;  %v5280_v8 = vpop.f32.mrb[104].mxu1  ;;  %v3633_v34 = vrot.slane %v3631_v43, 1  ;;  %v3635_v12 = vshrl.u32 %v11315_v16, 16  ;;  %v11963_v43 = vld [vmem:[#allocation11_spill] sm:$0xff] }
 0x3ba   : > { %v6256_v63 = vsel %vm5982_vm8, %v5845_v52, %v6119_v9  ;;  %v5702_v58 = vadd.f32 %v5272_v50, %v4621_v62  ;;  %v4622_v33 = vadd.f32 %v4194_v25, %v11957_v11  ;;  %v9133_v28 = vpop.f32.mrb[103].mxu0  ;;  %v9414_v19 = vpop.f32.mrb[105].mxu1  ;;  %v11960_v52 = vld [vmem:[#allocation8_spill] sm:$0xff]  ;;  %v3639_v25 = vshll.u32 %v11334_v32, 16 }
 0x3bb   : > { %v7903_v26 = vpack.c.bf16 %v6256_v63, %v6255_v15  ;;  %v5283_v22 = vpop.f32.mrb[106].mxu1  ;;  %v3634_v57 = vsel %vm660_vm3, %v3629_v3, %v3633_v34  ;;  %v4828_v28 = vsel %vm4725_vm4, %v4825_v46, %v4827_v45  ;;  %v11353_v19 = vld [vmem:[%s9826_s23 + $0x1b0] sm:$0xff]   ;;  %v3637_v16 = vor.u32 %v3635_v12, %v3633_v34 }
 0x3bc   : > { %v5846_v17 = vadd.f32 %v11220_v49, %v5702_v58  ;;  %v5703_v30 = vadd.f32 %v5275_v13, %v4622_v33  ;;  %9239 = vmatmul.mubr.msk.bf16.gmra.mrb[208].mxu0 %vm1217_vm2, %v3618_v37  ;;  %v9415_v53 = vpop.f32.mrb[107].mxu1  ;;  %v4829_v39 = vrot.slane %v11353_v19, 1 }
 0x3bd   : > { %8163 = vst [vmem:[%s10944_s4 + $0x98] sm:$0xff] %v7903_v26   ;;  %9242 = vmatprep.mubr.msk.bf16.mxu0 %vm9772_vm1, %v11890_v4 }
 0x3be   : > { %v6120_v54 = vmul.f32 0.01, %v5846_v17  ;;  %v5847_v29 = vadd.f32 %v11220_v49, %v5703_v30  ;;  %9521 = vmatmul.mubr.msk.bf16.gmra.mrb[212].mxu1 %vm1217_vm2, %v4824_v18  ;;  %vm5983_vm9 = vcmp.ge.f32.partialorder %v5846_v17, 0.0 }
 0x3bf   : > { %v4199_v0 = vpop.f32.mrb[104].mxu0  ;;  %9524 = vmatprep.mubr.msk.bf16.mxu1 %vm9772_vm1, %v11890_v4 }
 0x3c0   : > { %vm5984_vm10 = vcmp.ge.f32.partialorder %v5847_v29, 0.0  ;;  %v6121_v23 = vmul.f32 0.01, %v5847_v29  ;;  %v4623_v2 = vadd.f32 %v4199_v0, %v11958_v38  ;;  %v9136_v27 = vpop.f32.mrb[105].mxu0  ;;  %v6257_v48 = vsel %vm5983_vm9, %v5846_v17, %v6120_v54 }
 0x3c1   : > { %v4202_v51 = vpop.f32.mrb[106].mxu0  ;;  %v5288_v21 = vpop.f32.mrb[108].mxu1  ;;  %v3641_v17 = vrot.slane %v3639_v25, 1  ;;  %v3643_v27 = vshrl.u32 %v11334_v32, 16  ;;  %v11965_v25 = vld [vmem:[#allocation13_spill] sm:$0xff] }
 0x3c2   : > { %v6258_v50 = vsel %vm5984_vm10, %v5847_v29, %v6121_v23  ;;  %v5704_v41 = vadd.f32 %v5280_v8, %v4623_v2  ;;  %v4624_v59 = vadd.f32 %v4202_v51, %v11959_v1  ;;  %v9137_v47 = vpop.f32.mrb[107].mxu0  ;;  %v9418_v7 = vpop.f32.mrb[109].mxu1  ;;  %v11962_v29 = vld [vmem:[#allocation10_spill] sm:$0xff]  ;;  %v3647_v51 = vshll.u32 %v11353_v19, 16 }
 0x3c3   : > { %v7908_v61 = vpack.c.bf16 %v6258_v50, %v6257_v48  ;;  %v5291_v35 = vpop.f32.mrb[110].mxu1  ;;  %v3642_v38 = vsel %vm660_vm3, %v3637_v16, %v3641_v17  ;;  %v4830_v47 = vsel %vm4725_vm4, %v4827_v45, %v4829_v39  ;;  %v11372_v7 = vld [vmem:[%s9826_s23 + $0x1b8] sm:$0xff]   ;;  %v3645_v32 = vor.u32 %v3643_v27, %v3641_v17 }
 0x3c4   : > { %v5848_v5 = vadd.f32 %v11220_v49, %v5704_v41  ;;  %v5705_v13 = vadd.f32 %v5283_v22, %v4624_v59  ;;  %9243 = vmatmul.mubr.msk.bf16.gmra.mrb[212].mxu0 %vm1217_vm2, %v3626_v20  ;;  %v9419_v10 = vpop.f32.mrb[111].mxu1  ;;  %v4831_v34 = vrot.slane %v11372_v7, 1 }
 0x3c5   : > { %8164 = vst [vmem:[%s10944_s4 + $0xa0] sm:$0xff] %v7908_v61   ;;  %9246 = vmatprep.mubr.msk.bf16.mxu0 %vm9772_vm1, %v11890_v4 }
 0x3c6   : > { %v6122_v60 = vmul.f32 0.01, %v5848_v5  ;;  %v5849_v42 = vadd.f32 %v11220_v49, %v5705_v13  ;;  %9525 = vmatmul.mubr.msk.bf16.gmra.mrb[216].mxu1 %vm1217_vm2, %v4826_v36  ;;  %vm5985_vm11 = vcmp.ge.f32.partialorder %v5848_v5, 0.0 }
 0x3c7   : > { %v4207_v56 = vpop.f32.mrb[108].mxu0  ;;  %9528 = vmatprep.mubr.msk.bf16.mxu1 %vm9772_vm1, %v11890_v4 }
 0x3c8   : > { %vm5986_vm12 = vcmp.ge.f32.partialorder %v5849_v42, 0.0  ;;  %v6123_v14 = vmul.f32 0.01, %v5849_v42  ;;  %v4625_v44 = vadd.f32 %v4207_v56, %v11960_v52  ;;  %v9140_v55 = vpop.f32.mrb[109].mxu0  ;;  %v6259_v37 = vsel %vm5985_vm11, %v5848_v5, %v6122_v60 }
 0x3c9   : > { %v4210_v9 = vpop.f32.mrb[110].mxu0  ;;  %v5296_v62 = vpop.f32.mrb[112].mxu1  ;;  %v3649_v5 = vrot.slane %v3647_v51, 1  ;;  %v3651_v55 = vshrl.u32 %v11353_v19, 16  ;;  %v11967_v51 = vld [vmem:[#allocation15_spill] sm:$0xff] }
 0x3ca   : > { %v6260_v8 = vsel %vm5986_vm12, %v5849_v42, %v6123_v14  ;;  %v5706_v31 = vadd.f32 %v5288_v21, %v4625_v44  ;;  %v4626_v15 = vadd.f32 %v4210_v9, %v11961_v24  ;;  %v9141_v63 = vpop.f32.mrb[111].mxu0  ;;  %v9422_v58 = vpop.f32.mrb[113].mxu1  ;;  %v11964_v42 = vld [vmem:[#allocation12_spill] sm:$0xff]  ;;  %v3655_v9 = vshll.u32 %v11372_v7, 16 }
 0x3cb   : > { %v7913_v11 = vpack.c.bf16 %v6260_v8, %v6259_v37  ;;  %v5299_v33 = vpop.f32.mrb[114].mxu1  ;;  %v3650_v52 = vsel %vm660_vm3, %v3645_v32, %v3649_v5  ;;  %v4832_v63 = vsel %vm4725_vm4, %v4829_v39, %v4831_v34  ;;  %v11391_v58 = vld [vmem:[%s9826_s23 + $0x1c0] sm:$0xff]   ;;  %v3653_v19 = vor.u32 %v3651_v55, %v3649_v5 }
 0x3cc   : > { %v5850_v26 = vadd.f32 %v11220_v49, %v5706_v31  ;;  %v5707_v22 = vadd.f32 %v5291_v35, %v4626_v15  ;;  %9247 = vmatmul.mubr.msk.bf16.gmra.mrb[216].mxu0 %vm1217_vm2, %v3634_v57  ;;  %v9423_v18 = vpop.f32.mrb[115].mxu1  ;;  %v4833_v17 = vrot.slane %v11391_v58, 1 }
 0x3cd   : > { %8165 = vst [vmem:[%s10944_s4 + $0xa8] sm:$0xff] %v7913_v11   ;;  %9250 = vmatprep.mubr.msk.bf16.mxu0 %vm9772_vm1, %v11890_v4 }
 0x3ce   : > { %v6124_v30 = vmul.f32 0.01, %v5850_v26  ;;  %v5851_v53 = vadd.f32 %v11220_v49, %v5707_v22  ;;  %9529 = vmatmul.mubr.msk.bf16.gmra.mrb[220].mxu1 %vm1217_vm2, %v4828_v28  ;;  %vm5987_vm13 = vcmp.ge.f32.partialorder %v5850_v26, 0.0 }
 0x3cf   : > { %v4215_v6 = vpop.f32.mrb[112].mxu0  ;;  %9532 = vmatprep.mubr.msk.bf16.mxu1 %vm9772_vm1, %v11890_v4 }
 0x3d0   : > { %vm5988_vm14 = vcmp.ge.f32.partialorder %v5851_v53, 0.0  ;;  %v6125_v54 = vmul.f32 0.01, %v5851_v53  ;;  %v4627_v0 = vadd.f32 %v4215_v6, %v11962_v29  ;;  %v9144_v46 = vpop.f32.mrb[113].mxu0  ;;  %v6261_v20 = vsel %vm5987_vm13, %v5850_v26, %v6124_v30 }
 0x3d1   : > { %v4218_v23 = vpop.f32.mrb[114].mxu0  ;;  %v5304_v2 = vpop.f32.mrb[116].mxu1  ;;  %v3657_v26 = vrot.slane %v3655_v9, 1  ;;  %v3659_v46 = vshrl.u32 %v11372_v7, 16  ;;  %v11969_v9 = vld [vmem:[#allocation17_spill] sm:$0xff] }
 0x3d2   : > { %v6262_v21 = vsel %vm5988_vm14, %v5851_v53, %v6125_v54  ;;  %v5708_v40 = vadd.f32 %v5296_v62, %v4627_v0  ;;  %v4628_v48 = vadd.f32 %v4218_v23, %v11963_v43  ;;  %v9145_v50 = vpop.f32.mrb[115].mxu0  ;;  %v9426_v41 = vpop.f32.mrb[117].mxu1  ;;  %v11966_v53 = vld [vmem:[#allocation14_spill] sm:$0xff]  ;;  %v3663_v23 = vshll.u32 %v11391_v58, 16 }
 0x3d3   : > { %v7918_v1 = vpack.c.bf16 %v6262_v21, %v6261_v20  ;;  %v5307_v59 = vpop.f32.mrb[118].mxu1  ;;  %v3658_v29 = vsel %vm660_vm3, %v3653_v19, %v3657_v26  ;;  %v4834_v50 = vsel %vm4725_vm4, %v4831_v34, %v4833_v17  ;;  %v11410_v41 = vld [vmem:[%s9826_s23 + $0x1c8] sm:$0xff]   ;;  %v3661_v7 = vor.u32 %v3659_v46, %v3657_v26 }
 0x3d4   : > { %v5852_v61 = vadd.f32 %v11220_v49, %v5708_v40  ;;  %v5709_v35 = vadd.f32 %v5299_v33, %v4628_v48  ;;  %9251 = vmatmul.mubr.msk.bf16.gmra.mrb[220].mxu0 %vm1217_vm2, %v3642_v38  ;;  %v9427_v36 = vpop.f32.mrb[119].mxu1  ;;  %v4835_v5 = vrot.slane %v11410_v41, 1 }
 0x3d5   : > { %8166 = vst [vmem:[%s10944_s4 + $0xb0] sm:$0xff] %v7918_v1   ;;  %9254 = vmatprep.mubr.msk.bf16.mxu0 %vm9772_vm1, %v11890_v4 }
 0x3d6   : > { %v6126_v13 = vmul.f32 0.01, %v5852_v61  ;;  %v5853_v10 = vadd.f32 %v11220_v49, %v5709_v35  ;;  %9533 = vmatmul.mubr.msk.bf16.gmra.mrb[224].mxu1 %vm1217_vm2, %v4830_v47  ;;  %vm5989_vm15 = vcmp.ge.f32.partialorder %v5852_v61, 0.0 }
 0x3d7   : > { %v4223_v3 = vpop.f32.mrb[116].mxu0  ;;  %9536 = vmatprep.mubr.msk.bf16.mxu1 %vm9772_vm1, %v11890_v4 }
 0x3d8   : > { %vm5990_vm0 = vcmp.ge.f32.partialorder %v5853_v10, 0.0  ;;  %v6127_v60 = vmul.f32 0.01, %v5853_v10  ;;  %v4629_v56 = vadd.f32 %v4223_v3, %v11964_v42  ;;  %v9148_v45 = vpop.f32.mrb[117].mxu0  ;;  %v6263_v57 = vsel %vm5989_vm15, %v5852_v61, %v6126_v13 }
 0x3d9   : > { %v4226_v14 = vpop.f32.mrb[118].mxu0  ;;  %v5312_v44 = vpop.f32.mrb[120].mxu1  ;;  %v3665_v61 = vrot.slane %v3663_v23, 1  ;;  %v3667_v45 = vshrl.u32 %v11391_v58, 16  ;;  %v11971_v23 = vld [vmem:[#allocation19_spill] sm:$0xff] }
 0x3da   : > { %v6264_v62 = vsel %vm5990_vm0, %v5853_v10, %v6127_v60  ;;  %v5710_v12 = vadd.f32 %v5304_v2, %v4629_v56  ;;  %v4630_v37 = vadd.f32 %v4226_v14, %v11965_v25  ;;  %v9149_v8 = vpop.f32.mrb[119].mxu0  ;;  %v9430_v31 = vpop.f32.mrb[121].mxu1  ;;  %v11968_v10 = vld [vmem:[#allocation16_spill] sm:$0xff]  ;;  %v3671_v14 = vshll.u32 %v11410_v41, 16 }
 0x3db   : > { %v7923_v24 = vpack.c.bf16 %v6264_v62, %v6263_v57  ;;  %v5315_v15 = vpop.f32.mrb[122].mxu1  ;;  %v3666_v42 = vsel %vm660_vm3, %v3661_v7, %v3665_v61  ;;  %v4836_v8 = vsel %vm4725_vm4, %v4833_v17, %v4835_v5  ;;  %v11429_v31 = vld [vmem:[%s9826_s23 + $0x1d0] sm:$0xff]   ;;  %v3669_v58 = vor.u32 %v3667_v45, %v3665_v61 }
 0x3dc   : > { %v5854_v11 = vadd.f32 %v11220_v49, %v5710_v12  ;;  %v5711_v33 = vadd.f32 %v5307_v59, %v4630_v37  ;;  %9255 = vmatmul.mubr.msk.bf16.gmra.mrb[224].mxu0 %vm1217_vm2, %v3650_v52  ;;  %v9431_v28 = vpop.f32.mrb[123].mxu1  ;;  %v4837_v26 = vrot.slane %v11429_v31, 1 }
 0x3dd   : > { %8167 = vst [vmem:[%s10944_s4 + $0xb8] sm:$0xff] %v7923_v24   ;;  %9258 = vmatprep.mubr.msk.bf16.mxu0 %vm9772_vm1, %v11890_v4 }
 0x3de   : > { %v6128_v22 = vmul.f32 0.01, %v5854_v11  ;;  %v5855_v18 = vadd.f32 %v11220_v49, %v5711_v33  ;;  %9537 = vmatmul.mubr.msk.bf16.gmra.mrb[228].mxu1 %vm1217_vm2, %v4832_v63  ;;  %vm5991_vm5 = vcmp.ge.f32.partialorder %v5854_v11, 0.0 }
 0x3df   : > { %v4231_v16 = vpop.f32.mrb[120].mxu0  ;;  %9540 = vmatprep.mubr.msk.bf16.mxu1 %vm9772_vm1, %v11890_v4 }
 0x3e0   : > { %vm5992_vm6 = vcmp.ge.f32.partialorder %v5855_v18, 0.0  ;;  %v6129_v30 = vmul.f32 0.01, %v5855_v18  ;;  %v4631_v6 = vadd.f32 %v4231_v16, %v11966_v53  ;;  %v9152_v39 = vpop.f32.mrb[121].mxu0  ;;  %v6265_v38 = vsel %vm5991_vm5, %v5854_v11, %v6128_v22 }
 0x3e1   : > { %v4234_v54 = vpop.f32.mrb[122].mxu0  ;;  %v5320_v0 = vpop.f32.mrb[124].mxu1  ;;  %v3673_v11 = vrot.slane %v3671_v14, 1  ;;  %v3675_v39 = vshrl.u32 %v11410_v41, 16  ;;  %v11973_v14 = vld [vmem:[#allocation21_spill] sm:$0xff] }
 0x3e2   : > { %v6266_v2 = vsel %vm5992_vm6, %v5855_v18, %v6129_v30  ;;  %v5712_v27 = vadd.f32 %v5312_v44, %v4631_v6  ;;  %v4632_v20 = vadd.f32 %v4234_v54, %v11967_v51  ;;  %v9153_v21 = vpop.f32.mrb[123].mxu0  ;;  %v9434_v40 = vpop.f32.mrb[125].mxu1  ;;  %v11970_v18 = vld [vmem:[#allocation18_spill] sm:$0xff]  ;;  %v3679_v54 = vshll.u32 %v11429_v31, 16 }
 0x3e3   : > { %v7928_v43 = vpack.c.bf16 %v6266_v2, %v6265_v38  ;;  %v5323_v48 = vpop.f32.mrb[126].mxu1  ;;  %v3674_v53 = vsel %vm660_vm3, %v3669_v58, %v3673_v11  ;;  %v4838_v21 = vsel %vm4725_vm4, %v4835_v5, %v4837_v26  ;;  %v11448_v40 = vld [vmem:[%s9826_s23 + $0x1d8] sm:$0xff]   ;;  %v3677_v41 = vor.u32 %v3675_v39, %v3673_v11 }
 0x3e4   : > { %v5856_v1 = vadd.f32 %v11220_v49, %v5712_v27  ;;  %v5713_v59 = vadd.f32 %v5315_v15, %v4632_v20  ;;  %9259 = vmatmul.mubr.msk.bf16.gmra.mrb[228].mxu0 %vm1217_vm2, %v3658_v29  ;;  %v9435_v47 = vpop.f32.mrb[127].mxu1  ;;  %v4839_v61 = vrot.slane %v11448_v40, 1 }
 0x3e5   : > { %8168 = vst [vmem:[%s10944_s4 + $0xc0] sm:$0xff] %v7928_v43   ;;  %9262 = vmatprep.mubr.msk.bf16.mxu0 %vm9772_vm1, %v11890_v4 }
 0x3e6   : > { %v6130_v35 = vmul.f32 0.01, %v5856_v1  ;;  %v5857_v36 = vadd.f32 %v11220_v49, %v5713_v59  ;;  %9541 = vmatmul.mubr.msk.bf16.gmra.mrb[232].mxu1 %vm1217_vm2, %v4834_v50  ;;  %vm5993_vm7 = vcmp.ge.f32.partialorder %v5856_v1, 0.0 }
 0x3e7   : > { %v4239_v32 = vpop.f32.mrb[124].mxu0  ;;  %9544 = vmatprep.mubr.msk.bf16.mxu1 %vm9772_vm1, %v11890_v4 }
 0x3e8   : > { %vm5994_vm8 = vcmp.ge.f32.partialorder %v5857_v36, 0.0  ;;  %v6131_v13 = vmul.f32 0.01, %v5857_v36  ;;  %v4633_v3 = vadd.f32 %v4239_v32, %v11968_v10  ;;  %v9156_v34 = vpop.f32.mrb[125].mxu0  ;;  %v6267_v52 = vsel %vm5993_vm7, %v5856_v1, %v6130_v35 }
 0x3e9   : > { %v4242_v60 = vpop.f32.mrb[126].mxu0  ;;  %v5328_v56 = vpop.f32.mrb[128].mxu1  ;;  %v3681_v1 = vrot.slane %v3679_v54, 1  ;;  %v3683_v34 = vshrl.u32 %v11429_v31, 16  ;;  %v11975_v54 = vld [vmem:[#allocation23_spill] sm:$0xff] }
 0x3ea   : > { %v6268_v44 = vsel %vm5994_vm8, %v5857_v36, %v6131_v13  ;;  %v5714_v55 = vadd.f32 %v5320_v0, %v4633_v3  ;;  %v4634_v57 = vadd.f32 %v4242_v60, %v11969_v9  ;;  %v9157_v62 = vpop.f32.mrb[127].mxu0  ;;  %v9438_v12 = vpop.f32.mrb[129].mxu1  ;;  %v11972_v36 = vld [vmem:[#allocation20_spill] sm:$0xff]  ;;  %v3687_v60 = vshll.u32 %v11448_v40, 16 }
 0x3eb   : > { %v7933_v25 = vpack.c.bf16 %v6268_v44, %v6267_v52  ;;  %v5331_v37 = vpop.f32.mrb[130].mxu1  ;;  %v3682_v10 = vsel %vm660_vm3, %v3677_v41, %v3681_v1  ;;  %v4840_v62 = vsel %vm4725_vm4, %v4837_v26, %v4839_v61  ;;  %v11467_v12 = vld [vmem:[%s9826_s23 + $0x1e0] sm:$0xff]   ;;  %v3685_v31 = vor.u32 %v3683_v34, %v3681_v1 }
 0x3ec   : > { %v5858_v24 = vadd.f32 %v11220_v49, %v5714_v55  ;;  %v5715_v15 = vadd.f32 %v5323_v48, %v4634_v57  ;;  %9263 = vmatmul.mubr.msk.bf16.gmra.mrb[232].mxu0 %vm1217_vm2, %v3666_v42  ;;  %v9439_v63 = vpop.f32.mrb[131].mxu1  ;;  %v4841_v11 = vrot.slane %v11467_v12, 1 }
 0x3ed   : > { %8169 = vst [vmem:[%s10944_s4 + $0xc8] sm:$0xff] %v7933_v25   ;;  %9266 = vmatprep.mubr.msk.bf16.mxu0 %vm9772_vm1, %v11890_v4 }
 0x3ee   : > { %v6132_v33 = vmul.f32 0.01, %v5858_v24  ;;  %v5859_v28 = vadd.f32 %v11220_v49, %v5715_v15  ;;  %9545 = vmatmul.mubr.msk.bf16.gmra.mrb[236].mxu1 %vm1217_vm2, %v4836_v8  ;;  %vm5995_vm9 = vcmp.ge.f32.partialorder %v5858_v24, 0.0 }
 0x3ef   : > { %v4247_v19 = vpop.f32.mrb[128].mxu0  ;;  %9548 = vmatprep.mubr.msk.bf16.mxu1 %vm9772_vm1, %v11890_v4 }
 0x3f0   : > { %vm5996_vm10 = vcmp.ge.f32.partialorder %v5859_v28, 0.0  ;;  %v6133_v22 = vmul.f32 0.01, %v5859_v28  ;;  %v4635_v16 = vadd.f32 %v4247_v19, %v11970_v18  ;;  %v9160_v17 = vpop.f32.mrb[129].mxu0  ;;  %v6269_v29 = vsel %vm5995_vm9, %v5858_v24, %v6132_v33 }
 0x3f1   : > { %v4250_v30 = vpop.f32.mrb[130].mxu0  ;;  %v5336_v6 = vpop.f32.mrb[132].mxu1  ;;  %v3689_v24 = vrot.slane %v3687_v60, 1  ;;  %v3691_v17 = vshrl.u32 %v11448_v40, 16  ;;  %v11977_v60 = vld [vmem:[#allocation25_spill] sm:$0xff] }
 0x3f2   : > { %v6270_v0 = vsel %vm5996_vm10, %v5859_v28, %v6133_v22  ;;  %v5716_v46 = vadd.f32 %v5328_v56, %v4635_v16  ;;  %v4636_v38 = vadd.f32 %v4250_v30, %v11971_v23  ;;  %v9161_v2 = vpop.f32.mrb[131].mxu0  ;;  %v9442_v27 = vpop.f32.mrb[133].mxu1  ;;  %v11974_v28 = vld [vmem:[#allocation22_spill] sm:$0xff]  ;;  %v3695_v30 = vshll.u32 %v11467_v12, 16 }
 0x3f3   : > { %v7938_v51 = vpack.c.bf16 %v6270_v0, %v6269_v29  ;;  %v5339_v20 = vpop.f32.mrb[134].mxu1  ;;  %v3690_v18 = vsel %vm660_vm3, %v3685_v31, %v3689_v24  ;;  %v4842_v2 = vsel %vm4725_vm4, %v4839_v61, %v4841_v11  ;;  %v11486_v27 = vld [vmem:[%s9826_s23 + $0x1e8] sm:$0xff]   ;;  %v3693_v40 = vor.u32 %v3691_v17, %v3689_v24 }
 0x3f4   : > { %v5860_v43 = vadd.f32 %v11220_v49, %v5716_v46  ;;  %v5717_v48 = vadd.f32 %v5331_v37, %v4636_v38  ;;  %9267 = vmatmul.mubr.msk.bf16.gmra.mrb[236].mxu0 %vm1217_vm2, %v3674_v53  ;;  %v9443_v50 = vpop.f32.mrb[135].mxu1  ;;  %v4843_v1 = vrot.slane %v11486_v27, 1 }
 0x3f5   : > { %8170 = vst [vmem:[%s10944_s4 + $0xd0] sm:$0xff] %v7938_v51   ;;  %9270 = vmatprep.mubr.msk.bf16.mxu0 %vm9772_vm1, %v11890_v4 }
 0x3f6   : > { %v6134_v59 = vmul.f32 0.01, %v5860_v43  ;;  %v5861_v47 = vadd.f32 %v11220_v49, %v5717_v48  ;;  %9549 = vmatmul.mubr.msk.bf16.gmra.mrb[240].mxu1 %vm1217_vm2, %v4838_v21  ;;  %vm5997_vm11 = vcmp.ge.f32.partialorder %v5860_v43, 0.0 }
 0x3f7   : > { %v4255_v7 = vpop.f32.mrb[132].mxu0  ;;  %9552 = vmatprep.mubr.msk.bf16.mxu1 %vm9772_vm1, %v11890_v4 }
 0x3f8   : > { %vm5998_vm12 = vcmp.ge.f32.partialorder %v5861_v47, 0.0  ;;  %v6135_v35 = vmul.f32 0.01, %v5861_v47  ;;  %v4637_v32 = vadd.f32 %v4255_v7, %v11972_v36  ;;  %v9164_v5 = vpop.f32.mrb[133].mxu0  ;;  %v6271_v42 = vsel %vm5997_vm11, %v5860_v43, %v6134_v59 }
 0x3f9   : > { %v4258_v13 = vpop.f32.mrb[134].mxu0  ;;  %v5344_v3 = vpop.f32.mrb[136].mxu1  ;;  %v3697_v43 = vrot.slane %v3695_v30, 1  ;;  %v3699_v5 = vshrl.u32 %v11467_v12, 16  ;;  %v11979_v30 = vld [vmem:[#allocation27_spill] sm:$0xff] }
 0x3fa   : > { %v6272_v56 = vsel %vm5998_vm12, %v5861_v47, %v6135_v35  ;;  %v5718_v45 = vadd.f32 %v5336_v6, %v4637_v32  ;;  %v4638_v52 = vadd.f32 %v4258_v13, %v11973_v14  ;;  %v9165_v44 = vpop.f32.mrb[135].mxu0  ;;  %v9446_v55 = vpop.f32.mrb[137].mxu1  ;;  %v11976_v47 = vld [vmem:[#allocation24_spill] sm:$0xff]  ;;  %v3703_v13 = vshll.u32 %v11486_v27, 16 }
 0x3fb   : > { %v7943_v9 = vpack.c.bf16 %v6272_v56, %v6271_v42  ;;  %v5347_v57 = vpop.f32.mrb[138].mxu1  ;;  %v3698_v36 = vsel %vm660_vm3, %v3693_v40, %v3697_v43  ;;  %v4844_v44 = vsel %vm4725_vm4, %v4841_v11, %v4843_v1  ;;  %v11505_v55 = vld [vmem:[%s9826_s23 + $0x1f0] sm:$0xff]   ;;  %v3701_v12 = vor.u32 %v3699_v5, %v3697_v43 }
 0x3fc   : > { %v5862_v25 = vadd.f32 %v11220_v49, %v5718_v45  ;;  %v5719_v37 = vadd.f32 %v5339_v20, %v4638_v52  ;;  %9271 = vmatmul.mubr.msk.bf16.gmra.mrb[240].mxu0 %vm1217_vm2, %v3682_v10  ;;  %v9447_v8 = vpop.f32.mrb[139].mxu1  ;;  %v4845_v24 = vrot.slane %v11505_v55, 1 }
 0x3fd   : > { %8171 = vst [vmem:[%s10944_s4 + $0xd8] sm:$0xff] %v7943_v9   ;;  %9274 = vmatprep.mubr.msk.bf16.mxu0 %vm9772_vm1, %v11890_v4  ;;  %v11515_v8 = vld [vmem:[%s11850_s2] ss:$0 sm:$0xff] }
 0x3fe   : > { %v6136_v15 = vmul.f32 0.01, %v5862_v25  ;;  %v5863_v63 = vadd.f32 %v11220_v49, %v5719_v37  ;;  %9553 = vmatmul.mubr.msk.bf16.gmra.mrb[244].mxu1 %vm1217_vm2, %v4840_v62  ;;  %vm5999_vm13 = vcmp.ge.f32.partialorder %v5862_v25, 0.0 }
 0x3ff   : > { %v4263_v58 = vpop.f32.mrb[136].mxu0  ;;  %9556 = vmatprep.mubr.msk.bf16.mxu1 %vm9772_vm1, %v11890_v4 }
 0x400   : > { %vm6000_vm14 = vcmp.ge.f32.partialorder %v5863_v63, 0.0  ;;  %v6137_v33 = vmul.f32 0.01, %v5863_v63  ;;  %v4639_v19 = vadd.f32 %v4263_v58, %v11974_v28  ;;  %v9168_v26 = vpop.f32.mrb[137].mxu0  ;;  %v6273_v53 = vsel %vm5999_vm13, %v5862_v25, %v6136_v15 }
 0x401   : > { %v4266_v22 = vpop.f32.mrb[138].mxu0  ;;  %v5352_v16 = vpop.f32.mrb[140].mxu1  ;;  %v3705_v25 = vrot.slane %v3703_v13, 1  ;;  %v3707_v26 = vshrl.u32 %v11486_v27, 16  ;;  %v11981_v13 = vld [vmem:[#allocation29_spill] sm:$0xff] }
 0x402   : > { %v6274_v6 = vsel %vm6000_vm14, %v5863_v63, %v6137_v33  ;;  %v5720_v39 = vadd.f32 %v5344_v3, %v4639_v19  ;;  %v4640_v29 = vadd.f32 %v4266_v22, %v11975_v54  ;;  %v9169_v0 = vpop.f32.mrb[139].mxu0  ;;  %v9450_v46 = vpop.f32.mrb[141].mxu1  ;;  %v11978_v63 = vld [vmem:[#allocation26_spill] sm:$0xff]  ;;  %v3711_v22 = vshll.u32 %v11505_v55, 16 }
 0x403   : > { %v7948_v23 = vpack.c.bf16 %v6274_v6, %v6273_v53  ;;  %v5355_v38 = vpop.f32.mrb[142].mxu1  ;;  %v3706_v28 = vsel %vm660_vm3, %v3701_v12, %v3705_v25  ;;  %v4846_v0 = vsel %vm4725_vm4, %v4843_v1, %v4845_v24  ;;  %v11529_v46 = vld [vmem:[%s9826_s23 + $0x1f8] sm:$0xff]   ;;  %v3709_v27 = vor.u32 %v3707_v26, %v3705_v25 }
 0x404   : > { %v5864_v51 = vadd.f32 %v11220_v49, %v5720_v39  ;;  %v5721_v20 = vadd.f32 %v5347_v57, %v4640_v29  ;;  %9275 = vmatmul.mubr.msk.bf16.gmra.mrb[244].mxu0 %vm1217_vm2, %v3690_v18  ;;  %v9451_v21 = vpop.f32.mrb[143].mxu1  ;;  %v4847_v43 = vrot.slane %v11529_v46, 1 }
 0x405   : > { %8172 = vst [vmem:[%s10944_s4 + $0xe0] sm:$0xff] %v7948_v23   ;;  %9278 = vmatprep.mubr.msk.bf16.mxu0 %vm9772_vm1, %v11890_v4 }
 0x406   : > { %v6138_v48 = vmul.f32 0.01, %v5864_v51  ;;  %v5865_v50 = vadd.f32 %v11220_v49, %v5721_v20  ;;  %9557 = vmatmul.mubr.msk.bf16.gmra.mrb[248].mxu1 %vm1217_vm2, %v4842_v2  ;;  %vm6001_vm15 = vcmp.ge.f32.partialorder %v5864_v51, 0.0 }
 0x407   : > { %v4271_v41 = vpop.f32.mrb[140].mxu0  ;;  %9560 = vmatprep.mubr.msk.bf16.mxu1 %vm9772_vm1, %v11890_v4 }
 0x408   : > { %vm6002_vm0 = vcmp.ge.f32.partialorder %v5865_v50, 0.0  ;;  %v6139_v59 = vmul.f32 0.01, %v5865_v50  ;;  %v4641_v7 = vadd.f32 %v4271_v41, %v11976_v47  ;;  %v9172_v61 = vpop.f32.mrb[141].mxu0  ;;  %v6275_v10 = vsel %vm6001_vm15, %v5864_v51, %v6138_v48 }
 0x409   : > { %v4274_v35 = vpop.f32.mrb[142].mxu0  ;;  %v5360_v32 = vpop.f32.mrb[144].mxu1  ;;  %v3713_v51 = vrot.slane %v3711_v22, 1  ;;  %v3715_v61 = vshrl.u32 %v11505_v55, 16  ;;  %v11983_v22 = vld [vmem:[#allocation31_spill] sm:$0xff] }
 0x40a   : > { %v6276_v3 = vsel %vm6002_vm0, %v5865_v50, %v6139_v59  ;;  %v5722_v34 = vadd.f32 %v5352_v16, %v4641_v7  ;;  %v4642_v42 = vadd.f32 %v4274_v35, %v11977_v60  ;;  %v9173_v56 = vpop.f32.mrb[143].mxu0  ;;  %v9454_v45 = vpop.f32.mrb[145].mxu1  ;;  %v11980_v50 = vld [vmem:[#allocation28_spill] sm:$0xff]  ;;  %v3719_v35 = vshll.u32 %v11529_v46, 16 }
 0x40b   : > { %v7953_v14 = vpack.c.bf16 %v6276_v3, %v6275_v10  ;;  %v5363_v52 = vpop.f32.mrb[146].mxu1  ;;  %v3714_v47 = vsel %vm660_vm3, %v3709_v27, %v3713_v51  ;;  %v4848_v56 = vsel %vm4725_vm4, %v4845_v24, %v4847_v43  ;;  %v11548_v45 = vld [vmem:[%s9826_s23 + $0x200] sm:$0xff]   ;;  %v3717_v55 = vor.u32 %v3715_v61, %v3713_v51 }
 0x40c   : > { %v5866_v9 = vadd.f32 %v11220_v49, %v5722_v34  ;;  %v5723_v57 = vadd.f32 %v5355_v38, %v4642_v42  ;;  %9279 = vmatmul.mubr.msk.bf16.gmra.mrb[248].mxu0 %vm1217_vm2, %v3698_v36  ;;  %v9455_v62 = vpop.f32.mrb[147].mxu1  ;;  %v4849_v25 = vrot.slane %v11548_v45, 1 }
 0x40d   : > { %8173 = vst [vmem:[%s10944_s4 + $0xe8] sm:$0xff] %v7953_v14   ;;  %9282 = vmatprep.mubr.msk.bf16.mxu0 %vm9772_vm1, %v11890_v4 }
 0x40e   : > { %v6140_v37 = vmul.f32 0.01, %v5866_v9  ;;  %v5867_v31 = vadd.f32 %v11515_v8, %v5723_v57  ;;  %9561 = vmatmul.mubr.msk.bf16.gmra.mrb[252].mxu1 %vm1217_vm2, %v4844_v44  ;;  %vm6003_vm5 = vcmp.ge.f32.partialorder %v5866_v9, 0.0 }
 0x40f   : > { %v4279_v49 = vpop.f32.mrb[144].mxu0  ;;  %9564 = vmatprep.mubr.msk.bf16.mxu1 %vm9772_vm1, %v11890_v4 }
 0x410   : > { %vm6004_vm6 = vcmp.ge.f32.partialorder %v5867_v31, 0.0  ;;  %v6141_v15 = vmul.f32 0.01, %v5867_v31  ;;  %v4643_v58 = vadd.f32 %v4279_v49, %v11978_v63  ;;  %v9176_v11 = vpop.f32.mrb[145].mxu0  ;;  %v6277_v18 = vsel %vm6003_vm5, %v5866_v9, %v6140_v37 }
 0x411   : > { %v4282_v33 = vpop.f32.mrb[146].mxu0  ;;  %v5368_v19 = vpop.f32.mrb[148].mxu1  ;;  %v3721_v9 = vrot.slane %v3719_v35, 1  ;;  %v3723_v11 = vshrl.u32 %v11529_v46, 16  ;;  %v11985_v35 = vld [vmem:[#allocation33_spill] sm:$0xff] }
 0x412   : > { %v6278_v16 = vsel %vm6004_vm6, %v5867_v31, %v6141_v15  ;;  %v5724_v17 = vadd.f32 %v5360_v32, %v4643_v58  ;;  %v4644_v53 = vadd.f32 %v4282_v33, %v11979_v30  ;;  %v9177_v6 = vpop.f32.mrb[147].mxu0  ;;  %v9458_v39 = vpop.f32.mrb[149].mxu1  ;;  %v11982_v31 = vld [vmem:[#allocation30_spill] sm:$0xff]  ;;  %v3727_v33 = vshll.u32 %v11548_v45, 16 }
 0x413   : > { %v7958_v54 = vpack.c.bf16 %v6278_v16, %v6277_v18  ;;  %v5371_v29 = vpop.f32.mrb[150].mxu1  ;;  %v3722_v63 = vsel %vm660_vm3, %v3717_v55, %v3721_v9  ;;  %v4850_v6 = vsel %vm4725_vm4, %v4847_v43, %v4849_v25  ;;  %v11567_v39 = vld [vmem:[%s9826_s23 + $0x208] sm:$0xff]   ;;  %v3725_v46 = vor.u32 %v3723_v11, %v3721_v9 }
 0x414   : > { %v5868_v23 = vadd.f32 %v11515_v8, %v5724_v17  ;;  %v5725_v38 = vadd.f32 %v5363_v52, %v4644_v53  ;;  %9283 = vmatmul.mubr.msk.bf16.gmra.mrb[252].mxu0 %vm1217_vm2, %v3706_v28  ;;  %v9459_v2 = vpop.f32.mrb[151].mxu1  ;;  %v4851_v51 = vrot.slane %v11567_v39, 1 }
 0x415   : > { %8174 = vst [vmem:[%s10944_s4 + $0xf0] sm:$0xff] %v7958_v54   ;;  %9286 = vmatprep.mubr.msk.bf16.mxu0 %vm9772_vm1, %v11890_v4 }
 0x416   : > { %v6142_v20 = vmul.f32 0.01, %v5868_v23  ;;  %v5869_v21 = vadd.f32 %v11515_v8, %v5725_v38  ;;  %9565 = vmatmul.mubr.msk.bf16.gmra.mrb[0].mxu1 %vm1217_vm2, %v4846_v0  ;;  %vm6005_vm7 = vcmp.ge.f32.partialorder %v5868_v23, 0.0 }
 0x417   : > { %v4287_v40 = vpop.f32.mrb[148].mxu0  ;;  %9568 = vmatprep.mubr.msk.bf16.mxu1 %vm9772_vm1, %v11890_v4 }
 0x418   : > { %vm6006_vm8 = vcmp.ge.f32.partialorder %v5869_v21, 0.0  ;;  %v6143_v48 = vmul.f32 0.01, %v5869_v21  ;;  %v4645_v41 = vadd.f32 %v4287_v40, %v11980_v50  ;;  %v9180_v1 = vpop.f32.mrb[149].mxu0  ;;  %v6279_v36 = vsel %vm6005_vm7, %v5868_v23, %v6142_v20 }
 0x419   : > { %v4290_v59 = vpop.f32.mrb[150].mxu0  ;;  %v5376_v7 = vpop.f32.mrb[152].mxu1  ;;  %v3729_v23 = vrot.slane %v3727_v33, 1  ;;  %v3731_v1 = vshrl.u32 %v11548_v45, 16  ;;  %v11987_v33 = vld [vmem:[#allocation35_spill] sm:$0xff] }
 0x41a   : > { %v6280_v32 = vsel %vm6006_vm8, %v5869_v21, %v6143_v48  ;;  %v5726_v5 = vadd.f32 %v5368_v19, %v4645_v41  ;;  %v4646_v10 = vadd.f32 %v4290_v59, %v11981_v13  ;;  %v9181_v3 = vpop.f32.mrb[151].mxu0  ;;  %v9462_v34 = vpop.f32.mrb[153].mxu1  ;;  %v11984_v21 = vld [vmem:[#allocation32_spill] sm:$0xff]  ;;  %v3735_v59 = vshll.u32 %v11567_v39, 16 }
 0x41b   : > { %v7963_v60 = vpack.c.bf16 %v6280_v32, %v6279_v36  ;;  %v5379_v42 = vpop.f32.mrb[154].mxu1  ;;  %v3730_v50 = vsel %vm660_vm3, %v3725_v46, %v3729_v23  ;;  %v4852_v3 = vsel %vm4725_vm4, %v4849_v25, %v4851_v51  ;;  %v11586_v34 = vld [vmem:[%s9826_s23 + $0x210] sm:$0xff]   ;;  %v3733_v45 = vor.u32 %v3731_v1, %v3729_v23 }
 0x41c   : > { %v5870_v14 = vadd.f32 %v11515_v8, %v5726_v5  ;;  %v5727_v52 = vadd.f32 %v5371_v29, %v4646_v10  ;;  %9287 = vmatmul.mubr.msk.bf16.gmra.mrb[0].mxu0 %vm1217_vm2, %v3714_v47  ;;  %v9463_v44 = vpop.f32.mrb[155].mxu1  ;;  %v4853_v9 = vrot.slane %v11586_v34, 1 }
 0x41d   : > { %8175 = vst [vmem:[%s10944_s4 + $0xf8] sm:$0xff] %v7963_v60   ;;  %9290 = vmatprep.mubr.msk.bf16.mxu0 %vm9772_vm1, %v11890_v4 }
 0x41e   : > { %v6144_v57 = vmul.f32 0.01, %v5870_v14  ;;  %v5871_v62 = vadd.f32 %v11515_v8, %v5727_v52  ;;  %9569 = vmatmul.mubr.msk.bf16.gmra.mrb[4].mxu1 %vm1217_vm2, %v4848_v56  ;;  %vm6007_vm9 = vcmp.ge.f32.partialorder %v5870_v14, 0.0 }
 0x41f   : > { %v4295_v12 = vpop.f32.mrb[152].mxu0  ;;  %9572 = vmatprep.mubr.msk.bf16.mxu1 %vm9772_vm1, %v11890_v4 }
 0x420   : > { %vm6008_vm10 = vcmp.ge.f32.partialorder %v5871_v62, 0.0  ;;  %v6145_v37 = vmul.f32 0.01, %v5871_v62  ;;  %v4647_v49 = vadd.f32 %v4295_v12, %v11982_v31  ;;  %v9184_v24 = vpop.f32.mrb[153].mxu0  ;;  %v6281_v28 = vsel %vm6007_vm9, %v5870_v14, %v6144_v57 }
 0x421   : > { %v4298_v15 = vpop.f32.mrb[154].mxu0  ;;  %v5384_v58 = vpop.f32.mrb[156].mxu1  ;;  %v3737_v14 = vrot.slane %v3735_v59, 1  ;;  %v3739_v24 = vshrl.u32 %v11567_v39, 16  ;;  %v11989_v59 = vld [vmem:[#allocation37_spill] sm:$0xff] }
 0x422   : > { %v6282_v19 = vsel %vm6008_vm10, %v5871_v62, %v6145_v37  ;;  %v5728_v26 = vadd.f32 %v5376_v7, %v4647_v49  ;;  %v4648_v18 = vadd.f32 %v4298_v15, %v11983_v22  ;;  %v9185_v16 = vpop.f32.mrb[155].mxu0  ;;  %v9466_v17 = vpop.f32.mrb[157].mxu1  ;;  %v11986_v62 = vld [vmem:[#allocation34_spill] sm:$0xff]  ;;  %v3743_v15 = vshll.u32 %v11586_v34, 16 }
 0x423   : > { %v7968_v30 = vpack.c.bf16 %v6282_v19, %v6281_v28  ;;  %v5387_v53 = vpop.f32.mrb[158].mxu1  ;;  %v3738_v31 = vsel %vm660_vm3, %v3733_v45, %v3737_v14  ;;  %v4854_v16 = vsel %vm4725_vm4, %v4851_v51, %v4853_v9  ;;  %v11605_v17 = vld [vmem:[%s9826_s23 + $0x218] sm:$0xff]   ;;  %v3741_v39 = vor.u32 %v3739_v24, %v3737_v14 }
 0x424   : > { %v5872_v54 = vadd.f32 %v11515_v8, %v5728_v26  ;;  %v5729_v29 = vadd.f32 %v5379_v42, %v4648_v18  ;;  %9291 = vmatmul.mubr.msk.bf16.gmra.mrb[4].mxu0 %vm1217_vm2, %v3722_v63  ;;  %v9467_v0 = vpop.f32.mrb[159].mxu1  ;;  %v4855_v23 = vrot.slane %v11605_v17, 1 }
 0x425   : > { %8176 = vst [vmem:[%s10944_s4 + $0x100] sm:$0xff] %v7968_v30   ;;  %9294 = vmatprep.mubr.msk.bf16.mxu0 %vm9772_vm1, %v11890_v4 }
 0x426   : > { %v6146_v38 = vmul.f32 0.01, %v5872_v54  ;;  %v5873_v2 = vadd.f32 %v11515_v8, %v5729_v29  ;;  %9573 = vmatmul.mubr.msk.bf16.gmra.mrb[8].mxu1 %vm1217_vm2, %v4850_v6  ;;  %vm6009_vm11 = vcmp.ge.f32.partialorder %v5872_v54, 0.0 }
 0x427   : > { %v4303_v27 = vpop.f32.mrb[156].mxu0  ;;  %9576 = vmatprep.mubr.msk.bf16.mxu1 %vm9772_vm1, %v11890_v4 }
 0x428   : > { %vm6010_vm12 = vcmp.ge.f32.partialorder %v5873_v2, 0.0  ;;  %v6147_v20 = vmul.f32 0.01, %v5873_v2  ;;  %v4649_v40 = vadd.f32 %v4303_v27, %v11984_v21  ;;  %v9188_v43 = vpop.f32.mrb[157].mxu0  ;;  %v6283_v47 = vsel %vm6009_vm11, %v5872_v54, %v6146_v38 }
 0x429   : > { %v4306_v48 = vpop.f32.mrb[158].mxu0  ;;  %v5392_v41 = vpop.f32.mrb[160].mxu1  ;;  %v3745_v54 = vrot.slane %v3743_v15, 1  ;;  %v3747_v43 = vshrl.u32 %v11586_v34, 16  ;;  %v11991_v15 = vld [vmem:[#allocation39_spill] sm:$0xff] }
 0x42a   : > { %v6284_v7 = vsel %vm6010_vm12, %v5873_v2, %v6147_v20  ;;  %v5730_v61 = vadd.f32 %v5384_v58, %v4649_v40  ;;  %v4650_v36 = vadd.f32 %v4306_v48, %v11985_v35  ;;  %v9189_v32 = vpop.f32.mrb[159].mxu0  ;;  %v9470_v5 = vpop.f32.mrb[161].mxu1  ;;  %v11988_v2 = vld [vmem:[#allocation36_spill] sm:$0xff]  ;;  %v3751_v48 = vshll.u32 %v11605_v17, 16 }
 0x42b   : > { %v7973_v13 = vpack.c.bf16 %v6284_v7, %v6283_v47  ;;  %v5395_v10 = vpop.f32.mrb[162].mxu1  ;;  %v3746_v21 = vsel %vm660_vm3, %v3741_v39, %v3745_v54  ;;  %v4856_v32 = vsel %vm4725_vm4, %v4853_v9, %v4855_v23  ;;  %v11624_v5 = vld [vmem:[%s9826_s23 + $0x220] sm:$0xff]   ;;  %v3749_v34 = vor.u32 %v3747_v43, %v3745_v54 }
 0x42c   : > { %v5874_v60 = vadd.f32 %v11515_v8, %v5730_v61  ;;  %v5731_v42 = vadd.f32 %v5387_v53, %v4650_v36  ;;  %9295 = vmatmul.mubr.msk.bf16.gmra.mrb[8].mxu0 %vm1217_vm2, %v3730_v50  ;;  %v9471_v56 = vpop.f32.mrb[163].mxu1  ;;  %v4857_v14 = vrot.slane %v11624_v5, 1 }
 0x42d   : > { %8177 = vst [vmem:[%s10944_s4 + $0x108] sm:$0xff] %v7973_v13   ;;  %9298 = vmatprep.mubr.msk.bf16.mxu0 %vm9772_vm1, %v11890_v4 }
 0x42e   : > { %v6148_v52 = vmul.f32 0.01, %v5874_v60  ;;  %v5875_v44 = vadd.f32 %v11515_v8, %v5731_v42  ;;  %9577 = vmatmul.mubr.msk.bf16.gmra.mrb[12].mxu1 %vm1217_vm2, %v4852_v3  ;;  %vm6011_vm13 = vcmp.ge.f32.partialorder %v5874_v60, 0.0 }
 0x42f   : > { %v4311_v55 = vpop.f32.mrb[160].mxu0  ;;  %9580 = vmatprep.mubr.msk.bf16.mxu1 %vm9772_vm1, %v11890_v4 }
 0x430   : > { %vm6012_vm14 = vcmp.ge.f32.partialorder %v5875_v44, 0.0  ;;  %v6149_v57 = vmul.f32 0.01, %v5875_v44  ;;  %v4651_v12 = vadd.f32 %v4311_v55, %v11986_v62  ;;  %v9192_v25 = vpop.f32.mrb[161].mxu0  ;;  %v6285_v63 = vsel %vm6011_vm13, %v5874_v60, %v6148_v52 }
 0x431   : > { %v4314_v37 = vpop.f32.mrb[162].mxu0  ;;  %v5400_v49 = vpop.f32.mrb[164].mxu1  ;;  %v3753_v60 = vrot.slane %v3751_v48, 1  ;;  %v3755_v25 = vshrl.u32 %v11605_v17, 16  ;;  %v11993_v48 = vld [vmem:[#allocation41_spill] sm:$0xff] }
 0x432   : > { %v6286_v58 = vsel %vm6012_vm14, %v5875_v44, %v6149_v57  ;;  %v5732_v11 = vadd.f32 %v5392_v41, %v4651_v12  ;;  %v4652_v28 = vadd.f32 %v4314_v37, %v11987_v33  ;;  %v9193_v19 = vpop.f32.mrb[163].mxu0  ;;  %v9474_v26 = vpop.f32.mrb[165].mxu1  ;;  %v11990_v44 = vld [vmem:[#allocation38_spill] sm:$0xff]  ;;  %v3759_v37 = vshll.u32 %v11624_v5, 16 }
 0x433   : > { %v7978_v22 = vpack.c.bf16 %v6286_v58, %v6285_v63  ;;  %v5403_v18 = vpop.f32.mrb[166].mxu1  ;;  %v3754_v62 = vsel %vm660_vm3, %v3749_v34, %v3753_v60  ;;  %v4858_v19 = vsel %vm4725_vm4, %v4855_v23, %v4857_v14  ;;  %v11643_v26 = vld [vmem:[%s9826_s23 + $0x228] sm:$0xff]   ;;  %v3757_v17 = vor.u32 %v3755_v25, %v3753_v60 }
 0x434   : > { %v5876_v30 = vadd.f32 %v11515_v8, %v5732_v11  ;;  %v5733_v53 = vadd.f32 %v5395_v10, %v4652_v28  ;;  %9299 = vmatmul.mubr.msk.bf16.gmra.mrb[12].mxu0 %vm1217_vm2, %v3738_v31  ;;  %v9475_v6 = vpop.f32.mrb[167].mxu1  ;;  %v4859_v54 = vrot.slane %v11643_v26, 1 }
 0x435   : > { %8178 = vst [vmem:[%s10944_s4 + $0x110] sm:$0xff] %v7978_v22   ;;  %9302 = vmatprep.mubr.msk.bf16.mxu0 %vm9772_vm1, %v11890_v4 }
 0x436   : > { %v6150_v29 = vmul.f32 0.01, %v5876_v30  ;;  %v5877_v0 = vadd.f32 %v11515_v8, %v5733_v53  ;;  %9581 = vmatmul.mubr.msk.bf16.gmra.mrb[16].mxu1 %vm1217_vm2, %v4854_v16  ;;  %vm6013_vm15 = vcmp.ge.f32.partialorder %v5876_v30, 0.0 }
 0x437   : > { %v4319_v46 = vpop.f32.mrb[164].mxu0  ;;  %9584 = vmatprep.mubr.msk.bf16.mxu1 %vm9772_vm1, %v11890_v4 }
 0x438   : > { %vm6014_vm0 = vcmp.ge.f32.partialorder %v5877_v0, 0.0  ;;  %v6151_v38 = vmul.f32 0.01, %v5877_v0  ;;  %v4653_v27 = vadd.f32 %v4319_v46, %v11988_v2  ;;  %v9196_v51 = vpop.f32.mrb[165].mxu0  ;;  %v6287_v50 = vsel %vm6013_vm15, %v5876_v30, %v6150_v29 }
 0x439   : > { %v4322_v20 = vpop.f32.mrb[166].mxu0  ;;  %v5408_v40 = vpop.f32.mrb[168].mxu1  ;;  %v3761_v30 = vrot.slane %v3759_v37, 1  ;;  %v3763_v51 = vshrl.u32 %v11624_v5, 16  ;;  %v11995_v37 = vld [vmem:[#allocation43_spill] sm:$0xff] }
 0x43a   : > { %v6288_v41 = vsel %vm6014_vm0, %v5877_v0, %v6151_v38  ;;  %v5734_v1 = vadd.f32 %v5400_v49, %v4653_v27  ;;  %v4654_v47 = vadd.f32 %v4322_v20, %v11989_v59  ;;  %v9197_v7 = vpop.f32.mrb[167].mxu0  ;;  %v9478_v61 = vpop.f32.mrb[169].mxu1  ;;  %v11992_v0 = vld [vmem:[#allocation40_spill] sm:$0xff]  ;;  %v3767_v20 = vshll.u32 %v11643_v26, 16 }
 0x43b   : > { %v7983_v35 = vpack.c.bf16 %v6288_v41, %v6287_v50  ;;  %v5411_v36 = vpop.f32.mrb[170].mxu1  ;;  %v3762_v2 = vsel %vm660_vm3, %v3757_v17, %v3761_v30  ;;  %v4860_v7 = vsel %vm4725_vm4, %v4857_v14, %v4859_v54  ;;  %v11662_v61 = vld [vmem:[%s9826_s23 + $0x230] sm:$0x1f]   ;;  %v3765_v5 = vor.u32 %v3763_v51, %v3761_v30 }
 0x43c   : > { %v5878_v13 = vadd.f32 %v11515_v8, %v5734_v1  ;;  %v5735_v10 = vadd.f32 %v5403_v18, %v4654_v47  ;;  %9303 = vmatmul.mubr.msk.bf16.gmra.mrb[16].mxu0 %vm1217_vm2, %v3746_v21  ;;  %v9479_v3 = vpop.f32.mrb[171].mxu1  ;;  %v4861_v60 = vrot.slane %v11662_v61, 1  ;;  %v11996_v30 = vld [vmem:[#allocation44_spill] sm:$0xff] }
 0x43d   : > { %8179 = vst [vmem:[%s10944_s4 + $0x118] sm:$0xff] %v7983_v35   ;;  %9306 = vmatprep.mubr.msk.bf16.mxu0 %vm9772_vm1, %v11890_v4 }
 0x43e   : > { %v6152_v42 = vmul.f32 0.01, %v5878_v13  ;;  %v5879_v56 = vadd.f32 %v11515_v8, %v5735_v10  ;;  %9585 = vmatmul.mubr.msk.bf16.gmra.mrb[20].mxu1 %vm1217_vm2, %v4856_v32  ;;  %vm6015_vm5 = vcmp.ge.f32.partialorder %v5878_v13, 0.0 }
 0x43f   : > { %v4327_v45 = vpop.f32.mrb[168].mxu0  ;;  %9588 = vmatprep.mubr.msk.bf16.mxu1 %vm9772_vm1, %v11890_v4 }
 0x440   : > { %vm6016_vm6 = vcmp.ge.f32.partialorder %v5879_v56, 0.0  ;;  %v6153_v52 = vmul.f32 0.01, %v5879_v56  ;;  %v4655_v55 = vadd.f32 %v4327_v45, %v11990_v44  ;;  %v9200_v9 = vpop.f32.mrb[169].mxu0  ;;  %v6289_v31 = vsel %vm6015_vm5, %v5878_v13, %v6152_v42 }
 0x441   : > { %v4330_v57 = vpop.f32.mrb[170].mxu0  ;;  %v5416_v12 = vpop.f32.mrb[172].mxu1  ;;  %v3769_v13 = vrot.slane %v3767_v20, 1  ;;  %v3771_v9 = vshrl.u32 %v11643_v26, 16 }
 0x442   : > { %v6290_v49 = vsel %vm6016_vm6, %v5879_v56, %v6153_v52  ;;  %v5736_v24 = vadd.f32 %v5408_v40, %v4655_v55  ;;  %v4656_v63 = vadd.f32 %v4330_v57, %v11991_v15  ;;  %v9201_v58 = vpop.f32.mrb[171].mxu0  ;;  %v9482_v11 = vpop.f32.mrb[173].mxu1  ;;  %v11994_v56 = vld [vmem:[#allocation42_spill] sm:$0xff]  ;;  %v3775_v57 = vshll.u32 %v11662_v61, 16 }
 0x443   : > { %v7988_v33 = vpack.c.bf16 %v6290_v49, %v6289_v31  ;;  %v5419_v28 = vpop.f32.mrb[174].mxu1  ;;  %v3770_v44 = vsel %vm660_vm3, %v3765_v5, %v3769_v13  ;;  %v4862_v58 = vsel %vm4725_vm4, %v4859_v54, %v4861_v60 }
 0x444   : > { %v5880_v22 = vadd.f32 %v11515_v8, %v5736_v24  ;;  %v5737_v18 = vadd.f32 %v5411_v36, %v4656_v63  ;;  %9307 = vmatmul.mubr.msk.bf16.gmra.mrb[20].mxu0 %vm1217_vm2, %v3754_v62  ;;  %v9483_v16 = vpop.f32.mrb[175].mxu1  ;;  %v3777_v26 = vrot.slane %v3775_v57, 1 }
 0x445   : > { %8180 = vst [vmem:[%s10944_s4 + $0x120] sm:$0xff] %v7988_v33   ;;  %9310 = vmatprep.mubr.msk.bf16.mxu0 %vm9772_vm1, %v11890_v4 }
 0x446   : > { %v6154_v53 = vmul.f32 0.01, %v5880_v22  ;;  %v5881_v6 = vadd.f32 %v11515_v8, %v5737_v18  ;;  %9589 = vmatmul.mubr.msk.bf16.gmra.mrb[24].mxu1 %vm1217_vm2, %v4858_v19  ;;  %vm6017_vm7 = vcmp.ge.f32.partialorder %v5880_v22, 0.0  ;;  %v3773_v19 = vor.u32 %v3771_v9, %v3769_v13 }
 0x447   : > { %v4335_v39 = vpop.f32.mrb[172].mxu0  ;;  %9592 = vmatprep.mubr.msk.bf16.mxu1 %vm9772_vm1, %v11890_v4 }
 0x448   : > { %vm6018_vm8 = vcmp.ge.f32.partialorder %v5881_v6, 0.0  ;;  %v6155_v29 = vmul.f32 0.01, %v5881_v6  ;;  %v4657_v46 = vadd.f32 %v4335_v39, %v11992_v0  ;;  %v9204_v23 = vpop.f32.mrb[173].mxu0  ;;  %v6291_v21 = vsel %vm6017_vm7, %v5880_v22, %v6154_v53 }
 0x449   : > { %v4338_v38 = vpop.f32.mrb[174].mxu0  ;;  %v5424_v27 = vpop.f32.mrb[176].mxu1  ;;  %v3778_v54 = vsel %vm660_vm3, %v3773_v19, %v3777_v26 }
 0x44a   : > { %v6292_v40 = vsel %vm6018_vm8, %v5881_v6, %v6155_v29  ;;  %v5738_v43 = vadd.f32 %v5416_v12, %v4657_v46  ;;  %v4658_v50 = vadd.f32 %v4338_v38, %v11993_v48  ;;  %v9205_v41 = vpop.f32.mrb[175].mxu0  ;;  %v9486_v1 = vpop.f32.mrb[177].mxu1  ;;  %v11997_v38 = vld [vmem:[#allocation45_spill] sm:$0xff]  ;;  %v3779_v48 = vshrl.u32 %v11662_v61, 16 }
 0x44b   : > { %v7993_v59 = vpack.c.bf16 %v6292_v40, %v6291_v21  ;;  %v5427_v47 = vpop.f32.mrb[178].mxu1 }
 0x44c   : > { %v5882_v35 = vadd.f32 %v11515_v8, %v5738_v43  ;;  %v5739_v36 = vadd.f32 %v5419_v28, %v4658_v50  ;;  %9311 = vmatmul.mubr.msk.bf16.gmra.mrb[24].mxu0 %vm1217_vm2, %v3762_v2  ;;  %v9487_v32 = vpop.f32.mrb[179].mxu1 }
 0x44d   : > { %8181 = vst [vmem:[%s10944_s4 + $0x128] sm:$0xff] %v7993_v59   ;;  %9314 = vmatprep.mubr.msk.bf16.mxu0 %vm9772_vm1, %v11890_v4 }
 0x44e   : > { %v6156_v10 = vmul.f32 0.01, %v5882_v35  ;;  %v5883_v3 = vadd.f32 %v11515_v8, %v5739_v36  ;;  %9593 = vmatmul.mubr.msk.bf16.gmra.mrb[28].mxu1 %vm1217_vm2, %v4860_v7  ;;  %vm6019_vm9 = vcmp.ge.f32.partialorder %v5882_v35, 0.0  ;;  %v3781_v7 = vor.u32 %v3779_v48, %v3777_v26 }
 0x44f   : > { %v4343_v34 = vpop.f32.mrb[176].mxu0  ;;  %9596 = vmatprep.mubr.msk.bf16.mxu1 %vm9772_vm1, %v11890_v4 }
 0x450   : > { %vm6020_vm10 = vcmp.ge.f32.partialorder %v5883_v3, 0.0  ;;  %v6157_v42 = vmul.f32 0.01, %v5883_v3  ;;  %v4659_v45 = vadd.f32 %v4343_v34, %v11994_v56  ;;  %v9208_v14 = vpop.f32.mrb[177].mxu0  ;;  %v6293_v62 = vsel %vm6019_vm9, %v5882_v35, %v6156_v10  ;;  %v11998_v35 = vld [vmem:[#allocation46_spill] sm:$0xff] }
 0x451   : > { %v4346_v52 = vpop.f32.mrb[178].mxu0  ;;  %v5432_v55 = vpop.f32.mrb[180].mxu1 }
 0x452   : > { %v6294_v12 = vsel %vm6020_vm10, %v5883_v3, %v6157_v42  ;;  %v5740_v25 = vadd.f32 %v5424_v27, %v4659_v45  ;;  %v4660_v31 = vadd.f32 %v4346_v52, %v11995_v37  ;;  %v9209_v49 = vpop.f32.mrb[179].mxu0  ;;  %v9490_v24 = vpop.f32.mrb[181].mxu1 }
 0x453   : > { %v7998_v15 = vpack.c.bf16 %v6294_v12, %v6293_v62  ;;  %v5435_v63 = vpop.f32.mrb[182].mxu1  ;;  %v12000_v12 = vld [vmem:[#allocation48_spill] sm:$0xff] }
 0x454   : > { %v5884_v11 = vadd.f32 %v11515_v8, %v5740_v25  ;;  %v5741_v33 = vadd.f32 %v5427_v47, %v4660_v31  ;;  %9315 = vmatmul.mubr.msk.bf16.gmra.mrb[28].mxu0 %vm1217_vm2, %v3770_v44  ;;  %v9491_v28 = vpop.f32.mrb[183].mxu1 }
 0x455   : > { %8182 = vst [vmem:[%s10944_s4 + $0x130] sm:$0xff] %v7998_v15   ;;  %9318 = vmatprep.mubr.msk.bf16.mxu0 %vm9772_vm1, %v11890_v4 }
 0x456   : > { %v6158_v22 = vmul.f32 0.01, %v5884_v11  ;;  %v5885_v18 = vadd.f32 %v11515_v8, %v5741_v33  ;;  %9597 = vmatmul.mubr.msk.bf16.gmra.mrb[32].mxu1 %vm1217_vm2, %v4862_v58  ;;  %vm6021_vm11 = vcmp.ge.f32.partialorder %v5884_v11, 0.0  ;;  %v12001_v58 = vld [vmem:[#allocation49_spill] sm:$0xff] }
 0x457   : > { %v4351_v16 = vpop.f32.mrb[180].mxu0  ;;  %9600 = vmatprep.mubr.msk.bf16.mxu1 %vm9772_vm1, %v11890_v4 }
 0x458   : > { %vm6022_vm4 = vcmp.ge.f32.partialorder %v5885_v18, 0.0  ;;  %v6159_v17 = vmul.f32 0.01, %v5885_v18  ;;  %v4661_v53 = vadd.f32 %v4351_v16, %v11996_v30  ;;  %v9212_v6 = vpop.f32.mrb[181].mxu0  ;;  %v6295_v0 = vsel %vm6021_vm11, %v5884_v11, %v6158_v22 }
 0x459   : > { %v4354_v39 = vpop.f32.mrb[182].mxu0  ;;  %v5440_v29 = vpop.f32.mrb[184].mxu1 }
 0x45a   : > { %v6296_v46 = vsel %vm6022_vm4, %v5885_v18, %v6159_v17  ;;  %v5742_v23 = vadd.f32 %v5432_v55, %v4661_v53  ;;  %v4662_v2 = vadd.f32 %v4354_v39, %v11997_v38  ;;  %v9213_v27 = vpop.f32.mrb[183].mxu0  ;;  %v9494_v51 = vpop.f32.mrb[185].mxu1  ;;  %v12002_v39 = vld [vmem:[#allocation50_spill] sm:$0xff] }
 0x45b   : > { %v8003_v20 = vpack.c.bf16 %v6296_v46, %v6295_v0  ;;  %v5443_v21 = vpop.f32.mrb[186].mxu1  ;;  %v12003_v27 = vld [vmem:[#allocation51_spill] sm:$0xff] }
 0x45c   : > { %v5886_v40 = vadd.f32 %v11515_v8, %v5742_v23  ;;  %v5743_v43 = vadd.f32 %v5435_v63, %v4662_v2  ;;  %9319 = vmatmul.mubr.msk.bf16.gmra.mrb[32].mxu0 %vm1217_vm2, %v3778_v54  ;;  %v9495_v50 = vpop.f32.mrb[187].mxu1 }
 0x45d   : > { %8183 = vst [vmem:[%s10944_s4 + $0x138] sm:$0xff] %v8003_v20   ;;  %9322 = vmatprep.mubr.msk.bf16.mxu0 %vm9772_vm1, %v11890_v4  ;;  %v11999_v4 = vld [vmem:[#allocation47_spill] sm:$0xff] }
 0x45e   : > { %v6160_v41 = vmul.f32 0.01, %v5886_v40  ;;  %v5887_v1 = vadd.f32 %v11515_v8, %v5743_v43  ;;  %9601 = vmatmul.mubr.msk.bf16.gmra.mrb[36].mxu1 %vm1217_vm2, %v4861_v60  ;;  %vm6023_vm3 = vcmp.ge.f32.partialorder %v5886_v40, 0.0 }
 0x45f   : > { %v4359_v59 = vpop.f32.mrb[184].mxu0 }
 0x460   : > { %vm6024_vm12 = vcmp.ge.f32.partialorder %v5887_v1, 0.0  ;;  %v6161_v47 = vmul.f32 0.01, %v5887_v1  ;;  %v4663_v36 = vadd.f32 %v4359_v59, %v11998_v35  ;;  %v9216_v61 = vpop.f32.mrb[185].mxu0  ;;  %v6297_v13 = vsel %vm6023_vm3, %v5886_v40, %v6160_v41  ;;  %v12004_v35 = vld [vmem:[#allocation52_spill] sm:$0xff] }
 0x461   : > { %v4362_v32 = vpop.f32.mrb[186].mxu0  ;;  %v5448_v5 = vpop.f32.mrb[188].mxu1 }
 0x462   : > { %v6298_v10 = vsel %vm6024_vm12, %v5887_v1, %v6161_v47  ;;  %v5744_v3 = vadd.f32 %v5440_v29, %v4663_v36  ;;  %v4664_v34 = vadd.f32 %v4362_v32, %v11999_v4  ;;  %v9217_v42 = vpop.f32.mrb[187].mxu0  ;;  %v9498_v56 = vpop.f32.mrb[189].mxu1  ;;  %v12005_v4 = vld [vmem:[#allocation53_spill] sm:$0xff] }
 0x463   : > { %v8008_v45 = vpack.c.bf16 %v6298_v10, %v6297_v13  ;;  %v5451_v60 = vpop.f32.mrb[190].mxu1 }
 0x464   : > { %v5888_v14 = vadd.f32 %v11515_v8, %v5744_v3  ;;  %v5745_v52 = vadd.f32 %v5443_v21, %v4664_v34  ;;  %9323 = vmatmul.mubr.msk.bf16.gmra.mrb[36].mxu0 %vm1217_vm2, %v3781_v7  ;;  %v9499_v44 = vpop.f32.mrb[191].mxu1 }
 0x465   : > { %8184 = vst [vmem:[%s10944_s4 + $0x140] sm:$0xff] %v8008_v45  }
 0x466   : > { %v6162_v55 = vmul.f32 0.01, %v5888_v14  ;;  %v5889_v9 = vadd.f32 %v11515_v8, %v5745_v52  ;;  %vm6025_vm1 = vcmp.ge.f32.partialorder %v5888_v14, 0.0 }
 0x467   : > { %v4367_v57 = vpop.f32.mrb[188].mxu0 }
 0x468   : > { %vm6026_vm13 = vcmp.ge.f32.partialorder %v5889_v9, 0.0  ;;  %v6163_v62 = vmul.f32 0.01, %v5889_v9  ;;  %v4665_v25 = vadd.f32 %v4367_v57, %v12000_v12  ;;  %v9220_v37 = vpop.f32.mrb[189].mxu0  ;;  %v6299_v24 = vsel %vm6025_vm1, %v5888_v14, %v6162_v55  ;;  %v12006_v12 = vld [vmem:[#allocation54_spill] sm:$0xff] }
 0x469   : > { %v4370_v31 = vpop.f32.mrb[190].mxu0  ;;  %v5456_v49 = vpop.f32.mrb[192].mxu1 }
 0x46a   : > { %v6300_v15 = vsel %vm6026_vm13, %v5889_v9, %v6163_v62  ;;  %v5746_v63 = vadd.f32 %v5448_v5, %v4665_v25  ;;  %v4666_v11 = vadd.f32 %v4370_v31, %v12001_v58  ;;  %v9221_v33 = vpop.f32.mrb[191].mxu0  ;;  %v9502_v28 = vpop.f32.mrb[193].mxu1  ;;  %v12007_v58 = vld [vmem:[#allocation55_spill] sm:$0xff] }
 0x46b   : > { %v8013_v19 = vpack.c.bf16 %v6300_v15, %v6299_v24  ;;  %v5459_v26 = vpop.f32.mrb[194].mxu1 }
 0x46c   : > { %v5890_v22 = vadd.f32 %v11515_v8, %v5746_v63  ;;  %v5747_v18 = vadd.f32 %v5451_v60, %v4666_v11  ;;  %v9503_v16 = vpop.f32.mrb[195].mxu1 }
 0x46d   : > { %8185 = vst [vmem:[%s10944_s4 + $0x148] sm:$0xff] %v8013_v19  }
 0x46e   : > { %v6164_v17 = vmul.f32 0.01, %v5890_v22  ;;  %v5891_v30 = vadd.f32 %v11515_v8, %v5747_v18  ;;  %vm6027_vm2 = vcmp.ge.f32.partialorder %v5890_v22, 0.0 }
 0x46f   : > { %v4375_v53 = vpop.f32.mrb[192].mxu0 }
 0x470   : > { %vm6028_vm14 = vcmp.ge.f32.partialorder %v5891_v30, 0.0  ;;  %v6165_v6 = vmul.f32 0.01, %v5891_v30  ;;  %v4667_v54 = vadd.f32 %v4375_v53, %v12002_v39  ;;  %v9224_v29 = vpop.f32.mrb[193].mxu0  ;;  %v6301_v23 = vsel %vm6027_vm2, %v5890_v22, %v6164_v17  ;;  %v12008_v39 = vld [vmem:[#allocation56_spill] sm:$0xff] }
 0x471   : > { %v4378_v0 = vpop.f32.mrb[194].mxu0  ;;  %v5464_v46 = vpop.f32.mrb[196].mxu1 }
 0x472   : > { %v6302_v38 = vsel %vm6028_vm14, %v5891_v30, %v6165_v6  ;;  %v5748_v2 = vadd.f32 %v5456_v49, %v4667_v54  ;;  %v4668_v51 = vadd.f32 %v4378_v0, %v12003_v27  ;;  %v9225_v20 = vpop.f32.mrb[195].mxu0  ;;  %v9506_v21 = vpop.f32.mrb[197].mxu1  ;;  %v12009_v27 = vld [vmem:[#allocation57_spill] sm:$0xff] }
 0x473   : > { %v8018_v40 = vpack.c.bf16 %v6302_v38, %v6301_v23  ;;  %v5467_v43 = vpop.f32.mrb[198].mxu1 }
 0x474   : > { %v5892_v48 = vadd.f32 %v11515_v8, %v5748_v2  ;;  %v5749_v50 = vadd.f32 %v5459_v26, %v4668_v51  ;;  %v9507_v41 = vpop.f32.mrb[199].mxu1 }
 0x475   : > { %8186 = vst [vmem:[%s10944_s4 + $0x150] sm:$0xff] %v8018_v40  }
 0x476   : > { %v6166_v1 = vmul.f32 0.01, %v5892_v48  ;;  %v5893_v59 = vadd.f32 %v11515_v8, %v5749_v50  ;;  %vm6029_vm15 = vcmp.ge.f32.partialorder %v5892_v48, 0.0 }
 0x477   : > { %v4383_v47 = vpop.f32.mrb[196].mxu0 }
 0x478   : > { %vm6030_vm0 = vcmp.ge.f32.partialorder %v5893_v59, 0.0  ;;  %v6167_v7 = vmul.f32 0.01, %v5893_v59  ;;  %v4669_v36 = vadd.f32 %v4383_v47, %v12004_v35  ;;  %v9228_v61 = vpop.f32.mrb[197].mxu0  ;;  %v6303_v13 = vsel %vm6029_vm15, %v5892_v48, %v6166_v1  ;;  %v12010_v35 = vld [vmem:[#allocation58_spill] sm:$0xff] }
 0x479   : > { %v4386_v32 = vpop.f32.mrb[198].mxu0  ;;  %v5472_v5 = vpop.f32.mrb[200].mxu1 }
 0x47a   : > { %v6304_v10 = vsel %vm6030_vm0, %v5893_v59, %v6167_v7  ;;  %v5750_v3 = vadd.f32 %v5464_v46, %v4669_v36  ;;  %v4670_v34 = vadd.f32 %v4386_v32, %v12005_v4  ;;  %v9229_v42 = vpop.f32.mrb[199].mxu0  ;;  %v9510_v56 = vpop.f32.mrb[201].mxu1  ;;  %v12011_v4 = vld [vmem:[#allocation59_spill] sm:$0xff] }
 0x47b   : > { %v8023_v45 = vpack.c.bf16 %v6304_v10, %v6303_v13  ;;  %v5475_v60 = vpop.f32.mrb[202].mxu1 }
 0x47c   : > { %v5894_v14 = vadd.f32 %v11515_v8, %v5750_v3  ;;  %v5751_v52 = vadd.f32 %v5467_v43, %v4670_v34  ;;  %v9511_v44 = vpop.f32.mrb[203].mxu1 }
 0x47d   : > { %8187 = vst [vmem:[%s10944_s4 + $0x158] sm:$0xff] %v8023_v45  }
 0x47e   : > { %v6168_v55 = vmul.f32 0.01, %v5894_v14  ;;  %v5895_v9 = vadd.f32 %v11515_v8, %v5751_v52  ;;  %vm6031_vm5 = vcmp.ge.f32.partialorder %v5894_v14, 0.0 }
 0x47f   : > { %v4391_v57 = vpop.f32.mrb[200].mxu0 }
 0x480   : > { %vm6032_vm6 = vcmp.ge.f32.partialorder %v5895_v9, 0.0  ;;  %v6169_v62 = vmul.f32 0.01, %v5895_v9  ;;  %v4671_v25 = vadd.f32 %v4391_v57, %v12006_v12  ;;  %v9232_v37 = vpop.f32.mrb[201].mxu0  ;;  %v6305_v24 = vsel %vm6031_vm5, %v5894_v14, %v6168_v55  ;;  %v12012_v12 = vld [vmem:[#allocation60_spill] sm:$0xff] }
 0x481   : > { %v4394_v31 = vpop.f32.mrb[202].mxu0  ;;  %v5480_v49 = vpop.f32.mrb[204].mxu1 }
 0x482   : > { %v6306_v15 = vsel %vm6032_vm6, %v5895_v9, %v6169_v62  ;;  %v5752_v63 = vadd.f32 %v5472_v5, %v4671_v25  ;;  %v4672_v11 = vadd.f32 %v4394_v31, %v12007_v58  ;;  %v9233_v33 = vpop.f32.mrb[203].mxu0  ;;  %v9514_v28 = vpop.f32.mrb[205].mxu1  ;;  %v12013_v58 = vld [vmem:[#allocation61_spill] sm:$0xff] }
 0x483   : > { %v8028_v19 = vpack.c.bf16 %v6306_v15, %v6305_v24  ;;  %v5483_v26 = vpop.f32.mrb[206].mxu1 }
 0x484   : > { %v5896_v22 = vadd.f32 %v11515_v8, %v5752_v63  ;;  %v5753_v18 = vadd.f32 %v5475_v60, %v4672_v11  ;;  %v9515_v16 = vpop.f32.mrb[207].mxu1 }
 0x485   : > { %8188 = vst [vmem:[%s10944_s4 + $0x160] sm:$0xff] %v8028_v19  }
 0x486   : > { %v6170_v17 = vmul.f32 0.01, %v5896_v22  ;;  %v5897_v30 = vadd.f32 %v11515_v8, %v5753_v18  ;;  %vm6033_vm7 = vcmp.ge.f32.partialorder %v5896_v22, 0.0 }
 0x487   : > { %v4399_v53 = vpop.f32.mrb[204].mxu0 }
 0x488   : > { %vm6034_vm8 = vcmp.ge.f32.partialorder %v5897_v30, 0.0  ;;  %v6171_v6 = vmul.f32 0.01, %v5897_v30  ;;  %v4673_v54 = vadd.f32 %v4399_v53, %v12008_v39  ;;  %v9236_v29 = vpop.f32.mrb[205].mxu0  ;;  %v6307_v23 = vsel %vm6033_vm7, %v5896_v22, %v6170_v17 }
 0x489   : > { %v4402_v0 = vpop.f32.mrb[206].mxu0  ;;  %v5488_v46 = vpop.f32.mrb[208].mxu1 }
 0x48a   : > { %v6308_v38 = vsel %vm6034_vm8, %v5897_v30, %v6171_v6  ;;  %v5754_v2 = vadd.f32 %v5480_v49, %v4673_v54  ;;  %v4674_v51 = vadd.f32 %v4402_v0, %v12009_v27  ;;  %v9237_v20 = vpop.f32.mrb[207].mxu0  ;;  %v9518_v21 = vpop.f32.mrb[209].mxu1  ;;  %v11743_v30 = vld [vmem:[%s11850_s2] ss:$0 sm:$0xff]  ;;  %v12015_v27 = vld [vmem:[#allocation63_spill] sm:$0xff] }
 0x48b   : > { %v8033_v40 = vpack.c.bf16 %v6308_v38, %v6307_v23  ;;  %v5491_v43 = vpop.f32.mrb[210].mxu1  ;;  %v12014_v54 = vld [vmem:[#allocation62_spill] sm:$0xff] }
 0x48c   : > { %v5898_v48 = vadd.f32 %v11515_v8, %v5754_v2  ;;  %v5755_v50 = vadd.f32 %v5483_v26, %v4674_v51  ;;  %v9519_v41 = vpop.f32.mrb[211].mxu1 }
 0x48d   : > { %8189 = vst [vmem:[%s10944_s4 + $0x168] sm:$0xff] %v8033_v40  }
 0x48e   : > { %v6172_v1 = vmul.f32 0.01, %v5898_v48  ;;  %v5899_v59 = vadd.f32 %v11515_v8, %v5755_v50  ;;  %vm6035_vm9 = vcmp.ge.f32.partialorder %v5898_v48, 0.0 }
 0x48f   : > { %v4407_v47 = vpop.f32.mrb[208].mxu0 }
 0x490   : > { %vm6036_vm10 = vcmp.ge.f32.partialorder %v5899_v59, 0.0  ;;  %v6173_v7 = vmul.f32 0.01, %v5899_v59  ;;  %v4675_v36 = vadd.f32 %v4407_v47, %v12010_v35  ;;  %v9240_v61 = vpop.f32.mrb[209].mxu0  ;;  %v6309_v13 = vsel %vm6035_vm9, %v5898_v48, %v6172_v1  ;;  %v12016_v35 = vld [vmem:[#allocation64_spill] sm:$0xff] }
 0x491   : > { %v4410_v32 = vpop.f32.mrb[210].mxu0  ;;  %v5496_v5 = vpop.f32.mrb[212].mxu1 }
 0x492   : > { %v6310_v10 = vsel %vm6036_vm10, %v5899_v59, %v6173_v7  ;;  %v5756_v3 = vadd.f32 %v5488_v46, %v4675_v36  ;;  %v4676_v34 = vadd.f32 %v4410_v32, %v12011_v4  ;;  %v9241_v42 = vpop.f32.mrb[211].mxu0  ;;  %v9522_v56 = vpop.f32.mrb[213].mxu1  ;;  %v12017_v4 = vld [vmem:[#allocation65_spill] sm:$0xff] }
 0x493   : > { %v8038_v45 = vpack.c.bf16 %v6310_v10, %v6309_v13  ;;  %v5499_v60 = vpop.f32.mrb[214].mxu1 }
 0x494   : > { %v5900_v14 = vadd.f32 %v11515_v8, %v5756_v3  ;;  %v5757_v52 = vadd.f32 %v5491_v43, %v4676_v34  ;;  %v9523_v44 = vpop.f32.mrb[215].mxu1 }
 0x495   : > { %8190 = vst [vmem:[%s10944_s4 + $0x170] sm:$0xff] %v8038_v45  }
 0x496   : > { %v6174_v55 = vmul.f32 0.01, %v5900_v14  ;;  %v5901_v9 = vadd.f32 %v11515_v8, %v5757_v52  ;;  %vm6037_vm11 = vcmp.ge.f32.partialorder %v5900_v14, 0.0 }
 0x497   : > { %v4415_v57 = vpop.f32.mrb[212].mxu0 }
 0x498   : > { %vm6038_vm4 = vcmp.ge.f32.partialorder %v5901_v9, 0.0  ;;  %v6175_v62 = vmul.f32 0.01, %v5901_v9  ;;  %v4677_v25 = vadd.f32 %v4415_v57, %v12012_v12  ;;  %v9244_v37 = vpop.f32.mrb[213].mxu0  ;;  %v6311_v24 = vsel %vm6037_vm11, %v5900_v14, %v6174_v55  ;;  %v12018_v12 = vld [vmem:[#allocation66_spill] sm:$0xff] }
 0x499   : > { %v4418_v31 = vpop.f32.mrb[214].mxu0  ;;  %v5504_v49 = vpop.f32.mrb[216].mxu1 }
 0x49a   : > { %v6312_v15 = vsel %vm6038_vm4, %v5901_v9, %v6175_v62  ;;  %v5758_v63 = vadd.f32 %v5496_v5, %v4677_v25  ;;  %v4678_v11 = vadd.f32 %v4418_v31, %v12013_v58  ;;  %v9245_v33 = vpop.f32.mrb[215].mxu0  ;;  %v9526_v28 = vpop.f32.mrb[217].mxu1  ;;  %v12019_v58 = vld [vmem:[#allocation67_spill] sm:$0xff] }
 0x49b   : > { %v8043_v19 = vpack.c.bf16 %v6312_v15, %v6311_v24  ;;  %v5507_v26 = vpop.f32.mrb[218].mxu1 }
 0x49c   : > { %v5902_v22 = vadd.f32 %v11515_v8, %v5758_v63  ;;  %v5759_v18 = vadd.f32 %v5499_v60, %v4678_v11  ;;  %v9527_v16 = vpop.f32.mrb[219].mxu1 }
 0x49d   : > { %8191 = vst [vmem:[%s10944_s4 + $0x178] sm:$0xff] %v8043_v19  }
 0x49e   : > { %v6176_v17 = vmul.f32 0.01, %v5902_v22  ;;  %v5903_v53 = vadd.f32 %v11743_v30, %v5759_v18  ;;  %vm6039_vm3 = vcmp.ge.f32.partialorder %v5902_v22, 0.0 }
 0x49f   : > { %v4423_v6 = vpop.f32.mrb[216].mxu0 }
 0x4a0   : > { %vm6040_vm12 = vcmp.ge.f32.partialorder %v5903_v53, 0.0  ;;  %v6177_v39 = vmul.f32 0.01, %v5903_v53  ;;  %v4679_v29 = vadd.f32 %v4423_v6, %v12014_v54  ;;  %v9248_v0 = vpop.f32.mrb[217].mxu0  ;;  %v6313_v23 = vsel %vm6039_vm3, %v5902_v22, %v6176_v17  ;;  %v12020_v54 = vld [vmem:[#allocation68_spill] sm:$0xff] }
 0x4a1   : > { %v4426_v8 = vpop.f32.mrb[218].mxu0  ;;  %v5512_v46 = vpop.f32.mrb[220].mxu1 }
 0x4a2   : > { %v6314_v38 = vsel %vm6040_vm12, %v5903_v53, %v6177_v39  ;;  %v5760_v2 = vadd.f32 %v5504_v49, %v4679_v29  ;;  %v4680_v51 = vadd.f32 %v4426_v8, %v12015_v27  ;;  %v9249_v20 = vpop.f32.mrb[219].mxu0  ;;  %v9530_v21 = vpop.f32.mrb[221].mxu1  ;;  %v12021_v27 = vld [vmem:[#allocation69_spill] sm:$0xff] }
 0x4a3   : > { %v8048_v40 = vpack.c.bf16 %v6314_v38, %v6313_v23  ;;  %v5515_v43 = vpop.f32.mrb[222].mxu1 }
 0x4a4   : > { %v5904_v48 = vadd.f32 %v11743_v30, %v5760_v2  ;;  %v5761_v50 = vadd.f32 %v5507_v26, %v4680_v51  ;;  %v9531_v41 = vpop.f32.mrb[223].mxu1 }
 0x4a5   : > { %8192 = vst [vmem:[%s10944_s4 + $0x180] sm:$0xff] %v8048_v40  }
 0x4a6   : > { %v6178_v1 = vmul.f32 0.01, %v5904_v48  ;;  %v5905_v59 = vadd.f32 %v11743_v30, %v5761_v50  ;;  %vm6041_vm1 = vcmp.ge.f32.partialorder %v5904_v48, 0.0 }
 0x4a7   : > { %v4431_v47 = vpop.f32.mrb[220].mxu0 }
 0x4a8   : > { %vm6042_vm13 = vcmp.ge.f32.partialorder %v5905_v59, 0.0  ;;  %v6179_v7 = vmul.f32 0.01, %v5905_v59  ;;  %v4681_v36 = vadd.f32 %v4431_v47, %v12016_v35  ;;  %v9252_v61 = vpop.f32.mrb[221].mxu0  ;;  %v6315_v13 = vsel %vm6041_vm1, %v5904_v48, %v6178_v1  ;;  %v12022_v35 = vld [vmem:[#allocation70_spill] sm:$0xff] }
 0x4a9   : > { %v4434_v32 = vpop.f32.mrb[222].mxu0  ;;  %v5520_v5 = vpop.f32.mrb[224].mxu1 }
 0x4aa   : > { %v6316_v10 = vsel %vm6042_vm13, %v5905_v59, %v6179_v7  ;;  %v5762_v3 = vadd.f32 %v5512_v46, %v4681_v36  ;;  %v4682_v34 = vadd.f32 %v4434_v32, %v12017_v4  ;;  %v9253_v42 = vpop.f32.mrb[223].mxu0  ;;  %v9534_v56 = vpop.f32.mrb[225].mxu1  ;;  %v12023_v4 = vld [vmem:[#allocation71_spill] sm:$0xff] }
 0x4ab   : > { %v8053_v45 = vpack.c.bf16 %v6316_v10, %v6315_v13  ;;  %v5523_v60 = vpop.f32.mrb[226].mxu1 }
 0x4ac   : > { %v5906_v14 = vadd.f32 %v11743_v30, %v5762_v3  ;;  %v5763_v52 = vadd.f32 %v5515_v43, %v4682_v34  ;;  %v9535_v44 = vpop.f32.mrb[227].mxu1 }
 0x4ad   : > { %8193 = vst [vmem:[%s10944_s4 + $0x188] sm:$0xff] %v8053_v45  }
 0x4ae   : > { %v6180_v55 = vmul.f32 0.01, %v5906_v14  ;;  %v5907_v9 = vadd.f32 %v11743_v30, %v5763_v52  ;;  %vm6043_vm2 = vcmp.ge.f32.partialorder %v5906_v14, 0.0 }
 0x4af   : > { %v4439_v57 = vpop.f32.mrb[224].mxu0 }
 0x4b0   : > { %vm6044_vm14 = vcmp.ge.f32.partialorder %v5907_v9, 0.0  ;;  %v6181_v62 = vmul.f32 0.01, %v5907_v9  ;;  %v4683_v25 = vadd.f32 %v4439_v57, %v12018_v12  ;;  %v9256_v37 = vpop.f32.mrb[225].mxu0  ;;  %v6317_v24 = vsel %vm6043_vm2, %v5906_v14, %v6180_v55  ;;  %v12024_v12 = vld [vmem:[#allocation72_spill] sm:$0xff] }
 0x4b1   : > { %v4442_v31 = vpop.f32.mrb[226].mxu0  ;;  %v5528_v49 = vpop.f32.mrb[228].mxu1 }
 0x4b2   : > { %v6318_v15 = vsel %vm6044_vm14, %v5907_v9, %v6181_v62  ;;  %v5764_v63 = vadd.f32 %v5520_v5, %v4683_v25  ;;  %v4684_v11 = vadd.f32 %v4442_v31, %v12019_v58  ;;  %v9257_v33 = vpop.f32.mrb[227].mxu0  ;;  %v9538_v28 = vpop.f32.mrb[229].mxu1  ;;  %v12025_v58 = vld [vmem:[#allocation73_spill] sm:$0xff] }
 0x4b3   : > { %v8058_v19 = vpack.c.bf16 %v6318_v15, %v6317_v24  ;;  %v5531_v26 = vpop.f32.mrb[230].mxu1 }
 0x4b4   : > { %v5908_v22 = vadd.f32 %v11743_v30, %v5764_v63  ;;  %v5765_v18 = vadd.f32 %v5523_v60, %v4684_v11  ;;  %v9539_v16 = vpop.f32.mrb[231].mxu1 }
 0x4b5   : > { %8194 = vst [vmem:[%s10944_s4 + $0x190] sm:$0xff] %v8058_v19  }
 0x4b6   : > { %v6182_v17 = vmul.f32 0.01, %v5908_v22  ;;  %v5909_v53 = vadd.f32 %v11743_v30, %v5765_v18  ;;  %vm6045_vm15 = vcmp.ge.f32.partialorder %v5908_v22, 0.0 }
 0x4b7   : > { %v4447_v6 = vpop.f32.mrb[228].mxu0 }
 0x4b8   : > { %vm6046_vm0 = vcmp.ge.f32.partialorder %v5909_v53, 0.0  ;;  %v6183_v39 = vmul.f32 0.01, %v5909_v53  ;;  %v4685_v29 = vadd.f32 %v4447_v6, %v12020_v54  ;;  %v9260_v0 = vpop.f32.mrb[229].mxu0  ;;  %v6319_v23 = vsel %vm6045_vm15, %v5908_v22, %v6182_v17  ;;  %v12026_v54 = vld [vmem:[#allocation74_spill] sm:$0xff] }
 0x4b9   : > { %v4450_v8 = vpop.f32.mrb[230].mxu0  ;;  %v5536_v46 = vpop.f32.mrb[232].mxu1 }
 0x4ba   : > { %v6320_v38 = vsel %vm6046_vm0, %v5909_v53, %v6183_v39  ;;  %v5766_v2 = vadd.f32 %v5528_v49, %v4685_v29  ;;  %v4686_v51 = vadd.f32 %v4450_v8, %v12021_v27  ;;  %v9261_v20 = vpop.f32.mrb[231].mxu0  ;;  %v9542_v21 = vpop.f32.mrb[233].mxu1  ;;  %v12027_v27 = vld [vmem:[#allocation75_spill] sm:$0xff] }
 0x4bb   : > { %v8063_v40 = vpack.c.bf16 %v6320_v38, %v6319_v23  ;;  %v5539_v43 = vpop.f32.mrb[234].mxu1 }
 0x4bc   : > { %v5910_v48 = vadd.f32 %v11743_v30, %v5766_v2  ;;  %v5767_v50 = vadd.f32 %v5531_v26, %v4686_v51  ;;  %v9543_v41 = vpop.f32.mrb[235].mxu1 }
 0x4bd   : > { %8195 = vst [vmem:[%s10944_s4 + $0x198] sm:$0xff] %v8063_v40  }
 0x4be   : > { %v6184_v1 = vmul.f32 0.01, %v5910_v48  ;;  %v5911_v59 = vadd.f32 %v11743_v30, %v5767_v50  ;;  %vm6047_vm5 = vcmp.ge.f32.partialorder %v5910_v48, 0.0 }
 0x4bf   : > { %v4455_v47 = vpop.f32.mrb[232].mxu0 }
 0x4c0   : > { %vm6048_vm6 = vcmp.ge.f32.partialorder %v5911_v59, 0.0  ;;  %v6185_v7 = vmul.f32 0.01, %v5911_v59  ;;  %v4687_v36 = vadd.f32 %v4455_v47, %v12022_v35  ;;  %v9264_v61 = vpop.f32.mrb[233].mxu0  ;;  %v6321_v13 = vsel %vm6047_vm5, %v5910_v48, %v6184_v1  ;;  %v12028_v35 = vld [vmem:[#allocation76_spill] sm:$0xff] }
 0x4c1   : > { %v4458_v32 = vpop.f32.mrb[234].mxu0  ;;  %v5544_v5 = vpop.f32.mrb[236].mxu1 }
 0x4c2   : > { %v6322_v10 = vsel %vm6048_vm6, %v5911_v59, %v6185_v7  ;;  %v5768_v3 = vadd.f32 %v5536_v46, %v4687_v36  ;;  %v4688_v34 = vadd.f32 %v4458_v32, %v12023_v4  ;;  %v9265_v42 = vpop.f32.mrb[235].mxu0  ;;  %v9546_v56 = vpop.f32.mrb[237].mxu1  ;;  %v12029_v4 = vld [vmem:[#allocation77_spill] sm:$0xff] }
 0x4c3   : > { %v8068_v45 = vpack.c.bf16 %v6322_v10, %v6321_v13  ;;  %v5547_v60 = vpop.f32.mrb[238].mxu1 }
 0x4c4   : > { %v5912_v14 = vadd.f32 %v11743_v30, %v5768_v3  ;;  %v5769_v52 = vadd.f32 %v5539_v43, %v4688_v34  ;;  %v9547_v44 = vpop.f32.mrb[239].mxu1 }
 0x4c5   : > { %8196 = vst [vmem:[%s10944_s4 + $0x1a0] sm:$0xff] %v8068_v45  }
 0x4c6   : > { %v6186_v55 = vmul.f32 0.01, %v5912_v14  ;;  %v5913_v9 = vadd.f32 %v11743_v30, %v5769_v52  ;;  %vm6049_vm7 = vcmp.ge.f32.partialorder %v5912_v14, 0.0 }
 0x4c7   : > { %v4463_v57 = vpop.f32.mrb[236].mxu0 }
 0x4c8   : > { %vm6050_vm8 = vcmp.ge.f32.partialorder %v5913_v9, 0.0  ;;  %v6187_v62 = vmul.f32 0.01, %v5913_v9  ;;  %v4689_v25 = vadd.f32 %v4463_v57, %v12024_v12  ;;  %v9268_v37 = vpop.f32.mrb[237].mxu0  ;;  %v6323_v24 = vsel %vm6049_vm7, %v5912_v14, %v6186_v55  ;;  %v12030_v12 = vld [vmem:[#allocation78_spill] sm:$0xff] }
 0x4c9   : > { %v4466_v31 = vpop.f32.mrb[238].mxu0  ;;  %v5552_v49 = vpop.f32.mrb[240].mxu1 }
 0x4ca   : > { %v6324_v15 = vsel %vm6050_vm8, %v5913_v9, %v6187_v62  ;;  %v5770_v63 = vadd.f32 %v5544_v5, %v4689_v25  ;;  %v4690_v11 = vadd.f32 %v4466_v31, %v12025_v58  ;;  %v9269_v33 = vpop.f32.mrb[239].mxu0  ;;  %v9550_v28 = vpop.f32.mrb[241].mxu1  ;;  %v12031_v58 = vld [vmem:[#allocation79_spill] sm:$0xff] }
 0x4cb   : > { %v8073_v19 = vpack.c.bf16 %v6324_v15, %v6323_v24  ;;  %v5555_v26 = vpop.f32.mrb[242].mxu1 }
 0x4cc   : > { %v5914_v22 = vadd.f32 %v11743_v30, %v5770_v63  ;;  %v5771_v18 = vadd.f32 %v5547_v60, %v4690_v11  ;;  %v9551_v16 = vpop.f32.mrb[243].mxu1 }
 0x4cd   : > { %8197 = vst [vmem:[%s10944_s4 + $0x1a8] sm:$0xff] %v8073_v19  }
 0x4ce   : > { %v6188_v17 = vmul.f32 0.01, %v5914_v22  ;;  %v5915_v53 = vadd.f32 %v11743_v30, %v5771_v18  ;;  %vm6051_vm9 = vcmp.ge.f32.partialorder %v5914_v22, 0.0 }
 0x4cf   : > { %v4471_v6 = vpop.f32.mrb[240].mxu0 }
 0x4d0   : > { %vm6052_vm10 = vcmp.ge.f32.partialorder %v5915_v53, 0.0  ;;  %v6189_v39 = vmul.f32 0.01, %v5915_v53  ;;  %v4691_v29 = vadd.f32 %v4471_v6, %v12026_v54  ;;  %v9272_v0 = vpop.f32.mrb[241].mxu0  ;;  %v6325_v23 = vsel %vm6051_vm9, %v5914_v22, %v6188_v17  ;;  %v12032_v54 = vld [vmem:[#allocation80_spill] sm:$0xff] }
 0x4d1   : > { %v4474_v8 = vpop.f32.mrb[242].mxu0  ;;  %v5560_v46 = vpop.f32.mrb[244].mxu1 }
 0x4d2   : > { %v6326_v38 = vsel %vm6052_vm10, %v5915_v53, %v6189_v39  ;;  %v5772_v2 = vadd.f32 %v5552_v49, %v4691_v29  ;;  %v4692_v51 = vadd.f32 %v4474_v8, %v12027_v27  ;;  %v9273_v20 = vpop.f32.mrb[243].mxu0  ;;  %v9554_v21 = vpop.f32.mrb[245].mxu1  ;;  %v12033_v27 = vld [vmem:[#allocation81_spill] sm:$0xff] }
 0x4d3   : > { %v8078_v40 = vpack.c.bf16 %v6326_v38, %v6325_v23  ;;  %v5563_v43 = vpop.f32.mrb[246].mxu1 }
 0x4d4   : > { %v5916_v48 = vadd.f32 %v11743_v30, %v5772_v2  ;;  %v5773_v50 = vadd.f32 %v5555_v26, %v4692_v51  ;;  %v9555_v41 = vpop.f32.mrb[247].mxu1 }
 0x4d5   : > { %8198 = vst [vmem:[%s10944_s4 + $0x1b0] sm:$0xff] %v8078_v40  }
 0x4d6   : > { %v6190_v1 = vmul.f32 0.01, %v5916_v48  ;;  %v5917_v59 = vadd.f32 %v11743_v30, %v5773_v50  ;;  %vm6053_vm11 = vcmp.ge.f32.partialorder %v5916_v48, 0.0 }
 0x4d7   : > { %v4479_v47 = vpop.f32.mrb[244].mxu0 }
 0x4d8   : > { %vm6054_vm4 = vcmp.ge.f32.partialorder %v5917_v59, 0.0  ;;  %v6191_v7 = vmul.f32 0.01, %v5917_v59  ;;  %v4693_v36 = vadd.f32 %v4479_v47, %v12028_v35  ;;  %v9276_v61 = vpop.f32.mrb[245].mxu0  ;;  %v6327_v13 = vsel %vm6053_vm11, %v5916_v48, %v6190_v1  ;;  %v12034_v35 = vld [vmem:[#allocation82_spill] sm:$0xff] }
 0x4d9   : > { %v4482_v32 = vpop.f32.mrb[246].mxu0  ;;  %v5568_v5 = vpop.f32.mrb[248].mxu1 }
 0x4da   : > { %v6328_v10 = vsel %vm6054_vm4, %v5917_v59, %v6191_v7  ;;  %v5774_v3 = vadd.f32 %v5560_v46, %v4693_v36  ;;  %v4694_v34 = vadd.f32 %v4482_v32, %v12029_v4  ;;  %v9277_v42 = vpop.f32.mrb[247].mxu0  ;;  %v9558_v56 = vpop.f32.mrb[249].mxu1  ;;  %v12035_v4 = vld [vmem:[#allocation83_spill] sm:$0xff] }
 0x4db   : > { %v8083_v45 = vpack.c.bf16 %v6328_v10, %v6327_v13  ;;  %v5571_v60 = vpop.f32.mrb[250].mxu1 }
 0x4dc   : > { %v5918_v14 = vadd.f32 %v11743_v30, %v5774_v3  ;;  %v5775_v52 = vadd.f32 %v5563_v43, %v4694_v34  ;;  %v9559_v44 = vpop.f32.mrb[251].mxu1 }
 0x4dd   : > { %8199 = vst [vmem:[%s10944_s4 + $0x1b8] sm:$0xff] %v8083_v45  }
 0x4de   : > { %v6192_v55 = vmul.f32 0.01, %v5918_v14  ;;  %v5919_v9 = vadd.f32 %v11743_v30, %v5775_v52  ;;  %vm6055_vm3 = vcmp.ge.f32.partialorder %v5918_v14, 0.0 }
 0x4df   : > { %v4487_v57 = vpop.f32.mrb[248].mxu0 }
 0x4e0   : > { %vm6056_vm12 = vcmp.ge.f32.partialorder %v5919_v9, 0.0  ;;  %v6193_v62 = vmul.f32 0.01, %v5919_v9  ;;  %v4695_v25 = vadd.f32 %v4487_v57, %v12030_v12  ;;  %v9280_v37 = vpop.f32.mrb[249].mxu0  ;;  %v6329_v24 = vsel %vm6055_vm3, %v5918_v14, %v6192_v55  ;;  %v12036_v12 = vld [vmem:[#allocation84_spill] sm:$0xff] }
 0x4e1   : > { %v4490_v31 = vpop.f32.mrb[250].mxu0  ;;  %v5576_v49 = vpop.f32.mrb[252].mxu1 }
 0x4e2   : > { %v6330_v15 = vsel %vm6056_vm12, %v5919_v9, %v6193_v62  ;;  %v5776_v63 = vadd.f32 %v5568_v5, %v4695_v25  ;;  %v4696_v11 = vadd.f32 %v4490_v31, %v12031_v58  ;;  %v9281_v33 = vpop.f32.mrb[251].mxu0  ;;  %v9562_v28 = vpop.f32.mrb[253].mxu1  ;;  %v12037_v58 = vld [vmem:[#allocation85_spill] sm:$0xff] }
 0x4e3   : > { %v8088_v19 = vpack.c.bf16 %v6330_v15, %v6329_v24  ;;  %v5579_v26 = vpop.f32.mrb[254].mxu1 }
 0x4e4   : > { %v5920_v22 = vadd.f32 %v11743_v30, %v5776_v63  ;;  %v5777_v18 = vadd.f32 %v5571_v60, %v4696_v11  ;;  %v9563_v16 = vpop.f32.mrb[255].mxu1 }
 0x4e5   : > { %8200 = vst [vmem:[%s10944_s4 + $0x1c0] sm:$0xff] %v8088_v19  }
 0x4e6   : > { %v6194_v17 = vmul.f32 0.01, %v5920_v22  ;;  %v5921_v53 = vadd.f32 %v11743_v30, %v5777_v18  ;;  %vm6057_vm1 = vcmp.ge.f32.partialorder %v5920_v22, 0.0 }
 0x4e7   : > { %v4495_v6 = vpop.f32.mrb[252].mxu0 }
 0x4e8   : > { %vm6058_vm13 = vcmp.ge.f32.partialorder %v5921_v53, 0.0  ;;  %v6195_v39 = vmul.f32 0.01, %v5921_v53  ;;  %v4697_v29 = vadd.f32 %v4495_v6, %v12032_v54  ;;  %v9284_v0 = vpop.f32.mrb[253].mxu0  ;;  %v6331_v23 = vsel %vm6057_vm1, %v5920_v22, %v6194_v17  ;;  %v12038_v54 = vld [vmem:[#allocation86_spill] sm:$0xff] }
 0x4e9   : > { %v4498_v8 = vpop.f32.mrb[254].mxu0  ;;  %v5584_v46 = vpop.f32.mrb[0].mxu1 }
 0x4ea   : > { %v6332_v38 = vsel %vm6058_vm13, %v5921_v53, %v6195_v39  ;;  %v5778_v2 = vadd.f32 %v5576_v49, %v4697_v29  ;;  %v4698_v51 = vadd.f32 %v4498_v8, %v12033_v27  ;;  %v9285_v20 = vpop.f32.mrb[255].mxu0  ;;  %v9566_v21 = vpop.f32.mrb[1].mxu1  ;;  %v12039_v27 = vld [vmem:[#allocation87_spill] sm:$0xff] }
 0x4eb   : > { %v8093_v40 = vpack.c.bf16 %v6332_v38, %v6331_v23  ;;  %v5587_v43 = vpop.f32.mrb[2].mxu1 }
 0x4ec   : > { %v5922_v48 = vadd.f32 %v11743_v30, %v5778_v2  ;;  %v5779_v50 = vadd.f32 %v5579_v26, %v4698_v51  ;;  %v9567_v41 = vpop.f32.mrb[3].mxu1 }
 0x4ed   : > { %8201 = vst [vmem:[%s10944_s4 + $0x1c8] sm:$0xff] %v8093_v40  }
 0x4ee   : > { %v6196_v1 = vmul.f32 0.01, %v5922_v48  ;;  %v5923_v59 = vadd.f32 %v11743_v30, %v5779_v50  ;;  %vm6059_vm2 = vcmp.ge.f32.partialorder %v5922_v48, 0.0 }
 0x4ef   : > { %v4503_v47 = vpop.f32.mrb[0].mxu0 }
 0x4f0   : > { %vm6060_vm14 = vcmp.ge.f32.partialorder %v5923_v59, 0.0  ;;  %v6197_v7 = vmul.f32 0.01, %v5923_v59  ;;  %v4699_v36 = vadd.f32 %v4503_v47, %v12034_v35  ;;  %v9288_v61 = vpop.f32.mrb[1].mxu0  ;;  %v6333_v13 = vsel %vm6059_vm2, %v5922_v48, %v6196_v1  ;;  %v12040_v35 = vld [vmem:[#allocation88_spill] sm:$0xff] }
 0x4f1   : > { %v4506_v32 = vpop.f32.mrb[2].mxu0  ;;  %v5592_v5 = vpop.f32.mrb[4].mxu1 }
 0x4f2   : > { %v6334_v10 = vsel %vm6060_vm14, %v5923_v59, %v6197_v7  ;;  %v5780_v3 = vadd.f32 %v5584_v46, %v4699_v36  ;;  %v4700_v34 = vadd.f32 %v4506_v32, %v12035_v4  ;;  %v9289_v42 = vpop.f32.mrb[3].mxu0  ;;  %v9570_v56 = vpop.f32.mrb[5].mxu1  ;;  %v12041_v4 = vld [vmem:[#allocation89_spill] sm:$0xff] }
 0x4f3   : > { %v8098_v45 = vpack.c.bf16 %v6334_v10, %v6333_v13  ;;  %v5595_v60 = vpop.f32.mrb[6].mxu1 }
 0x4f4   : > { %v5924_v14 = vadd.f32 %v11743_v30, %v5780_v3  ;;  %v5781_v52 = vadd.f32 %v5587_v43, %v4700_v34  ;;  %v9571_v44 = vpop.f32.mrb[7].mxu1 }
 0x4f5   : > { %8202 = vst [vmem:[%s10944_s4 + $0x1d0] sm:$0xff] %v8098_v45  }
 0x4f6   : > { %v6198_v55 = vmul.f32 0.01, %v5924_v14  ;;  %v5925_v9 = vadd.f32 %v11743_v30, %v5781_v52  ;;  %vm6061_vm15 = vcmp.ge.f32.partialorder %v5924_v14, 0.0 }
 0x4f7   : > { %v4511_v57 = vpop.f32.mrb[4].mxu0 }
 0x4f8   : > { %vm6062_vm0 = vcmp.ge.f32.partialorder %v5925_v9, 0.0  ;;  %v6199_v62 = vmul.f32 0.01, %v5925_v9  ;;  %v4701_v25 = vadd.f32 %v4511_v57, %v12036_v12  ;;  %v9292_v37 = vpop.f32.mrb[5].mxu0  ;;  %v6335_v24 = vsel %vm6061_vm15, %v5924_v14, %v6198_v55  ;;  %v12042_v12 = vld [vmem:[#allocation90_spill] sm:$0xff] }
 0x4f9   : > { %v4514_v31 = vpop.f32.mrb[6].mxu0  ;;  %v5600_v49 = vpop.f32.mrb[8].mxu1 }
 0x4fa   : > { %v6336_v15 = vsel %vm6062_vm0, %v5925_v9, %v6199_v62  ;;  %v5782_v63 = vadd.f32 %v5592_v5, %v4701_v25  ;;  %v4702_v11 = vadd.f32 %v4514_v31, %v12037_v58  ;;  %v9293_v33 = vpop.f32.mrb[7].mxu0  ;;  %v9574_v28 = vpop.f32.mrb[9].mxu1  ;;  %v12043_v58 = vld [vmem:[#allocation91_spill] sm:$0xff] }
 0x4fb   : > { %v8103_v19 = vpack.c.bf16 %v6336_v15, %v6335_v24  ;;  %v5603_v26 = vpop.f32.mrb[10].mxu1 }
 0x4fc   : > { %v5926_v22 = vadd.f32 %v11743_v30, %v5782_v63  ;;  %v5783_v18 = vadd.f32 %v5595_v60, %v4702_v11  ;;  %v9575_v16 = vpop.f32.mrb[11].mxu1 }
 0x4fd   : > { %8203 = vst [vmem:[%s10944_s4 + $0x1d8] sm:$0xff] %v8103_v19  }
 0x4fe   : > { %v6200_v17 = vmul.f32 0.01, %v5926_v22  ;;  %v5927_v53 = vadd.f32 %v11743_v30, %v5783_v18  ;;  %vm6063_vm5 = vcmp.ge.f32.partialorder %v5926_v22, 0.0 }
 0x4ff   : > { %v4519_v6 = vpop.f32.mrb[8].mxu0 }
 0x500   : > { %vm6064_vm6 = vcmp.ge.f32.partialorder %v5927_v53, 0.0  ;;  %v6201_v39 = vmul.f32 0.01, %v5927_v53  ;;  %v4703_v29 = vadd.f32 %v4519_v6, %v12038_v54  ;;  %v9296_v0 = vpop.f32.mrb[9].mxu0  ;;  %v6337_v23 = vsel %vm6063_vm5, %v5926_v22, %v6200_v17  ;;  %v12044_v54 = vld [vmem:[#allocation92_spill] sm:$0xff] }
 0x501   : > { %v4522_v8 = vpop.f32.mrb[10].mxu0  ;;  %v5608_v46 = vpop.f32.mrb[12].mxu1 }
 0x502   : > { %v6338_v38 = vsel %vm6064_vm6, %v5927_v53, %v6201_v39  ;;  %v5784_v2 = vadd.f32 %v5600_v49, %v4703_v29  ;;  %v4704_v51 = vadd.f32 %v4522_v8, %v12039_v27  ;;  %v9297_v20 = vpop.f32.mrb[11].mxu0  ;;  %v9578_v21 = vpop.f32.mrb[13].mxu1  ;;  %v12045_v27 = vld [vmem:[#allocation93_spill] sm:$0xff] }
 0x503   : > { %v8108_v40 = vpack.c.bf16 %v6338_v38, %v6337_v23  ;;  %v5611_v43 = vpop.f32.mrb[14].mxu1 }
 0x504   : > { %v5928_v48 = vadd.f32 %v11743_v30, %v5784_v2  ;;  %v5785_v50 = vadd.f32 %v5603_v26, %v4704_v51  ;;  %v9579_v41 = vpop.f32.mrb[15].mxu1 }
 0x505   : > { %8204 = vst [vmem:[%s10944_s4 + $0x1e0] sm:$0xff] %v8108_v40  }
 0x506   : > { %v6202_v1 = vmul.f32 0.01, %v5928_v48  ;;  %v5929_v59 = vadd.f32 %v11743_v30, %v5785_v50  ;;  %vm6065_vm7 = vcmp.ge.f32.partialorder %v5928_v48, 0.0 }
 0x507   : > { %v4527_v47 = vpop.f32.mrb[12].mxu0 }
 0x508   : > { %vm6066_vm8 = vcmp.ge.f32.partialorder %v5929_v59, 0.0  ;;  %v6203_v7 = vmul.f32 0.01, %v5929_v59  ;;  %v4705_v36 = vadd.f32 %v4527_v47, %v12040_v35  ;;  %v9300_v61 = vpop.f32.mrb[13].mxu0  ;;  %v6339_v13 = vsel %vm6065_vm7, %v5928_v48, %v6202_v1  ;;  %v12046_v35 = vld [vmem:[#allocation94_spill] sm:$0xff] }
 0x509   : > { %v4530_v32 = vpop.f32.mrb[14].mxu0  ;;  %v5616_v5 = vpop.f32.mrb[16].mxu1 }
 0x50a   : > { %v6340_v10 = vsel %vm6066_vm8, %v5929_v59, %v6203_v7  ;;  %v5786_v3 = vadd.f32 %v5608_v46, %v4705_v36  ;;  %v4706_v34 = vadd.f32 %v4530_v32, %v12041_v4  ;;  %v9301_v42 = vpop.f32.mrb[15].mxu0  ;;  %v9582_v56 = vpop.f32.mrb[17].mxu1  ;;  %v12047_v4 = vld [vmem:[#allocation95_spill] sm:$0xff] }
 0x50b   : > { %v8113_v45 = vpack.c.bf16 %v6340_v10, %v6339_v13  ;;  %v5619_v60 = vpop.f32.mrb[18].mxu1 }
 0x50c   : > { %v5930_v14 = vadd.f32 %v11743_v30, %v5786_v3  ;;  %v5787_v52 = vadd.f32 %v5611_v43, %v4706_v34  ;;  %v9583_v44 = vpop.f32.mrb[19].mxu1 }
 0x50d   : > { %8205 = vst [vmem:[%s10944_s4 + $0x1e8] sm:$0xff] %v8113_v45  }
 0x50e   : > { %v6204_v55 = vmul.f32 0.01, %v5930_v14  ;;  %v5931_v9 = vadd.f32 %v11743_v30, %v5787_v52  ;;  %vm6067_vm9 = vcmp.ge.f32.partialorder %v5930_v14, 0.0 }
 0x50f   : > { %v4535_v57 = vpop.f32.mrb[16].mxu0 }
 0x510   : > { %vm6068_vm10 = vcmp.ge.f32.partialorder %v5931_v9, 0.0  ;;  %v6205_v62 = vmul.f32 0.01, %v5931_v9  ;;  %v4707_v25 = vadd.f32 %v4535_v57, %v12042_v12  ;;  %v9304_v37 = vpop.f32.mrb[17].mxu0  ;;  %v6341_v24 = vsel %vm6067_vm9, %v5930_v14, %v6204_v55  ;;  %v12048_v12 = vld [vmem:[#allocation96_spill] sm:$0xff] }
 0x511   : > { %v4538_v31 = vpop.f32.mrb[18].mxu0  ;;  %v5624_v49 = vpop.f32.mrb[20].mxu1 }
 0x512   : > { %v6342_v15 = vsel %vm6068_vm10, %v5931_v9, %v6205_v62  ;;  %v5788_v63 = vadd.f32 %v5616_v5, %v4707_v25  ;;  %v4708_v11 = vadd.f32 %v4538_v31, %v12043_v58  ;;  %v9305_v33 = vpop.f32.mrb[19].mxu0  ;;  %v9586_v28 = vpop.f32.mrb[21].mxu1  ;;  %v12049_v58 = vld [vmem:[#allocation97_spill] sm:$0xff] }
 0x513   : > { %v8118_v19 = vpack.c.bf16 %v6342_v15, %v6341_v24  ;;  %v5627_v26 = vpop.f32.mrb[22].mxu1 }
 0x514   : > { %v5932_v22 = vadd.f32 %v11743_v30, %v5788_v63  ;;  %v5789_v18 = vadd.f32 %v5619_v60, %v4708_v11  ;;  %v9587_v16 = vpop.f32.mrb[23].mxu1 }
 0x515   : > { %8206 = vst [vmem:[%s10944_s4 + $0x1f0] sm:$0xff] %v8118_v19  }
 0x516   : > { %v6206_v17 = vmul.f32 0.01, %v5932_v22  ;;  %v5933_v53 = vadd.f32 %v11743_v30, %v5789_v18  ;;  %vm6069_vm11 = vcmp.ge.f32.partialorder %v5932_v22, 0.0 }
 0x517   : > { %v4543_v6 = vpop.f32.mrb[20].mxu0 }
 0x518   : > { %vm6070_vm4 = vcmp.ge.f32.partialorder %v5933_v53, 0.0  ;;  %v6207_v39 = vmul.f32 0.01, %v5933_v53  ;;  %v4709_v29 = vadd.f32 %v4543_v6, %v12044_v54  ;;  %v9308_v0 = vpop.f32.mrb[21].mxu0  ;;  %v6343_v23 = vsel %vm6069_vm11, %v5932_v22, %v6206_v17  ;;  %v12050_v54 = vld [vmem:[#allocation98_spill] sm:$0xff] }
 0x519   : > { %v4546_v8 = vpop.f32.mrb[22].mxu0  ;;  %v5632_v46 = vpop.f32.mrb[24].mxu1 }
 0x51a   : > { %v6344_v38 = vsel %vm6070_vm4, %v5933_v53, %v6207_v39  ;;  %v5790_v2 = vadd.f32 %v5624_v49, %v4709_v29  ;;  %v4710_v51 = vadd.f32 %v4546_v8, %v12045_v27  ;;  %v9309_v20 = vpop.f32.mrb[23].mxu0  ;;  %v9590_v21 = vpop.f32.mrb[25].mxu1  ;;  %v12051_v27 = vld [vmem:[#allocation99_spill] sm:$0xff] }
 0x51b   : > { %v8123_v40 = vpack.c.bf16 %v6344_v38, %v6343_v23  ;;  %v5635_v43 = vpop.f32.mrb[26].mxu1 }
 0x51c   : > { %v5934_v48 = vadd.f32 %v11743_v30, %v5790_v2  ;;  %v5791_v50 = vadd.f32 %v5627_v26, %v4710_v51  ;;  %v9591_v41 = vpop.f32.mrb[27].mxu1 }
 0x51d   : > { %8207 = vst [vmem:[%s10944_s4 + $0x1f8] sm:$0xff] %v8123_v40  }
 0x51e   : > { %v6208_v1 = vmul.f32 0.01, %v5934_v48  ;;  %v5935_v59 = vadd.f32 %v11743_v30, %v5791_v50  ;;  %vm6071_vm3 = vcmp.ge.f32.partialorder %v5934_v48, 0.0 }
 0x51f   : > { %v4551_v47 = vpop.f32.mrb[24].mxu0 }
 0x520   : > { %vm6072_vm12 = vcmp.ge.f32.partialorder %v5935_v59, 0.0  ;;  %v6209_v7 = vmul.f32 0.01, %v5935_v59  ;;  %v4711_v36 = vadd.f32 %v4551_v47, %v12046_v35  ;;  %v9312_v61 = vpop.f32.mrb[25].mxu0  ;;  %v6345_v13 = vsel %vm6071_vm3, %v5934_v48, %v6208_v1  ;;  %v12052_v35 = vld [vmem:[#allocation100_spill] sm:$0xff] }
 0x521   : > { %v4554_v32 = vpop.f32.mrb[26].mxu0  ;;  %v5640_v5 = vpop.f32.mrb[28].mxu1 }
 0x522   : > { %v6346_v10 = vsel %vm6072_vm12, %v5935_v59, %v6209_v7  ;;  %v5792_v3 = vadd.f32 %v5632_v46, %v4711_v36  ;;  %v4712_v34 = vadd.f32 %v4554_v32, %v12047_v4  ;;  %v9313_v42 = vpop.f32.mrb[27].mxu0  ;;  %v9594_v56 = vpop.f32.mrb[29].mxu1 }
 0x523   : > { %v8128_v45 = vpack.c.bf16 %v6346_v10, %v6345_v13  ;;  %v5643_v60 = vpop.f32.mrb[30].mxu1 }
 0x524   : > { %v5936_v14 = vadd.f32 %v11743_v30, %v5792_v3  ;;  %v5793_v52 = vadd.f32 %v5635_v43, %v4712_v34  ;;  %v9595_v44 = vpop.f32.mrb[31].mxu1 }
 0x525   : > { %8208 = vst [vmem:[%s10944_s4 + $0x200] sm:$0xff] %v8128_v45  }
 0x526   : > { %v6210_v55 = vmul.f32 0.01, %v5936_v14  ;;  %v5937_v9 = vadd.f32 %v11743_v30, %v5793_v52  ;;  %vm6073_vm1 = vcmp.ge.f32.partialorder %v5936_v14, 0.0 }
 0x527   : > { %v4559_v57 = vpop.f32.mrb[28].mxu0 }
 0x528   : > { %vm6074_vm13 = vcmp.ge.f32.partialorder %v5937_v9, 0.0  ;;  %v6211_v62 = vmul.f32 0.01, %v5937_v9  ;;  %v4713_v25 = vadd.f32 %v4559_v57, %v12048_v12  ;;  %v9316_v37 = vpop.f32.mrb[29].mxu0  ;;  %v6347_v24 = vsel %vm6073_vm1, %v5936_v14, %v6210_v55 }
 0x529   : > { %v4562_v31 = vpop.f32.mrb[30].mxu0  ;;  %v5648_v49 = vpop.f32.mrb[32].mxu1 }
 0x52a   : > { %v6348_v15 = vsel %vm6074_vm13, %v5937_v9, %v6211_v62  ;;  %v5794_v63 = vadd.f32 %v5640_v5, %v4713_v25  ;;  %v4714_v11 = vadd.f32 %v4562_v31, %v12049_v58  ;;  %v9317_v33 = vpop.f32.mrb[31].mxu0  ;;  %v9598_v28 = vpop.f32.mrb[33].mxu1 }
 0x52b   : > { %v8133_v19 = vpack.c.bf16 %v6348_v15, %v6347_v24  ;;  %v5651_v26 = vpop.f32.mrb[34].mxu1 }
 0x52c   : > { %v5938_v22 = vadd.f32 %v11743_v30, %v5794_v63  ;;  %v5795_v18 = vadd.f32 %v5643_v60, %v4714_v11  ;;  %v9599_v16 = vpop.f32.mrb[35].mxu1 }
 0x52d   : > { %8209 = vst [vmem:[%s10944_s4 + $0x208] sm:$0xff] %v8133_v19  }
 0x52e   : > { %v6212_v17 = vmul.f32 0.01, %v5938_v22  ;;  %v5939_v53 = vadd.f32 %v11743_v30, %v5795_v18  ;;  %vm6075_vm2 = vcmp.ge.f32.partialorder %v5938_v22, 0.0 }
 0x52f   : > { %v4567_v6 = vpop.f32.mrb[32].mxu0 }
 0x530   : > { %vm6076_vm14 = vcmp.ge.f32.partialorder %v5939_v53, 0.0  ;;  %v6213_v39 = vmul.f32 0.01, %v5939_v53  ;;  %v4715_v29 = vadd.f32 %v4567_v6, %v12050_v54  ;;  %v9320_v0 = vpop.f32.mrb[33].mxu0  ;;  %v6349_v23 = vsel %vm6075_vm2, %v5938_v22, %v6212_v17 }
 0x531   : > { %v4570_v8 = vpop.f32.mrb[34].mxu0  ;;  %v5656_v46 = vpop.f32.mrb[36].mxu1 }
 0x532   : > { %v6350_v38 = vsel %vm6076_vm14, %v5939_v53, %v6213_v39  ;;  %v5796_v2 = vadd.f32 %v5648_v49, %v4715_v29  ;;  %v4716_v51 = vadd.f32 %v4570_v8, %v12051_v27  ;;  %v9321_v20 = vpop.f32.mrb[35].mxu0  ;;  %v9602_v21 = vpop.f32.mrb[37].mxu1 }
 0x533   : > { %v8138_v40 = vpack.c.bf16 %v6350_v38, %v6349_v23  ;;  %v5659_v43 = vpop.f32.mrb[38].mxu1 }
 0x534   : > { %v5940_v48 = vadd.f32 %v11743_v30, %v5796_v2  ;;  %v5797_v50 = vadd.f32 %v5651_v26, %v4716_v51  ;;  %v9603_v41 = vpop.f32.mrb[39].mxu1 }
 0x535   : > { %8210 = vst [vmem:[%s10944_s4 + $0x210] sm:$0xff] %v8138_v40  }
 0x536   : > { %v6214_v1 = vmul.f32 0.01, %v5940_v48  ;;  %v5941_v59 = vadd.f32 %v11743_v30, %v5797_v50  ;;  %vm6077_vm15 = vcmp.ge.f32.partialorder %v5940_v48, 0.0 }
 0x537   : > { %v4575_v47 = vpop.f32.mrb[36].mxu0 }
 0x538   : > { %vm6078_vm0 = vcmp.ge.f32.partialorder %v5941_v59, 0.0  ;;  %v6215_v7 = vmul.f32 0.01, %v5941_v59  ;;  %v4717_v36 = vadd.f32 %v4575_v47, %v12052_v35  ;;  %v9324_v61 = vpop.f32.mrb[37].mxu0  ;;  %v6351_v5 = vsel %vm6077_vm15, %v5940_v48, %v6214_v1 }
 0x539   : > { %v4578_v32 = vpop.f32.mrb[38].mxu0 }
 0x53a   : > { %v6352_v13 = vsel %vm6078_vm0, %v5941_v59, %v6215_v7  ;;  %v5798_v10 = vadd.f32 %v5656_v46, %v4717_v36  ;;  %v9325_v3 = vpop.f32.mrb[39].mxu0 }
 0x53b   : > { %v8143_v4 = vpack.c.bf16 %v6352_v13, %v6351_v5 }
 0x53c   : > { %v5942_v34 = vadd.f32 %v11743_v30, %v5798_v10 }
 0x53d   : > { %8211 = vst [vmem:[%s10944_s4 + $0x218] sm:$0xff] %v8143_v4  }
 0x53e   : > { %vm6079_vm5 = vcmp.ge.f32.partialorder %v5942_v34, 0.0  ;;  %v6216_v42 = vmul.f32 0.01, %v5942_v34 }
 0x540   : > { %v6353_v56 = vsel %vm6079_vm5, %v5942_v34, %v6216_v42 }
 0x541   : > { %v7804_v45 = vpack.c.bf16 %v6353_v56, %v6353_v56 }
 0x543   : > { %7039 = vst [vmem:[%s10944_s4 + $0x220] sm:$0xf] %v7804_v45 }
 0x544 PF: > { %s13_s12 = sadd.s32 1, %s9769_s12  }
 0x545   : > { %p10_p4 = scmp.ge.s32.totalorder %s13_s12, 4  }
 0x547   :  { %12 = sbr.rel (!%p10_p4) target bundleno = 1 (0x1), region = 65 }

// kernel: _lambda_.7
= control target key start
LH: loop header
LB: loop body
LE: loop exit
PB: predicated region body
PF: predicated region fallthrough
CT: control target
= control target key end

     0   :  { %s3031_s12 = smov 0   ;;  %s3567_s0 = inlined_call_operand.vmem [shape: bf16[2,320,16], index: 0, kind: input, shape index: {}]   ;;  %s3568_s1 = inlined_call_operand.vmem [shape: bf16[4,16,128], index: 1, kind: input, shape index: {}]   ;;  %s3569_s2 = inlined_call_operand.vmem [shape: f32[1,128], index: 2, kind: input, shape index: {}]   ;;  %s3570_s3 = inlined_call_operand.vmem [shape: bf16[2,296,128], index: 3, kind: output, shape index: {}]  }
   0x1 LB: > { %s2236_s13 = sadd.s32 4294967295, %s3007_s12   ;;  %p2240_p0 = scmp.ge.s32.totalorder %s3007_s12, 1  ;;  %s3007_s12 = sphi %s3031_s12, %s13_s12  }
   0x2   : > { %p137_p1 = scmp.lt.s32.totalorder %s3007_s12, 3 }
   0x4   : > { %p138_p2 = pnand %p2240_p0, %p137_p1 }
   0x5   : > { %v2957_v0 = vld [vmem:[%s3568_s1 + $0x8] sm:$0xff] (!%p138_p2)   ;;  %v3009_v1 = vmov (!%p138_p2), 0.0   ;;  %v2958_v2 = vld [vmem:[%s3568_s1] sm:$0xff] (!%p138_p2)   ;;  %vm3010_vm0 = vmmov (!%p138_p2), 0   ;;  %p161_p3 = scmp.lt.s32.totalorder (!%p138_p2), %s2236_s13, 1  ;;  %vm468_vm1 = vcmask (!%p138_p2), 130048  }
   0x6   : > { %141 = sbr.rel (%p138_p2) target bundleno = 545 (0x221), region = 32  ;;  %2633 = vmatprep.subr.bf16.mxu0 (!%p138_p2), %v3009_v1  ;;  %2711 = vmatprep.subr.bf16.mxu1 (!%p138_p2), %v3009_v1  ;;  %v2962_v3 = vld [vmem:[%s3568_s1 + $0x18] sm:$0xff] (!%p138_p2)   ;;  %vm310_vm2 = vsmask.f32 (!%p138_p2), 7424  ;;  %v2961_v12 = vld [vmem:[%s3568_s1 + $0x10] sm:$0xff] (!%p138_p2)   ;;  %vm1518_vm3 = vcmask (!%p138_p2), 1046528  }
   0x7   : > { %2634 = vmatpush3.bf16.msra.mxu0 (!%p138_p2), %v2957_v0  ;;  %2713 = vmatprep.mubr.msk.bf16.mxu1 (!%p138_p2), %vm3010_vm0, %v3009_v1 }
   0x8   : > { %2712 = vmatpush3.bf16.msra.mxu1 (!%p138_p2), %v2958_v2  ;;  %2635 = vmatprep.mubr.msk.bf16.mxu0 (!%p138_p2), %vm3010_vm0, %v3009_v1 }
   0x9   : > { %2789 = vmatprep.subr.bf16.mxu0 (!%p138_p2), %v3009_v1  ;;  %2867 = vmatprep.subr.bf16.mxu1 (!%p138_p2), %v3009_v1 }
   0xd   : > { %s3572_s13 = smov (!%p161_p3, %s2236_s13), 1 }
   0xe   : > { %s2945_s18 = smul.u32 160, %s3572_s13 }
   0xf   : > { %s2946_s28 = smul.u32 148, %s3572_s13 }
  0x10   : > { %s3059_s21 = scalar_lea.vmem %s3567_s0, %s2945_s18 }
  0x11   : > { %v2959_v4 = vld [vmem:[%s3059_s21] sm:$0xff]   ;;  %v2960_v5 = vld [vmem:[%s3059_s21 + $0x8] sm:$0xff]   ;;  %v2963_v9 = vld [vmem:[%s3059_s21 + $0x10] sm:$0xff]   ;;  %s3474_s4 = scalar_lea.vmem %s3570_s3, %s2946_s28 }
  0x12   : > { %2714 = vmatmul.mubr.msk.bf16.vlgmr.msra.gmra.mrb[0].mxu1 %vm468_vm1, %v2959_v4  ;;  %v312_v6 = vshrl.u32 %v2959_v4, 16  ;;  %v314_v7 = vshll.u32 %v2959_v4, 16  ;;  %v319_v8 = vshll.u32 %v2960_v5, 16  ;;  %v323_v14 = vshrl.u32 %v2960_v5, 16  ;;  %v2964_v19 = vld [vmem:[%s3059_s21 + $0x18] sm:$0xff]   ;;  %v2965_v25 = vld [vmem:[%s3059_s21 + $0x20] sm:$0xff]  }
  0x13   : > { %2868 = vmatpush3.bf16.msra.mxu1 %v2962_v3  ;;  %2717 = vmatprep.mubr.msk.bf16.mxu1 %vm3010_vm0, %v3009_v1  ;;  %v327_v15 = vshll.u32 %v2963_v9, 16  ;;  %v331_v21 = vshrl.u32 %v2963_v9, 16  ;;  %v335_v22 = vshll.u32 %v2964_v19, 16  ;;  %v339_v27 = vshrl.u32 %v2964_v19, 16  ;;  %v2966_v31 = vld [vmem:[%s3059_s21 + $0x28] sm:$0xff]   ;;  %v2967_v37 = vld [vmem:[%s3059_s21 + $0x30] sm:$0xff]  }
  0x14   : > { %v316_v10 = vrot.slane %v314_v7, 1  ;;  %v321_v11 = vrot.slane %v319_v8, 1  ;;  %v343_v28 = vshll.u32 %v2965_v25, 16  ;;  %v347_v33 = vshrl.u32 %v2965_v25, 16  ;;  %v2968_v43 = vld [vmem:[%s3059_s21 + $0x38] sm:$0xff]   ;;  %v2969_v49 = vld [vmem:[%s3059_s21 + $0x40] sm:$0xff]  }
  0x15   : > { %v329_v18 = vrot.slane %v327_v15, 1  ;;  %v337_v24 = vrot.slane %v335_v22, 1  ;;  %v351_v34 = vshll.u32 %v2966_v31, 16  ;;  %v355_v39 = vshrl.u32 %v2966_v31, 16  ;;  %v2970_v55 = vld [vmem:[%s3059_s21 + $0x48] sm:$0xff]   ;;  %v2971_v61 = vld [vmem:[%s3059_s21 + $0x50] sm:$0xff]  }
  0x16   : > { %v317_v13 = vor.u32 %v316_v10, %v312_v6  ;;  %v325_v17 = vor.u32 %v323_v14, %v321_v11  ;;  %v345_v30 = vrot.slane %v343_v28, 1  ;;  %v359_v40 = vshll.u32 %v2967_v37, 16  ;;  %v2972_v4 = vld [vmem:[%s3059_s21 + $0x58] sm:$0xff]   ;;  %v2973_v10 = vld [vmem:[%s3059_s21 + $0x60] sm:$0xff]   ;;  %v2975_v22 = vld [vmem:[%s3059_s21 + $0x70] sm:$0xff]  }
  0x17   : > { %v333_v23 = vor.u32 %v331_v21, %v329_v18  ;;  %v341_v29 = vor.u32 %v339_v27, %v337_v24  ;;  %v353_v36 = vrot.slane %v351_v34, 1  ;;  %v363_v45 = vshrl.u32 %v2967_v37, 16  ;;  %v2976_v28 = vld [vmem:[%s3059_s21 + $0x78] sm:$0xff]   ;;  %v2977_v34 = vld [vmem:[%s3059_s21 + $0x80] sm:$0xff]  }
  0x18   : > { %v322_v16 = vsel %vm310_vm2, %v317_v13, %v321_v11  ;;  %v330_v20 = vsel %vm310_vm2, %v325_v17, %v329_v18  ;;  %v349_v35 = vor.u32 %v347_v33, %v345_v30  ;;  %v361_v42 = vrot.slane %v359_v40, 1  ;;  %v2978_v40 = vld [vmem:[%s3059_s21 + $0x88] sm:$0xff]  }
  0x19   : > { %2636 = vmatmul.mubr.msk.bf16.vlgmr.msra.gmra.mrb[0].mxu0 %vm468_vm1, %v322_v16  ;;  %v338_v26 = vsel %vm310_vm2, %v333_v23, %v337_v24  ;;  %v346_v32 = vsel %vm310_vm2, %v341_v29, %v345_v30  ;;  %v357_v41 = vor.u32 %v355_v39, %v353_v36  ;;  %v367_v46 = vshll.u32 %v2968_v43, 16  ;;  %v2974_v16 = vld [vmem:[%s3059_s21 + $0x68] sm:$0xff]  }
  0x1a   : > { %2790 = vmatpush3.bf16.msra.mxu0 %v2961_v12  ;;  %2639 = vmatprep.mubr.msk.bf16.mxu0 %vm3010_vm0, %v3009_v1  ;;  %v354_v38 = vsel %vm310_vm2, %v349_v35, %v353_v36  ;;  %v365_v47 = vor.u32 %v363_v45, %v361_v42  ;;  %v371_v51 = vshrl.u32 %v2968_v43, 16  ;;  %v375_v52 = vshll.u32 %v2969_v49, 16  ;;  %v211_v45 = vld [vmem:[%s3059_s21 + $0x94] sm:$0x1] }
  0x1b   : > { %2718 = vmatmul.mubr.msk.bf16.gmra.mrb[4].mxu1 %vm468_vm1, %v2960_v5  ;;  %v362_v44 = vsel %vm310_vm2, %v357_v41, %v361_v42  ;;  %v369_v48 = vrot.slane %v367_v46, 1  ;;  %v379_v57 = vshrl.u32 %v2969_v49, 16  ;;  %v383_v58 = vshll.u32 %v2970_v55, 16 }
  0x1c   : > { %2721 = vmatprep.mubr.msk.bf16.mxu1 %vm3010_vm0, %v3009_v1  ;;  %v377_v54 = vrot.slane %v375_v52, 1  ;;  %v387_v63 = vshrl.u32 %v2970_v55, 16  ;;  %v391_v0 = vshll.u32 %v2971_v61, 16  ;;  %v395_v6 = vshrl.u32 %v2971_v61, 16 }
  0x1d   : > { %v370_v50 = vsel %vm310_vm2, %v365_v47, %v369_v48  ;;  %v373_v53 = vor.u32 %v371_v51, %v369_v48  ;;  %v385_v60 = vrot.slane %v383_v58, 1  ;;  %v399_v7 = vshll.u32 %v2972_v4, 16 }
  0x1e   : > { %v381_v59 = vor.u32 %v379_v57, %v377_v54  ;;  %v393_v3 = vrot.slane %v391_v0, 1  ;;  %v403_v12 = vshrl.u32 %v2972_v4, 16  ;;  %v407_v13 = vshll.u32 %v2973_v10, 16 }
  0x1f   : > { %v378_v56 = vsel %vm310_vm2, %v373_v53, %v377_v54  ;;  %v389_v2 = vor.u32 %v387_v63, %v385_v60  ;;  %v411_v18 = vshrl.u32 %v2973_v10, 16  ;;  %v419_v24 = vshrl.u32 %v2974_v16, 16  ;;  %v940_v54 = vld [vmem:[%s3059_s21 + $0x8] sm:$0xf] }
  0x20   : > { %v386_v62 = vsel %vm310_vm2, %v381_v59, %v385_v60  ;;  %v397_v8 = vor.u32 %v395_v6, %v393_v3  ;;  %v409_v15 = vrot.slane %v407_v13, 1  ;;  %v427_v30 = vshrl.u32 %v2975_v22, 16  ;;  %v2982_v60 = vld [vmem:[%s3059_s21 + $0x10] sm:$0xff]  }
  0x21   : > { %2640 = vmatmul.mubr.msk.bf16.gmra.mrb[4].mxu0 %vm468_vm1, %v330_v20  ;;  %v394_v5 = vsel %vm310_vm2, %v389_v2, %v393_v3  ;;  %v435_v36 = vshrl.u32 %v2976_v28, 16  ;;  %v443_v42 = vshrl.u32 %v2977_v34, 16  ;;  %v1520_v2 = vrot.slane %v2982_v60, 1 }
  0x22   : > { %2643 = vmatprep.mubr.msk.bf16.mxu0 %vm3010_vm0, %v3009_v1  ;;  %v413_v20 = vor.u32 %v411_v18, %v409_v15  ;;  %v1084_v6 = vshll.u32 %v2982_v60, 16  ;;  %v1088_v13 = vshrl.u32 %v2982_v60, 16 }
  0x23   : > { %2722 = vmatmul.mubr.msk.bf16.gmra.mrb[8].mxu1 %vm468_vm1, %v2963_v9  ;;  %v401_v9 = vrot.slane %v399_v7, 1 }
  0x24   : > { %2725 = vmatprep.mubr.msk.bf16.mxu1 %vm3010_vm0, %v3009_v1 }
  0x25   : > { %v402_v11 = vsel %vm310_vm2, %v397_v8, %v401_v9  ;;  %v405_v14 = vor.u32 %v403_v12, %v401_v9  ;;  %v2984_v8 = vld [vmem:[%s3059_s21 + $0x18] sm:$0xff]  }
  0x27   : > { %v410_v17 = vsel %vm310_vm2, %v405_v14, %v409_v15  ;;  %v1092_v14 = vshll.u32 %v2984_v8, 16 }
  0x29   : > { %2644 = vmatmul.mubr.msk.bf16.gmra.mrb[8].mxu0 %vm468_vm1, %v338_v26  ;;  %v1094_v18 = vrot.slane %v1092_v14, 1 }
  0x2a   : > { %2647 = vmatprep.mubr.msk.bf16.mxu0 %vm3010_vm0, %v3009_v1 }
  0x2b   : > { %2726 = vmatmul.mubr.msk.bf16.gmra.mrb[12].mxu1 %vm468_vm1, %v2964_v19  ;;  %v415_v19 = vshll.u32 %v2974_v16, 16 }
  0x2c   : > { %2729 = vmatprep.mubr.msk.bf16.mxu1 %vm3010_vm0, %v3009_v1 }
  0x2d   : > { %v417_v21 = vrot.slane %v415_v19, 1 }
  0x2f   : > { %v418_v23 = vsel %vm310_vm2, %v413_v20, %v417_v21  ;;  %v421_v26 = vor.u32 %v419_v24, %v417_v21  ;;  %v1096_v21 = vshrl.u32 %v2984_v8, 16  ;;  %v2986_v24 = vld [vmem:[%s3059_s21 + $0x28] sm:$0xff]  }
  0x31   : > { %2648 = vmatmul.mubr.msk.bf16.gmra.mrb[12].mxu0 %vm468_vm1, %v346_v32 }
  0x32   : > { %2651 = vmatprep.mubr.msk.bf16.mxu0 %vm3010_vm0, %v3009_v1 }
  0x33   : > { %2730 = vmatmul.mubr.msk.bf16.gmra.mrb[16].mxu1 %vm468_vm1, %v2965_v25  ;;  %v423_v25 = vshll.u32 %v2975_v22, 16 }
  0x34   : > { %2733 = vmatprep.mubr.msk.bf16.mxu1 %vm3010_vm0, %v3009_v1 }
  0x35   : > { %v425_v27 = vrot.slane %v423_v25, 1  ;;  %v1098_v25 = vor.u32 %v1096_v21, %v1094_v18 }
  0x37   : > { %v426_v29 = vsel %vm310_vm2, %v421_v26, %v425_v27  ;;  %v429_v32 = vor.u32 %v427_v30, %v425_v27  ;;  %v1526_v27 = vrot.slane %v2986_v24, 1  ;;  %v1108_v30 = vshll.u32 %v2986_v24, 16 }
  0x39   : > { %2652 = vmatmul.mubr.msk.bf16.gmra.mrb[16].mxu0 %vm468_vm1, %v354_v38 }
  0x3a   : > { %2655 = vmatprep.mubr.msk.bf16.mxu0 %vm3010_vm0, %v3009_v1 }
  0x3b   : > { %2734 = vmatmul.mubr.msk.bf16.gmra.mrb[20].mxu1 %vm468_vm1, %v2966_v31  ;;  %v431_v31 = vshll.u32 %v2976_v28, 16 }
  0x3c   : > { %2737 = vmatprep.mubr.msk.bf16.mxu1 %vm3010_vm0, %v3009_v1 }
  0x3d   : > { %v433_v33 = vrot.slane %v431_v31, 1 }
  0x3f   : > { %v434_v35 = vsel %vm310_vm2, %v429_v32, %v433_v33  ;;  %v437_v38 = vor.u32 %v435_v36, %v433_v33  ;;  %v2987_v32 = vld [vmem:[%s3059_s21 + $0x30] sm:$0xff]  }
  0x41   : > { %2656 = vmatmul.mubr.msk.bf16.gmra.mrb[20].mxu0 %vm468_vm1, %v362_v44  ;;  %v208_v44 = vld [vmem:[%s3059_s21 + $0x90] sm:$0xf] }
  0x42   : > { %2659 = vmatprep.mubr.msk.bf16.mxu0 %vm3010_vm0, %v3009_v1  ;;  %v2263_v48 = vcombine.low %v208_v44, %v211_v45  ;;  %v2284_v59 = vcombine.low %v208_v44, %v208_v44  ;;  %v1120_v45 = vshrl.u32 %v2987_v32, 16 }
  0x43   : > { %2738 = vmatmul.mubr.msk.bf16.gmra.mrb[24].mxu1 %vm468_vm1, %v2967_v37  ;;  %v439_v37 = vshll.u32 %v2977_v34, 16 }
  0x44   : > { %2741 = vmatprep.mubr.msk.bf16.mxu1 %vm3010_vm0, %v3009_v1  ;;  %v455_v51 = vshll.u32 %v2263_v48, 16 }
  0x45   : > { %v441_v39 = vrot.slane %v439_v37, 1  ;;  %v1112_v37 = vshrl.u32 %v2986_v24, 16 }
  0x46   : > { %v457_v53 = vrot.slane %v455_v51, 1 }
  0x47   : > { %v442_v41 = vsel %vm310_vm2, %v437_v38, %v441_v39  ;;  %v445_v46 = vor.u32 %v443_v42, %v441_v39  ;;  %v1116_v38 = vshll.u32 %v2987_v32, 16 }
  0x49   : > { %2660 = vmatmul.mubr.msk.bf16.gmra.mrb[24].mxu0 %vm468_vm1, %v370_v50  ;;  %v451_v50 = vshrl.u32 %v2978_v40, 16  ;;  %v1118_v42 = vrot.slane %v1116_v38, 1 }
  0x4a   : > { %2663 = vmatprep.mubr.msk.bf16.mxu0 %vm3010_vm0, %v3009_v1 }
  0x4b   : > { %2742 = vmatmul.mubr.msk.bf16.gmra.mrb[28].mxu1 %vm468_vm1, %v2968_v43  ;;  %v447_v43 = vshll.u32 %v2978_v40, 16 }
  0x4c   : > { %2745 = vmatprep.mubr.msk.bf16.mxu1 %vm3010_vm0, %v3009_v1 }
  0x4d   : > { %v449_v47 = vrot.slane %v447_v43, 1 }
  0x4f   : > { %v453_v52 = vor.u32 %v451_v50, %v449_v47 }
  0x51   : > { %2664 = vmatmul.mubr.msk.bf16.gmra.mrb[28].mxu0 %vm468_vm1, %v378_v56  ;;  %v1511_v56 = vld [vmem:[%s3059_s21 + $0x8] sm:$0xe]  ;;  %v458_v57 = vsel %vm310_vm2, %v453_v52, %v457_v53 }
  0x52   : > { %2667 = vmatprep.mubr.msk.bf16.mxu0 %vm3010_vm0, %v3009_v1 }
  0x53   : > { %2746 = vmatmul.mubr.msk.bf16.gmra.mrb[32].mxu1 %vm468_vm1, %v2969_v49  ;;  %v450_v49 = vsel %vm310_vm2, %v445_v46, %v449_v47 }
  0x54   : > { %2749 = vmatprep.mubr.msk.bf16.mxu1 %vm3010_vm0, %v3009_v1 }
  0x59   : > { %2668 = vmatmul.mubr.msk.bf16.gmra.mrb[32].mxu0 %vm468_vm1, %v386_v62  ;;  %v459_v62 = vshrl.u32 %v2263_v48, 16  ;;  %v2989_v48 = vld [vmem:[%s3059_s21 + $0x40] sm:$0xff]  }
  0x5a   : > { %2671 = vmatprep.mubr.msk.bf16.mxu0 %vm3010_vm0, %v3009_v1  ;;  %v1532_v51 = vrot.slane %v2989_v48, 1 }
  0x5b   : > { %2750 = vmatmul.mubr.msk.bf16.gmra.mrb[36].mxu1 %vm468_vm1, %v2970_v55  ;;  %v941_v55 = vld [vmem:[%s3059_s21 + $0xc] sm:$0xf]  ;;  %v461_v3 = vor.u32 %v459_v62, %v457_v53 }
  0x5c   : > { %2753 = vmatprep.mubr.msk.bf16.mxu1 %vm3010_vm0, %v3009_v1  ;;  %v2307_v58 = vcombine.low %v940_v54, %v941_v55  ;;  %v1132_v54 = vshll.u32 %v2989_v48, 16 }
  0x5e   : > { %v1079_v63 = vshll.u32 %v2307_v58, 16 }
  0x61   : > { %2672 = vmatmul.mubr.msk.bf16.gmra.mrb[36].mxu0 %vm468_vm1, %v394_v5  ;;  %v1081_v5 = vrot.slane %v1079_v63, 1 }
  0x62   : > { %2675 = vmatprep.mubr.msk.bf16.mxu0 %vm3010_vm0, %v3009_v1 }
  0x63   : > { %2754 = vmatmul.mubr.msk.bf16.gmra.mrb[40].mxu1 %vm468_vm1, %v2971_v61  ;;  %v2348_v61 = vcombine.low %v1511_v56, %v941_v55  ;;  %v2990_v56 = vld [vmem:[%s3059_s21 + $0x48] sm:$0xff]  }
  0x64   : > { %2757 = vmatprep.mubr.msk.bf16.mxu1 %vm3010_vm0, %v3009_v1  ;;  %v1140_v62 = vshll.u32 %v2990_v56, 16 }
  0x65   : > { %v1519_v0 = vrot.slane %v2348_v61, 1  ;;  %v1136_v61 = vshrl.u32 %v2989_v48, 16  ;;  %v2994_v48 = vld [vmem:[%s3059_s21 + $0x68] sm:$0xff]  }
  0x67   : > { %v1521_v7 = vsel %vm1518_vm3, %v1519_v0, %v1520_v2  ;;  %v2991_v0 = vld [vmem:[%s3059_s21 + $0x50] sm:$0xff]  }
  0x69   : > { %2676 = vmatmul.mubr.msk.bf16.gmra.mrb[40].mxu0 %vm468_vm1, %v402_v11  ;;  %v1522_v11 = vrot.slane %v2984_v8, 1  ;;  %v1144_v8 = vshrl.u32 %v2990_v56, 16 }
  0x6a   : > { %2679 = vmatprep.mubr.msk.bf16.mxu0 %vm3010_vm0, %v3009_v1 }
  0x6b   : > { %2758 = vmatmul.mubr.msk.bf16.gmra.mrb[44].mxu1 %vm468_vm1, %v2972_v4  ;;  %v1077_v4 = vshrl.u32 %v2307_v58, 16  ;;  %v1523_v15 = vsel %vm1518_vm3, %v1520_v2, %v1522_v11  ;;  %v1134_v58 = vrot.slane %v1132_v54, 1 }
  0x6c   : > { %2761 = vmatprep.mubr.msk.bf16.mxu1 %vm3010_vm0, %v3009_v1 }
  0x6d   : > { %v1082_v9 = vor.u32 %v1081_v5, %v1077_v4  ;;  %v1138_v2 = vor.u32 %v1136_v61, %v1134_v58  ;;  %v1536_v4 = vrot.slane %v2991_v0, 1 }
  0x71   : > { %2680 = vmatmul.mubr.msk.bf16.gmra.mrb[44].mxu0 %vm468_vm1, %v410_v17 }
  0x72   : > { %2683 = vmatprep.mubr.msk.bf16.mxu0 %vm3010_vm0, %v3009_v1 }
  0x73   : > { %2762 = vmatmul.mubr.msk.bf16.gmra.mrb[48].mxu1 %vm468_vm1, %v2973_v10  ;;  %v1086_v10 = vrot.slane %v1084_v6, 1 }
  0x74   : > { %2765 = vmatprep.mubr.msk.bf16.mxu1 %vm3010_vm0, %v3009_v1 }
  0x75   : > { %v1087_v12 = vsel %vm310_vm2, %v1082_v9, %v1086_v10  ;;  %v1090_v17 = vor.u32 %v1088_v13, %v1086_v10  ;;  %v1148_v9 = vshll.u32 %v2991_v0, 16  ;;  %v2992_v13 = vld [vmem:[%s3059_s21 + $0x58] sm:$0xff]  }
  0x76   : > { %v1156_v24 = vshll.u32 %v2992_v13, 16 }
  0x77   : > { %v1095_v20 = vsel %vm310_vm2, %v1090_v17, %v1094_v18  ;;  %v1538_v17 = vrot.slane %v2992_v13, 1 }
  0x79   : > { %2684 = vmatmul.mubr.msk.bf16.gmra.mrb[48].mxu0 %vm468_vm1, %v418_v23 }
  0x7a   : > { %2687 = vmatprep.mubr.msk.bf16.mxu0 %vm3010_vm0, %v3009_v1 }
  0x7b   : > { %2766 = vmatmul.mubr.msk.bf16.gmra.mrb[52].mxu1 %vm468_vm1, %v2974_v16  ;;  %v2985_v16 = vld [vmem:[%s3059_s21 + $0x20] sm:$0xff]  }
  0x7c   : > { %2769 = vmatprep.mubr.msk.bf16.mxu1 %vm3010_vm0, %v3009_v1  ;;  %v1524_v19 = vrot.slane %v2985_v16, 1 }
  0x7e   : > { %v1525_v23 = vsel %vm1518_vm3, %v1522_v11, %v1524_v19  ;;  %v1527_v31 = vsel %vm1518_vm3, %v1524_v19, %v1526_v27 }
  0x81   : > { %2688 = vmatmul.mubr.msk.bf16.gmra.mrb[52].mxu0 %vm468_vm1, %v426_v29  ;;  %v1104_v29 = vshrl.u32 %v2985_v16, 16 }
  0x82   : > { %2691 = vmatprep.mubr.msk.bf16.mxu0 %vm3010_vm0, %v3009_v1 }
  0x83   : > { %2770 = vmatmul.mubr.msk.bf16.gmra.mrb[56].mxu1 %vm468_vm1, %v2975_v22  ;;  %v1100_v22 = vshll.u32 %v2985_v16, 16 }
  0x84   : > { %2773 = vmatprep.mubr.msk.bf16.mxu1 %vm3010_vm0, %v3009_v1 }
  0x85   : > { %v1102_v26 = vrot.slane %v1100_v22, 1 }
  0x87   : > { %v1106_v33 = vor.u32 %v1104_v29, %v1102_v26  ;;  %v1539_v29 = vsel %vm1518_vm3, %v1536_v4, %v1538_v17 }
  0x89   : > { %2692 = vmatmul.mubr.msk.bf16.gmra.mrb[56].mxu0 %vm468_vm1, %v434_v35  ;;  %v1528_v35 = vrot.slane %v2987_v32, 1 }
  0x8a   : > { %2695 = vmatprep.mubr.msk.bf16.mxu0 %vm3010_vm0, %v3009_v1 }
  0x8b   : > { %2774 = vmatmul.mubr.msk.bf16.gmra.mrb[60].mxu1 %vm468_vm1, %v2976_v28  ;;  %v1103_v28 = vsel %vm310_vm2, %v1098_v25, %v1102_v26  ;;  %v1529_v39 = vsel %vm1518_vm3, %v1526_v27, %v1528_v35 }
  0x8c   : > { %2777 = vmatprep.mubr.msk.bf16.mxu1 %vm3010_vm0, %v3009_v1 }
  0x91   : > { %2696 = vmatmul.mubr.msk.bf16.gmra.mrb[60].mxu0 %vm468_vm1, %v442_v41 }
  0x92   : > { %2699 = vmatprep.mubr.msk.bf16.mxu0 %vm3010_vm0, %v3009_v1 }
  0x93   : > { %2778 = vmatmul.mubr.msk.bf16.gmra.mrb[64].mxu1 %vm468_vm1, %v2977_v34  ;;  %v1110_v34 = vrot.slane %v1108_v30, 1  ;;  %v2993_v30 = vld [vmem:[%s3059_s21 + $0x60] sm:$0xff]  }
  0x94   : > { %2781 = vmatprep.mubr.msk.bf16.mxu1 %vm3010_vm0, %v3009_v1 }
  0x95   : > { %v1111_v36 = vsel %vm310_vm2, %v1106_v33, %v1110_v34  ;;  %v1114_v41 = vor.u32 %v1112_v37, %v1110_v34  ;;  %v1158_v33 = vrot.slane %v1156_v24, 1 }
  0x97   : > { %v1119_v44 = vsel %vm310_vm2, %v1114_v41, %v1118_v42  ;;  %v1160_v41 = vshrl.u32 %v2992_v13, 16 }
  0x99   : > { %2700 = vmatmul.mubr.msk.bf16.gmra.mrb[64].mxu0 %vm468_vm1, %v450_v49  ;;  %v1122_v49 = vor.u32 %v1120_v45, %v1118_v42  ;;  %v1164_v42 = vshll.u32 %v2993_v30, 16 }
  0x9a   : > { %2703 = vmatprep.mubr.msk.bf16.mxu0 %vm3010_vm0, %v3009_v1 }
  0x9b   : > { %2782 = vmatmul.mubr.msk.bf16.gmra.mrb[68].mxu1 %vm468_vm1, %v2978_v40  ;;  %v2988_v40 = vld [vmem:[%s3059_s21 + $0x38] sm:$0xff]  }
  0x9c   : > { %2785 = vmatprep.mubr.msk.bf16.mxu1 %vm3010_vm0, %v3009_v1  ;;  %v1530_v43 = vrot.slane %v2988_v40, 1  ;;  %v1124_v46 = vshll.u32 %v2988_v40, 16  ;;  %v1128_v53 = vshrl.u32 %v2988_v40, 16 }
  0x9e   : > { %v1531_v47 = vsel %vm1518_vm3, %v1528_v35, %v1530_v43  ;;  %v1126_v50 = vrot.slane %v1124_v46, 1  ;;  %v1533_v55 = vsel %vm1518_vm3, %v1530_v43, %v1532_v51  ;;  %v1540_v35 = vrot.slane %v2993_v30, 1 }
  0xa0   : > { %v1127_v52 = vsel %vm310_vm2, %v1122_v49, %v1126_v50 }
  0xa1   : > { %2704 = vmatmul.mubr.msk.bf16.gmra.mrb[68].mxu0 %vm468_vm1, %v458_v57  ;;  %v1130_v57 = vor.u32 %v1128_v53, %v1126_v50  ;;  %v1162_v50 = vor.u32 %v1160_v41, %v1158_v33  ;;  %v1542_v53 = vrot.slane %v2994_v48, 1 }
  0xa2   : > { %2707 = vmatprep.mubr.msk.bf16.mxu0 %vm3010_vm0, %v3009_v1 }
  0xa3   : > { %2786 = vmatmul.mubr.msk.bf16.gmra.mrb[72].mxu1 %vm468_vm1, %v2284_v59  ;;  %v1534_v59 = vrot.slane %v2990_v56, 1  ;;  %v1135_v60 = vsel %vm310_vm2, %v1130_v57, %v1134_v58 }
  0xa4   : > { %2869 = vmatprep.mubr.msk.bf16.mxu1 %vm3010_vm0, %v3009_v1 }
  0xa5   : > { %v1535_v63 = vsel %vm1518_vm3, %v1532_v51, %v1534_v59  ;;  %v1166_v51 = vrot.slane %v1164_v42, 1  ;;  %v2997_v42 = vld [vmem:[%s3059_s21 + $0x80] sm:$0xff]  }
  0xa7   : > { %v1167_v57 = vsel %vm310_vm2, %v1162_v50, %v1166_v51 }
  0xa9   : > { %2708 = vmatmul.mubr.msk.bf16.gmra.mrb[72].mxu0 %vm468_vm1, %v461_v3  ;;  %v1142_v3 = vrot.slane %v1140_v62, 1 }
  0xaa   : > { %2791 = vmatprep.mubr.msk.bf16.mxu0 %vm3010_vm0, %v3009_v1 }
  0xab   : > { %2870 = vmatmul.mubr.msk.bf16.vlgmr.msra.gmra.mrb[76].mxu1 %vm468_vm1, %v1521_v7  ;;  %v1143_v6 = vsel %vm310_vm2, %v1138_v2, %v1142_v3  ;;  %v1146_v14 = vor.u32 %v1144_v8, %v1142_v3  ;;  %v1543_v2 = vsel %vm1518_vm3, %v1540_v35, %v1542_v53  ;;  %v2995_v3 = vld [vmem:[%s3059_s21 + $0x70] sm:$0xff]  }
  0xac   : > { %2873 = vmatprep.mubr.msk.bf16.mxu1 %vm3010_vm0, %v3009_v1  ;;  %v1544_v8 = vrot.slane %v2995_v3, 1 }
  0xb1   : > { %2792 = vmatmul.mubr.msk.bf16.vlgmr.msra.gmra.mrb[76].mxu0 %vm468_vm1, %v1087_v12  ;;  %v1537_v12 = vsel %vm1518_vm3, %v1534_v59, %v1536_v4  ;;  %v1168_v59 = vshrl.u32 %v2993_v30, 16 }
  0xb2   : > { %2795 = vmatprep.mubr.msk.bf16.mxu0 %vm3010_vm0, %v3009_v1 }
  0xb3   : > { %2874 = vmatmul.mubr.msk.bf16.gmra.mrb[80].mxu1 %vm468_vm1, %v1523_v15  ;;  %v1150_v15 = vrot.slane %v1148_v9, 1 }
  0xb4   : > { %2877 = vmatprep.mubr.msk.bf16.mxu1 %vm3010_vm0, %v3009_v1 }
  0xb5   : > { %v1151_v21 = vsel %vm310_vm2, %v1146_v14, %v1150_v15  ;;  %v1176_v14 = vshrl.u32 %v2994_v48, 16 }
  0xb9   : > { %2796 = vmatmul.mubr.msk.bf16.gmra.mrb[80].mxu0 %vm468_vm1, %v1095_v20 }
  0xba   : > { %2799 = vmatprep.mubr.msk.bf16.mxu0 %vm3010_vm0, %v3009_v1 }
  0xbb   : > { %2878 = vmatmul.mubr.msk.bf16.gmra.mrb[84].mxu1 %vm468_vm1, %v1525_v23  ;;  %v1152_v23 = vshrl.u32 %v2991_v0, 16 }
  0xbc   : > { %2881 = vmatprep.mubr.msk.bf16.mxu1 %vm3010_vm0, %v3009_v1 }
  0xbd   : > { %v1154_v32 = vor.u32 %v1152_v23, %v1150_v15  ;;  %v1180_v15 = vshll.u32 %v2995_v3, 16 }
  0xc1   : > { %2800 = vmatmul.mubr.msk.bf16.gmra.mrb[84].mxu0 %vm468_vm1, %v1103_v28 }
  0xc2   : > { %2803 = vmatprep.mubr.msk.bf16.mxu0 %vm3010_vm0, %v3009_v1 }
  0xc3   : > { %2882 = vmatmul.mubr.msk.bf16.gmra.mrb[88].mxu1 %vm468_vm1, %v1527_v31 }
  0xc4   : > { %2885 = vmatprep.mubr.msk.bf16.mxu1 %vm3010_vm0, %v3009_v1 }
  0xc9   : > { %2804 = vmatmul.mubr.msk.bf16.gmra.mrb[88].mxu0 %vm468_vm1, %v1111_v36 }
  0xca   : > { %2807 = vmatprep.mubr.msk.bf16.mxu0 %vm3010_vm0, %v3009_v1 }
  0xcb   : > { %2886 = vmatmul.mubr.msk.bf16.gmra.mrb[92].mxu1 %vm468_vm1, %v1529_v39  ;;  %v1159_v39 = vsel %vm310_vm2, %v1154_v32, %v1158_v33 }
  0xcc   : > { %2889 = vmatprep.mubr.msk.bf16.mxu1 %vm3010_vm0, %v3009_v1 }
  0xd1   : > { %2808 = vmatmul.mubr.msk.bf16.gmra.mrb[92].mxu0 %vm468_vm1, %v1119_v44 }
  0xd2   : > { %2811 = vmatprep.mubr.msk.bf16.mxu0 %vm3010_vm0, %v3009_v1 }
  0xd3   : > { %2890 = vmatmul.mubr.msk.bf16.gmra.mrb[96].mxu1 %vm468_vm1, %v1531_v47  ;;  %v1541_v47 = vsel %vm1518_vm3, %v1538_v17, %v1540_v35 }
  0xd4   : > { %2893 = vmatprep.mubr.msk.bf16.mxu1 %vm3010_vm0, %v3009_v1 }
  0xd9   : > { %2812 = vmatmul.mubr.msk.bf16.gmra.mrb[96].mxu0 %vm468_vm1, %v1127_v52 }
  0xda   : > { %2815 = vmatprep.mubr.msk.bf16.mxu0 %vm3010_vm0, %v3009_v1 }
  0xdb   : > { %2894 = vmatmul.mubr.msk.bf16.gmra.mrb[100].mxu1 %vm468_vm1, %v1533_v55 }
  0xdc   : > { %2897 = vmatprep.mubr.msk.bf16.mxu1 %vm3010_vm0, %v3009_v1 }
  0xe1   : > { %2816 = vmatmul.mubr.msk.bf16.gmra.mrb[100].mxu0 %vm468_vm1, %v1135_v60  ;;  %v1172_v60 = vshll.u32 %v2994_v48, 16  ;;  %v1548_v48 = vrot.slane %v2997_v42, 1 }
  0xe2   : > { %2819 = vmatprep.mubr.msk.bf16.mxu0 %vm3010_vm0, %v3009_v1 }
  0xe3   : > { %2898 = vmatmul.mubr.msk.bf16.gmra.mrb[104].mxu1 %vm468_vm1, %v1535_v63 }
  0xe4   : > { %2901 = vmatprep.mubr.msk.bf16.mxu1 %vm3010_vm0, %v3009_v1 }
  0xe5   : > { %v790_v5 = vpop.f32.mrb[0].mxu1 }
  0xe6   : > { %v2715_v7 = vpop.f32.mrb[1].mxu1 }
  0xe7   : > { %v793_v10 = vpop.f32.mrb[2].mxu1 }
  0xe8   : > { %v2716_v11 = vpop.f32.mrb[3].mxu1 }
  0xe9   : > { %2820 = vmatmul.mubr.msk.bf16.gmra.mrb[104].mxu0 %vm468_vm1, %v1143_v6  ;;  %v1174_v6 = vrot.slane %v1172_v60, 1 }
  0xea   : > { %2823 = vmatprep.mubr.msk.bf16.mxu0 %vm3010_vm0, %v3009_v1 }
  0xeb   : > { %2902 = vmatmul.mubr.msk.bf16.gmra.mrb[108].mxu1 %vm468_vm1, %v1537_v12  ;;  %v1178_v24 = vor.u32 %v1176_v14, %v1174_v6 }
  0xec   : > { %v560_v16 = vpop.f32.mrb[0].mxu0  ;;  %2905 = vmatprep.mubr.msk.bf16.mxu1 %vm3010_vm0, %v3009_v1 }
  0xed   : > { %v3300_v18 = vadd.f32 %v790_v5, %v560_v16  ;;  %v2637_v19 = vpop.f32.mrb[1].mxu0  ;;  %v1170_v5 = vor.u32 %v1168_v59, %v1166_v51 }
  0xee   : > { %v563_v20 = vpop.f32.mrb[2].mxu0  ;;  %v798_v22 = vpop.f32.mrb[4].mxu1 }
  0xef   : > { %v3303_v25 = vadd.f32 %v793_v10, %v563_v20  ;;  %v2638_v26 = vpop.f32.mrb[3].mxu0  ;;  %v2719_v27 = vpop.f32.mrb[5].mxu1  ;;  %v1175_v12 = vsel %vm310_vm2, %v1170_v5, %v1174_v6 }
  0xf0   : > { %v801_v28 = vpop.f32.mrb[6].mxu1  ;;  %v1182_v26 = vrot.slane %v1180_v15, 1 }
  0xf1   : > { %2824 = vmatmul.mubr.msk.bf16.gmra.mrb[108].mxu0 %vm468_vm1, %v1151_v21  ;;  %v2720_v31 = vpop.f32.mrb[7].mxu1  ;;  %v1545_v21 = vsel %vm1518_vm3, %v1542_v53, %v1544_v8 }
  0xf2   : > { %2827 = vmatprep.mubr.msk.bf16.mxu0 %vm3010_vm0, %v3009_v1  ;;  %v1183_v32 = vsel %vm310_vm2, %v1178_v24, %v1182_v26 }
  0xf3   : > { %2906 = vmatmul.mubr.msk.bf16.gmra.mrb[112].mxu1 %vm468_vm1, %v1539_v29 }
  0xf4   : > { %v568_v34 = vpop.f32.mrb[4].mxu0  ;;  %2909 = vmatprep.mubr.msk.bf16.mxu1 %vm3010_vm0, %v3009_v1 }
  0xf5   : > { %v3313_v36 = vadd.f32 %v798_v22, %v568_v34  ;;  %v2641_v37 = vpop.f32.mrb[5].mxu0  ;;  %v2996_v22 = vld [vmem:[%s3059_s21 + $0x78] sm:$0xff]   ;;  %v1184_v34 = vshrl.u32 %v2995_v3, 16 }
  0xf6   : > { %v571_v38 = vpop.f32.mrb[6].mxu0  ;;  %v806_v40 = vpop.f32.mrb[8].mxu1  ;;  %v1188_v35 = vshll.u32 %v2996_v22, 16 }
  0xf7   : > { %v3316_v43 = vadd.f32 %v801_v28, %v571_v38  ;;  %v2642_v44 = vpop.f32.mrb[7].mxu0  ;;  %v2723_v45 = vpop.f32.mrb[9].mxu1  ;;  %v1546_v28 = vrot.slane %v2996_v22, 1 }
  0xf8   : > { %v809_v46 = vpop.f32.mrb[10].mxu1  ;;  %v1186_v45 = vor.u32 %v1184_v34, %v1182_v26 }
  0xf9   : > { %2828 = vmatmul.mubr.msk.bf16.gmra.mrb[112].mxu0 %vm468_vm1, %v1159_v39  ;;  %v2724_v49 = vpop.f32.mrb[11].mxu1  ;;  %v1547_v41 = vsel %vm1518_vm3, %v1544_v8, %v1546_v28 }
  0xfa   : > { %2831 = vmatprep.mubr.msk.bf16.mxu0 %vm3010_vm0, %v3009_v1 }
  0xfb   : > { %2910 = vmatmul.mubr.msk.bf16.gmra.mrb[116].mxu1 %vm468_vm1, %v1541_v47 }
  0xfc   : > { %v576_v52 = vpop.f32.mrb[8].mxu0  ;;  %2913 = vmatprep.mubr.msk.bf16.mxu1 %vm3010_vm0, %v3009_v1 }
  0xfd   : > { %v3326_v54 = vadd.f32 %v806_v40, %v576_v52  ;;  %v2645_v55 = vpop.f32.mrb[9].mxu0 }
  0xfe   : > { %v579_v56 = vpop.f32.mrb[10].mxu0  ;;  %v814_v58 = vpop.f32.mrb[12].mxu1  ;;  %v1192_v55 = vshrl.u32 %v2996_v22, 16 }
  0xff   : > { %v3329_v61 = vadd.f32 %v809_v46, %v579_v56  ;;  %v2646_v62 = vpop.f32.mrb[11].mxu0  ;;  %v2727_v63 = vpop.f32.mrb[13].mxu1  ;;  %v1190_v46 = vrot.slane %v1188_v35, 1  ;;  %v1196_v56 = vshll.u32 %v2997_v42, 16 }
 0x100   : > { %v817_v0 = vpop.f32.mrb[14].mxu1  ;;  %v1549_v62 = vsel %vm1518_vm3, %v1546_v28, %v1548_v48  ;;  %v2998_v63 = vld [vmem:[%s3059_s21 + $0x88] sm:$0xff]  }
 0x101   : > { %2832 = vmatmul.mubr.msk.bf16.gmra.mrb[116].mxu0 %vm468_vm1, %v1167_v57  ;;  %v2728_v4 = vpop.f32.mrb[15].mxu1  ;;  %v1191_v52 = vsel %vm310_vm2, %v1186_v45, %v1190_v46  ;;  %v1198_v3 = vrot.slane %v1196_v56, 1  ;;  %v1550_v5 = vrot.slane %v2998_v63, 1  ;;  %v1208_v34 = vshrl.u32 %v2998_v63, 16 }
 0x102   : > { %2835 = vmatprep.mubr.msk.bf16.mxu0 %vm3010_vm0, %v3009_v1 }
 0x103   : > { %2914 = vmatmul.mubr.msk.bf16.gmra.mrb[120].mxu1 %vm468_vm1, %v1543_v2  ;;  %v1194_v2 = vor.u32 %v1192_v55, %v1190_v46 }
 0x104   : > { %v584_v7 = vpop.f32.mrb[12].mxu0  ;;  %2917 = vmatprep.mubr.msk.bf16.mxu1 %vm3010_vm0, %v3009_v1 }
 0x105   : > { %v3339_v9 = vadd.f32 %v814_v58, %v584_v7  ;;  %v2649_v10 = vpop.f32.mrb[13].mxu0 }
 0x106   : > { %v587_v11 = vpop.f32.mrb[14].mxu0  ;;  %v822_v13 = vpop.f32.mrb[16].mxu1  ;;  %v1199_v10 = vsel %vm310_vm2, %v1194_v2, %v1198_v3 }
 0x107   : > { %v3342_v16 = vadd.f32 %v817_v0, %v587_v11  ;;  %v2650_v17 = vpop.f32.mrb[15].mxu0  ;;  %v2731_v19 = vpop.f32.mrb[17].mxu1 }
 0x108   : > { %v825_v20 = vpop.f32.mrb[18].mxu1 }
 0x109   : > { %2836 = vmatmul.mubr.msk.bf16.gmra.mrb[120].mxu0 %vm468_vm1, %v1175_v12  ;;  %v2732_v23 = vpop.f32.mrb[19].mxu1  ;;  %v1200_v12 = vshrl.u32 %v2997_v42, 16 }
 0x10a   : > { %2839 = vmatprep.mubr.msk.bf16.mxu0 %vm3010_vm0, %v3009_v1 }
 0x10b   : > { %2918 = vmatmul.mubr.msk.bf16.gmra.mrb[124].mxu1 %vm468_vm1, %v1545_v21  ;;  %v2999_v21 = vld [vmem:[%s3059_s21 + $0x90] sm:$0xff]   ;;  %v1202_v23 = vor.u32 %v1200_v12, %v1198_v3 }
 0x10c   : > { %v592_v27 = vpop.f32.mrb[16].mxu0  ;;  %2921 = vmatprep.mubr.msk.bf16.mxu1 %vm3010_vm0, %v3009_v1  ;;  %v1212_v35 = vshll.u32 %v2999_v21, 16 }
 0x10d   : > { %v3352_v29 = vadd.f32 %v822_v13, %v592_v27  ;;  %v2653_v30 = vpop.f32.mrb[17].mxu0  ;;  %v1204_v13 = vshll.u32 %v2998_v63, 16  ;;  %v1552_v27 = vrot.slane %v2999_v21, 1 }
 0x10e   : > { %v595_v31 = vpop.f32.mrb[18].mxu0  ;;  %v830_v33 = vpop.f32.mrb[20].mxu1 }
 0x10f   : > { %v3355_v37 = vadd.f32 %v825_v20, %v595_v31  ;;  %v2654_v38 = vpop.f32.mrb[19].mxu0  ;;  %v2735_v39 = vpop.f32.mrb[21].mxu1  ;;  %v1551_v20 = vsel %vm1518_vm3, %v1548_v48, %v1550_v5  ;;  %v1206_v24 = vrot.slane %v1204_v13, 1  ;;  %v1553_v42 = vsel %vm1518_vm3, %v1550_v5, %v1552_v27 }
 0x110   : > { %v833_v40 = vpop.f32.mrb[22].mxu1 }
 0x111   : > { %2840 = vmatmul.mubr.msk.bf16.gmra.mrb[124].mxu0 %vm468_vm1, %v1183_v32  ;;  %v2736_v44 = vpop.f32.mrb[23].mxu1  ;;  %v1207_v32 = vsel %vm310_vm2, %v1202_v23, %v1206_v24  ;;  %v1210_v46 = vor.u32 %v1208_v34, %v1206_v24 }
 0x112   : > { %2843 = vmatprep.mubr.msk.bf16.mxu0 %vm3010_vm0, %v3009_v1  ;;  %v3000_v44 = vld [vmem:[%s3059_s21 + $0x98] sm:$0x1f]  }
 0x113   : > { %2922 = vmatmul.mubr.msk.bf16.gmra.mrb[128].mxu1 %vm468_vm1, %v1547_v41 }
 0x114   : > { %v600_v47 = vpop.f32.mrb[20].mxu0  ;;  %2925 = vmatprep.mubr.msk.bf16.mxu1 %vm3010_vm0, %v3009_v1 }
 0x115   : > { %v3365_v49 = vadd.f32 %v830_v33, %v600_v47  ;;  %v2657_v50 = vpop.f32.mrb[21].mxu0  ;;  %v1214_v47 = vrot.slane %v1212_v35, 1 }
 0x116   : > { %v603_v51 = vpop.f32.mrb[22].mxu0  ;;  %v838_v53 = vpop.f32.mrb[24].mxu1  ;;  %v1554_v50 = vrot.slane %v3000_v44, 1 }
 0x117   : > { %v3368_v57 = vadd.f32 %v833_v40, %v603_v51  ;;  %v2658_v58 = vpop.f32.mrb[23].mxu0  ;;  %v2739_v59 = vpop.f32.mrb[25].mxu1  ;;  %v1215_v55 = vsel %vm310_vm2, %v1210_v46, %v1214_v47 }
 0x118   : > { %v841_v60 = vpop.f32.mrb[26].mxu1  ;;  %v1216_v58 = vshrl.u32 %v2999_v21, 16  ;;  %v1220_v59 = vshll.u32 %v3000_v44, 16  ;;  %v1555_v2 = vsel %vm1518_vm3, %v1552_v27, %v1554_v50 }
 0x119   : > { %2844 = vmatmul.mubr.msk.bf16.gmra.mrb[128].mxu0 %vm468_vm1, %v1191_v52  ;;  %v2740_v0 = vpop.f32.mrb[27].mxu1 }
 0x11a   : > { %2847 = vmatprep.mubr.msk.bf16.mxu0 %vm3010_vm0, %v3009_v1  ;;  %v1222_v5 = vrot.slane %v1220_v59, 1 }
 0x11b   : > { %2926 = vmatmul.mubr.msk.bf16.gmra.mrb[132].mxu1 %vm468_vm1, %v1549_v62 }
 0x11c   : > { %v608_v4 = vpop.f32.mrb[24].mxu0  ;;  %2929 = vmatprep.mubr.msk.bf16.mxu1 %vm3010_vm0, %v3009_v1 }
 0x11d   : > { %v3378_v6 = vadd.f32 %v838_v53, %v608_v4  ;;  %v2661_v7 = vpop.f32.mrb[25].mxu0  ;;  %v1218_v4 = vor.u32 %v1216_v58, %v1214_v47 }
 0x11e   : > { %v611_v8 = vpop.f32.mrb[26].mxu0  ;;  %v846_v11 = vpop.f32.mrb[28].mxu1 }
 0x11f   : > { %v3381_v14 = vadd.f32 %v841_v60, %v611_v8  ;;  %v2662_v15 = vpop.f32.mrb[27].mxu0  ;;  %v2743_v17 = vpop.f32.mrb[29].mxu1  ;;  %v1223_v12 = vsel %vm310_vm2, %v1218_v4, %v1222_v5 }
 0x120   : > { %v849_v19 = vpop.f32.mrb[30].mxu1 }
 0x121   : > { %2848 = vmatmul.mubr.msk.bf16.gmra.mrb[132].mxu0 %vm468_vm1, %v1199_v10  ;;  %v2744_v22 = vpop.f32.mrb[31].mxu1 }
 0x122   : > { %2851 = vmatprep.mubr.msk.bf16.mxu0 %vm3010_vm0, %v3009_v1  ;;  %v1224_v22 = vshrl.u32 %v3000_v44, 16 }
 0x123   : > { %2930 = vmatmul.mubr.msk.bf16.gmra.mrb[136].mxu1 %vm468_vm1, %v1551_v20 }
 0x124   : > { %v616_v26 = vpop.f32.mrb[28].mxu0  ;;  %2933 = vmatprep.mubr.msk.bf16.mxu1 %vm3010_vm0, %v3009_v1  ;;  %v1226_v27 = vor.u32 %v1224_v22, %v1222_v5 }
 0x125   : > { %v3391_v28 = vadd.f32 %v846_v11, %v616_v26  ;;  %v2665_v30 = vpop.f32.mrb[29].mxu0 }
 0x126   : > { %v619_v31 = vpop.f32.mrb[30].mxu0  ;;  %v854_v33 = vpop.f32.mrb[32].mxu1 }
 0x127   : > { %v3394_v38 = vadd.f32 %v849_v19, %v619_v31  ;;  %v2666_v39 = vpop.f32.mrb[31].mxu0  ;;  %v2747_v40 = vpop.f32.mrb[33].mxu1 }
 0x128   : > { %v857_v41 = vpop.f32.mrb[34].mxu1 }
 0x129   : > { %2852 = vmatmul.mubr.msk.bf16.gmra.mrb[136].mxu0 %vm468_vm1, %v1207_v32  ;;  %v2748_v45 = vpop.f32.mrb[35].mxu1 }
 0x12a   : > { %2855 = vmatprep.mubr.msk.bf16.mxu0 %vm3010_vm0, %v3009_v1 }
 0x12b   : > { %2934 = vmatmul.mubr.msk.bf16.gmra.mrb[140].mxu1 %vm468_vm1, %v1553_v42 }
 0x12c   : > { %v624_v48 = vpop.f32.mrb[32].mxu0  ;;  %2937 = vmatprep.mubr.msk.bf16.mxu1 %vm3010_vm0, %v3009_v1 }
 0x12d   : > { %v3404_v51 = vadd.f32 %v854_v33, %v624_v48  ;;  %v2669_v52 = vpop.f32.mrb[33].mxu0 }
 0x12e   : > { %v627_v53 = vpop.f32.mrb[34].mxu0  ;;  %v862_v56 = vpop.f32.mrb[36].mxu1 }
 0x12f   : > { %v3407_v60 = vadd.f32 %v857_v41, %v627_v53  ;;  %v2670_v62 = vpop.f32.mrb[35].mxu0  ;;  %v2751_v63 = vpop.f32.mrb[37].mxu1 }
 0x130   : > { %v865_v0 = vpop.f32.mrb[38].mxu1 }
 0x131   : > { %2856 = vmatmul.mubr.msk.bf16.gmra.mrb[140].mxu0 %vm468_vm1, %v1215_v55  ;;  %v2752_v3 = vpop.f32.mrb[39].mxu1 }
 0x132   : > { %2859 = vmatprep.mubr.msk.bf16.mxu0 %vm3010_vm0, %v3009_v1 }
 0x133   : > { %2938 = vmatmul.mubr.msk.bf16.gmra.mrb[144].mxu1 %vm468_vm1, %v1555_v2 }
 0x134   : > { %v632_v7 = vpop.f32.mrb[36].mxu0  ;;  %2941 = vmatprep.mubr.msk.bf16.mxu1 %vm3010_vm0, %v3009_v1 }
 0x135   : > { %v3416_v8 = vadd.f32 %v862_v56, %v632_v7  ;;  %v2673_v10 = vpop.f32.mrb[37].mxu0 }
 0x136   : > { %v635_v11 = vpop.f32.mrb[38].mxu0  ;;  %v870_v13 = vpop.f32.mrb[40].mxu1 }
 0x137   : > { %v3419_v15 = vadd.f32 %v865_v0, %v635_v11  ;;  %v2674_v17 = vpop.f32.mrb[39].mxu0  ;;  %v2755_v19 = vpop.f32.mrb[41].mxu1 }
 0x138   : > { %v873_v20 = vpop.f32.mrb[42].mxu1 }
 0x139   : > { %2860 = vmatmul.mubr.msk.bf16.gmra.mrb[144].mxu0 %vm468_vm1, %v1223_v12  ;;  %v2756_v21 = vpop.f32.mrb[43].mxu1 }
 0x13a   : > { %2863 = vmatprep.mubr.msk.bf16.mxu0 %vm3010_vm0, %v3009_v1 }
 0x13b   : > { %2942 = vmatmul.mubr.msk.bf16.gmra.mrb[148].mxu1 %vm468_vm1, %v1554_v50 }
 0x13c   : > { %v640_v23 = vpop.f32.mrb[40].mxu0 }
 0x13d   : > { %v3425_v24 = vadd.f32 %v870_v13, %v640_v23  ;;  %v2677_v26 = vpop.f32.mrb[41].mxu0 }
 0x13e   : > { %v643_v30 = vpop.f32.mrb[42].mxu0  ;;  %v878_v31 = vpop.f32.mrb[44].mxu1 }
 0x13f   : > { %v3427_v32 = vadd.f32 %v873_v20, %v643_v30  ;;  %v2678_v33 = vpop.f32.mrb[43].mxu0  ;;  %v2759_v34 = vpop.f32.mrb[45].mxu1 }
 0x140   : > { %v881_v35 = vpop.f32.mrb[46].mxu1 }
 0x141   : > { %2864 = vmatmul.mubr.msk.bf16.gmra.mrb[148].mxu0 %vm468_vm1, %v1226_v27  ;;  %v2760_v39 = vpop.f32.mrb[47].mxu1 }
 0x144   : > { %v648_v40 = vpop.f32.mrb[44].mxu0 }
 0x145   : > { %v3430_v41 = vadd.f32 %v878_v31, %v648_v40  ;;  %v2681_v1 = vpop.f32.mrb[45].mxu0 }
 0x146   : > { %v651_v42 = vpop.f32.mrb[46].mxu0  ;;  %v886_v44 = vpop.f32.mrb[48].mxu1 }
 0x147   : > { %v3432_v45 = vadd.f32 %v881_v35, %v651_v42  ;;  %v2682_v46 = vpop.f32.mrb[47].mxu0  ;;  %v2763_v47 = vpop.f32.mrb[49].mxu1 }
 0x148   : > { %v889_v48 = vpop.f32.mrb[50].mxu1 }
 0x149   : > { %v2764_v50 = vpop.f32.mrb[51].mxu1 }
 0x14c   : > { %v656_v52 = vpop.f32.mrb[48].mxu0 }
 0x14d   : > { %v3434_v53 = vadd.f32 %v886_v44, %v656_v52  ;;  %v2685_v55 = vpop.f32.mrb[49].mxu0 }
 0x14e   : > { %v659_v56 = vpop.f32.mrb[50].mxu0  ;;  %v894_v58 = vpop.f32.mrb[52].mxu1 }
 0x14f   : > { %v3436_v59 = vadd.f32 %v889_v48, %v659_v56  ;;  %v2686_v62 = vpop.f32.mrb[51].mxu0  ;;  %v2767_v63 = vpop.f32.mrb[53].mxu1 }
 0x150   : > { %v897_v0 = vpop.f32.mrb[54].mxu1 }
 0x151   : > { %v2768_v2 = vpop.f32.mrb[55].mxu1 }
 0x154   : > { %v664_v3 = vpop.f32.mrb[52].mxu0 }
 0x155   : > { %v3438_v4 = vadd.f32 %v894_v58, %v664_v3  ;;  %v2689_v5 = vpop.f32.mrb[53].mxu0 }
 0x156   : > { %v667_v7 = vpop.f32.mrb[54].mxu0  ;;  %v902_v10 = vpop.f32.mrb[56].mxu1 }
 0x157   : > { %v3440_v11 = vadd.f32 %v897_v0, %v667_v7  ;;  %v2690_v12 = vpop.f32.mrb[55].mxu0  ;;  %v2771_v13 = vpop.f32.mrb[57].mxu1 }
 0x158   : > { %v905_v17 = vpop.f32.mrb[58].mxu1 }
 0x159   : > { %v2772_v19 = vpop.f32.mrb[59].mxu1 }
 0x15c   : > { %v672_v20 = vpop.f32.mrb[56].mxu0 }
 0x15d   : > { %v3442_v21 = vadd.f32 %v902_v10, %v672_v20  ;;  %v2693_v22 = vpop.f32.mrb[57].mxu0 }
 0x15e   : > { %v675_v23 = vpop.f32.mrb[58].mxu0  ;;  %v910_v26 = vpop.f32.mrb[60].mxu1 }
 0x15f   : > { %v3444_v27 = vadd.f32 %v905_v17, %v675_v23  ;;  %v2694_v30 = vpop.f32.mrb[59].mxu0  ;;  %v2775_v31 = vpop.f32.mrb[61].mxu1 }
 0x160   : > { %v913_v33 = vpop.f32.mrb[62].mxu1 }
 0x161   : > { %v2776_v34 = vpop.f32.mrb[63].mxu1 }
 0x164   : > { %v680_v35 = vpop.f32.mrb[60].mxu0 }
 0x165   : > { %v3446_v39 = vadd.f32 %v910_v26, %v680_v35  ;;  %v2697_v40 = vpop.f32.mrb[61].mxu0 }
 0x166   : > { %v683_v1 = vpop.f32.mrb[62].mxu0  ;;  %v918_v42 = vpop.f32.mrb[64].mxu1 }
 0x167   : > { %v3448_v44 = vadd.f32 %v913_v33, %v683_v1  ;;  %v2698_v46 = vpop.f32.mrb[63].mxu0  ;;  %v2779_v47 = vpop.f32.mrb[65].mxu1 }
 0x168   : > { %v921_v48 = vpop.f32.mrb[66].mxu1 }
 0x169   : > { %v2780_v50 = vpop.f32.mrb[67].mxu1 }
 0x16c   : > { %v688_v52 = vpop.f32.mrb[64].mxu0 }
 0x16d   : > { %v3450_v55 = vadd.f32 %v918_v42, %v688_v52  ;;  %v2701_v56 = vpop.f32.mrb[65].mxu0  ;;  %v3464_v52 = vld [vmem:[%s3569_s2] ss:$0 sm:$0xff] }
 0x16e   : > { %v691_v58 = vpop.f32.mrb[66].mxu0  ;;  %v926_v62 = vpop.f32.mrb[68].mxu1 }
 0x16f   : > { %v3452_v63 = vadd.f32 %v921_v48, %v691_v58  ;;  %v2702_v0 = vpop.f32.mrb[67].mxu0  ;;  %v2783_v2 = vpop.f32.mrb[69].mxu1 }
 0x170   : > { %v929_v3 = vpop.f32.mrb[70].mxu1 }
 0x171   : > { %v2784_v5 = vpop.f32.mrb[71].mxu1 }
 0x174   : > { %v696_v7 = vpop.f32.mrb[68].mxu0 }
 0x175   : > { %v3454_v10 = vadd.f32 %v926_v62, %v696_v7  ;;  %v2705_v12 = vpop.f32.mrb[69].mxu0 }
 0x176   : > { %v699_v13 = vpop.f32.mrb[70].mxu0  ;;  %v934_v17 = vpop.f32.mrb[72].mxu1 }
 0x177   : > { %v3456_v19 = vadd.f32 %v929_v3, %v699_v13  ;;  %v2706_v20 = vpop.f32.mrb[71].mxu0  ;;  %v2787_v22 = vpop.f32.mrb[73].mxu1 }
 0x178   : > { %v937_v23 = vpop.f32.mrb[74].mxu1 }
 0x179   : > { %v2788_v26 = vpop.f32.mrb[75].mxu1 }
 0x17c   : > { %v704_v30 = vpop.f32.mrb[72].mxu0 }
 0x17d   : > { %v3458_v31 = vadd.f32 %v934_v17, %v704_v30  ;;  %v2709_v33 = vpop.f32.mrb[73].mxu0 }
 0x17e   : > { %v707_v34 = vpop.f32.mrb[74].mxu0  ;;  %v1653_v35 = vpop.f32.mrb[76].mxu1 }
 0x17f   : > { %v2710_v40 = vpop.f32.mrb[75].mxu0  ;;  %v2871_v1 = vpop.f32.mrb[77].mxu1 }
 0x180   : > { %v1656_v42 = vpop.f32.mrb[78].mxu1 }
 0x181   : > { %v2872_v46 = vpop.f32.mrb[79].mxu1 }
 0x184   : > { %v1324_v47 = vpop.f32.mrb[76].mxu0 }
 0x185   : > { %v1474_v48 = vadd.f32 %v1324_v47, %v3300_v18  ;;  %v2793_v50 = vpop.f32.mrb[77].mxu0 }
 0x186   : > { %v1327_v56 = vpop.f32.mrb[78].mxu0  ;;  %v1661_v58 = vpop.f32.mrb[80].mxu1 }
 0x187   : > { %v1803_v62 = vadd.f32 %v1653_v35, %v1474_v48  ;;  %v1475_v0 = vadd.f32 %v1327_v56, %v3303_v25  ;;  %v2794_v2 = vpop.f32.mrb[79].mxu0  ;;  %v2875_v3 = vpop.f32.mrb[81].mxu1 }
 0x188   : > { %v1664_v5 = vpop.f32.mrb[82].mxu1 }
 0x189   : > { %v1847_v7 = vadd.f32 %v3464_v52, %v1803_v62  ;;  %v1804_v12 = vadd.f32 %v1656_v42, %v1475_v0  ;;  %v2876_v13 = vpop.f32.mrb[83].mxu1 }
 0x18b   : > { %v1921_v17 = vmul.f32 0.01, %v1847_v7  ;;  %v1848_v18 = vadd.f32 %v3464_v52, %v1804_v12  ;;  %vm1884_vm4 = vcmp.ge.f32.partialorder %v1847_v7, 0.0 }
 0x18c   : > { %v1332_v20 = vpop.f32.mrb[80].mxu0 }
 0x18d   : > { %vm1885_vm5 = vcmp.ge.f32.partialorder %v1848_v18, 0.0  ;;  %v1922_v22 = vmul.f32 0.01, %v1848_v18  ;;  %v1476_v23 = vadd.f32 %v1332_v20, %v3313_v36  ;;  %v2797_v26 = vpop.f32.mrb[81].mxu0  ;;  %v1958_v33 = vsel %vm1884_vm4, %v1847_v7, %v1921_v17 }
 0x18e   : > { %v1335_v30 = vpop.f32.mrb[82].mxu0  ;;  %v1669_v25 = vpop.f32.mrb[84].mxu1 }
 0x18f   : > { %v1959_v34 = vsel %vm1885_vm5, %v1848_v18, %v1922_v22  ;;  %v1805_v35 = vadd.f32 %v1661_v58, %v1476_v23  ;;  %v1477_v40 = vadd.f32 %v1335_v30, %v3316_v43  ;;  %v2798_v1 = vpop.f32.mrb[83].mxu0  ;;  %v2879_v42 = vpop.f32.mrb[85].mxu1 }
 0x190   : > { %v2449_v46 = vpack.c.bf16 %v1959_v34, %v1958_v33  ;;  %v1672_v47 = vpop.f32.mrb[86].mxu1 }
 0x191   : > { %v1849_v36 = vadd.f32 %v3464_v52, %v1805_v35  ;;  %v1806_v48 = vadd.f32 %v1664_v5, %v1477_v40  ;;  %v2880_v50 = vpop.f32.mrb[87].mxu1 }
 0x192   : > { %2450 = vst [vmem:[%s3474_s4] sm:$0xff] %v2449_v46  }
 0x193   : > { %v1923_v56 = vmul.f32 0.01, %v1849_v36  ;;  %v1850_v62 = vadd.f32 %v3464_v52, %v1806_v48  ;;  %vm1886_vm6 = vcmp.ge.f32.partialorder %v1849_v36, 0.0 }
 0x194   : > { %v1340_v0 = vpop.f32.mrb[84].mxu0 }
 0x195   : > { %vm1887_vm7 = vcmp.ge.f32.partialorder %v1850_v62, 0.0  ;;  %v1924_v2 = vmul.f32 0.01, %v1850_v62  ;;  %v1478_v58 = vadd.f32 %v1340_v0, %v3326_v54  ;;  %v2801_v43 = vpop.f32.mrb[85].mxu0  ;;  %v1960_v12 = vsel %vm1886_vm6, %v1849_v36, %v1923_v56 }
 0x196   : > { %v1343_v3 = vpop.f32.mrb[86].mxu0  ;;  %v1677_v7 = vpop.f32.mrb[88].mxu1 }
 0x197   : > { %v1961_v13 = vsel %vm1887_vm7, %v1850_v62, %v1924_v2  ;;  %v1807_v17 = vadd.f32 %v1669_v25, %v1478_v58  ;;  %v1479_v5 = vadd.f32 %v1343_v3, %v3329_v61  ;;  %v2802_v18 = vpop.f32.mrb[87].mxu0  ;;  %v2883_v20 = vpop.f32.mrb[89].mxu1 }
 0x198   : > { %v2454_v22 = vpack.c.bf16 %v1961_v13, %v1960_v12  ;;  %v1680_v23 = vpop.f32.mrb[90].mxu1 }
 0x199   : > { %v1851_v26 = vadd.f32 %v3464_v52, %v1807_v17  ;;  %v1808_v30 = vadd.f32 %v1672_v47, %v1479_v5  ;;  %v2884_v33 = vpop.f32.mrb[91].mxu1 }
 0x19a   : > { %2536 = vst [vmem:[%s3474_s4 + $0x8] sm:$0xff] %v2454_v22  }
 0x19b   : > { %v1925_v34 = vmul.f32 0.01, %v1851_v26  ;;  %v1852_v54 = vadd.f32 %v3464_v52, %v1808_v30  ;;  %vm1888_vm8 = vcmp.ge.f32.partialorder %v1851_v26, 0.0 }
 0x19c   : > { %v1348_v35 = vpop.f32.mrb[88].mxu0 }
 0x19d   : > { %vm1889_vm9 = vcmp.ge.f32.partialorder %v1852_v54, 0.0  ;;  %v1926_v40 = vmul.f32 0.01, %v1852_v54  ;;  %v1480_v25 = vadd.f32 %v1348_v35, %v3339_v9  ;;  %v2805_v61 = vpop.f32.mrb[89].mxu0  ;;  %v1962_v46 = vsel %vm1888_vm8, %v1851_v26, %v1925_v34 }
 0x19e   : > { %v1351_v1 = vpop.f32.mrb[90].mxu0  ;;  %v1685_v42 = vpop.f32.mrb[92].mxu1 }
 0x19f   : > { %v1963_v36 = vsel %vm1889_vm9, %v1852_v54, %v1926_v40  ;;  %v1809_v48 = vadd.f32 %v1677_v7, %v1480_v25  ;;  %v1481_v47 = vadd.f32 %v1351_v1, %v3342_v16  ;;  %v2806_v50 = vpop.f32.mrb[91].mxu0  ;;  %v2887_v56 = vpop.f32.mrb[93].mxu1 }
 0x1a0   : > { %v2459_v62 = vpack.c.bf16 %v1963_v36, %v1962_v46  ;;  %v1688_v0 = vpop.f32.mrb[94].mxu1 }
 0x1a1   : > { %v1853_v2 = vadd.f32 %v3464_v52, %v1809_v48  ;;  %v1810_v58 = vadd.f32 %v1680_v23, %v1481_v47  ;;  %v2888_v43 = vpop.f32.mrb[95].mxu1 }
 0x1a2   : > { %2537 = vst [vmem:[%s3474_s4 + $0x10] sm:$0xff] %v2459_v62  }
 0x1a3   : > { %v1927_v3 = vmul.f32 0.01, %v1853_v2  ;;  %v1854_v9 = vadd.f32 %v3464_v52, %v1810_v58  ;;  %vm1890_vm10 = vcmp.ge.f32.partialorder %v1853_v2, 0.0 }
 0x1a4   : > { %v1356_v12 = vpop.f32.mrb[92].mxu0 }
 0x1a5   : > { %vm1891_vm11 = vcmp.ge.f32.partialorder %v1854_v9, 0.0  ;;  %v1928_v13 = vmul.f32 0.01, %v1854_v9  ;;  %v1482_v7 = vadd.f32 %v1356_v12, %v3352_v29  ;;  %v2809_v16 = vpop.f32.mrb[93].mxu0  ;;  %v1964_v18 = vsel %vm1890_vm10, %v1853_v2, %v1927_v3 }
 0x1a6   : > { %v1359_v17 = vpop.f32.mrb[94].mxu0  ;;  %v1693_v5 = vpop.f32.mrb[96].mxu1 }
 0x1a7   : > { %v1965_v20 = vsel %vm1891_vm11, %v1854_v9, %v1928_v13  ;;  %v1811_v22 = vadd.f32 %v1685_v42, %v1482_v7  ;;  %v1483_v23 = vadd.f32 %v1359_v17, %v3355_v37  ;;  %v2810_v26 = vpop.f32.mrb[95].mxu0  ;;  %v2891_v30 = vpop.f32.mrb[97].mxu1 }
 0x1a8   : > { %v2464_v33 = vpack.c.bf16 %v1965_v20, %v1964_v18  ;;  %v1696_v34 = vpop.f32.mrb[98].mxu1 }
 0x1a9   : > { %v1855_v54 = vadd.f32 %v3464_v52, %v1811_v22  ;;  %v1812_v35 = vadd.f32 %v1688_v0, %v1483_v23  ;;  %v2892_v40 = vpop.f32.mrb[99].mxu1 }
 0x1aa   : > { %2538 = vst [vmem:[%s3474_s4 + $0x18] sm:$0xff] %v2464_v33  }
 0x1ab   : > { %v1929_v25 = vmul.f32 0.01, %v1855_v54  ;;  %v1856_v29 = vadd.f32 %v3464_v52, %v1812_v35  ;;  %vm1892_vm12 = vcmp.ge.f32.partialorder %v1855_v54, 0.0 }
 0x1ac   : > { %v1364_v61 = vpop.f32.mrb[96].mxu0 }
 0x1ad   : > { %vm1893_vm13 = vcmp.ge.f32.partialorder %v1856_v29, 0.0  ;;  %v1930_v1 = vmul.f32 0.01, %v1856_v29  ;;  %v1484_v42 = vadd.f32 %v1364_v61, %v3365_v49  ;;  %v2813_v37 = vpop.f32.mrb[97].mxu0  ;;  %v1966_v48 = vsel %vm1892_vm12, %v1855_v54, %v1929_v25 }
 0x1ae   : > { %v1367_v46 = vpop.f32.mrb[98].mxu0  ;;  %v1701_v36 = vpop.f32.mrb[100].mxu1 }
 0x1af   : > { %v1967_v47 = vsel %vm1893_vm13, %v1856_v29, %v1930_v1  ;;  %v1813_v50 = vadd.f32 %v1693_v5, %v1484_v42  ;;  %v1485_v56 = vadd.f32 %v1367_v46, %v3368_v57  ;;  %v2814_v62 = vpop.f32.mrb[99].mxu0  ;;  %v2895_v0 = vpop.f32.mrb[101].mxu1 }
 0x1b0   : > { %v2469_v2 = vpack.c.bf16 %v1967_v47, %v1966_v48  ;;  %v1704_v58 = vpop.f32.mrb[102].mxu1 }
 0x1b1   : > { %v1857_v43 = vadd.f32 %v3464_v52, %v1813_v50  ;;  %v1814_v3 = vadd.f32 %v1696_v34, %v1485_v56  ;;  %v2896_v9 = vpop.f32.mrb[103].mxu1 }
 0x1b2   : > { %2539 = vst [vmem:[%s3474_s4 + $0x20] sm:$0xff] %v2469_v2  }
 0x1b3   : > { %v1931_v12 = vmul.f32 0.01, %v1857_v43  ;;  %v1858_v49 = vadd.f32 %v3464_v52, %v1814_v3  ;;  %vm1894_vm14 = vcmp.ge.f32.partialorder %v1857_v43, 0.0 }
 0x1b4   : > { %v1372_v13 = vpop.f32.mrb[100].mxu0 }
 0x1b5   : > { %vm1895_vm15 = vcmp.ge.f32.partialorder %v1858_v49, 0.0  ;;  %v1932_v7 = vmul.f32 0.01, %v1858_v49  ;;  %v1486_v16 = vadd.f32 %v1372_v13, %v3378_v6  ;;  %v2817_v57 = vpop.f32.mrb[101].mxu0  ;;  %v1968_v18 = vsel %vm1894_vm14, %v1857_v43, %v1931_v12 }
 0x1b6   : > { %v1375_v17 = vpop.f32.mrb[102].mxu0  ;;  %v1709_v5 = vpop.f32.mrb[104].mxu1 }
 0x1b7   : > { %v1969_v20 = vsel %vm1895_vm15, %v1858_v49, %v1932_v7  ;;  %v1815_v22 = vadd.f32 %v1701_v36, %v1486_v16  ;;  %v1487_v23 = vadd.f32 %v1375_v17, %v3381_v14  ;;  %v2818_v26 = vpop.f32.mrb[103].mxu0  ;;  %v2899_v30 = vpop.f32.mrb[105].mxu1 }
 0x1b8   : > { %v2474_v33 = vpack.c.bf16 %v1969_v20, %v1968_v18  ;;  %v1712_v34 = vpop.f32.mrb[106].mxu1 }
 0x1b9   : > { %v1859_v54 = vadd.f32 %v3464_v52, %v1815_v22  ;;  %v1816_v35 = vadd.f32 %v1704_v58, %v1487_v23  ;;  %v2900_v40 = vpop.f32.mrb[107].mxu1 }
 0x1ba   : > { %2540 = vst [vmem:[%s3474_s4 + $0x28] sm:$0xff] %v2474_v33  }
 0x1bb   : > { %v1933_v25 = vmul.f32 0.01, %v1859_v54  ;;  %v1860_v6 = vadd.f32 %v3464_v52, %v1816_v35  ;;  %vm1896_vm0 = vcmp.ge.f32.partialorder %v1859_v54, 0.0 }
 0x1bc   : > { %v1380_v29 = vpop.f32.mrb[104].mxu0 }
 0x1bd   : > { %vm1897_vm1 = vcmp.ge.f32.partialorder %v1860_v6, 0.0  ;;  %v1934_v61 = vmul.f32 0.01, %v1860_v6  ;;  %v1488_v1 = vadd.f32 %v1380_v29, %v3391_v28  ;;  %v2821_v14 = vpop.f32.mrb[105].mxu0  ;;  %v1970_v46 = vsel %vm1896_vm0, %v1859_v54, %v1933_v25 }
 0x1be   : > { %v1383_v42 = vpop.f32.mrb[106].mxu0  ;;  %v1717_v37 = vpop.f32.mrb[108].mxu1 }
 0x1bf   : > { %v1971_v36 = vsel %vm1897_vm1, %v1860_v6, %v1934_v61  ;;  %v1817_v48 = vadd.f32 %v1709_v5, %v1488_v1  ;;  %v1489_v47 = vadd.f32 %v1383_v42, %v3394_v38  ;;  %v2822_v50 = vpop.f32.mrb[107].mxu0  ;;  %v2903_v56 = vpop.f32.mrb[109].mxu1 }
 0x1c0   : > { %v2479_v62 = vpack.c.bf16 %v1971_v36, %v1970_v46  ;;  %v1720_v0 = vpop.f32.mrb[110].mxu1 }
 0x1c1   : > { %v1861_v2 = vadd.f32 %v3464_v52, %v1817_v48  ;;  %v1818_v58 = vadd.f32 %v1712_v34, %v1489_v47  ;;  %v2904_v43 = vpop.f32.mrb[111].mxu1 }
 0x1c2   : > { %2541 = vst [vmem:[%s3474_s4 + $0x30] sm:$0xff] %v2479_v62  }
 0x1c3   : > { %v1935_v3 = vmul.f32 0.01, %v1861_v2  ;;  %v1862_v28 = vadd.f32 %v3464_v52, %v1818_v58  ;;  %vm1898_vm2 = vcmp.ge.f32.partialorder %v1861_v2, 0.0 }
 0x1c4   : > { %v1388_v9 = vpop.f32.mrb[108].mxu0 }
 0x1c5   : > { %vm1899_vm3 = vcmp.ge.f32.partialorder %v1862_v28, 0.0  ;;  %v1936_v12 = vmul.f32 0.01, %v1862_v28  ;;  %v1490_v49 = vadd.f32 %v1388_v9, %v3404_v51  ;;  %v2825_v38 = vpop.f32.mrb[109].mxu0  ;;  %v1972_v16 = vsel %vm1898_vm2, %v1861_v2, %v1935_v3 }
 0x1c6   : > { %v1391_v13 = vpop.f32.mrb[110].mxu0  ;;  %v1725_v7 = vpop.f32.mrb[112].mxu1 }
 0x1c7   : > { %v1973_v57 = vsel %vm1899_vm3, %v1862_v28, %v1936_v12  ;;  %v1819_v17 = vadd.f32 %v1717_v37, %v1490_v49  ;;  %v1491_v5 = vadd.f32 %v1391_v13, %v3407_v60  ;;  %v2826_v18 = vpop.f32.mrb[111].mxu0  ;;  %v2907_v20 = vpop.f32.mrb[113].mxu1 }
 0x1c8   : > { %v2484_v22 = vpack.c.bf16 %v1973_v57, %v1972_v16  ;;  %v1728_v23 = vpop.f32.mrb[114].mxu1 }
 0x1c9   : > { %v1863_v26 = vadd.f32 %v3464_v52, %v1819_v17  ;;  %v1820_v30 = vadd.f32 %v1720_v0, %v1491_v5  ;;  %v2908_v33 = vpop.f32.mrb[115].mxu1 }
 0x1ca   : > { %2542 = vst [vmem:[%s3474_s4 + $0x38] sm:$0xff] %v2484_v22  }
 0x1cb   : > { %v1937_v34 = vmul.f32 0.01, %v1863_v26  ;;  %v1864_v51 = vadd.f32 %v3464_v52, %v1820_v30  ;;  %vm1900_vm4 = vcmp.ge.f32.partialorder %v1863_v26, 0.0 }
 0x1cc   : > { %v1396_v54 = vpop.f32.mrb[112].mxu0 }
 0x1cd   : > { %vm1901_vm5 = vcmp.ge.f32.partialorder %v1864_v51, 0.0  ;;  %v1938_v35 = vmul.f32 0.01, %v1864_v51  ;;  %v1492_v40 = vadd.f32 %v1396_v54, %v3416_v8  ;;  %v2829_v60 = vpop.f32.mrb[113].mxu0  ;;  %v1974_v29 = vsel %vm1900_vm4, %v1863_v26, %v1937_v34 }
 0x1ce   : > { %v1399_v25 = vpop.f32.mrb[114].mxu0  ;;  %v1733_v6 = vpop.f32.mrb[116].mxu1 }
 0x1cf   : > { %v1975_v61 = vsel %vm1901_vm5, %v1864_v51, %v1938_v35  ;;  %v1821_v1 = vadd.f32 %v1725_v7, %v1492_v40  ;;  %v1493_v14 = vadd.f32 %v1399_v25, %v3419_v15  ;;  %v2830_v42 = vpop.f32.mrb[115].mxu0  ;;  %v2911_v37 = vpop.f32.mrb[117].mxu1 }
 0x1d0   : > { %v2489_v46 = vpack.c.bf16 %v1975_v61, %v1974_v29  ;;  %v1736_v36 = vpop.f32.mrb[118].mxu1 }
 0x1d1   : > { %v1865_v48 = vadd.f32 %v3464_v52, %v1821_v1  ;;  %v1822_v47 = vadd.f32 %v1728_v23, %v1493_v14  ;;  %v2912_v50 = vpop.f32.mrb[119].mxu1 }
 0x1d2   : > { %2543 = vst [vmem:[%s3474_s4 + $0x40] sm:$0xff] %v2489_v46  }
 0x1d3   : > { %v1939_v56 = vmul.f32 0.01, %v1865_v48  ;;  %v1866_v8 = vadd.f32 %v3464_v52, %v1822_v47  ;;  %vm1902_vm6 = vcmp.ge.f32.partialorder %v1865_v48, 0.0 }
 0x1d4   : > { %v1404_v62 = vpop.f32.mrb[116].mxu0 }
 0x1d5   : > { %vm1903_vm7 = vcmp.ge.f32.partialorder %v1866_v8, 0.0  ;;  %v1940_v0 = vmul.f32 0.01, %v1866_v8  ;;  %v1494_v2 = vadd.f32 %v1404_v62, %v3425_v24  ;;  %v2833_v15 = vpop.f32.mrb[117].mxu0  ;;  %v1976_v3 = vsel %vm1902_vm6, %v1865_v48, %v1939_v56 }
 0x1d6   : > { %v1407_v58 = vpop.f32.mrb[118].mxu0  ;;  %v1741_v43 = vpop.f32.mrb[120].mxu1 }
 0x1d7   : > { %v1977_v28 = vsel %vm1903_vm7, %v1866_v8, %v1940_v0  ;;  %v1823_v9 = vadd.f32 %v1733_v6, %v1494_v2  ;;  %v1495_v12 = vadd.f32 %v1407_v58, %v3427_v32  ;;  %v2834_v49 = vpop.f32.mrb[119].mxu0  ;;  %v2915_v38 = vpop.f32.mrb[121].mxu1 }
 0x1d8   : > { %v2494_v13 = vpack.c.bf16 %v1977_v28, %v1976_v3  ;;  %v1744_v7 = vpop.f32.mrb[122].mxu1 }
 0x1d9   : > { %v1867_v16 = vadd.f32 %v3464_v52, %v1823_v9  ;;  %v1824_v57 = vadd.f32 %v1736_v36, %v1495_v12  ;;  %v2916_v17 = vpop.f32.mrb[123].mxu1 }
 0x1da   : > { %2544 = vst [vmem:[%s3474_s4 + $0x48] sm:$0xff] %v2494_v13  }
 0x1db   : > { %v1941_v5 = vmul.f32 0.01, %v1867_v16  ;;  %v1868_v24 = vadd.f32 %v3464_v52, %v1824_v57  ;;  %vm1904_vm8 = vcmp.ge.f32.partialorder %v1867_v16, 0.0 }
 0x1dc   : > { %v1412_v18 = vpop.f32.mrb[120].mxu0 }
 0x1dd   : > { %vm1905_vm9 = vcmp.ge.f32.partialorder %v1868_v24, 0.0  ;;  %v1942_v20 = vmul.f32 0.01, %v1868_v24  ;;  %v1496_v22 = vadd.f32 %v1412_v18, %v3430_v41  ;;  %v2837_v32 = vpop.f32.mrb[121].mxu0  ;;  %v1978_v30 = vsel %vm1904_vm8, %v1867_v16, %v1941_v5 }
 0x1de   : > { %v1415_v23 = vpop.f32.mrb[122].mxu0  ;;  %v1749_v26 = vpop.f32.mrb[124].mxu1 }
 0x1df   : > { %v1979_v33 = vsel %vm1905_vm9, %v1868_v24, %v1942_v20  ;;  %v1825_v34 = vadd.f32 %v1741_v43, %v1496_v22  ;;  %v1497_v51 = vadd.f32 %v1415_v23, %v3432_v45  ;;  %v2838_v54 = vpop.f32.mrb[123].mxu0  ;;  %v2919_v35 = vpop.f32.mrb[125].mxu1 }
 0x1e0   : > { %v2499_v40 = vpack.c.bf16 %v1979_v33, %v1978_v30  ;;  %v1752_v60 = vpop.f32.mrb[126].mxu1 }
 0x1e1   : > { %v1869_v25 = vadd.f32 %v3464_v52, %v1825_v34  ;;  %v1826_v6 = vadd.f32 %v1744_v7, %v1497_v51  ;;  %v2920_v29 = vpop.f32.mrb[127].mxu1 }
 0x1e2   : > { %2545 = vst [vmem:[%s3474_s4 + $0x50] sm:$0xff] %v2499_v40  }
 0x1e3   : > { %v1943_v61 = vmul.f32 0.01, %v1869_v25  ;;  %v1870_v41 = vadd.f32 %v3464_v52, %v1826_v6  ;;  %vm1906_vm10 = vcmp.ge.f32.partialorder %v1869_v25, 0.0 }
 0x1e4   : > { %v1420_v1 = vpop.f32.mrb[124].mxu0 }
 0x1e5   : > { %vm1907_vm11 = vcmp.ge.f32.partialorder %v1870_v41, 0.0  ;;  %v1944_v14 = vmul.f32 0.01, %v1870_v41  ;;  %v1498_v42 = vadd.f32 %v1420_v1, %v3434_v53  ;;  %v2841_v45 = vpop.f32.mrb[125].mxu0  ;;  %v1980_v36 = vsel %vm1906_vm10, %v1869_v25, %v1943_v61 }
 0x1e6   : > { %v1423_v37 = vpop.f32.mrb[126].mxu0  ;;  %v1757_v46 = vpop.f32.mrb[128].mxu1 }
 0x1e7   : > { %v1981_v48 = vsel %vm1907_vm11, %v1870_v41, %v1944_v14  ;;  %v1827_v47 = vadd.f32 %v1749_v26, %v1498_v42  ;;  %v1499_v50 = vadd.f32 %v1423_v37, %v3436_v59  ;;  %v2842_v56 = vpop.f32.mrb[127].mxu0  ;;  %v2923_v8 = vpop.f32.mrb[129].mxu1 }
 0x1e8   : > { %v2504_v62 = vpack.c.bf16 %v1981_v48, %v1980_v36  ;;  %v1760_v0 = vpop.f32.mrb[130].mxu1 }
 0x1e9   : > { %v1871_v2 = vadd.f32 %v3464_v52, %v1827_v47  ;;  %v1828_v15 = vadd.f32 %v1752_v60, %v1499_v50  ;;  %v2924_v58 = vpop.f32.mrb[131].mxu1 }
 0x1ea   : > { %2546 = vst [vmem:[%s3474_s4 + $0x58] sm:$0xff] %v2504_v62  }
 0x1eb   : > { %v1945_v43 = vmul.f32 0.01, %v1871_v2  ;;  %v1872_v53 = vadd.f32 %v3464_v52, %v1828_v15  ;;  %vm1908_vm12 = vcmp.ge.f32.partialorder %v1871_v2, 0.0 }
 0x1ec   : > { %v1428_v3 = vpop.f32.mrb[128].mxu0 }
 0x1ed   : > { %vm1909_vm13 = vcmp.ge.f32.partialorder %v1872_v53, 0.0  ;;  %v1946_v28 = vmul.f32 0.01, %v1872_v53  ;;  %v1500_v9 = vadd.f32 %v1428_v3, %v3438_v4  ;;  %v2845_v59 = vpop.f32.mrb[129].mxu0  ;;  %v1982_v38 = vsel %vm1908_vm12, %v1871_v2, %v1945_v43 }
 0x1ee   : > { %v1431_v12 = vpop.f32.mrb[130].mxu0  ;;  %v1765_v49 = vpop.f32.mrb[132].mxu1 }
 0x1ef   : > { %v1983_v13 = vsel %vm1909_vm13, %v1872_v53, %v1946_v28  ;;  %v1829_v7 = vadd.f32 %v1757_v46, %v1500_v9  ;;  %v1501_v16 = vadd.f32 %v1431_v12, %v3440_v11  ;;  %v2846_v57 = vpop.f32.mrb[131].mxu0  ;;  %v2927_v17 = vpop.f32.mrb[133].mxu1 }
 0x1f0   : > { %v2509_v5 = vpack.c.bf16 %v1983_v13, %v1982_v38  ;;  %v1768_v24 = vpop.f32.mrb[134].mxu1 }
 0x1f1   : > { %v1873_v18 = vadd.f32 %v3464_v52, %v1829_v7  ;;  %v1830_v20 = vadd.f32 %v1760_v0, %v1501_v16  ;;  %v2928_v22 = vpop.f32.mrb[135].mxu1 }
 0x1f2   : > { %2547 = vst [vmem:[%s3474_s4 + $0x60] sm:$0xff] %v2509_v5  }
 0x1f3   : > { %v1947_v32 = vmul.f32 0.01, %v1873_v18  ;;  %v1874_v4 = vadd.f32 %v3464_v52, %v1830_v20  ;;  %vm1910_vm14 = vcmp.ge.f32.partialorder %v1873_v18, 0.0 }
 0x1f4   : > { %v1436_v23 = vpop.f32.mrb[132].mxu0 }
 0x1f5   : > { %vm1911_vm15 = vcmp.ge.f32.partialorder %v1874_v4, 0.0  ;;  %v1948_v26 = vmul.f32 0.01, %v1874_v4  ;;  %v1502_v30 = vadd.f32 %v1436_v23, %v3442_v21  ;;  %v2849_v11 = vpop.f32.mrb[133].mxu0  ;;  %v1984_v51 = vsel %vm1910_vm14, %v1873_v18, %v1947_v32 }
 0x1f6   : > { %v1439_v33 = vpop.f32.mrb[134].mxu0  ;;  %v1773_v34 = vpop.f32.mrb[136].mxu1 }
 0x1f7   : > { %v1985_v54 = vsel %vm1911_vm15, %v1874_v4, %v1948_v26  ;;  %v1831_v35 = vadd.f32 %v1765_v49, %v1502_v30  ;;  %v1503_v40 = vadd.f32 %v1439_v33, %v3444_v27  ;;  %v2850_v60 = vpop.f32.mrb[135].mxu0  ;;  %v2931_v25 = vpop.f32.mrb[137].mxu1 }
 0x1f8   : > { %v2514_v6 = vpack.c.bf16 %v1985_v54, %v1984_v51  ;;  %v1776_v29 = vpop.f32.mrb[138].mxu1 }
 0x1f9   : > { %v1875_v61 = vadd.f32 %v3464_v52, %v1831_v35  ;;  %v1832_v41 = vadd.f32 %v1768_v24, %v1503_v40  ;;  %v2932_v1 = vpop.f32.mrb[139].mxu1 }
 0x1fa   : > { %2548 = vst [vmem:[%s3474_s4 + $0x68] sm:$0xff] %v2514_v6  }
 0x1fb   : > { %v1949_v14 = vmul.f32 0.01, %v1875_v61  ;;  %v1876_v21 = vadd.f32 %v3464_v52, %v1832_v41  ;;  %vm1912_vm0 = vcmp.ge.f32.partialorder %v1875_v61, 0.0 }
 0x1fc   : > { %v1444_v42 = vpop.f32.mrb[136].mxu0 }
 0x1fd   : > { %vm1913_vm1 = vcmp.ge.f32.partialorder %v1876_v21, 0.0  ;;  %v1950_v45 = vmul.f32 0.01, %v1876_v21  ;;  %v1504_v37 = vadd.f32 %v1444_v42, %v3446_v39  ;;  %v2853_v27 = vpop.f32.mrb[137].mxu0  ;;  %v1986_v48 = vsel %vm1912_vm0, %v1875_v61, %v1949_v14 }
 0x1fe   : > { %v1447_v46 = vpop.f32.mrb[138].mxu0  ;;  %v1781_v36 = vpop.f32.mrb[140].mxu1 }
 0x1ff   : > { %v1987_v47 = vsel %vm1913_vm1, %v1876_v21, %v1950_v45  ;;  %v1833_v50 = vadd.f32 %v1773_v34, %v1504_v37  ;;  %v1505_v56 = vadd.f32 %v1447_v46, %v3448_v44  ;;  %v2854_v8 = vpop.f32.mrb[139].mxu0  ;;  %v2935_v62 = vpop.f32.mrb[141].mxu1 }
 0x200   : > { %v2519_v0 = vpack.c.bf16 %v1987_v47, %v1986_v48  ;;  %v1784_v2 = vpop.f32.mrb[142].mxu1 }
 0x201   : > { %v1877_v15 = vadd.f32 %v3464_v52, %v1833_v50  ;;  %v1834_v58 = vadd.f32 %v1776_v29, %v1505_v56  ;;  %v2936_v43 = vpop.f32.mrb[143].mxu1 }
 0x202   : > { %2549 = vst [vmem:[%s3474_s4 + $0x70] sm:$0xff] %v2519_v0  }
 0x203   : > { %v1951_v53 = vmul.f32 0.01, %v1877_v15  ;;  %v1878_v39 = vadd.f32 %v3464_v52, %v1834_v58  ;;  %vm1914_vm2 = vcmp.ge.f32.partialorder %v1877_v15, 0.0 }
 0x204   : > { %v1452_v3 = vpop.f32.mrb[140].mxu0 }
 0x205   : > { %vm1915_vm3 = vcmp.ge.f32.partialorder %v1878_v39, 0.0  ;;  %v1952_v28 = vmul.f32 0.01, %v1878_v39  ;;  %v1506_v9 = vadd.f32 %v1452_v3, %v3450_v55  ;;  %v2857_v44 = vpop.f32.mrb[141].mxu0  ;;  %v1988_v49 = vsel %vm1914_vm2, %v1877_v15, %v1951_v53 }
 0x206   : > { %v1455_v59 = vpop.f32.mrb[142].mxu0  ;;  %v1789_v12 = vpop.f32.mrb[144].mxu1 }
 0x207   : > { %v1989_v38 = vsel %vm1915_vm3, %v1878_v39, %v1952_v28  ;;  %v1835_v13 = vadd.f32 %v1781_v36, %v1506_v9  ;;  %v1507_v7 = vadd.f32 %v1455_v59, %v3452_v63  ;;  %v2858_v16 = vpop.f32.mrb[143].mxu0  ;;  %v2939_v57 = vpop.f32.mrb[145].mxu1 }
 0x208   : > { %v2524_v17 = vpack.c.bf16 %v1989_v38, %v1988_v49  ;;  %v1792_v5 = vpop.f32.mrb[146].mxu1 }
 0x209   : > { %v1879_v24 = vadd.f32 %v3464_v52, %v1835_v13  ;;  %v1836_v18 = vadd.f32 %v1784_v2, %v1507_v7  ;;  %v2940_v20 = vpop.f32.mrb[147].mxu1 }
 0x20a   : > { %2550 = vst [vmem:[%s3474_s4 + $0x78] sm:$0xff] %v2524_v17  }
 0x20b   : > { %v1953_v22 = vmul.f32 0.01, %v1879_v24  ;;  %v1880_v55 = vadd.f32 %v3464_v52, %v1836_v18  ;;  %vm1916_vm4 = vcmp.ge.f32.partialorder %v1879_v24, 0.0 }
 0x20c   : > { %v1460_v32 = vpop.f32.mrb[144].mxu0 }
 0x20d   : > { %vm1917_vm5 = vcmp.ge.f32.partialorder %v1880_v55, 0.0  ;;  %v1954_v4 = vmul.f32 0.01, %v1880_v55  ;;  %v1508_v23 = vadd.f32 %v1460_v32, %v3454_v10  ;;  %v2861_v63 = vpop.f32.mrb[145].mxu0  ;;  %v1990_v11 = vsel %vm1916_vm4, %v1879_v24, %v1953_v22 }
 0x20e   : > { %v1463_v26 = vpop.f32.mrb[146].mxu0  ;;  %v1797_v30 = vpop.f32.mrb[148].mxu1 }
 0x20f   : > { %v1991_v33 = vsel %vm1917_vm5, %v1880_v55, %v1954_v4  ;;  %v1837_v34 = vadd.f32 %v1789_v12, %v1508_v23  ;;  %v1509_v51 = vadd.f32 %v1463_v26, %v3456_v19  ;;  %v2862_v54 = vpop.f32.mrb[147].mxu0  ;;  %v2943_v35 = vpop.f32.mrb[149].mxu1 }
 0x210   : > { %v2529_v40 = vpack.c.bf16 %v1991_v33, %v1990_v11  ;;  %v1800_v60 = vpop.f32.mrb[150].mxu1 }
 0x211   : > { %v1881_v25 = vadd.f32 %v3464_v52, %v1837_v34  ;;  %v1838_v6 = vadd.f32 %v1792_v5, %v1509_v51  ;;  %v2944_v29 = vpop.f32.mrb[151].mxu1 }
 0x212   : > { %2551 = vst [vmem:[%s3474_s4 + $0x80] sm:$0xff] %v2529_v40  }
 0x213   : > { %v1955_v61 = vmul.f32 0.01, %v1881_v25  ;;  %v1882_v10 = vadd.f32 %v3464_v52, %v1838_v6  ;;  %vm1918_vm6 = vcmp.ge.f32.partialorder %v1881_v25, 0.0 }
 0x214   : > { %v1468_v41 = vpop.f32.mrb[148].mxu0 }
 0x215   : > { %vm1919_vm7 = vcmp.ge.f32.partialorder %v1882_v10, 0.0  ;;  %v1956_v1 = vmul.f32 0.01, %v1882_v10  ;;  %v1510_v19 = vadd.f32 %v1468_v41, %v3458_v31  ;;  %v2865_v14 = vpop.f32.mrb[149].mxu0  ;;  %v1992_v42 = vsel %vm1918_vm6, %v1881_v25, %v1955_v61 }
 0x216   : > { %v1471_v21 = vpop.f32.mrb[150].mxu0 }
 0x217   : > { %v1993_v45 = vsel %vm1919_vm7, %v1882_v10, %v1956_v1  ;;  %v1839_v37 = vadd.f32 %v1797_v30, %v1510_v19  ;;  %v2866_v27 = vpop.f32.mrb[151].mxu0 }
 0x218   : > { %v2534_v46 = vpack.c.bf16 %v1993_v45, %v1992_v42 }
 0x219   : > { %v1883_v36 = vadd.f32 %v3464_v52, %v1839_v37 }
 0x21a   : > { %2552 = vst [vmem:[%s3474_s4 + $0x88] sm:$0xff] %v2534_v46  }
 0x21b   : > { %vm1920_vm8 = vcmp.ge.f32.partialorder %v1883_v36, 0.0  ;;  %v1957_v48 = vmul.f32 0.01, %v1883_v36 }
 0x21d   : > { %v1994_v47 = vsel %vm1920_vm8, %v1883_v36, %v1957_v48 }
 0x21e   : > { %v2445_v50 = vpack.c.bf16 %v1994_v47, %v1994_v47 }
 0x220   : > { %2180 = vst [vmem:[%s3474_s4 + $0x90] sm:$0xf] %v2445_v50 }
 0x221 PF: > { %s13_s12 = sadd.s32 1, %s3007_s12  }
 0x222   : > { %p10_p4 = scmp.ge.s32.totalorder %s13_s12, 4  }
 0x224   :  { %12 = sbr.rel (!%p10_p4) target bundleno = 1 (0x1), region = 65 }

// kernel: _lambda_.8
= control target key start
LH: loop header
LB: loop body
LE: loop exit
PB: predicated region body
PF: predicated region fallthrough
CT: control target
= control target key end

     0   :  { %s1306_s12 = smov 0   ;;  %s1507_s0 = inlined_call_operand.vmem [shape: bf16[2,104,32], index: 0, kind: input, shape index: {}]   ;;  %s1508_s1 = inlined_call_operand.vmem [shape: bf16[4,32,128], index: 1, kind: input, shape index: {}]   ;;  %s1509_s2 = inlined_call_operand.vmem [shape: f32[1,128], index: 2, kind: input, shape index: {}]   ;;  %s1510_s3 = inlined_call_operand.vmem [shape: bf16[2,88,128], index: 3, kind: output, shape index: {}]  }
   0x1 LB: > { %s1007_s13 = sadd.s32 4294967295, %s1284_s12   ;;  %p1011_p0 = scmp.ge.s32.totalorder %s1284_s12, 1  ;;  %s1284_s12 = sphi %s1306_s12, %s13_s12  }
   0x2   : > { %p137_p1 = scmp.lt.s32.totalorder %s1284_s12, 3 }
   0x4   : > { %p138_p2 = pnand %p1011_p0, %p137_p1 }
   0x5   : > { %v1256_v0 = vld [vmem:[%s1508_s1 + $0x10] sm:$0xff] (!%p138_p2)   ;;  %p161_p3 = scmp.lt.s32.totalorder (!%p138_p2), %s1007_s13, 1  ;;  %v1257_v1 = vld [vmem:[%s1508_s1 + $0x20] sm:$0xff] (!%p138_p2)   ;;  %v1258_v2 = vld [vmem:[%s1508_s1 + $0x18] sm:$0xff] (!%p138_p2)   ;;  %vm223_vm0 = vsmask.f32 (!%p138_p2), 7424 }
   0x6   : > { %141 = sbr.rel (%p138_p2) target bundleno = 295 (0x127), region = 32  ;;  %1158 = vmatprep.subr.bf16.mxu1 (!%p138_p2), %v1256_v0  ;;  %1190 = vmatprep.subr.bf16.mxu0 (!%p138_p2), %v1257_v1  ;;  %v1259_v3 = vld [vmem:[%s1508_s1 + $0x28] sm:$0xff] (!%p138_p2)   ;;  %v1262_v4 = vld [vmem:[%s1508_s1] sm:$0xff] (!%p138_p2)   ;;  %v1340_v5 = vld [vmem:[%s1508_s1 + $0x30] sm:$0xff] (!%p138_p2)   ;;  %vm283_vm1 = vcmask (!%p138_p2), 261120   ;;  %vm712_vm2 = vcmask (!%p138_p2), 1046528  }
   0x7   : > { %1159 = vmatpush3.bf16.msra.mxu1 (!%p138_p2), %v1256_v0  ;;  %1191 = vmatpush3.bf16.msra.mxu0 (!%p138_p2), %v1257_v1  ;;  %v1272_v50 = vld [vmem:[%s1508_s1 + $0x8] sm:$0xff] (!%p138_p2)   ;;  %v1275_v52 = vld [vmem:[%s1508_s1 + $0x38] sm:$0xff] (!%p138_p2)  }
   0x8   : > { %1160 = vmatprep.subr.bf16.mxu1 (!%p138_p2), %v1258_v2  ;;  %1192 = vmatprep.subr.bf16.mxu0 (!%p138_p2), %v1259_v3 }
   0xb   : > { %1161 = vmatpush3.bf16.msra.mxu1 (!%p138_p2), %v1258_v2  ;;  %1193 = vmatpush3.bf16.msra.mxu0 (!%p138_p2), %v1259_v3 }
   0xc   : > { %1174 = vmatprep.subr.bf16.mxu1 (!%p138_p2), %v1262_v4  ;;  %1206 = vmatprep.subr.bf16.mxu0 (!%p138_p2), %v1340_v5 }
   0xd   : > { %s1512_s13 = smov (!%p161_p3, %s1007_s13), 1 }
   0xe   : > { %s1246_s22 = smul.u32 52, %s1512_s13 }
   0xf   : > { %s1247_s9 = smul.u32 44, %s1512_s13 }
  0x10   : > { %s1335_s27 = scalar_lea.vmem %s1507_s0, %s1246_s22 }
  0x11   : > { %v1343_v6 = vld [vmem:[%s1335_s27] sm:$0xff]   ;;  %v1346_v7 = vld [vmem:[%s1335_s27 + $0x8] sm:$0xff]   ;;  %v1362_v18 = vld [vmem:[%s1335_s27 + $0x10] sm:$0xff]   ;;  %s1483_s13 = scalar_lea.vmem %s1510_s3, %s1247_s9 }
  0x12   : > { %v488_v8 = vld [vmem:[%s1335_s27 + $0x4] sm:$0xf]  ;;  %v1350_v9 = vld [vmem:[%s1335_s27 + $0x8] sm:$0xf]  ;;  %v225_v10 = vshrl.u32 %v1343_v6, 16  ;;  %v227_v11 = vshll.u32 %v1343_v6, 16 }
  0x13   : > { %v232_v12 = vshll.u32 %v1346_v7, 16  ;;  %v236_v13 = vshrl.u32 %v1346_v7, 16  ;;  %v1045_v14 = vcombine.low %v488_v8, %v1350_v9  ;;  %v1359_v15 = vld [vmem:[%s1335_s27 + $0xc] sm:$0xff]   ;;  %v1365_v19 = vld [vmem:[%s1335_s27 + $0x14] sm:$0xff]   ;;  %v240_v26 = vshll.u32 %v1362_v18, 16  ;;  %v1377_v35 = vld [vmem:[%s1335_s27 + $0x1c] sm:$0xff]  }
  0x14   : > { %v229_v16 = vrot.slane %v227_v11, 1  ;;  %v543_v22 = vshll.u32 %v1359_v15, 16  ;;  %v547_v23 = vshrl.u32 %v1359_v15, 16  ;;  %v551_v27 = vshll.u32 %v1365_v19, 16  ;;  %v1372_v30 = vld [vmem:[%s1335_s27 + $0x18] sm:$0xff]   ;;  %v1383_v40 = vld [vmem:[%s1335_s27 + $0x20] sm:$0xff]  }
  0x15   : > { %v234_v17 = vrot.slane %v232_v12, 1  ;;  %v536_v20 = vshrl.u32 %v1045_v14, 16  ;;  %v538_v21 = vshll.u32 %v1045_v14, 16  ;;  %v244_v31 = vshrl.u32 %v1362_v18, 16  ;;  %v1388_v45 = vld [vmem:[%s1335_s27 + $0x24] sm:$0xff]  }
  0x16   : > { %v230_v24 = vor.u32 %v229_v16, %v225_v10  ;;  %v545_v29 = vrot.slane %v543_v22, 1  ;;  %v242_v33 = vrot.slane %v240_v26, 1  ;;  %v553_v34 = vrot.slane %v551_v27, 1  ;;  %v1398_v51 = vld [vmem:[%s1335_s27 + $0x28] sm:$0xf] }
  0x17   : > { %v238_v25 = vor.u32 %v236_v13, %v234_v17  ;;  %v540_v28 = vrot.slane %v538_v21, 1  ;;  %v555_v36 = vshrl.u32 %v1365_v19, 16  ;;  %v248_v39 = vshll.u32 %v1372_v30, 16  ;;  %v187_v57 = vld [vmem:[%s1335_s27 + $0x2c] sm:$0x1] }
  0x18   : > { %v235_v32 = vsel %vm223_vm0, %v230_v24, %v234_v17  ;;  %v549_v38 = vor.u32 %v547_v23, %v545_v29  ;;  %v246_v42 = vor.u32 %v244_v31, %v242_v33  ;;  %v559_v44 = vshll.u32 %v1377_v35, 16  ;;  %v1274_v2 = vld [vmem:[%s1335_s27 + $0x2c] sm:$0x1f]  }
  0x19   : > { %1162 = vmatprep.mubr.msk.bf16.mxu1 %vm283_vm1, %v235_v32  ;;  %v541_v37 = vor.u32 %v540_v28, %v536_v20  ;;  %v243_v41 = vsel %vm223_vm0, %v238_v25, %v242_v33  ;;  %v557_v43 = vor.u32 %v555_v36, %v553_v34  ;;  %v250_v48 = vrot.slane %v248_v39, 1 }
  0x1a   : > { %1163 = vmatmul.mubr.msk.bf16.vlgmr.msra.gmra.mrb[0].mxu1 %vm283_vm1, %v243_v41  ;;  %v554_v47 = vsel %vm223_vm0, %v549_v38, %v553_v34  ;;  %v252_v49 = vshrl.u32 %v1372_v30, 16  ;;  %v561_v53 = vrot.slane %v559_v44, 1  ;;  %v256_v54 = vshll.u32 %v1383_v40, 16 }
  0x1b   : > { %v546_v46 = vsel %vm223_vm0, %v541_v37, %v545_v29  ;;  %1175 = vmatpush3.bf16.msra.mxu1 %v1262_v4  ;;  %v563_v55 = vshrl.u32 %v1377_v35, 16  ;;  %v567_v56 = vshll.u32 %v1388_v45, 16  ;;  %v251_v58 = vsel %vm223_vm0, %v246_v42, %v250_v48 }
  0x1c   : > { %1194 = vmatprep.mubr.msk.bf16.mxu0 %vm283_vm1, %v546_v46  ;;  %v254_v59 = vor.u32 %v252_v49, %v250_v48  ;;  %1176 = vmatprep.subr.bf16.mxu1 %v1272_v50  ;;  %v1023_v60 = vcombine.low %v1398_v51, %v187_v57  ;;  %v260_v61 = vshrl.u32 %v1383_v40, 16  ;;  %v562_v62 = vsel %vm223_vm0, %v557_v43, %v561_v53  ;;  %v1473_v43 = vld [vmem:[%s1509_s2] ss:$0 sm:$0xff] }
  0x1d   : > { %1195 = vmatmul.mubr.msk.bf16.vlgmr.msra.gmra.mrb[0].mxu0 %vm283_vm1, %v554_v47  ;;  %1166 = vmatprep.mubr.msk.bf16.mxu1 %vm283_vm1, %v251_v58  ;;  %v258_v63 = vrot.slane %v256_v54, 1  ;;  %v565_v0 = vor.u32 %v563_v55, %v561_v53  ;;  %v569_v1 = vrot.slane %v567_v56, 1  ;;  %v571_v4 = vshrl.u32 %v1388_v45, 16 }
  0x1e   : > { %1207 = vmatpush3.bf16.msra.mxu0 %v1340_v5  ;;  %1198 = vmatprep.mubr.msk.bf16.mxu0 %vm283_vm1, %v562_v62  ;;  %v264_v3 = vshll.u32 %v1023_v60, 16  ;;  %v575_v11 = vshll.u32 %v1274_v2, 16  ;;  %v703_v5 = vld [vmem:[%s1335_s27 + $0x4] sm:$0xe]  ;;  %v268_v20 = vshrl.u32 %v1023_v60, 16  ;;  %v579_v23 = vshrl.u32 %v1274_v2, 16 }
  0x1f   : > { %1208 = vmatprep.subr.bf16.mxu0 %v1275_v52  ;;  %v259_v8 = vsel %vm223_vm0, %v254_v59, %v258_v63  ;;  %1177 = vmatpush3.bf16.msra.mxu1 %v1272_v50  ;;  %v262_v10 = vor.u32 %v260_v61, %v258_v63  ;;  %v573_v13 = vor.u32 %v571_v4, %v569_v1  ;;  %v714_v26 = vrot.slane %v1359_v15, 1 }
  0x20   : > { %v266_v12 = vrot.slane %v264_v3, 1  ;;  %v570_v14 = vsel %vm223_vm0, %v565_v0, %v569_v1  ;;  %v577_v16 = vrot.slane %v575_v11, 1  ;;  %v1063_v21 = vcombine.low %v703_v5, %v1350_v9 }
  0x21   : > { %v716_v9 = vrot.slane %v1365_v19, 1  ;;  %v718_v29 = vrot.slane %v1377_v35, 1  ;;  %v722_v32 = vrot.slane %v1274_v2, 1 }
  0x22   : > { %1209 = vmatpush3.bf16.msra.mxu0 %v1275_v52  ;;  %1167 = vmatmul.mubr.msk.bf16.gmra.mrb[4].mxu1 %vm283_vm1, %v259_v8  ;;  %v267_v17 = vsel %vm223_vm0, %v262_v10, %v266_v12  ;;  %v578_v22 = vsel %vm223_vm0, %v573_v13, %v577_v16  ;;  %v270_v24 = vor.u32 %v268_v20, %v266_v12  ;;  %v713_v25 = vrot.slane %v1063_v21, 1 }
  0x23   : > { %1170 = vmatprep.mubr.msk.bf16.mxu1 %vm283_vm1, %v267_v17  ;;  %v581_v27 = vor.u32 %v579_v23, %v577_v16  ;;  %v717_v31 = vsel %vm712_vm2, %v714_v26, %v716_v9  ;;  %v719_v15 = vsel %vm712_vm2, %v716_v9, %v718_v29 }
  0x24   : > { %v715_v28 = vsel %vm712_vm2, %v713_v25, %v714_v26 }
  0x25   : > { %1199 = vmatmul.mubr.msk.bf16.gmra.mrb[4].mxu0 %vm283_vm1, %v570_v14 }
  0x26   : > { %1202 = vmatprep.mubr.msk.bf16.mxu0 %vm283_vm1, %v578_v22 }
  0x2a   : > { %1171 = vmatmul.mubr.msk.bf16.gmra.mrb[8].mxu1 %vm283_vm1, %v270_v24 }
  0x2b   : > { %1178 = vmatprep.mubr.msk.bf16.mxu1 %vm283_vm1, %v1343_v6  ;;  %v720_v6 = vrot.slane %v1388_v45, 1 }
  0x2d   : > { %1203 = vmatmul.mubr.msk.bf16.gmra.mrb[8].mxu0 %vm283_vm1, %v581_v27  ;;  %v721_v19 = vsel %vm712_vm2, %v718_v29, %v720_v6  ;;  %v723_v33 = vsel %vm712_vm2, %v720_v6, %v722_v32 }
  0x2e   : > { %1210 = vmatprep.mubr.msk.bf16.mxu0 %vm283_vm1, %v715_v28 }
  0x32   : > { %1179 = vmatmul.mubr.msk.bf16.vlgmr.msra.gmra.mrb[0].mxu1 %vm283_vm1, %v1346_v7  ;;  %v1032_v7 = vcombine.low %v1398_v51, %v1398_v51 }
  0x33   : > { %1182 = vmatprep.mubr.msk.bf16.mxu1 %vm283_vm1, %v1362_v18 }
  0x35   : > { %1211 = vmatmul.mubr.msk.bf16.vlgmr.msra.gmra.mrb[0].mxu0 %vm283_vm1, %v717_v31 }
  0x36   : > { %1214 = vmatprep.mubr.msk.bf16.mxu0 %vm283_vm1, %v719_v15 }
  0x3a   : > { %1183 = vmatmul.mubr.msk.bf16.gmra.mrb[4].mxu1 %vm283_vm1, %v1372_v30 }
  0x3b   : > { %1186 = vmatprep.mubr.msk.bf16.mxu1 %vm283_vm1, %v1383_v40 }
  0x3d   : > { %1215 = vmatmul.mubr.msk.bf16.gmra.mrb[4].mxu0 %vm283_vm1, %v721_v19 }
  0x3e   : > { %1218 = vmatprep.mubr.msk.bf16.mxu0 %vm283_vm1, %v723_v33 }
  0x42   : > { %1187 = vmatmul.mubr.msk.bf16.gmra.mrb[12].mxu1 %vm283_vm1, %v1032_v7 }
  0x45   : > { %1219 = vmatmul.mubr.msk.bf16.gmra.mrb[12].mxu0 %vm283_vm1, %v722_v32 }
  0xfd   : > { %v1458_v18 = vpop.f32.mrb[8].mxu1 }
  0xfe   : > { %v1460_v34 = vpop.f32.mrb[9].mxu1 }
  0xff   : > { %v1173_v35 = vpop.f32.mrb[10].mxu1 }
 0x100   : > { %v1462_v30 = vpop.f32.mrb[8].mxu0  ;;  %v1466_v37 = vpop.f32.mrb[11].mxu1 }
 0x101   : > { %v1464_v36 = vpop.f32.mrb[9].mxu0 }
 0x102   : > { %v1205_v38 = vpop.f32.mrb[10].mxu0 }
 0x103   : > { %v1468_v39 = vpop.f32.mrb[11].mxu0 }
 0x105   : > { %v1180_v40 = vpop.f32.mrb[0].mxu1 }
 0x106   : > { %v442_v41 = vpop.f32.mrb[1].mxu1 }
 0x107   : > { %v1181_v44 = vpop.f32.mrb[2].mxu1 }
 0x108   : > { %v1212_v42 = vpop.f32.mrb[0].mxu0  ;;  %v445_v47 = vpop.f32.mrb[3].mxu1 }
 0x109   : > { %v1222_v45 = vadd.f32 %v1212_v42, %v1180_v40  ;;  %v788_v46 = vpop.f32.mrb[1].mxu0 }
 0x10a   : > { %v1223_v48 = vadd.f32 %v788_v46, %v442_v41  ;;  %v1213_v49 = vpop.f32.mrb[2].mxu0 }
 0x10b   : > { %v854_v50 = vadd.f32 %v1222_v45, %v1473_v43  ;;  %v1224_v51 = vadd.f32 %v1213_v49, %v1181_v44  ;;  %v791_v52 = vpop.f32.mrb[3].mxu0 }
 0x10c   : > { %v852_v53 = vadd.f32 %v1223_v48, %v1473_v43  ;;  %v1225_v54 = vadd.f32 %v791_v52, %v445_v47 }
 0x10d   : > { %v876_v55 = vmul.f32 0.01, %v854_v50  ;;  %v855_v56 = vadd.f32 %v1224_v51, %v1473_v43  ;;  %vm865_vm3 = vcmp.ge.f32.partialorder %v854_v50, 0.0  ;;  %v1184_v59 = vpop.f32.mrb[4].mxu1 }
 0x10e   : > { %v874_v57 = vmul.f32 0.01, %v852_v53  ;;  %v853_v58 = vadd.f32 %v1225_v54, %v1473_v43  ;;  %vm863_vm4 = vcmp.ge.f32.partialorder %v852_v53, 0.0  ;;  %v458_v61 = vpop.f32.mrb[5].mxu1 }
 0x10f   : > { %vm866_vm5 = vcmp.ge.f32.partialorder %v855_v56, 0.0  ;;  %v877_v60 = vmul.f32 0.01, %v855_v56  ;;  %v1185_v0 = vpop.f32.mrb[6].mxu1  ;;  %v887_v1 = vsel %vm865_vm3, %v854_v50, %v876_v55 }
 0x110   : > { %vm864_vm6 = vcmp.ge.f32.partialorder %v853_v58, 0.0  ;;  %v875_v62 = vmul.f32 0.01, %v853_v58  ;;  %v1216_v63 = vpop.f32.mrb[4].mxu0  ;;  %v461_v8 = vpop.f32.mrb[7].mxu1  ;;  %v885_v10 = vsel %vm863_vm4, %v852_v53, %v874_v57 }
 0x111   : > { %v888_v2 = vsel %vm866_vm5, %v855_v56, %v877_v60  ;;  %v1226_v3 = vadd.f32 %v1216_v63, %v1184_v59  ;;  %v804_v4 = vpop.f32.mrb[5].mxu0 }
 0x112   : > { %v1105_v11 = vpack.c.bf16 %v888_v2, %v887_v1  ;;  %v886_v5 = vsel %vm864_vm6, %v853_v58, %v875_v62  ;;  %v1227_v12 = vadd.f32 %v804_v4, %v458_v61  ;;  %v1217_v13 = vpop.f32.mrb[6].mxu0 }
 0x113   : > { %v1100_v14 = vpack.c.bf16 %v886_v5, %v885_v10  ;;  %v858_v16 = vadd.f32 %v1226_v3, %v1473_v43  ;;  %v1228_v17 = vadd.f32 %v1217_v13, %v1185_v0  ;;  %v807_v20 = vpop.f32.mrb[7].mxu0 }
 0x114   : > { %1122 = vst [vmem:[%s1483_s13 + $0x8] sm:$0xff] %v1105_v11   ;;  %v856_v21 = vadd.f32 %v1227_v12, %v1473_v43  ;;  %v1229_v22 = vadd.f32 %v807_v20, %v461_v8 }
 0x115   : > { %1101 = vst [vmem:[%s1483_s13] sm:$0xff] %v1100_v14   ;;  %v880_v23 = vmul.f32 0.01, %v858_v16  ;;  %v859_v24 = vadd.f32 %v1228_v17, %v1473_v43  ;;  %vm869_vm7 = vcmp.ge.f32.partialorder %v858_v16, 0.0  ;;  %v1188_v27 = vpop.f32.mrb[12].mxu1 }
 0x116   : > { %vm867_vm8 = vcmp.ge.f32.partialorder %v856_v21, 0.0  ;;  %v878_v25 = vmul.f32 0.01, %v856_v21  ;;  %v857_v26 = vadd.f32 %v1229_v22, %v1473_v43  ;;  %v483_v9 = vadd.f32 %v1188_v27, %v1458_v18  ;;  %v474_v29 = vpop.f32.mrb[13].mxu1 }
 0x117   : > { %vm870_vm9 = vcmp.ge.f32.partialorder %v859_v24, 0.0  ;;  %v881_v28 = vmul.f32 0.01, %v859_v24  ;;  %v475_v15 = vadd.f32 %v474_v29, %v1460_v34  ;;  %v1189_v32 = vpop.f32.mrb[14].mxu1  ;;  %v891_v19 = vsel %vm869_vm7, %v858_v16, %v880_v23 }
 0x118   : > { %vm868_vm10 = vcmp.ge.f32.partialorder %v857_v26, 0.0  ;;  %v879_v31 = vmul.f32 0.01, %v857_v26  ;;  %v1220_v6 = vpop.f32.mrb[12].mxu0  ;;  %v889_v33 = vsel %vm867_vm8, %v856_v21, %v878_v25  ;;  %v702_v35 = vadd.f32 %v1462_v30, %v483_v9  ;;  %v477_v40 = vpop.f32.mrb[15].mxu1 }
 0x119   : > { %v892_v7 = vsel %vm870_vm9, %v859_v24, %v881_v28  ;;  %v820_v38 = vpop.f32.mrb[13].mxu0  ;;  %v700_v18 = vadd.f32 %v1464_v36, %v475_v15  ;;  %v478_v44 = vadd.f32 %v477_v40, %v1466_v37 }
 0x11a   : > { %v1115_v41 = vpack.c.bf16 %v892_v7, %v891_v19  ;;  %v890_v42 = vsel %vm868_vm10, %v857_v26, %v879_v31  ;;  %v1221_v45 = vpop.f32.mrb[14].mxu0  ;;  %v844_v34 = vadd.f32 %v1220_v6, %v702_v35 }
 0x11b   : > { %v1110_v46 = vpack.c.bf16 %v890_v42, %v889_v33  ;;  %v823_v47 = vpop.f32.mrb[15].mxu0  ;;  %v842_v48 = vadd.f32 %v820_v38, %v700_v18  ;;  %v701_v49 = vadd.f32 %v1468_v39, %v478_v44 }
 0x11c   : > { %1124 = vst [vmem:[%s1483_s13 + $0x18] sm:$0xff] %v1115_v41   ;;  %v862_v30 = vadd.f32 %v1473_v43, %v844_v34 }
 0x11d   : > { %1123 = vst [vmem:[%s1483_s13 + $0x10] sm:$0xff] %v1110_v46   ;;  %v860_v50 = vadd.f32 %v1473_v43, %v842_v48  ;;  %v843_v51 = vadd.f32 %v823_v47, %v701_v49 }
 0x11e   : > { %vm873_vm11 = vcmp.ge.f32.partialorder %v862_v30, 0.0  ;;  %v884_v36 = vmul.f32 0.01, %v862_v30 }
 0x11f   : > { %v882_v52 = vmul.f32 0.01, %v860_v50  ;;  %v861_v37 = vadd.f32 %v1473_v43, %v843_v51  ;;  %vm871_vm12 = vcmp.ge.f32.partialorder %v860_v50, 0.0 }
 0x120   : > { %v895_v53 = vsel %vm873_vm11, %v862_v30, %v884_v36 }
 0x121   : > { %v1096_v54 = vpack.c.bf16 %v895_v53, %v895_v53  ;;  %vm872_vm13 = vcmp.ge.f32.partialorder %v861_v37, 0.0  ;;  %v883_v55 = vmul.f32 0.01, %v861_v37  ;;  %v893_v56 = vsel %vm871_vm12, %v860_v50, %v882_v52 }
 0x123   : > { %951 = vst [vmem:[%s1483_s13 + $0x28] sm:$0xf] %v1096_v54  ;;  %v894_v39 = vsel %vm872_vm13, %v861_v37, %v883_v55 }
 0x124   : > { %v1120_v57 = vpack.c.bf16 %v894_v39, %v893_v56 }
 0x126   : > { %1125 = vst [vmem:[%s1483_s13 + $0x20] sm:$0xff] %v1120_v57  }
 0x127 PF: > { %s13_s12 = sadd.s32 1, %s1284_s12  }
 0x128   : > { %p10_p4 = scmp.ge.s32.totalorder %s13_s12, 4  }
 0x12a   :  { %12 = sbr.rel (!%p10_p4) target bundleno = 1 (0x1), region = 65 }

// kernel: _lambda_.9
= control target key start
LH: loop header
LB: loop body
LE: loop exit
PB: predicated region body
PF: predicated region fallthrough
CT: control target
= control target key end

     0   :  { %s935_s12 = smov 0   ;;  %s1041_s0 = inlined_call_operand.vmem [shape: bf16[2,40,64], index: 0, kind: input, shape index: {}]   ;;  %s1042_s1 = inlined_call_operand.vmem [shape: bf16[4,64,128], index: 1, kind: input, shape index: {}]   ;;  %s1043_s2 = inlined_call_operand.vmem [shape: f32[1,128], index: 2, kind: input, shape index: {}]   ;;  %s1044_s3 = inlined_call_operand.vmem [shape: bf16[2,32,128], index: 3, kind: output, shape index: {}]  }
   0x1 LB: > { %s707_s13 = sadd.s32 4294967295, %s913_s12   ;;  %p711_p0 = scmp.ge.s32.totalorder %s913_s12, 1  ;;  %s913_s12 = sphi %s935_s12, %s13_s12  }
   0x2   : > { %p137_p1 = scmp.lt.s32.totalorder %s913_s12, 3 }
   0x4   : > { %p138_p2 = pnand %p711_p0, %p137_p1 }
   0x5   : > { %v885_v0 = vld [vmem:[%s1042_s1 + $0x20] sm:$0xff] (!%p138_p2)   ;;  %p161_p3 = scmp.lt.s32.totalorder (!%p138_p2), %s707_s13, 1  ;;  %v887_v2 = vld [vmem:[%s1042_s1 + $0x28] sm:$0xff] (!%p138_p2)   ;;  %v889_v4 = vld [vmem:[%s1042_s1 + $0x30] sm:$0xff] (!%p138_p2)   ;;  %vm207_vm0 = vsmask.f32 (!%p138_p2), 7424 }
   0x6   : > { %141 = sbr.rel (%p138_p2) target bundleno = 271 (0x10f), region = 32  ;;  %v886_v1 = vld [vmem:[%s1042_s1 + $0x40] sm:$0xff] (!%p138_p2)   ;;  %816 = vmatprep.subr.bf16.mxu1 (!%p138_p2), %v885_v0  ;;  %v888_v3 = vld [vmem:[%s1042_s1 + $0x48] sm:$0xff] (!%p138_p2)   ;;  %v890_v5 = vld [vmem:[%s1042_s1 + $0x50] sm:$0xff] (!%p138_p2)   ;;  %vm402_vm1 = vsmask.f32 (!%p138_p2), 5376 }
   0x7   : > { %840 = vmatprep.subr.bf16.mxu0 (!%p138_p2), %v886_v1  ;;  %817 = vmatpush3.bf16.msra.mxu1 (!%p138_p2), %v885_v0  ;;  %v891_v6 = vld [vmem:[%s1042_s1 + $0x38] sm:$0xff] (!%p138_p2)   ;;  %v895_v17 = vld [vmem:[%s1042_s1] sm:$0xff] (!%p138_p2)   ;;  %vm252_vm2 = vcmask (!%p138_p2), 523264   ;;  %v900_v39 = vld [vmem:[%s1042_s1 + $0x8] sm:$0xff] (!%p138_p2)   ;;  %vm520_vm3 = vcmask (!%p138_p2), 1044480  }
   0x8   : > { %841 = vmatpush3.bf16.msra.mxu0 (!%p138_p2), %v886_v1  ;;  %818 = vmatprep.subr.bf16.mxu1 (!%p138_p2), %v887_v2  ;;  %v892_v9 = vld [vmem:[%s1042_s1 + $0x58] sm:$0xff] (!%p138_p2)   ;;  %v897_v19 = vld [vmem:[%s1042_s1 + $0x60] sm:$0xff] (!%p138_p2)   ;;  %v901_v45 = vld [vmem:[%s1042_s1 + $0x68] sm:$0xff] (!%p138_p2)  }
   0x9   : > { %842 = vmatprep.subr.bf16.mxu0 (!%p138_p2), %v888_v3  ;;  %v902_v48 = vld [vmem:[%s1042_s1 + $0x10] sm:$0xff] (!%p138_p2)   ;;  %v904_v53 = vld [vmem:[%s1042_s1 + $0x18] sm:$0xff] (!%p138_p2)   ;;  %v769_v62 = vld [vmem:[%s1043_s2] ss:$0 sm:$0xff] (!%p138_p2) }
   0xa   : > { %v903_v52 = vld [vmem:[%s1042_s1 + $0x70] sm:$0xff] (!%p138_p2)   ;;  %v905_v55 = vld [vmem:[%s1042_s1 + $0x78] sm:$0xff] (!%p138_p2)  }
   0xb   : > { %819 = vmatpush3.bf16.msra.mxu1 (!%p138_p2), %v887_v2 }
   0xc   : > { %843 = vmatpush3.bf16.msra.mxu0 (!%p138_p2), %v888_v3  ;;  %820 = vmatprep.subr.bf16.mxu1 (!%p138_p2), %v889_v4 }
   0xd   : > { %s1046_s13 = smov (!%p161_p3, %s707_s13), 1  ;;  %844 = vmatprep.subr.bf16.mxu0 %v890_v5 }
   0xe   : > { %s876_s24 = smul.u32 20, %s1046_s13  ;;  %s776_s27 = sshll.u32 %s1046_s13, 4 }
   0xf   : > { %821 = vmatpush3.bf16.msra.mxu1 %v889_v4  ;;  %s170_s30 = scalar_lea.vmem %s1044_s3, %s776_s27 }
  0x10   : > { %s967_s29 = scalar_lea.vmem %s1041_s0, %s876_s24  ;;  %845 = vmatpush3.bf16.msra.mxu0 %v890_v5  ;;  %822 = vmatprep.subr.bf16.mxu1 %v891_v6 }
  0x11   : > { %v172_v7 = vld [vmem:[%s967_s29] sm:$0xf]  ;;  %v974_v8 = vld [vmem:[%s967_s29 + $0x4] sm:$0xf]  ;;  %v981_v11 = vld [vmem:[%s967_s29 + $0x8] sm:$0xff]   ;;  %846 = vmatprep.subr.bf16.mxu0 %v892_v9 }
  0x12   : > { %v723_v10 = vcombine.low %v172_v7, %v974_v8  ;;  %v385_v12 = vld [vmem:[%s967_s29] sm:$0xc]  ;;  %v216_v15 = vshll.u32 %v981_v11, 16  ;;  %v220_v16 = vshrl.u32 %v981_v11, 16  ;;  %v522_v50 = vrot.slane %v981_v11, 3 }
  0x13   : > { %v746_v18 = vcombine.low %v385_v12, %v974_v8  ;;  %v898_v26 = vld [vmem:[%s967_s29 + $0x10] ss:$0 sps:$4 sm:$0x11]   ;;  %823 = vmatpush3.bf16.msra.mxu1 %v891_v6  ;;  %v507_v46 = vld [vmem:[%s967_s29] sm:$0x8] }
  0x14   : > { %v209_v13 = vshrl.u32 %v723_v10, 16  ;;  %v211_v14 = vshll.u32 %v723_v10, 16  ;;  %v218_v21 = vrot.slane %v216_v15, 1  ;;  %v411_v22 = vrot.slane %v220_v16, 2  ;;  %847 = vmatpush3.bf16.msra.mxu0 %v892_v9  ;;  %828 = vmatprep.subr.bf16.mxu1 %v895_v17 }
  0x15   : > { %v412_v23 = vrot.slane %v216_v15, 3  ;;  %v404_v24 = vshrl.u32 %v746_v18, 16  ;;  %v407_v25 = vshll.u32 %v746_v18, 16  ;;  %v899_v29 = vld [vmem:[%s967_s29 + $0x10] ss:$0 sps:$4 sm:$0x77]   ;;  %852 = vmatprep.subr.bf16.mxu0 %v897_v19  ;;  %v762_v49 = vcombine.low %v507_v46, %v974_v8 }
  0x16   : > { %v213_v20 = vrot.slane %v211_v14, 1  ;;  %v222_v28 = vor.u32 %v220_v16, %v218_v21  ;;  %v224_v33 = vshll.u32 %v898_v26, 16  ;;  %v416_v35 = vshrl.u32 %v899_v29, 16 }
  0x17   : > { %v406_v30 = vrot.slane %v404_v24, 2  ;;  %v409_v31 = vrot.slane %v407_v25, 3  ;;  %v413_v32 = vor.u32 %v412_v23, %v411_v22  ;;  %v419_v36 = vshll.u32 %v899_v29, 16 }
  0x18   : > { %v214_v27 = vor.u32 %v213_v20, %v209_v13  ;;  %v226_v38 = vrot.slane %v224_v33, 1  ;;  %v418_v40 = vrot.slane %v416_v35, 2  ;;  %v521_v51 = vrot.slane %v762_v49, 3 }
  0x19   : > { %v410_v37 = vor.u32 %v409_v31, %v406_v30  ;;  %v421_v41 = vrot.slane %v419_v36, 3  ;;  %v524_v56 = vrot.slane %v899_v29, 3 }
  0x1a   : > { %v219_v34 = vsel %vm207_vm0, %v214_v27, %v218_v21  ;;  %v227_v43 = vsel %vm207_vm0, %v222_v28, %v226_v38  ;;  %v523_v54 = vsel %vm520_vm3, %v521_v51, %v522_v50 }
  0x1b   : > { %824 = vmatprep.mubr.msk.bf16.mxu1 %vm252_vm2, %v219_v34  ;;  %v414_v42 = vsel %vm402_vm1, %v410_v37, %v413_v32  ;;  %v422_v44 = vor.u32 %v421_v41, %v418_v40  ;;  %v525_v57 = vsel %vm520_vm3, %v522_v50, %v524_v56 }
  0x1c   : > { %848 = vmatprep.mubr.msk.bf16.mxu0 %vm252_vm2, %v414_v42  ;;  %825 = vmatmul.mubr.msk.bf16.vlgmr.msra.gmra.mrb[0].mxu1 %vm252_vm2, %v227_v43 }
  0x1d   : > { %829 = vmatpush3.bf16.msra.mxu1 %v895_v17  ;;  %836 = vmatprep.mubr.msk.bf16.mxu1 %vm252_vm2, %v723_v10  ;;  %v423_v47 = vsel %vm402_vm1, %v413_v32, %v422_v44 }
  0x1e   : > { %830 = vmatprep.subr.bf16.mxu1 %v900_v39  ;;  %849 = vmatmul.mubr.msk.bf16.vlgmr.msra.gmra.mrb[0].mxu0 %vm252_vm2, %v423_v47 }
  0x1f   : > { %853 = vmatpush3.bf16.msra.mxu0 %v897_v19  ;;  %860 = vmatprep.mubr.msk.bf16.mxu0 %vm252_vm2, %v523_v54 }
  0x20   : > { %854 = vmatprep.subr.bf16.mxu0 %v901_v45 }
  0x21   : > { %831 = vmatpush3.bf16.msra.mxu1 %v900_v39 }
  0x22   : > { %832 = vmatprep.subr.bf16.mxu1 %v902_v48 }
  0x23   : > { %855 = vmatpush3.bf16.msra.mxu0 %v901_v45 }
  0x24   : > { %856 = vmatprep.subr.bf16.mxu0 %v903_v52 }
  0x25   : > { %833 = vmatpush3.bf16.msra.mxu1 %v902_v48 }
  0x26   : > { %834 = vmatprep.subr.bf16.mxu1 %v904_v53 }
  0x27   : > { %857 = vmatpush3.bf16.msra.mxu0 %v903_v52 }
  0x28   : > { %858 = vmatprep.subr.bf16.mxu0 %v905_v55 }
  0x29   : > { %835 = vmatpush3.bf16.msra.mxu1 %v904_v53 }
  0x2b   : > { %859 = vmatpush3.bf16.msra.mxu0 %v905_v55 }
  0x2c   : > { %837 = vmatmul.mubr.msk.bf16.vlgmr.msra.gmra.mrb[0].mxu1 %vm252_vm2, %v981_v11 }
  0x2e   : > { %861 = vmatmul.mubr.msk.bf16.vlgmr.msra.gmra.mrb[0].mxu0 %vm252_vm2, %v525_v57 }
  0xff   : > { %v838_v58 = vpop.f32.mrb[0].mxu1 }
 0x100   : > { %v370_v59 = vpop.f32.mrb[1].mxu1 }
 0x101   : > { %v839_v60 = vpop.f32.mrb[2].mxu1  ;;  %v862_v61 = vpop.f32.mrb[0].mxu0 }
 0x102   : > { %v373_v63 = vpop.f32.mrb[3].mxu1  ;;  %v864_v0 = vadd.f32 %v862_v61, %v838_v58  ;;  %v590_v1 = vpop.f32.mrb[1].mxu0 }
 0x103   : > { %v865_v2 = vadd.f32 %v590_v1, %v370_v59  ;;  %v863_v3 = vpop.f32.mrb[2].mxu0 }
 0x104   : > { %v618_v4 = vadd.f32 %v864_v0, %v769_v62  ;;  %v866_v5 = vadd.f32 %v863_v3, %v839_v60  ;;  %v593_v6 = vpop.f32.mrb[3].mxu0 }
 0x105   : > { %v616_v7 = vadd.f32 %v865_v2, %v769_v62  ;;  %v867_v8 = vadd.f32 %v593_v6, %v373_v63 }
 0x106   : > { %v626_v9 = vmul.f32 0.01, %v618_v4  ;;  %v619_v10 = vadd.f32 %v866_v5, %v769_v62  ;;  %vm622_vm4 = vcmp.ge.f32.partialorder %v618_v4, 0.0 }
 0x107   : > { %v624_v11 = vmul.f32 0.01, %v616_v7  ;;  %v617_v12 = vadd.f32 %v867_v8, %v769_v62  ;;  %vm620_vm5 = vcmp.ge.f32.partialorder %v616_v7, 0.0 }
 0x108   : > { %vm623_vm6 = vcmp.ge.f32.partialorder %v619_v10, 0.0  ;;  %v627_v13 = vmul.f32 0.01, %v619_v10  ;;  %v630_v15 = vsel %vm622_vm4, %v618_v4, %v626_v9 }
 0x109   : > { %vm621_vm7 = vcmp.ge.f32.partialorder %v617_v12, 0.0  ;;  %v625_v14 = vmul.f32 0.01, %v617_v12  ;;  %v628_v17 = vsel %vm620_vm5, %v616_v7, %v624_v11 }
 0x10a   : > { %v631_v16 = vsel %vm623_vm6, %v619_v10, %v627_v13 }
 0x10b   : > { %v789_v18 = vpack.c.bf16 %v631_v16, %v630_v15  ;;  %v629_v19 = vsel %vm621_vm7, %v617_v12, %v625_v14 }
 0x10c   : > { %v784_v20 = vpack.c.bf16 %v629_v19, %v628_v17 }
 0x10d   : > { %791 = vst [vmem:[%s170_s30 + $0x8] sm:$0xff] %v789_v18  }
 0x10e   : > { %785 = vst [vmem:[%s170_s30] sm:$0xff] %v784_v20  }
 0x10f PF: > { %s13_s12 = sadd.s32 1, %s913_s12  }
 0x110   : > { %p10_p4 = scmp.ge.s32.totalorder %s13_s12, 4  }
 0x112   :  { %12 = sbr.rel (!%p10_p4) target bundleno = 1 (0x1), region = 65 }

// kernel: _lambda_.11
= control target key start
LH: loop header
LB: loop body
LE: loop exit
PB: predicated region body
PF: predicated region fallthrough
CT: control target
= control target key end

     0   :  { %v180_v0 = vmov 0.0   ;;  %vm181_vm0 = vmmov 0   ;;  %s235_s1 = inlined_call_operand.vmem [shape: bf16[128,128], index: 1, kind: input, shape index: {}]   ;;  %s236_s0 = inlined_call_operand.vmem [shape: bf16[2,128], index: 0, kind: input, shape index: {}]   ;;  %s237_s2 = inlined_call_operand.vmem [shape: f32[1,128], index: 2, kind: input, shape index: {}]   ;;  %s238_s3 = inlined_call_operand.vmem [shape: f32[2,128], index: 3, kind: output, shape index: {}]  }
   0x1   :  { %150 = vmatprep.subr.bf16.mxu0 %v180_v0  ;;  %v172_v1 = vld [vmem:[%s235_s1] sm:$0xff]   ;;  %166 = vmatprep.mubr.msk.bf16.mxu0 %vm181_vm0, %v180_v0  ;;  %v173_v2 = vld [vmem:[%s235_s1 + $0x8] sm:$0xff]   ;;  %v174_v3 = vld [vmem:[%s235_s1 + $0x10] sm:$0xff]  }
   0x2   :  { %151 = vmatpush3.bf16.msra.mxu0 %v172_v1  ;;  %v175_v4 = vld [vmem:[%s235_s1 + $0x18] sm:$0xff]   ;;  %v176_v5 = vld [vmem:[%s235_s1 + $0x20] sm:$0xff]   ;;  %v177_v6 = vld [vmem:[%s235_s1 + $0x28] sm:$0xff]  }
   0x3   :  { %152 = vmatprep.subr.bf16.mxu0 %v180_v0  ;;  %v178_v7 = vld [vmem:[%s235_s1 + $0x30] sm:$0xff]   ;;  %v179_v8 = vld [vmem:[%s235_s1 + $0x38] sm:$0xff]   ;;  %v15_v9 = vld [vmem:[%s236_s0] sm:$0x1] }
   0x4   :  { %v132_v10 = vld [vmem:[%s237_s2] ss:$0 sm:$0xff] }
   0x6   :  { %153 = vmatpush3.bf16.msra.mxu0 %v173_v2 }
   0x7   :  { %154 = vmatprep.subr.bf16.mxu0 %v180_v0 }
   0xa   :  { %155 = vmatpush3.bf16.msra.mxu0 %v174_v3 }
   0xb   :  { %156 = vmatprep.subr.bf16.mxu0 %v180_v0 }
   0xe   :  { %157 = vmatpush3.bf16.msra.mxu0 %v175_v4 }
   0xf   :  { %158 = vmatprep.subr.bf16.mxu0 %v180_v0 }
  0x12   :  { %159 = vmatpush3.bf16.msra.mxu0 %v176_v5 }
  0x13   :  { %160 = vmatprep.subr.bf16.mxu0 %v180_v0 }
  0x16   :  { %161 = vmatpush3.bf16.msra.mxu0 %v177_v6 }
  0x17   :  { %162 = vmatprep.subr.bf16.mxu0 %v180_v0 }
  0x1a   :  { %163 = vmatpush3.bf16.msra.mxu0 %v178_v7 }
  0x1b   :  { %164 = vmatprep.subr.bf16.mxu0 %v180_v0 }
  0x1e   :  { %165 = vmatpush3.bf16.msra.mxu0 %v179_v8 }
  0x21   :  { %167 = vmatmul.mubr.bf16.vlgmr.msra.gmra.mrb[0].mxu0 %v15_v9 }
  0xf4   :  { %v121_v11 = vpop.f32.mrb[0].mxu0 }
  0xf5   :  { %v122_v12 = vadd.f32 %v132_v10, %v121_v11  ;;  %v168_v13 = vpop.f32.mrb[1].mxu0 }
  0xf6   :  { %v124_v14 = vpop.f32.mrb[2].mxu0 }
  0xf7   :  { %127 = vst [vmem:[%s238_s3] sm:$0x3] %v122_v12  ;;  %v169_v15 = vpop.f32.mrb[3].mxu0 }

// kernel: _lambda_.10
= control target key start
LH: loop header
LB: loop body
LE: loop exit
PB: predicated region body
PF: predicated region fallthrough
CT: control target
= control target key end

     0   :  { %s1050_s12 = smov 0   ;;  %s1224_s0 = inlined_call_operand.vmem [shape: bf16[2,24,128], index: 0, kind: input, shape index: {}]   ;;  %s1225_s1 = inlined_call_operand.vmem [shape: bf16[4,128,128], index: 1, kind: input, shape index: {}]   ;;  %s1226_s2 = inlined_call_operand.vmem [shape: f32[1,128], index: 2, kind: input, shape index: {}]   ;;  %s1227_s3 = inlined_call_operand.vmem [shape: bf16[2,16,128], index: 3, kind: output, shape index: {}]  }
   0x1 LB: > { %s748_s13 = sadd.s32 4294967295, %s1026_s12   ;;  %p752_p0 = scmp.ge.s32.totalorder %s1026_s12, 1  ;;  %s1026_s12 = sphi %s1050_s12, %s13_s12  }
   0x2   : > { %p137_p1 = scmp.lt.s32.totalorder %s1026_s12, 3 }
   0x4   : > { %p138_p2 = pnand %p752_p0, %p137_p1 }
   0x5   : > { %v982_v0 = vld [vmem:[%s1225_s1 + $0x40] sm:$0xff] (!%p138_p2)   ;;  %v1028_v1 = vmov (!%p138_p2), 0.0   ;;  %v984_v3 = vld [vmem:[%s1225_s1 + $0x48] sm:$0xff] (!%p138_p2)   ;;  %vm1029_vm0 = vmmov (!%p138_p2), 0   ;;  %p161_p3 = scmp.lt.s32.totalorder (!%p138_p2), %s748_s13, 1  ;;  %v986_v5 = vld [vmem:[%s1225_s1 + $0x50] sm:$0xff] (!%p138_p2)  }
   0x6   : > { %141 = sbr.rel (%p138_p2) target bundleno = 296 (0x128), region = 32  ;;  %891 = vmatprep.subr.bf16.mxu0 (!%p138_p2), %v1028_v1  ;;  %911 = vmatprep.subr.bf16.mxu1 (!%p138_p2), %v1028_v1  ;;  %v983_v2 = vld [vmem:[%s1225_s1] sm:$0xff] (!%p138_p2)   ;;  %v985_v4 = vld [vmem:[%s1225_s1 + $0x8] sm:$0xff] (!%p138_p2)   ;;  %v987_v6 = vld [vmem:[%s1225_s1 + $0x10] sm:$0xff] (!%p138_p2)   ;;  %vm218_vm1 = vsmask.f32 (!%p138_p2), 7424 }
   0x7   : > { %892 = vmatpush3.bf16.msra.mxu0 (!%p138_p2), %v982_v0  ;;  %907 = vmatprep.mubr.msk.bf16.mxu0 (!%p138_p2), %vm1029_vm0, %v1028_v1  ;;  %v988_v7 = vld [vmem:[%s1225_s1 + $0x58] sm:$0xff] (!%p138_p2)   ;;  %v990_v9 = vld [vmem:[%s1225_s1 + $0x60] sm:$0xff] (!%p138_p2)   ;;  %v992_v13 = vld [vmem:[%s1225_s1 + $0x68] sm:$0xff] (!%p138_p2)   ;;  %vm441_vm2 = vsmask.f32 (!%p138_p2), 6400  ;;  %vm572_vm3 = vcmask (!%p138_p2), 1045504  }
   0x8   : > { %912 = vmatpush3.bf16.msra.mxu1 (!%p138_p2), %v983_v2  ;;  %893 = vmatprep.subr.bf16.mxu0 (!%p138_p2), %v1028_v1  ;;  %v989_v8 = vld [vmem:[%s1225_s1 + $0x18] sm:$0xff] (!%p138_p2)   ;;  %v991_v10 = vld [vmem:[%s1225_s1 + $0x20] sm:$0xff] (!%p138_p2)   ;;  %v993_v16 = vld [vmem:[%s1225_s1 + $0x28] sm:$0xff] (!%p138_p2)  }
   0x9   : > { %913 = vmatprep.subr.bf16.mxu1 (!%p138_p2), %v1028_v1  ;;  %927 = vmatprep.mubr.msk.bf16.mxu1 (!%p138_p2), %vm1029_vm0, %v1028_v1  ;;  %v994_v18 = vld [vmem:[%s1225_s1 + $0x70] sm:$0xff] (!%p138_p2)   ;;  %v996_v23 = vld [vmem:[%s1225_s1 + $0x78] sm:$0xff] (!%p138_p2)   ;;  %v1001_v29 = vld [vmem:[%s1225_s1 + $0x80] sm:$0xff] (!%p138_p2)  }
   0xa   : > { %v995_v22 = vld [vmem:[%s1225_s1 + $0x30] sm:$0xff] (!%p138_p2)   ;;  %v997_v24 = vld [vmem:[%s1225_s1 + $0x38] sm:$0xff] (!%p138_p2)   ;;  %v1002_v30 = vld [vmem:[%s1225_s1 + $0xc0] sm:$0xff] (!%p138_p2)  }
   0xb   : > { %894 = vmatpush3.bf16.msra.mxu0 (!%p138_p2), %v984_v3  ;;  %v1003_v31 = vld [vmem:[%s1225_s1 + $0x88] sm:$0xff] (!%p138_p2)   ;;  %v1005_v33 = vld [vmem:[%s1225_s1 + $0x90] sm:$0xff] (!%p138_p2)   ;;  %v1007_v35 = vld [vmem:[%s1225_s1 + $0x98] sm:$0xff] (!%p138_p2)  }
   0xc   : > { %914 = vmatpush3.bf16.msra.mxu1 (!%p138_p2), %v985_v4  ;;  %895 = vmatprep.subr.bf16.mxu0 (!%p138_p2), %v1028_v1  ;;  %v1004_v32 = vld [vmem:[%s1225_s1 + $0xc8] sm:$0xff] (!%p138_p2)   ;;  %v1006_v34 = vld [vmem:[%s1225_s1 + $0xd0] sm:$0xff] (!%p138_p2)   ;;  %v1008_v36 = vld [vmem:[%s1225_s1 + $0xd8] sm:$0xff] (!%p138_p2)  }
   0xd   : > { %s1229_s13 = smov (!%p161_p3, %s748_s13), 1  ;;  %915 = vmatprep.subr.bf16.mxu1 %v1028_v1  ;;  %v1009_v38 = vld [vmem:[%s1225_s1 + $0xa0] sm:$0xff]   ;;  %v1011_v42 = vld [vmem:[%s1225_s1 + $0xa8] sm:$0xff]   ;;  %v1013_v49 = vld [vmem:[%s1225_s1 + $0xb0] sm:$0xff]  }
   0xe   : > { %s971_s26 = smul.u32 12, %s1229_s13  ;;  %v1010_v41 = vld [vmem:[%s1225_s1 + $0xe0] sm:$0xff]   ;;  %v1012_v47 = vld [vmem:[%s1225_s1 + $0xe8] sm:$0xff]   ;;  %v1014_v54 = vld [vmem:[%s1225_s1 + $0xf0] sm:$0xff]   ;;  %s847_s8 = sshll.u32 %s1229_s13, 3 }
   0xf   : > { %896 = vmatpush3.bf16.msra.mxu0 %v986_v5  ;;  %v1015_v56 = vld [vmem:[%s1225_s1 + $0xb8] sm:$0xff]   ;;  %s170_s11 = scalar_lea.vmem %s1227_s3, %s847_s8 }
  0x10   : > { %916 = vmatpush3.bf16.msra.mxu1 %v987_v6  ;;  %897 = vmatprep.subr.bf16.mxu0 %v1028_v1  ;;  %s1100_s6 = scalar_lea.vmem %s1224_s0, %s971_s26  ;;  %v1016_v59 = vld [vmem:[%s1225_s1 + $0xf8] sm:$0xff]  }
  0x11   : > { %917 = vmatprep.subr.bf16.mxu1 %v1028_v1  ;;  %v190_v11 = vld [vmem:[%s1100_s6] sm:$0xf]  ;;  %v1112_v12 = vld [vmem:[%s1100_s6 + $0x4] sm:$0xf] }
  0x12   : > { %v772_v14 = vcombine.low %v190_v11, %v1112_v12  ;;  %v999_v15 = vld [vmem:[%s1100_s6 + $0x8] ss:$0 sps:$4 sm:$0x11]   ;;  %v1000_v27 = vld [vmem:[%s1100_s6] sm:$0xff]  }
  0x13   : > { %898 = vmatpush3.bf16.msra.mxu0 %v988_v7  ;;  %v227_v21 = vshll.u32 %v999_v15, 16  ;;  %v416_v37 = vld [vmem:[%s1100_s6] sm:$0xe]  ;;  %v1018_v40 = vld [vmem:[%s1100_s6 + $0x8] ss:$0 sps:$4 sm:$0x33]  }
  0x14   : > { %918 = vmatpush3.bf16.msra.mxu1 %v989_v8  ;;  %899 = vmatprep.subr.bf16.mxu0 %v1028_v1  ;;  %v222_v17 = vshll.u32 %v772_v14, 16  ;;  %v220_v19 = vshrl.u32 %v772_v14, 16  ;;  %v807_v39 = vcombine.low %v416_v37, %v1112_v12  ;;  %v451_v45 = vshrl.u32 %v1018_v40, 16  ;;  %v551_v48 = vld [vmem:[%s1100_s6] sm:$0xc] }
  0x15   : > { %919 = vmatprep.subr.bf16.mxu1 %v1028_v1  ;;  %v229_v26 = vrot.slane %v227_v21, 1  ;;  %v454_v46 = vshll.u32 %v1018_v40, 16  ;;  %v833_v55 = vcombine.low %v551_v48, %v1112_v12  ;;  %v574_v61 = vrot.slane %v1018_v40, 2  ;;  %v842_v14 = vld [vmem:[%s1226_s2] ss:$0 sm:$0xff] }
  0x16   : > { %v224_v20 = vrot.slane %v222_v17, 1  ;;  %v443_v43 = vshrl.u32 %v807_v39, 16  ;;  %v446_v44 = vshll.u32 %v807_v39, 16  ;;  %v453_v52 = vrot.slane %v451_v45, 1 }
  0x17   : > { %900 = vmatpush3.bf16.msra.mxu0 %v990_v9  ;;  %v456_v53 = vrot.slane %v454_v46, 2  ;;  %v573_v60 = vrot.slane %v833_v55, 2 }
  0x18   : > { %920 = vmatpush3.bf16.msra.mxu1 %v991_v10  ;;  %901 = vmatprep.subr.bf16.mxu0 %v1028_v1  ;;  %v225_v25 = vor.u32 %v224_v20, %v220_v19  ;;  %v445_v50 = vrot.slane %v443_v43, 1  ;;  %v448_v51 = vrot.slane %v446_v44, 2 }
  0x19   : > { %921 = vmatprep.subr.bf16.mxu1 %v1028_v1  ;;  %v457_v58 = vor.u32 %v456_v53, %v453_v52  ;;  %v575_v63 = vsel %vm572_vm3, %v573_v60, %v574_v61 }
  0x1a   : > { %v230_v28 = vsel %vm218_vm1, %v225_v25, %v229_v26  ;;  %v449_v57 = vor.u32 %v448_v51, %v445_v50 }
  0x1b   : > { %902 = vmatpush3.bf16.msra.mxu0 %v992_v13 }
  0x1c   : > { %922 = vmatpush3.bf16.msra.mxu1 %v993_v16  ;;  %903 = vmatprep.subr.bf16.mxu0 %v1028_v1  ;;  %v458_v62 = vsel %vm441_vm2, %v449_v57, %v457_v58 }
  0x1d   : > { %923 = vmatprep.subr.bf16.mxu1 %v1028_v1 }
  0x1f   : > { %904 = vmatpush3.bf16.msra.mxu0 %v994_v18 }
  0x20   : > { %924 = vmatpush3.bf16.msra.mxu1 %v995_v22  ;;  %905 = vmatprep.subr.bf16.mxu0 %v1028_v1 }
  0x21   : > { %925 = vmatprep.subr.bf16.mxu1 %v1028_v1 }
  0x23   : > { %906 = vmatpush3.bf16.msra.mxu0 %v996_v23 }
  0x24   : > { %926 = vmatpush3.bf16.msra.mxu1 %v997_v24  ;;  %931 = vmatprep.subr.bf16.mxu0 %v1028_v1 }
  0x25   : > { %951 = vmatprep.subr.bf16.mxu1 %v1028_v1 }
  0x26   : > { %908 = vmatmul.mubr.bf16.vlgmr.msra.gmra.mrb[0].mxu0 %v230_v28 }
  0x27   : > { %928 = vmatmul.mubr.bf16.vlgmr.msra.gmra.mrb[0].mxu1 %v1000_v27  ;;  %932 = vmatpush3.bf16.msra.mxu0 %v1001_v29 }
  0x28   : > { %952 = vmatpush3.bf16.msra.mxu1 %v1002_v30  ;;  %933 = vmatprep.subr.bf16.mxu0 %v1028_v1 }
  0x29   : > { %953 = vmatprep.subr.bf16.mxu1 %v1028_v1  ;;  %947 = vmatprep.mubr.msk.bf16.mxu0 %vm1029_vm0, %v1028_v1 }
  0x2a   : > { %967 = vmatprep.mubr.msk.bf16.mxu1 %vm1029_vm0, %v1028_v1 }
  0x2b   : > { %934 = vmatpush3.bf16.msra.mxu0 %v1003_v31 }
  0x2c   : > { %954 = vmatpush3.bf16.msra.mxu1 %v1004_v32  ;;  %935 = vmatprep.subr.bf16.mxu0 %v1028_v1 }
  0x2d   : > { %955 = vmatprep.subr.bf16.mxu1 %v1028_v1 }
  0x2f   : > { %936 = vmatpush3.bf16.msra.mxu0 %v1005_v33 }
  0x30   : > { %956 = vmatpush3.bf16.msra.mxu1 %v1006_v34  ;;  %937 = vmatprep.subr.bf16.mxu0 %v1028_v1 }
  0x31   : > { %957 = vmatprep.subr.bf16.mxu1 %v1028_v1 }
  0x33   : > { %938 = vmatpush3.bf16.msra.mxu0 %v1007_v35 }
  0x34   : > { %958 = vmatpush3.bf16.msra.mxu1 %v1008_v36  ;;  %939 = vmatprep.subr.bf16.mxu0 %v1028_v1 }
  0x35   : > { %959 = vmatprep.subr.bf16.mxu1 %v1028_v1 }
  0x37   : > { %940 = vmatpush3.bf16.msra.mxu0 %v1009_v38 }
  0x38   : > { %960 = vmatpush3.bf16.msra.mxu1 %v1010_v41  ;;  %941 = vmatprep.subr.bf16.mxu0 %v1028_v1 }
  0x39   : > { %961 = vmatprep.subr.bf16.mxu1 %v1028_v1 }
  0x3b   : > { %942 = vmatpush3.bf16.msra.mxu0 %v1011_v42 }
  0x3c   : > { %962 = vmatpush3.bf16.msra.mxu1 %v1012_v47  ;;  %943 = vmatprep.subr.bf16.mxu0 %v1028_v1 }
  0x3d   : > { %963 = vmatprep.subr.bf16.mxu1 %v1028_v1 }
  0x3f   : > { %944 = vmatpush3.bf16.msra.mxu0 %v1013_v49 }
  0x40   : > { %964 = vmatpush3.bf16.msra.mxu1 %v1014_v54  ;;  %945 = vmatprep.subr.bf16.mxu0 %v1028_v1 }
  0x41   : > { %965 = vmatprep.subr.bf16.mxu1 %v1028_v1 }
  0x43   : > { %946 = vmatpush3.bf16.msra.mxu0 %v1015_v56 }
  0x44   : > { %966 = vmatpush3.bf16.msra.mxu1 %v1016_v59 }
  0x46   : > { %948 = vmatmul.mubr.bf16.vlgmr.msra.gmra.mrb[4].mxu0 %v458_v62 }
  0x47   : > { %968 = vmatmul.mubr.bf16.vlgmr.msra.gmra.mrb[4].mxu1 %v575_v63 }
  0xf9   : > { %v314_v0 = vpop.f32.mrb[0].mxu0 }
  0xfa   : > { %v409_v2 = vpop.f32.mrb[0].mxu1  ;;  %v909_v3 = vpop.f32.mrb[1].mxu0 }
  0xfb   : > { %v410_v4 = vadd.f32 %v409_v2, %v314_v0  ;;  %v929_v5 = vpop.f32.mrb[1].mxu1  ;;  %v317_v6 = vpop.f32.mrb[2].mxu0 }
  0xfc   : > { %v412_v7 = vpop.f32.mrb[2].mxu1  ;;  %v910_v8 = vpop.f32.mrb[3].mxu0 }
  0xfd   : > { %v413_v9 = vadd.f32 %v412_v7, %v317_v6  ;;  %v930_v10 = vpop.f32.mrb[3].mxu1 }
 0x119   : > { %v542_v11 = vpop.f32.mrb[4].mxu0 }
 0x11a   : > { %v549_v12 = vadd.f32 %v542_v11, %v410_v4  ;;  %v659_v1 = vpop.f32.mrb[4].mxu1  ;;  %v949_v13 = vpop.f32.mrb[5].mxu0 }
 0x11b   : > { %v969_v15 = vpop.f32.mrb[5].mxu1  ;;  %v545_v16 = vpop.f32.mrb[6].mxu0 }
 0x11c   : > { %v666_v17 = vadd.f32 %v659_v1, %v549_v12  ;;  %v550_v18 = vadd.f32 %v545_v16, %v413_v9  ;;  %v662_v19 = vpop.f32.mrb[6].mxu1  ;;  %v950_v20 = vpop.f32.mrb[7].mxu0 }
 0x11d   : > { %v970_v21 = vpop.f32.mrb[7].mxu1 }
 0x11e   : > { %v675_v22 = vadd.f32 %v842_v14, %v666_v17  ;;  %v667_v23 = vadd.f32 %v662_v19, %v550_v18 }
 0x120   : > { %v679_v24 = vmul.f32 0.01, %v675_v22  ;;  %v676_v25 = vadd.f32 %v842_v14, %v667_v23  ;;  %vm677_vm4 = vcmp.ge.f32.partialorder %v675_v22, 0.0 }
 0x122   : > { %vm678_vm5 = vcmp.ge.f32.partialorder %v676_v25, 0.0  ;;  %v680_v26 = vmul.f32 0.01, %v676_v25  ;;  %v681_v27 = vsel %vm677_vm4, %v675_v22, %v679_v24 }
 0x124   : > { %v682_v28 = vsel %vm678_vm5, %v676_v25, %v680_v26 }
 0x125   : > { %v853_v29 = vpack.c.bf16 %v682_v28, %v681_v27 }
 0x127   : > { %854 = vst [vmem:[%s170_s11] sm:$0xff] %v853_v29  }
 0x128 PF: > { %s13_s12 = sadd.s32 1, %s1026_s12  }
 0x129   : > { %p10_p4 = scmp.ge.s32.totalorder %s13_s12, 4  }
 0x12b   :  { %12 = sbr.rel (!%p10_p4) target bundleno = 1 (0x1), region = 65 }

</bundles_post_ra>
